<compile_context>
chip_gen: v7x
topology: tpu7x:2x2x1
jax: 0.10.0
libtpu: 0.0.40
codegen_flags: <defaults>
</compile_context>

<pallas_src>
import numpy as np
import jax
import jax.numpy as jnp
from jax.experimental import pallas as pl
from jax.experimental.pallas import tpu as pltpu

LEAK = 0.01  # F.leaky_relu default negative_slope

# Per-layer (unfused) parameter names, matching the PyTorch module.
LAYERS = [
    "c1", "c2", "c3", "e1", "e2", "e3",
    "c4", "c5", "c6", "c7", "c8", "c9", "cw",
    "bc1", "bc2", "bc3", "be1", "be2", "be3", "bt1", "bt2", "bt3",
    "bc4", "bc5", "bc6",
    "l1", "l2",
]

# Rows of the packed bias array (order must match _pack_params).
(B_M1, B_M2, B_M3, B_F47, B_F58, B_F69, B_CW,
 B_B1, B_B2, B_B3, B_BC4, B_BC5, B_BC6, B_L1, B_L2) = range(15)


def _lrelu(v):
    return jnp.where(v >= 0, v, LEAK * v)


def posenet_kernel(inp_ref, bd_ref, spe_ref,
                   m1_ref, m2_ref, m3_ref, cw_ref, b1_ref, b2_ref,
                   l1a_ref, l1b_ref, l1c_ref, l1d_ref, l1e_ref, l2_ref,
                   bias_ref,
                   f47_hbm, f58_hbm, f69_hbm, b3_hbm, bc4_hbm, bc5_hbm, bc6_hbm,
                   out_ref,
                   f47_v, f58_v, f69_v, b3_v, bc4_v, bc5_v, bc6_v, dma_sem):
    Bt, Nm, c_inp = inp_ref.shape
    _, Nb, c_bd = bd_ref.shape

    # Kick off HBM->VMEM streaming of the late-chain weights immediately so the
    # fetch overlaps with the small early-layer matmuls below.  Each copy is
    # waited on right before its weight's first use.
    hbm_srcs = [f47_hbm, f58_hbm, f69_hbm, b3_hbm, bc4_hbm, bc5_hbm, bc6_hbm]
    vmem_dsts = [f47_v, f58_v, f69_v, b3_v, bc4_v, bc5_v, bc6_v]
    copies = [pltpu.make_async_copy(s, d, dma_sem.at[i])
              for i, (s, d) in enumerate(zip(hbm_srcs, vmem_dsts))]
    for cp in copies:
        cp.start()
    cp_f47, cp_f58, cp_f69, cp_b3, cp_bc4, cp_bc5, cp_bc6 = copies

    def bias(row, n):
        return bias_ref[row, :n].reshape(1, n)

    def bf16(h):
        return h.astype(jnp.bfloat16)

    def layer(h, w_ref, row, act=True):
        y = jnp.dot(h, w_ref[...], preferred_element_type=jnp.float32)
        y = y + bias(row, w_ref.shape[1])
        return _lrelu(y) if act else y

    # ---- early chains (small weights, auto-pipelined; overlap with weight DMA)
    h = inp_ref[...].reshape(Bt * Nm, c_inp)          # bf16, columns = [emb | x]
    h = layer(h, m1_ref, B_M1)
    h = layer(bf16(h), m2_ref, B_M2)
    pf2 = layer(bf16(h), m3_ref, B_M3)                # (Bt*Nm, 512) = [x_256 | emb_256]

    hb = bd_ref[...].reshape(Bt * Nb, c_bd)           # bf16, columns = [emb | x | t]
    hb = layer(hb, b1_ref, B_B1)
    hb = layer(bf16(hb), b2_ref, B_B2)                # (Bt*Nb, 384)

    # ---- main late chain ----------------------------------------------------
    cp_f47.wait()
    h = layer(bf16(pf2), f47_v, B_F47)                # (Bt*Nm, 512) = [x1_256 | x2_256]
    cp_f58.wait()
    h = layer(bf16(h), f58_v, B_F58)                  # (Bt*Nm, 1024)
    cp_f69.wait()
    x12 = layer(bf16(h), f69_v, B_F69)                # (Bt*Nm, 128) = [x1_64 | x2_64]

    x12_3 = x12.reshape(Bt, Nm, x12.shape[-1])
    ap_x1 = jnp.mean(x12_3, axis=1)[:, :64]           # AvgPool1d over points
    mp_x2 = jnp.max(x12_3, axis=1)[:, 64:]            # MaxPool1d over points

    # conv_weight as VPU multiply + lane reduce, then Softmax over points.
    wf = jnp.sum(x12 * cw_ref[...], axis=-1, keepdims=True)
    wf = wf + bias_ref[B_CW, 0:1].reshape(1, 1)
    wf3 = wf.reshape(Bt, Nm, 1)
    wf3 = wf3 - jnp.max(wf3, axis=1, keepdims=True)
    e = jnp.exp(wf3)
    inv = pl.reciprocal(jnp.sum(e, axis=1, keepdims=True))   # exact; 1 recip/row
    weight = e * inv
    weight_x3 = jnp.sum(weight * pf2.reshape(Bt, Nm, pf2.shape[-1]), axis=1)  # (Bt, 512)

    # ---- border late chain (PointFeatFuse3P tail) ---------------------------
    cp_b3.wait()
    hb = layer(bf16(hb), b3_v, B_B3)                  # (Bt*Nb, 512) = bcat
    cp_bc4.wait()
    hb = layer(bf16(hb), bc4_v, B_BC4)
    cp_bc5.wait()
    hb = layer(bf16(hb), bc5_v, B_BC5)
    cp_bc6.wait()
    hb = layer(bf16(hb), bc6_v, B_BC6)                # (Bt*Nb, bc)
    border_feat = jnp.max(hb.reshape(Bt, Nb, hb.shape[-1]), axis=1)   # (Bt, bc)

    # ---- head: last_emb with W1 split by feature segment (no lane concat) ---
    spe = spe_ref[...].reshape(Bt, spe_ref.shape[-1])
    h = (jnp.dot(bf16(ap_x1), l1a_ref[...], preferred_element_type=jnp.float32)
         + jnp.dot(bf16(mp_x2), l1b_ref[...], preferred_element_type=jnp.float32)
         + jnp.dot(bf16(weight_x3), l1c_ref[...], preferred_element_type=jnp.float32)
         + jnp.dot(bf16(border_feat), l1d_ref[...], preferred_element_type=jnp.float32)
         + jnp.dot(bf16(spe), l1e_ref[...], preferred_element_type=jnp.float32))
    h = _lrelu(h + bias(B_L1, l1a_ref.shape[1]))
    out = jnp.dot(bf16(h), l2_ref[...], preferred_element_type=jnp.float32)
    out = out + bias(B_L2, l2_ref.shape[1])
    out_ref[...] = out.reshape(Bt, 1, out.shape[-1])


def init_params(key, ic=7, border_ic=3, output_dim=64, bc=256):
    """Deterministic synthetic parameters; BN (eval-mode) folded into conv W/b."""
    dims = {
        "c1": (2, 64, True),   "c2": (64, 128, True),  "c3": (128, 256, True),
        "e1": (ic, 64, True),  "e2": (64, 128, True),  "e3": (128, 256, True),
        "c4": (512, 256, True), "c5": (256, 512, True), "c6": (512, 64, False),
        "c7": (512, 256, True), "c8": (256, 512, True), "c9": (512, 64, False),
        "cw": (128, 1, False),
        "bc1": (2, 64, False),  "bc2": (64, 128, False), "bc3": (128, 128, False),
        "be1": (border_ic, 64, False), "be2": (64, 128, False), "be3": (128, 256, False),
        "bt1": (3, 64, False),  "bt2": (64, 128, False), "bt3": (128, 128, False),
        "bc4": (512, 256, False), "bc5": (256, 512, False), "bc6": (512, bc, False),
        "l1": (704 + bc, 256, False), "l2": (256, output_dim, False),
    }
    params = {}
    for name in LAYERS:
        cin, cout, has_bn = dims[name]
        key, k1, k2, k3, k4, k5, k6 = jax.random.split(key, 7)
        W = jax.random.normal(k1, (cin, cout), jnp.float32) / jnp.sqrt(float(cin))
        b = 0.1 * jax.random.normal(k2, (cout,), jnp.float32)
        if has_bn:  # eval-mode BatchNorm1d folded in
            gamma = 1.0 + 0.1 * jax.random.normal(k3, (cout,), jnp.float32)
            beta = 0.1 * jax.random.normal(k4, (cout,), jnp.float32)
            mean = 0.1 * jax.random.normal(k5, (cout,), jnp.float32)
            var = 1.0 + 0.5 * jax.random.uniform(k6, (cout,), jnp.float32)
            scale = gamma / jnp.sqrt(var + 1e-5)
            W = W * scale[None, :]
            b = (b - mean) * scale + beta
        params[name] = (W, b)
    return params


def _pack_params(params):
    """Fuse the parallel branches into block-diagonal / concatenated MXU weights,
    fold the input channel reorder into the first fused layers (row permutation),
    split W_l1 by feature segment, and pack all biases into one f32 array."""
    def W(n):
        return params[n][0]

    def b(n):
        return params[n][1]

    def blockdiag(*ws):
        R = sum(w.shape[0] for w in ws)
        C = sum(w.shape[1] for w in ws)
        out = jnp.zeros((R, C), jnp.float32)
        r = c = 0
        for w in ws:
            out = out.at[r:r + w.shape[0], c:c + w.shape[1]].set(w)
            r += w.shape[0]
            c += w.shape[1]
        return out

    ic = W("e1").shape[0]
    b_emb = W("be1").shape[0]
    b_t = W("bt1").shape[0]
    bc = W("bc6").shape[1]

    # First fused layers: permute rows so the kernel consumes inp / borders in
    # their native channel order ([emb | x] and [emb | x | t]) — no wrapper-side
    # channel concatenation.
    m1 = blockdiag(W("c1"), W("e1"))
    m1 = m1[np.array(list(range(2, 2 + ic)) + [0, 1]), :]
    b1 = blockdiag(W("bc1"), W("be1"), W("bt1"))
    b1 = b1[np.array(list(range(2, 2 + b_emb)) + [0, 1]
                     + list(range(2 + b_emb, 2 + b_emb + b_t))), :]

    m2 = blockdiag(W("c2"), W("e2"))
    m3 = blockdiag(W("c3"), W("e3"))
    f47 = jnp.concatenate([W("c4"), W("c7")], axis=1)   # both consume pf2
    f58 = blockdiag(W("c5"), W("c8"))
    f69 = blockdiag(W("c6"), W("c9"))
    b2 = blockdiag(W("bc2"), W("be2"), W("bt2"))
    b3 = blockdiag(W("bc3"), W("be3"), W("bt3"))

    Wl1 = W("l1")
    offs = [0, 64, 128, 640, 640 + bc, Wl1.shape[0]]    # [ap|mp|wx3|border|spe]
    l1_parts = [Wl1[offs[i]:offs[i + 1]] for i in range(5)]

    fused_b = [
        jnp.concatenate([b("c1"), b("e1")]),
        jnp.concatenate([b("c2"), b("e2")]),
        jnp.concatenate([b("c3"), b("e3")]),
        jnp.concatenate([b("c4"), b("c7")]),
        jnp.concatenate([b("c5"), b("c8")]),
        jnp.concatenate([b("c6"), b("c9")]),
        b("cw"),
        jnp.concatenate([b("bc1"), b("be1"), b("bt1")]),
        jnp.concatenate([b("bc2"), b("be2"), b("bt2")]),
        jnp.concatenate([b("bc3"), b("be3"), b("bt3")]),
        b("bc4"), b("bc5"), b("bc6"),
        b("l1"), b("l2"),
    ]
    width = max(int(v.shape[0]) for v in fused_b)
    width = ((width + 127) // 128) * 128
    rows = ((len(fused_b) + 7) // 8) * 8
    bias_pack = jnp.zeros((rows, width), jnp.float32)
    for i, v in enumerate(fused_b):
        bias_pack = bias_pack.at[i, :v.shape[0]].set(v)

    def bf(w):
        return w.astype(jnp.bfloat16)

    cw_row = W("cw").T.astype(jnp.float32)              # (1, 128) stays f32 (VPU reduce)

    # Resident small weights: auto-pipelined (constant block index -> fetched once).
    auto_w = ([bf(m1), bf(m2), bf(m3), cw_row, bf(b1), bf(b2)]
              + [bf(w) for w in l1_parts] + [bf(W("l2"))])
    # Large late-chain weights: kept in HBM, streamed manually inside the kernel.
    manual_w = [bf(f47), bf(f58), bf(f69), bf(b3),
                bf(W("bc4")), bf(W("bc5")), bf(W("bc6"))]
    return auto_w, manual_w, bias_pack


def _default_min_grid_tiles():
    """>=2 grid steps lets dimension_semantics=("parallel",) shard across the two
    TensorCores of a v7x chip; earlier generations have one TensorCore per chip."""
    try:
        kind = jax.devices()[0].device_kind.lower()
    except Exception:
        return 1
    return 2 if "v7" in kind else 1


def posenet_feat_offset_emb(inp, borders, spatial_embs, params,
                            max_batch_tile=16, min_grid_tiles=None,
                            vmem_limit_bytes=48 * 1024 * 1024):
    """inp: (B, ic+2, Nm) ; borders: (B, border_ic+5, Nb) ; spatial_embs: (B, 64)."""
    B, _, Nm = inp.shape
    _, _, Nb = borders.shape
    spe_dim = spatial_embs.shape[-1]
    assert Nm % 8 == 0 and Nb % 8 == 0, (
        "main/border point counts must be multiples of 8 (sublane tiling)")

    # NCW -> NWC only; the channel order is consumed natively by the row-permuted
    # fused weights.  bf16 point features = MXU operands, half the DMA bytes.
    inp_t = jnp.transpose(inp, (0, 2, 1)).astype(jnp.bfloat16)
    bd_t = jnp.transpose(borders, (0, 2, 1)).astype(jnp.bfloat16)
    spe = spatial_embs.astype(jnp.float32)
    c_inp = inp_t.shape[-1]
    c_bd = bd_t.shape[-1]

    auto_w, manual_w, bias_pack = _pack_params(params)
    output_dim = auto_w[-1].shape[1]   # l2 weight

    # Balanced batch tiling (pads at most num_tiles-1 rows); >=2 tiles on v7x so
    # the parallel grid axis can use both TensorCores.
    if min_grid_tiles is None:
        min_grid_tiles = _default_min_grid_tiles()
    num_tiles = max(min_grid_tiles, -(-B // max_batch_tile))
    num_tiles = min(num_tiles, B)
    Bt = -(-B // num_tiles)
    Bp = Bt * num_tiles
    if Bp != B:
        pad = Bp - B
        inp_t = jnp.pad(inp_t, ((0, pad), (0, 0), (0, 0)))
        bd_t = jnp.pad(bd_t, ((0, pad), (0, 0), (0, 0)))
        spe = jnp.pad(spe, ((0, pad), (0, 0)))
    # Carry spatial_embs / output as (B, 1, C): last-two block dims == full dims
    # for any Bt, so the (8,128) blocking constraint never triggers.
    spe3 = spe.reshape(Bp, 1, spe_dim)

    in_specs = [
        pl.BlockSpec((Bt, Nm, c_inp), lambda g: (g, 0, 0)),
        pl.BlockSpec((Bt, Nb, c_bd), lambda g: (g, 0, 0)),
        pl.BlockSpec((Bt, 1, spe_dim), lambda g: (g, 0, 0)),
    ]
    for p in auto_w:
        in_specs.append(pl.BlockSpec(p.shape, lambda g: (0, 0)))
    in_specs.append(pl.BlockSpec(bias_pack.shape, lambda g: (0, 0)))
    for _ in manual_w:
        # Late-chain weights stay in HBM; the kernel streams them into single-
        # buffered VMEM scratch with make_async_copy, overlapped with compute.
        in_specs.append(pl.BlockSpec(memory_space=pl.ANY))

    scratch_shapes = [pltpu.VMEM(w.shape, jnp.bfloat16) for w in manual_w]
    scratch_shapes.append(pltpu.SemaphoreType.DMA((len(manual_w),)))

    out = pl.pallas_call(
        posenet_kernel,
        out_shape=jax.ShapeDtypeStruct((Bp, 1, output_dim), jnp.float32),
        grid=(num_tiles,),
        in_specs=in_specs,
        out_specs=pl.BlockSpec((Bt, 1, output_dim), lambda g: (g, 0, 0)),
        scratch_shapes=scratch_shapes,
        compiler_params=pltpu.CompilerParams(
            dimension_semantics=("parallel",),      # independent batch tiles
            vmem_limit_bytes=vmem_limit_bytes,      # 48 MiB: safe on v7x (64 MiB)
        ),
    )(inp_t, bd_t, spe3, *auto_w, bias_pack, *manual_w)
    return out.reshape(Bp, output_dim)[:B]


def reference_forward(inp, borders, spatial_embs, params):
    """Pure-JAX reference of the PyTorch forward (eval mode, with_weight=False),
    using per-layer (unfused) weights and the same bf16-operand / f32-accumulate
    matmul numerics as the kernel."""
    def bf(h):
        return h.astype(jnp.bfloat16)

    def lin(h, name, act=True):
        W, b = params[name]
        y = jnp.einsum("bnc,cd->bnd", bf(h), bf(W),
                       preferred_element_type=jnp.float32) + b[None, None, :]
        return jnp.where(y >= 0, y, LEAK * y) if act else y

    xin = jnp.transpose(inp, (0, 2, 1))
    bd = jnp.transpose(borders, (0, 2, 1))
    x, emb = xin[..., -2:], xin[..., :-2]
    x = lin(x, "c1"); emb = lin(emb, "e1")
    x = lin(x, "c2"); emb = lin(emb, "e2")
    x = lin(x, "c3"); emb = lin(emb, "e3")
    pf2 = jnp.concatenate([x, emb], axis=-1)
    x1 = lin(lin(lin(pf2, "c4"), "c5"), "c6")
    ap_x1 = jnp.mean(x1, axis=1)
    x2 = lin(lin(lin(pf2, "c7"), "c8"), "c9")
    mp_x2 = jnp.max(x2, axis=1)

    # conv_weight evaluated in f32 (mirrors the kernel's VPU lane-reduce)
    W_cw, b_cw = params["cw"]
    cat = jnp.concatenate([x1, x2], axis=-1)
    wf = jnp.sum(cat * W_cw[:, 0][None, None, :], axis=-1, keepdims=True) + b_cw
    wf = wf - jnp.max(wf, axis=1, keepdims=True)
    e = jnp.exp(wf)
    weight = e / jnp.sum(e, axis=1, keepdims=True)
    weight_x3 = jnp.sum(weight * pf2, axis=1)

    bx, bemb, bt = bd[..., 3:5], bd[..., :3], bd[..., 5:]
    bx = lin(bx, "bc1"); bemb = lin(bemb, "be1"); bt = lin(bt, "bt1")
    bx = lin(bx, "bc2"); bemb = lin(bemb, "be2"); bt = lin(bt, "bt2")
    bx = lin(bx, "bc3"); bemb = lin(bemb, "be3"); bt = lin(bt, "bt3")
    bcat = jnp.concatenate([bx, bemb, bt], axis=-1)
    bb = lin(lin(lin(bcat, "bc4"), "bc5"), "bc6")
    border_feat = jnp.max(bb, axis=1)

    feat = jnp.concatenate([ap_x1, mp_x2, weight_x3, border_feat, spatial_embs], axis=-1)
    W1, b1 = params["l1"]
    W2, b2 = params["l2"]
    h = jnp.dot(bf(feat), bf(W1), preferred_element_type=jnp.float32) + b1
    h = jnp.where(h >= 0, h, LEAK * h)
    return jnp.dot(bf(h), bf(W2), preferred_element_type=jnp.float32) + b2


if __name__ == "__main__":
    key = jax.random.PRNGKey(0)
    B = 2
    ic, border_ic, output_dim = 7, 3, 64   # border_ic=3 so borders[:, :3] matches e_conv1
    num_points_total = 96
    border_points = num_points_total // 3              # 32 (num_points / 3)
    main_points = num_points_total - border_points     # 64

    kp, k1, k2, k3 = jax.random.split(key, 4)
    params = init_params(kp, ic=ic, border_ic=border_ic, output_dim=output_dim)

    inp = jax.random.normal(k1, (B, ic + 2, main_points), jnp.float32)
    borders = jax.random.normal(k2, (B, border_ic + 2 + 3, border_points), jnp.float32)
    spatial_embs = jax.random.normal(k3, (B, 64), jnp.float32)

    out = posenet_feat_offset_emb(inp, borders, spatial_embs, params)
    out = jax.block_until_ready(out)

    ref = jax.block_until_ready(reference_forward(inp, borders, spatial_embs, params))
    assert out.shape == (B, output_dim)
    np.testing.assert_allclose(np.asarray(out), np.asarray(ref), rtol=5e-3, atol=5e-3)
    print("KERNEL_OK")
</pallas_src>

<mosaic_0001>
module attributes {stable_mosaic.version = 11 : i64} {
  func.func @posenet_kernel(%arg0: i32, %arg1: memref<2x64x9xbf16, #tpu.memory_space<vmem>>, %arg2: memref<2x32x8xbf16, #tpu.memory_space<vmem>>, %arg3: memref<2x1x64xf32, #tpu.memory_space<vmem>>, %arg4: memref<9x128xbf16, #tpu.memory_space<vmem>>, %arg5: memref<128x256xbf16, #tpu.memory_space<vmem>>, %arg6: memref<256x512xbf16, #tpu.memory_space<vmem>>, %arg7: memref<1x128xf32, #tpu.memory_space<vmem>>, %arg8: memref<8x192xbf16, #tpu.memory_space<vmem>>, %arg9: memref<192x384xbf16, #tpu.memory_space<vmem>>, %arg10: memref<64x256xbf16, #tpu.memory_space<vmem>>, %arg11: memref<64x256xbf16, #tpu.memory_space<vmem>>, %arg12: memref<512x256xbf16, #tpu.memory_space<vmem>>, %arg13: memref<256x256xbf16, #tpu.memory_space<vmem>>, %arg14: memref<64x256xbf16, #tpu.memory_space<vmem>>, %arg15: memref<256x64xbf16, #tpu.memory_space<vmem>>, %arg16: memref<16x1024xf32, #tpu.memory_space<vmem>>, %arg17: memref<512x512xbf16, #tpu.memory_space<any>>, %arg18: memref<512x1024xbf16, #tpu.memory_space<any>>, %arg19: memref<1024x128xbf16, #tpu.memory_space<any>>, %arg20: memref<384x512xbf16, #tpu.memory_space<any>>, %arg21: memref<512x256xbf16, #tpu.memory_space<any>>, %arg22: memref<256x512xbf16, #tpu.memory_space<any>>, %arg23: memref<512x256xbf16, #tpu.memory_space<any>>, %arg24: memref<2x1x64xf32, #tpu.memory_space<vmem>>, %arg25: memref<512x512xbf16, #tpu.memory_space<vmem>>, %arg26: memref<512x1024xbf16, #tpu.memory_space<vmem>>, %arg27: memref<1024x128xbf16, #tpu.memory_space<vmem>>, %arg28: memref<384x512xbf16, #tpu.memory_space<vmem>>, %arg29: memref<512x256xbf16, #tpu.memory_space<vmem>>, %arg30: memref<256x512xbf16, #tpu.memory_space<vmem>>, %arg31: memref<512x256xbf16, #tpu.memory_space<vmem>>, %arg32: memref<7x!tpu.dma_semaphore, #tpu.memory_space<semaphore_mem>>) attributes {dimension_semantics = [#tpu.dimension_semantics<parallel>], iteration_bounds = array<i64: 1>, scalar_prefetch = 0 : i64, scratch_operands = 8 : i64, tpu.core_type = #tpu.core_type<tc>, window_params = [{transform_indices = @transform_0, window_bounds = array<i64: 2, 64, 9>}, {transform_indices = @transform_1, window_bounds = array<i64: 2, 32, 8>}, {transform_indices = @transform_2, window_bounds = array<i64: 2, 1, 64>}, {pipeline_mode = #tpu.pipeline_mode<synchronous>, transform_indices = @transform_3, window_bounds = array<i64: 9, 128>}, {pipeline_mode = #tpu.pipeline_mode<synchronous>, transform_indices = @transform_4, window_bounds = array<i64: 128, 256>}, {pipeline_mode = #tpu.pipeline_mode<synchronous>, transform_indices = @transform_5, window_bounds = array<i64: 256, 512>}, {pipeline_mode = #tpu.pipeline_mode<synchronous>, transform_indices = @transform_6, window_bounds = array<i64: 1, 128>}, {pipeline_mode = #tpu.pipeline_mode<synchronous>, transform_indices = @transform_7, window_bounds = array<i64: 8, 192>}, {pipeline_mode = #tpu.pipeline_mode<synchronous>, transform_indices = @transform_8, window_bounds = array<i64: 192, 384>}, {pipeline_mode = #tpu.pipeline_mode<synchronous>, transform_indices = @transform_9, window_bounds = array<i64: 64, 256>}, {pipeline_mode = #tpu.pipeline_mode<synchronous>, transform_indices = @transform_10, window_bounds = array<i64: 64, 256>}, {pipeline_mode = #tpu.pipeline_mode<synchronous>, transform_indices = @transform_11, window_bounds = array<i64: 512, 256>}, {pipeline_mode = #tpu.pipeline_mode<synchronous>, transform_indices = @transform_12, window_bounds = array<i64: 256, 256>}, {pipeline_mode = #tpu.pipeline_mode<synchronous>, transform_indices = @transform_13, window_bounds = array<i64: 64, 256>}, {pipeline_mode = #tpu.pipeline_mode<synchronous>, transform_indices = @transform_14, window_bounds = array<i64: 256, 64>}, {pipeline_mode = #tpu.pipeline_mode<synchronous>, transform_indices = @transform_15, window_bounds = array<i64: 16, 1024>}, {}, {}, {}, {}, {}, {}, {}, {transform_indices = @transform_23, window_bounds = array<i64: 2, 1, 64>}]} {
    %c0_i32 = arith.constant 0 : i32
    %0 = tpu.memref_slice %arg32[%c0_i32] : memref<7x!tpu.dma_semaphore, #tpu.memory_space<semaphore_mem>> -> memref<1x!tpu.dma_semaphore, #tpu.memory_space<semaphore_mem>>
    %1 = tpu.memref_squeeze %0 : memref<1x!tpu.dma_semaphore, #tpu.memory_space<semaphore_mem>> -> memref<!tpu.dma_semaphore, #tpu.memory_space<semaphore_mem>>
    tpu.enqueue_dma source(%arg17 : memref<512x512xbf16, #tpu.memory_space<any>>) target(%arg25 : memref<512x512xbf16, #tpu.memory_space<vmem>>) target_semaphore(%1 : memref<!tpu.dma_semaphore, #tpu.memory_space<semaphore_mem>>)
    %c1_i32 = arith.constant 1 : i32
    %2 = tpu.memref_slice %arg32[%c1_i32] : memref<7x!tpu.dma_semaphore, #tpu.memory_space<semaphore_mem>> -> memref<1x!tpu.dma_semaphore, #tpu.memory_space<semaphore_mem>>
    %3 = tpu.memref_squeeze %2 : memref<1x!tpu.dma_semaphore, #tpu.memory_space<semaphore_mem>> -> memref<!tpu.dma_semaphore, #tpu.memory_space<semaphore_mem>>
    tpu.enqueue_dma source(%arg18 : memref<512x1024xbf16, #tpu.memory_space<any>>) target(%arg26 : memref<512x1024xbf16, #tpu.memory_space<vmem>>) target_semaphore(%3 : memref<!tpu.dma_semaphore, #tpu.memory_space<semaphore_mem>>)
    %c2_i32 = arith.constant 2 : i32
    %4 = tpu.memref_slice %arg32[%c2_i32] : memref<7x!tpu.dma_semaphore, #tpu.memory_space<semaphore_mem>> -> memref<1x!tpu.dma_semaphore, #tpu.memory_space<semaphore_mem>>
    %5 = tpu.memref_squeeze %4 : memref<1x!tpu.dma_semaphore, #tpu.memory_space<semaphore_mem>> -> memref<!tpu.dma_semaphore, #tpu.memory_space<semaphore_mem>>
    tpu.enqueue_dma source(%arg19 : memref<1024x128xbf16, #tpu.memory_space<any>>) target(%arg27 : memref<1024x128xbf16, #tpu.memory_space<vmem>>) target_semaphore(%5 : memref<!tpu.dma_semaphore, #tpu.memory_space<semaphore_mem>>)
    %c3_i32 = arith.constant 3 : i32
    %6 = tpu.memref_slice %arg32[%c3_i32] : memref<7x!tpu.dma_semaphore, #tpu.memory_space<semaphore_mem>> -> memref<1x!tpu.dma_semaphore, #tpu.memory_space<semaphore_mem>>
    %7 = tpu.memref_squeeze %6 : memref<1x!tpu.dma_semaphore, #tpu.memory_space<semaphore_mem>> -> memref<!tpu.dma_semaphore, #tpu.memory_space<semaphore_mem>>
    tpu.enqueue_dma source(%arg20 : memref<384x512xbf16, #tpu.memory_space<any>>) target(%arg28 : memref<384x512xbf16, #tpu.memory_space<vmem>>) target_semaphore(%7 : memref<!tpu.dma_semaphore, #tpu.memory_space<semaphore_mem>>)
    %c4_i32 = arith.constant 4 : i32
    %8 = tpu.memref_slice %arg32[%c4_i32] : memref<7x!tpu.dma_semaphore, #tpu.memory_space<semaphore_mem>> -> memref<1x!tpu.dma_semaphore, #tpu.memory_space<semaphore_mem>>
    %9 = tpu.memref_squeeze %8 : memref<1x!tpu.dma_semaphore, #tpu.memory_space<semaphore_mem>> -> memref<!tpu.dma_semaphore, #tpu.memory_space<semaphore_mem>>
    tpu.enqueue_dma source(%arg21 : memref<512x256xbf16, #tpu.memory_space<any>>) target(%arg29 : memref<512x256xbf16, #tpu.memory_space<vmem>>) target_semaphore(%9 : memref<!tpu.dma_semaphore, #tpu.memory_space<semaphore_mem>>)
    %c5_i32 = arith.constant 5 : i32
    %10 = tpu.memref_slice %arg32[%c5_i32] : memref<7x!tpu.dma_semaphore, #tpu.memory_space<semaphore_mem>> -> memref<1x!tpu.dma_semaphore, #tpu.memory_space<semaphore_mem>>
    %11 = tpu.memref_squeeze %10 : memref<1x!tpu.dma_semaphore, #tpu.memory_space<semaphore_mem>> -> memref<!tpu.dma_semaphore, #tpu.memory_space<semaphore_mem>>
    tpu.enqueue_dma source(%arg22 : memref<256x512xbf16, #tpu.memory_space<any>>) target(%arg30 : memref<256x512xbf16, #tpu.memory_space<vmem>>) target_semaphore(%11 : memref<!tpu.dma_semaphore, #tpu.memory_space<semaphore_mem>>)
    %c6_i32 = arith.constant 6 : i32
    %12 = tpu.memref_slice %arg32[%c6_i32] : memref<7x!tpu.dma_semaphore, #tpu.memory_space<semaphore_mem>> -> memref<1x!tpu.dma_semaphore, #tpu.memory_space<semaphore_mem>>
    %13 = tpu.memref_squeeze %12 : memref<1x!tpu.dma_semaphore, #tpu.memory_space<semaphore_mem>> -> memref<!tpu.dma_semaphore, #tpu.memory_space<semaphore_mem>>
    tpu.enqueue_dma source(%arg23 : memref<512x256xbf16, #tpu.memory_space<any>>) target(%arg31 : memref<512x256xbf16, #tpu.memory_space<vmem>>) target_semaphore(%13 : memref<!tpu.dma_semaphore, #tpu.memory_space<semaphore_mem>>)
    %c0 = arith.constant 0 : index
    %c0_0 = arith.constant 0 : index
    %c0_1 = arith.constant 0 : index
    %14 = vector.load %arg1[%c0, %c0_0, %c0_1] : memref<2x64x9xbf16, #tpu.memory_space<vmem>>, vector<2x64x9xbf16>
    %15 = vector.shape_cast %14 : vector<2x64x9xbf16> to vector<128x9xbf16>
    %c0_2 = arith.constant 0 : index
    %c0_3 = arith.constant 0 : index
    %16 = vector.load %arg4[%c0_2, %c0_3] : memref<9x128xbf16, #tpu.memory_space<vmem>>, vector<9x128xbf16>
    %cst = arith.constant dense<0.000000e+00> : vector<128x128xf32>
    %17 = tpu.matmul %15, %16, %cst {dimension_numbers = #tpu.dot_dimension_numbers<[1], [0], [0], [1], [0, 0, 1, 1], [], []>} : vector<128x9xbf16>, vector<9x128xbf16>, vector<128x128xf32> -> vector<128x128xf32>
    %c0_4 = arith.constant 0 : index
    %c0_5 = arith.constant 0 : index
    %18 = vector.load %arg16[%c0_4, %c0_5] : memref<16x1024xf32, #tpu.memory_space<vmem>>, vector<1x128xf32>
    %19 = vector.shape_cast %18 : vector<1x128xf32> to vector<128xf32>
    %20 = vector.shape_cast %19 : vector<128xf32> to vector<1x128xf32>
    %21 = vector.broadcast %20 : vector<1x128xf32> to vector<128x128xf32>
    %22 = arith.addf %17, %21 : vector<128x128xf32>
    %cst_6 = arith.constant 0.000000e+00 : f32
    %23 = vector.broadcast %cst_6 : f32 to vector<128x128xf32>
    %24 = arith.cmpf oge, %22, %23 : vector<128x128xf32>
    %cst_7 = arith.constant 0.00999999977 : f32
    %25 = vector.broadcast %cst_7 : f32 to vector<128x128xf32>
    %26 = arith.mulf %25, %22 : vector<128x128xf32>
    %27 = arith.select %24, %22, %26 : vector<128x128xi1>, vector<128x128xf32>
    %28 = arith.truncf %27 : vector<128x128xf32> to vector<128x128xbf16>
    %c0_8 = arith.constant 0 : index
    %c0_9 = arith.constant 0 : index
    %29 = vector.load %arg5[%c0_8, %c0_9] : memref<128x256xbf16, #tpu.memory_space<vmem>>, vector<128x256xbf16>
    %cst_10 = arith.constant dense<0.000000e+00> : vector<128x256xf32>
    %30 = tpu.matmul %28, %29, %cst_10 {dimension_numbers = #tpu.dot_dimension_numbers<[1], [0], [0], [1], [0, 0, 1, 1], [], []>} : vector<128x128xbf16>, vector<128x256xbf16>, vector<128x256xf32> -> vector<128x256xf32>
    %c1 = arith.constant 1 : index
    %c0_11 = arith.constant 0 : index
    %31 = vector.load %arg16[%c1, %c0_11] : memref<16x1024xf32, #tpu.memory_space<vmem>>, vector<1x256xf32>
    %32 = vector.shape_cast %31 : vector<1x256xf32> to vector<256xf32>
    %33 = vector.shape_cast %32 : vector<256xf32> to vector<1x256xf32>
    %34 = vector.broadcast %33 : vector<1x256xf32> to vector<128x256xf32>
    %35 = arith.addf %30, %34 : vector<128x256xf32>
    %cst_12 = arith.constant 0.000000e+00 : f32
    %36 = vector.broadcast %cst_12 : f32 to vector<128x256xf32>
    %37 = arith.cmpf oge, %35, %36 : vector<128x256xf32>
    %cst_13 = arith.constant 0.00999999977 : f32
    %38 = vector.broadcast %cst_13 : f32 to vector<128x256xf32>
    %39 = arith.mulf %38, %35 : vector<128x256xf32>
    %40 = arith.select %37, %35, %39 : vector<128x256xi1>, vector<128x256xf32>
    %41 = arith.truncf %40 : vector<128x256xf32> to vector<128x256xbf16>
    %c0_14 = arith.constant 0 : index
    %c0_15 = arith.constant 0 : index
    %42 = vector.load %arg6[%c0_14, %c0_15] : memref<256x512xbf16, #tpu.memory_space<vmem>>, vector<256x512xbf16>
    %cst_16 = arith.constant dense<0.000000e+00> : vector<128x512xf32>
    %43 = tpu.matmul %41, %42, %cst_16 {dimension_numbers = #tpu.dot_dimension_numbers<[1], [0], [0], [1], [0, 0, 1, 1], [], []>} : vector<128x256xbf16>, vector<256x512xbf16>, vector<128x512xf32> -> vector<128x512xf32>
    %c2 = arith.constant 2 : index
    %c0_17 = arith.constant 0 : index
    %44 = vector.load %arg16[%c2, %c0_17] : memref<16x1024xf32, #tpu.memory_space<vmem>>, vector<1x512xf32>
    %45 = vector.shape_cast %44 : vector<1x512xf32> to vector<512xf32>
    %46 = vector.shape_cast %45 : vector<512xf32> to vector<1x512xf32>
    %47 = vector.broadcast %46 : vector<1x512xf32> to vector<128x512xf32>
    %48 = arith.addf %43, %47 : vector<128x512xf32>
    %cst_18 = arith.constant 0.000000e+00 : f32
    %49 = vector.broadcast %cst_18 : f32 to vector<128x512xf32>
    %50 = arith.cmpf oge, %48, %49 : vector<128x512xf32>
    %cst_19 = arith.constant 0.00999999977 : f32
    %51 = vector.broadcast %cst_19 : f32 to vector<128x512xf32>
    %52 = arith.mulf %51, %48 : vector<128x512xf32>
    %53 = arith.select %50, %48, %52 : vector<128x512xi1>, vector<128x512xf32>
    %c0_20 = arith.constant 0 : index
    %c0_21 = arith.constant 0 : index
    %c0_22 = arith.constant 0 : index
    %54 = vector.load %arg2[%c0_20, %c0_21, %c0_22] : memref<2x32x8xbf16, #tpu.memory_space<vmem>>, vector<2x32x8xbf16>
    %55 = vector.shape_cast %54 : vector<2x32x8xbf16> to vector<64x8xbf16>
    %c0_23 = arith.constant 0 : index
    %c0_24 = arith.constant 0 : index
    %56 = vector.load %arg8[%c0_23, %c0_24] : memref<8x192xbf16, #tpu.memory_space<vmem>>, vector<8x192xbf16>
    %cst_25 = arith.constant dense<0.000000e+00> : vector<64x192xf32>
    %57 = tpu.matmul %55, %56, %cst_25 {dimension_numbers = #tpu.dot_dimension_numbers<[1], [0], [0], [1], [0, 0, 1, 1], [], []>} : vector<64x8xbf16>, vector<8x192xbf16>, vector<64x192xf32> -> vector<64x192xf32>
    %c7 = arith.constant 7 : index
    %c0_26 = arith.constant 0 : index
    %58 = vector.load %arg16[%c7, %c0_26] : memref<16x1024xf32, #tpu.memory_space<vmem>>, vector<1x192xf32>
    %59 = vector.shape_cast %58 : vector<1x192xf32> to vector<192xf32>
    %60 = vector.shape_cast %59 : vector<192xf32> to vector<1x192xf32>
    %61 = vector.broadcast %60 : vector<1x192xf32> to vector<64x192xf32>
    %62 = arith.addf %57, %61 : vector<64x192xf32>
    %cst_27 = arith.constant 0.000000e+00 : f32
    %63 = vector.broadcast %cst_27 : f32 to vector<64x192xf32>
    %64 = arith.cmpf oge, %62, %63 : vector<64x192xf32>
    %cst_28 = arith.constant 0.00999999977 : f32
    %65 = vector.broadcast %cst_28 : f32 to vector<64x192xf32>
    %66 = arith.mulf %65, %62 : vector<64x192xf32>
    %67 = arith.select %64, %62, %66 : vector<64x192xi1>, vector<64x192xf32>
    %68 = arith.truncf %67 : vector<64x192xf32> to vector<64x192xbf16>
    %c0_29 = arith.constant 0 : index
    %c0_30 = arith.constant 0 : index
    %69 = vector.load %arg9[%c0_29, %c0_30] : memref<192x384xbf16, #tpu.memory_space<vmem>>, vector<192x384xbf16>
    %cst_31 = arith.constant dense<0.000000e+00> : vector<64x384xf32>
    %70 = tpu.matmul %68, %69, %cst_31 {dimension_numbers = #tpu.dot_dimension_numbers<[1], [0], [0], [1], [0, 0, 1, 1], [], []>} : vector<64x192xbf16>, vector<192x384xbf16>, vector<64x384xf32> -> vector<64x384xf32>
    %c8 = arith.constant 8 : index
    %c0_32 = arith.constant 0 : index
    %71 = vector.load %arg16[%c8, %c0_32] : memref<16x1024xf32, #tpu.memory_space<vmem>>, vector<1x384xf32>
    %72 = vector.shape_cast %71 : vector<1x384xf32> to vector<384xf32>
    %73 = vector.shape_cast %72 : vector<384xf32> to vector<1x384xf32>
    %74 = vector.broadcast %73 : vector<1x384xf32> to vector<64x384xf32>
    %75 = arith.addf %70, %74 : vector<64x384xf32>
    %cst_33 = arith.constant 0.000000e+00 : f32
    %76 = vector.broadcast %cst_33 : f32 to vector<64x384xf32>
    %77 = arith.cmpf oge, %75, %76 : vector<64x384xf32>
    %cst_34 = arith.constant 0.00999999977 : f32
    %78 = vector.broadcast %cst_34 : f32 to vector<64x384xf32>
    %79 = arith.mulf %78, %75 : vector<64x384xf32>
    %80 = arith.select %77, %75, %79 : vector<64x384xi1>, vector<64x384xf32>
    %c0_i32_35 = arith.constant 0 : i32
    %81 = tpu.memref_slice %arg32[%c0_i32_35] : memref<7x!tpu.dma_semaphore, #tpu.memory_space<semaphore_mem>> -> memref<1x!tpu.dma_semaphore, #tpu.memory_space<semaphore_mem>>
    %82 = tpu.memref_squeeze %81 : memref<1x!tpu.dma_semaphore, #tpu.memory_space<semaphore_mem>> -> memref<!tpu.dma_semaphore, #tpu.memory_space<semaphore_mem>>
    tpu.wait_dma2 semaphore(%82 : memref<!tpu.dma_semaphore, #tpu.memory_space<semaphore_mem>>) src(%arg17 : memref<512x512xbf16, #tpu.memory_space<any>>) dst(%arg25 : memref<512x512xbf16, #tpu.memory_space<vmem>>)
    %83 = arith.truncf %53 : vector<128x512xf32> to vector<128x512xbf16>
    %c0_36 = arith.constant 0 : index
    %c0_37 = arith.constant 0 : index
    %84 = vector.load %arg25[%c0_36, %c0_37] : memref<512x512xbf16, #tpu.memory_space<vmem>>, vector<512x512xbf16>
    %cst_38 = arith.constant dense<0.000000e+00> : vector<128x512xf32>
    %85 = tpu.matmul %83, %84, %cst_38 {dimension_numbers = #tpu.dot_dimension_numbers<[1], [0], [0], [1], [0, 0, 1, 1], [], []>} : vector<128x512xbf16>, vector<512x512xbf16>, vector<128x512xf32> -> vector<128x512xf32>
    %c3 = arith.constant 3 : index
    %c0_39 = arith.constant 0 : index
    %86 = vector.load %arg16[%c3, %c0_39] : memref<16x1024xf32, #tpu.memory_space<vmem>>, vector<1x512xf32>
    %87 = vector.shape_cast %86 : vector<1x512xf32> to vector<512xf32>
    %88 = vector.shape_cast %87 : vector<512xf32> to vector<1x512xf32>
    %89 = vector.broadcast %88 : vector<1x512xf32> to vector<128x512xf32>
    %90 = arith.addf %85, %89 : vector<128x512xf32>
    %cst_40 = arith.constant 0.000000e+00 : f32
    %91 = vector.broadcast %cst_40 : f32 to vector<128x512xf32>
    %92 = arith.cmpf oge, %90, %91 : vector<128x512xf32>
    %cst_41 = arith.constant 0.00999999977 : f32
    %93 = vector.broadcast %cst_41 : f32 to vector<128x512xf32>
    %94 = arith.mulf %93, %90 : vector<128x512xf32>
    %95 = arith.select %92, %90, %94 : vector<128x512xi1>, vector<128x512xf32>
    %c1_i32_42 = arith.constant 1 : i32
    %96 = tpu.memref_slice %arg32[%c1_i32_42] : memref<7x!tpu.dma_semaphore, #tpu.memory_space<semaphore_mem>> -> memref<1x!tpu.dma_semaphore, #tpu.memory_space<semaphore_mem>>
    %97 = tpu.memref_squeeze %96 : memref<1x!tpu.dma_semaphore, #tpu.memory_space<semaphore_mem>> -> memref<!tpu.dma_semaphore, #tpu.memory_space<semaphore_mem>>
    tpu.wait_dma2 semaphore(%97 : memref<!tpu.dma_semaphore, #tpu.memory_space<semaphore_mem>>) src(%arg18 : memref<512x1024xbf16, #tpu.memory_space<any>>) dst(%arg26 : memref<512x1024xbf16, #tpu.memory_space<vmem>>)
    %98 = arith.truncf %95 : vector<128x512xf32> to vector<128x512xbf16>
    %c0_43 = arith.constant 0 : index
    %c0_44 = arith.constant 0 : index
    %99 = vector.load %arg26[%c0_43, %c0_44] : memref<512x1024xbf16, #tpu.memory_space<vmem>>, vector<512x1024xbf16>
    %cst_45 = arith.constant dense<0.000000e+00> : vector<128x1024xf32>
    %100 = tpu.matmul %98, %99, %cst_45 {dimension_numbers = #tpu.dot_dimension_numbers<[1], [0], [0], [1], [0, 0, 1, 1], [], []>} : vector<128x512xbf16>, vector<512x1024xbf16>, vector<128x1024xf32> -> vector<128x1024xf32>
    %c4 = arith.constant 4 : index
    %c0_46 = arith.constant 0 : index
    %101 = vector.load %arg16[%c4, %c0_46] : memref<16x1024xf32, #tpu.memory_space<vmem>>, vector<1x1024xf32>
    %102 = vector.shape_cast %101 : vector<1x1024xf32> to vector<1024xf32>
    %103 = vector.shape_cast %102 : vector<1024xf32> to vector<1x1024xf32>
    %104 = vector.broadcast %103 : vector<1x1024xf32> to vector<128x1024xf32>
    %105 = arith.addf %100, %104 : vector<128x1024xf32>
    %cst_47 = arith.constant 0.000000e+00 : f32
    %106 = vector.broadcast %cst_47 : f32 to vector<128x1024xf32>
    %107 = arith.cmpf oge, %105, %106 : vector<128x1024xf32>
    %cst_48 = arith.constant 0.00999999977 : f32
    %108 = vector.broadcast %cst_48 : f32 to vector<128x1024xf32>
    %109 = arith.mulf %108, %105 : vector<128x1024xf32>
    %110 = arith.select %107, %105, %109 : vector<128x1024xi1>, vector<128x1024xf32>
    %c2_i32_49 = arith.constant 2 : i32
    %111 = tpu.memref_slice %arg32[%c2_i32_49] : memref<7x!tpu.dma_semaphore, #tpu.memory_space<semaphore_mem>> -> memref<1x!tpu.dma_semaphore, #tpu.memory_space<semaphore_mem>>
    %112 = tpu.memref_squeeze %111 : memref<1x!tpu.dma_semaphore, #tpu.memory_space<semaphore_mem>> -> memref<!tpu.dma_semaphore, #tpu.memory_space<semaphore_mem>>
    tpu.wait_dma2 semaphore(%112 : memref<!tpu.dma_semaphore, #tpu.memory_space<semaphore_mem>>) src(%arg19 : memref<1024x128xbf16, #tpu.memory_space<any>>) dst(%arg27 : memref<1024x128xbf16, #tpu.memory_space<vmem>>)
    %113 = arith.truncf %110 : vector<128x1024xf32> to vector<128x1024xbf16>
    %c0_50 = arith.constant 0 : index
    %c0_51 = arith.constant 0 : index
    %114 = vector.load %arg27[%c0_50, %c0_51] : memref<1024x128xbf16, #tpu.memory_space<vmem>>, vector<1024x128xbf16>
    %cst_52 = arith.constant dense<0.000000e+00> : vector<128x128xf32>
    %115 = tpu.matmul %113, %114, %cst_52 {dimension_numbers = #tpu.dot_dimension_numbers<[1], [0], [0], [1], [0, 0, 1, 1], [], []>} : vector<128x1024xbf16>, vector<1024x128xbf16>, vector<128x128xf32> -> vector<128x128xf32>
    %c5 = arith.constant 5 : index
    %c0_53 = arith.constant 0 : index
    %116 = vector.load %arg16[%c5, %c0_53] : memref<16x1024xf32, #tpu.memory_space<vmem>>, vector<1x128xf32>
    %117 = vector.shape_cast %116 : vector<1x128xf32> to vector<128xf32>
    %118 = vector.shape_cast %117 : vector<128xf32> to vector<1x128xf32>
    %119 = vector.broadcast %118 : vector<1x128xf32> to vector<128x128xf32>
    %120 = arith.addf %115, %119 : vector<128x128xf32>
    %cst_54 = arith.constant 0.000000e+00 : f32
    %121 = vector.broadcast %cst_54 : f32 to vector<128x128xf32>
    %122 = arith.cmpf oge, %120, %121 : vector<128x128xf32>
    %cst_55 = arith.constant 0.00999999977 : f32
    %123 = vector.broadcast %cst_55 : f32 to vector<128x128xf32>
    %124 = arith.mulf %123, %120 : vector<128x128xf32>
    %125 = arith.select %122, %120, %124 : vector<128x128xi1>, vector<128x128xf32>
    %126 = vector.shape_cast %125 : vector<128x128xf32> to vector<2x64x128xf32>
    %cst_56 = arith.constant dense<0.000000e+00> : vector<2x128xf32>
    %127 = vector.multi_reduction <add>, %126, %cst_56 [1] : vector<2x64x128xf32> to vector<2x128xf32>
    %cst_57 = arith.constant 6.400000e+01 : f32
    %128 = vector.broadcast %cst_57 : f32 to vector<2x128xf32>
    %129 = arith.divf %127, %128 : vector<2x128xf32>
    %130 = vector.extract_strided_slice %129 {offsets = [0, 0], sizes = [2, 64], strides = [1, 1]} : vector<2x128xf32> to vector<2x64xf32>
    %cst_58 = arith.constant dense<0xFF800000> : vector<2x128xf32>
    %131 = vector.multi_reduction <maximumf>, %126, %cst_58 [1] : vector<2x64x128xf32> to vector<2x128xf32>
    %132 = vector.extract_strided_slice %131 {offsets = [0, 64], sizes = [2, 64], strides = [1, 1]} : vector<2x128xf32> to vector<2x64xf32>
    %c0_59 = arith.constant 0 : index
    %c0_60 = arith.constant 0 : index
    %133 = vector.load %arg7[%c0_59, %c0_60] : memref<1x128xf32, #tpu.memory_space<vmem>>, vector<1x128xf32>
    %134 = vector.broadcast %133 : vector<1x128xf32> to vector<128x128xf32>
    %135 = arith.mulf %125, %134 : vector<128x128xf32>
    %cst_61 = arith.constant dense<0.000000e+00> : vector<128xf32>
    %136 = vector.multi_reduction <add>, %135, %cst_61 [1] : vector<128x128xf32> to vector<128xf32>
    %137 = vector.shape_cast %136 : vector<128xf32> to vector<128x1xf32>
    %c6 = arith.constant 6 : index
    %c0_62 = arith.constant 0 : index
    %138 = vector.load %arg16[%c6, %c0_62] : memref<16x1024xf32, #tpu.memory_space<vmem>>, vector<1x1xf32>
    %139 = vector.shape_cast %138 : vector<1x1xf32> to vector<1xf32>
    %140 = vector.shape_cast %139 : vector<1xf32> to vector<1x1xf32>
    %141 = vector.broadcast %140 : vector<1x1xf32> to vector<128x1xf32>
    %142 = arith.addf %137, %141 : vector<128x1xf32>
    %143 = vector.shape_cast %142 : vector<128x1xf32> to vector<2x64x1xf32>
    %cst_63 = arith.constant dense<0xFF800000> : vector<2x1xf32>
    %144 = vector.multi_reduction <maximumf>, %143, %cst_63 [1] : vector<2x64x1xf32> to vector<2x1xf32>
    %145 = vector.shape_cast %144 : vector<2x1xf32> to vector<2x1x1xf32>
    %146 = vector.broadcast %145 : vector<2x1x1xf32> to vector<2x64x1xf32>
    %147 = arith.subf %143, %146 : vector<2x64x1xf32>
    %148 = math.exp %147 : vector<2x64x1xf32>
    %cst_64 = arith.constant dense<0.000000e+00> : vector<2x1xf32>
    %149 = vector.multi_reduction <add>, %148, %cst_64 [1] : vector<2x64x1xf32> to vector<2x1xf32>
    %150 = vector.shape_cast %149 : vector<2x1xf32> to vector<2x1x1xf32>
    %151 = tpu.reciprocal %150 : vector<2x1x1xf32> -> vector<2x1x1xf32>
    %152 = vector.broadcast %151 : vector<2x1x1xf32> to vector<2x64x1xf32>
    %153 = arith.mulf %148, %152 : vector<2x64x1xf32>
    %154 = vector.shape_cast %53 : vector<128x512xf32> to vector<2x64x512xf32>
    %155 = vector.broadcast %153 : vector<2x64x1xf32> to vector<2x64x512xf32>
    %156 = arith.mulf %155, %154 : vector<2x64x512xf32>
    %cst_65 = arith.constant dense<0.000000e+00> : vector<2x512xf32>
    %157 = vector.multi_reduction <add>, %156, %cst_65 [1] : vector<2x64x512xf32> to vector<2x512xf32>
    %c3_i32_66 = arith.constant 3 : i32
    %158 = tpu.memref_slice %arg32[%c3_i32_66] : memref<7x!tpu.dma_semaphore, #tpu.memory_space<semaphore_mem>> -> memref<1x!tpu.dma_semaphore, #tpu.memory_space<semaphore_mem>>
    %159 = tpu.memref_squeeze %158 : memref<1x!tpu.dma_semaphore, #tpu.memory_space<semaphore_mem>> -> memref<!tpu.dma_semaphore, #tpu.memory_space<semaphore_mem>>
    tpu.wait_dma2 semaphore(%159 : memref<!tpu.dma_semaphore, #tpu.memory_space<semaphore_mem>>) src(%arg20 : memref<384x512xbf16, #tpu.memory_space<any>>) dst(%arg28 : memref<384x512xbf16, #tpu.memory_space<vmem>>)
    %160 = arith.truncf %80 : vector<64x384xf32> to vector<64x384xbf16>
    %c0_67 = arith.constant 0 : index
    %c0_68 = arith.constant 0 : index
    %161 = vector.load %arg28[%c0_67, %c0_68] : memref<384x512xbf16, #tpu.memory_space<vmem>>, vector<384x512xbf16>
    %cst_69 = arith.constant dense<0.000000e+00> : vector<64x512xf32>
    %162 = tpu.matmul %160, %161, %cst_69 {dimension_numbers = #tpu.dot_dimension_numbers<[1], [0], [0], [1], [0, 0, 1, 1], [], []>} : vector<64x384xbf16>, vector<384x512xbf16>, vector<64x512xf32> -> vector<64x512xf32>
    %c9 = arith.constant 9 : index
    %c0_70 = arith.constant 0 : index
    %163 = vector.load %arg16[%c9, %c0_70] : memref<16x1024xf32, #tpu.memory_space<vmem>>, vector<1x512xf32>
    %164 = vector.shape_cast %163 : vector<1x512xf32> to vector<512xf32>
    %165 = vector.shape_cast %164 : vector<512xf32> to vector<1x512xf32>
    %166 = vector.broadcast %165 : vector<1x512xf32> to vector<64x512xf32>
    %167 = arith.addf %162, %166 : vector<64x512xf32>
    %cst_71 = arith.constant 0.000000e+00 : f32
    %168 = vector.broadcast %cst_71 : f32 to vector<64x512xf32>
    %169 = arith.cmpf oge, %167, %168 : vector<64x512xf32>
    %cst_72 = arith.constant 0.00999999977 : f32
    %170 = vector.broadcast %cst_72 : f32 to vector<64x512xf32>
    %171 = arith.mulf %170, %167 : vector<64x512xf32>
    %172 = arith.select %169, %167, %171 : vector<64x512xi1>, vector<64x512xf32>
    %c4_i32_73 = arith.constant 4 : i32
    %173 = tpu.memref_slice %arg32[%c4_i32_73] : memref<7x!tpu.dma_semaphore, #tpu.memory_space<semaphore_mem>> -> memref<1x!tpu.dma_semaphore, #tpu.memory_space<semaphore_mem>>
    %174 = tpu.memref_squeeze %173 : memref<1x!tpu.dma_semaphore, #tpu.memory_space<semaphore_mem>> -> memref<!tpu.dma_semaphore, #tpu.memory_space<semaphore_mem>>
    tpu.wait_dma2 semaphore(%174 : memref<!tpu.dma_semaphore, #tpu.memory_space<semaphore_mem>>) src(%arg21 : memref<512x256xbf16, #tpu.memory_space<any>>) dst(%arg29 : memref<512x256xbf16, #tpu.memory_space<vmem>>)
    %175 = arith.truncf %172 : vector<64x512xf32> to vector<64x512xbf16>
    %c0_74 = arith.constant 0 : index
    %c0_75 = arith.constant 0 : index
    %176 = vector.load %arg29[%c0_74, %c0_75] : memref<512x256xbf16, #tpu.memory_space<vmem>>, vector<512x256xbf16>
    %cst_76 = arith.constant dense<0.000000e+00> : vector<64x256xf32>
    %177 = tpu.matmul %175, %176, %cst_76 {dimension_numbers = #tpu.dot_dimension_numbers<[1], [0], [0], [1], [0, 0, 1, 1], [], []>} : vector<64x512xbf16>, vector<512x256xbf16>, vector<64x256xf32> -> vector<64x256xf32>
    %c10 = arith.constant 10 : index
    %c0_77 = arith.constant 0 : index
    %178 = vector.load %arg16[%c10, %c0_77] : memref<16x1024xf32, #tpu.memory_space<vmem>>, vector<1x256xf32>
    %179 = vector.shape_cast %178 : vector<1x256xf32> to vector<256xf32>
    %180 = vector.shape_cast %179 : vector<256xf32> to vector<1x256xf32>
    %181 = vector.broadcast %180 : vector<1x256xf32> to vector<64x256xf32>
    %182 = arith.addf %177, %181 : vector<64x256xf32>
    %cst_78 = arith.constant 0.000000e+00 : f32
    %183 = vector.broadcast %cst_78 : f32 to vector<64x256xf32>
    %184 = arith.cmpf oge, %182, %183 : vector<64x256xf32>
    %cst_79 = arith.constant 0.00999999977 : f32
    %185 = vector.broadcast %cst_79 : f32 to vector<64x256xf32>
    %186 = arith.mulf %185, %182 : vector<64x256xf32>
    %187 = arith.select %184, %182, %186 : vector<64x256xi1>, vector<64x256xf32>
    %c5_i32_80 = arith.constant 5 : i32
    %188 = tpu.memref_slice %arg32[%c5_i32_80] : memref<7x!tpu.dma_semaphore, #tpu.memory_space<semaphore_mem>> -> memref<1x!tpu.dma_semaphore, #tpu.memory_space<semaphore_mem>>
    %189 = tpu.memref_squeeze %188 : memref<1x!tpu.dma_semaphore, #tpu.memory_space<semaphore_mem>> -> memref<!tpu.dma_semaphore, #tpu.memory_space<semaphore_mem>>
    tpu.wait_dma2 semaphore(%189 : memref<!tpu.dma_semaphore, #tpu.memory_space<semaphore_mem>>) src(%arg22 : memref<256x512xbf16, #tpu.memory_space<any>>) dst(%arg30 : memref<256x512xbf16, #tpu.memory_space<vmem>>)
    %190 = arith.truncf %187 : vector<64x256xf32> to vector<64x256xbf16>
    %c0_81 = arith.constant 0 : index
    %c0_82 = arith.constant 0 : index
    %191 = vector.load %arg30[%c0_81, %c0_82] : memref<256x512xbf16, #tpu.memory_space<vmem>>, vector<256x512xbf16>
    %cst_83 = arith.constant dense<0.000000e+00> : vector<64x512xf32>
    %192 = tpu.matmul %190, %191, %cst_83 {dimension_numbers = #tpu.dot_dimension_numbers<[1], [0], [0], [1], [0, 0, 1, 1], [], []>} : vector<64x256xbf16>, vector<256x512xbf16>, vector<64x512xf32> -> vector<64x512xf32>
    %c11 = arith.constant 11 : index
    %c0_84 = arith.constant 0 : index
    %193 = vector.load %arg16[%c11, %c0_84] : memref<16x1024xf32, #tpu.memory_space<vmem>>, vector<1x512xf32>
    %194 = vector.shape_cast %193 : vector<1x512xf32> to vector<512xf32>
    %195 = vector.shape_cast %194 : vector<512xf32> to vector<1x512xf32>
    %196 = vector.broadcast %195 : vector<1x512xf32> to vector<64x512xf32>
    %197 = arith.addf %192, %196 : vector<64x512xf32>
    %cst_85 = arith.constant 0.000000e+00 : f32
    %198 = vector.broadcast %cst_85 : f32 to vector<64x512xf32>
    %199 = arith.cmpf oge, %197, %198 : vector<64x512xf32>
    %cst_86 = arith.constant 0.00999999977 : f32
    %200 = vector.broadcast %cst_86 : f32 to vector<64x512xf32>
    %201 = arith.mulf %200, %197 : vector<64x512xf32>
    %202 = arith.select %199, %197, %201 : vector<64x512xi1>, vector<64x512xf32>
    %c6_i32_87 = arith.constant 6 : i32
    %203 = tpu.memref_slice %arg32[%c6_i32_87] : memref<7x!tpu.dma_semaphore, #tpu.memory_space<semaphore_mem>> -> memref<1x!tpu.dma_semaphore, #tpu.memory_space<semaphore_mem>>
    %204 = tpu.memref_squeeze %203 : memref<1x!tpu.dma_semaphore, #tpu.memory_space<semaphore_mem>> -> memref<!tpu.dma_semaphore, #tpu.memory_space<semaphore_mem>>
    tpu.wait_dma2 semaphore(%204 : memref<!tpu.dma_semaphore, #tpu.memory_space<semaphore_mem>>) src(%arg23 : memref<512x256xbf16, #tpu.memory_space<any>>) dst(%arg31 : memref<512x256xbf16, #tpu.memory_space<vmem>>)
    %205 = arith.truncf %202 : vector<64x512xf32> to vector<64x512xbf16>
    %c0_88 = arith.constant 0 : index
    %c0_89 = arith.constant 0 : index
    %206 = vector.load %arg31[%c0_88, %c0_89] : memref<512x256xbf16, #tpu.memory_space<vmem>>, vector<512x256xbf16>
    %cst_90 = arith.constant dense<0.000000e+00> : vector<64x256xf32>
    %207 = tpu.matmul %205, %206, %cst_90 {dimension_numbers = #tpu.dot_dimension_numbers<[1], [0], [0], [1], [0, 0, 1, 1], [], []>} : vector<64x512xbf16>, vector<512x256xbf16>, vector<64x256xf32> -> vector<64x256xf32>
    %c12 = arith.constant 12 : index
    %c0_91 = arith.constant 0 : index
    %208 = vector.load %arg16[%c12, %c0_91] : memref<16x1024xf32, #tpu.memory_space<vmem>>, vector<1x256xf32>
    %209 = vector.shape_cast %208 : vector<1x256xf32> to vector<256xf32>
    %210 = vector.shape_cast %209 : vector<256xf32> to vector<1x256xf32>
    %211 = vector.broadcast %210 : vector<1x256xf32> to vector<64x256xf32>
    %212 = arith.addf %207, %211 : vector<64x256xf32>
    %cst_92 = arith.constant 0.000000e+00 : f32
    %213 = vector.broadcast %cst_92 : f32 to vector<64x256xf32>
    %214 = arith.cmpf oge, %212, %213 : vector<64x256xf32>
    %cst_93 = arith.constant 0.00999999977 : f32
    %215 = vector.broadcast %cst_93 : f32 to vector<64x256xf32>
    %216 = arith.mulf %215, %212 : vector<64x256xf32>
    %217 = arith.select %214, %212, %216 : vector<64x256xi1>, vector<64x256xf32>
    %218 = vector.shape_cast %217 : vector<64x256xf32> to vector<2x32x256xf32>
    %cst_94 = arith.constant dense<0xFF800000> : vector<2x256xf32>
    %219 = vector.multi_reduction <maximumf>, %218, %cst_94 [1] : vector<2x32x256xf32> to vector<2x256xf32>
    %c0_95 = arith.constant 0 : index
    %c0_96 = arith.constant 0 : index
    %c0_97 = arith.constant 0 : index
    %220 = vector.load %arg3[%c0_95, %c0_96, %c0_97] : memref<2x1x64xf32, #tpu.memory_space<vmem>>, vector<2x1x64xf32>
    %221 = vector.shape_cast %220 : vector<2x1x64xf32> to vector<2x64xf32>
    %222 = arith.truncf %130 : vector<2x64xf32> to vector<2x64xbf16>
    %c0_98 = arith.constant 0 : index
    %c0_99 = arith.constant 0 : index
    %223 = vector.load %arg10[%c0_98, %c0_99] : memref<64x256xbf16, #tpu.memory_space<vmem>>, vector<64x256xbf16>
    %cst_100 = arith.constant dense<0.000000e+00> : vector<2x256xf32>
    %224 = tpu.matmul %222, %223, %cst_100 {dimension_numbers = #tpu.dot_dimension_numbers<[1], [0], [0], [1], [0, 0, 1, 1], [], []>} : vector<2x64xbf16>, vector<64x256xbf16>, vector<2x256xf32> -> vector<2x256xf32>
    %225 = arith.truncf %132 : vector<2x64xf32> to vector<2x64xbf16>
    %c0_101 = arith.constant 0 : index
    %c0_102 = arith.constant 0 : index
    %226 = vector.load %arg11[%c0_101, %c0_102] : memref<64x256xbf16, #tpu.memory_space<vmem>>, vector<64x256xbf16>
    %cst_103 = arith.constant dense<0.000000e+00> : vector<2x256xf32>
    %227 = tpu.matmul %225, %226, %cst_103 {dimension_numbers = #tpu.dot_dimension_numbers<[1], [0], [0], [1], [0, 0, 1, 1], [], []>} : vector<2x64xbf16>, vector<64x256xbf16>, vector<2x256xf32> -> vector<2x256xf32>
    %228 = arith.addf %224, %227 : vector<2x256xf32>
    %229 = arith.truncf %157 : vector<2x512xf32> to vector<2x512xbf16>
    %c0_104 = arith.constant 0 : index
    %c0_105 = arith.constant 0 : index
    %230 = vector.load %arg12[%c0_104, %c0_105] : memref<512x256xbf16, #tpu.memory_space<vmem>>, vector<512x256xbf16>
    %cst_106 = arith.constant dense<0.000000e+00> : vector<2x256xf32>
    %231 = tpu.matmul %229, %230, %cst_106 {dimension_numbers = #tpu.dot_dimension_numbers<[1], [0], [0], [1], [0, 0, 1, 1], [], []>} : vector<2x512xbf16>, vector<512x256xbf16>, vector<2x256xf32> -> vector<2x256xf32>
    %232 = arith.addf %228, %231 : vector<2x256xf32>
    %233 = arith.truncf %219 : vector<2x256xf32> to vector<2x256xbf16>
    %c0_107 = arith.constant 0 : index
    %c0_108 = arith.constant 0 : index
    %234 = vector.load %arg13[%c0_107, %c0_108] : memref<256x256xbf16, #tpu.memory_space<vmem>>, vector<256x256xbf16>
    %cst_109 = arith.constant dense<0.000000e+00> : vector<2x256xf32>
    %235 = tpu.matmul %233, %234, %cst_109 {dimension_numbers = #tpu.dot_dimension_numbers<[1], [0], [0], [1], [0, 0, 1, 1], [], []>} : vector<2x256xbf16>, vector<256x256xbf16>, vector<2x256xf32> -> vector<2x256xf32>
    %236 = arith.addf %232, %235 : vector<2x256xf32>
    %237 = arith.truncf %221 : vector<2x64xf32> to vector<2x64xbf16>
    %c0_110 = arith.constant 0 : index
    %c0_111 = arith.constant 0 : index
    %238 = vector.load %arg14[%c0_110, %c0_111] : memref<64x256xbf16, #tpu.memory_space<vmem>>, vector<64x256xbf16>
    %cst_112 = arith.constant dense<0.000000e+00> : vector<2x256xf32>
    %239 = tpu.matmul %237, %238, %cst_112 {dimension_numbers = #tpu.dot_dimension_numbers<[1], [0], [0], [1], [0, 0, 1, 1], [], []>} : vector<2x64xbf16>, vector<64x256xbf16>, vector<2x256xf32> -> vector<2x256xf32>
    %240 = arith.addf %236, %239 : vector<2x256xf32>
    %c13 = arith.constant 13 : index
    %c0_113 = arith.constant 0 : index
    %241 = vector.load %arg16[%c13, %c0_113] : memref<16x1024xf32, #tpu.memory_space<vmem>>, vector<1x256xf32>
    %242 = vector.shape_cast %241 : vector<1x256xf32> to vector<256xf32>
    %243 = vector.shape_cast %242 : vector<256xf32> to vector<1x256xf32>
    %244 = vector.broadcast %243 : vector<1x256xf32> to vector<2x256xf32>
    %245 = arith.addf %240, %244 : vector<2x256xf32>
    %cst_114 = arith.constant 0.000000e+00 : f32
    %246 = vector.broadcast %cst_114 : f32 to vector<2x256xf32>
    %247 = arith.cmpf oge, %245, %246 : vector<2x256xf32>
    %cst_115 = arith.constant 0.00999999977 : f32
    %248 = vector.broadcast %cst_115 : f32 to vector<2x256xf32>
    %249 = arith.mulf %248, %245 : vector<2x256xf32>
    %250 = arith.select %247, %245, %249 : vector<2x256xi1>, vector<2x256xf32>
    %251 = arith.truncf %250 : vector<2x256xf32> to vector<2x256xbf16>
    %c0_116 = arith.constant 0 : index
    %c0_117 = arith.constant 0 : index
    %252 = vector.load %arg15[%c0_116, %c0_117] : memref<256x64xbf16, #tpu.memory_space<vmem>>, vector<256x64xbf16>
    %cst_118 = arith.constant dense<0.000000e+00> : vector<2x64xf32>
    %253 = tpu.matmul %251, %252, %cst_118 {dimension_numbers = #tpu.dot_dimension_numbers<[1], [0], [0], [1], [0, 0, 1, 1], [], []>} : vector<2x256xbf16>, vector<256x64xbf16>, vector<2x64xf32> -> vector<2x64xf32>
    %c14 = arith.constant 14 : index
    %c0_119 = arith.constant 0 : index
    %254 = vector.load %arg16[%c14, %c0_119] : memref<16x1024xf32, #tpu.memory_space<vmem>>, vector<1x64xf32>
    %255 = vector.shape_cast %254 : vector<1x64xf32> to vector<64xf32>
    %256 = vector.shape_cast %255 : vector<64xf32> to vector<1x64xf32>
    %257 = vector.broadcast %256 : vector<1x64xf32> to vector<2x64xf32>
    %258 = arith.addf %253, %257 : vector<2x64xf32>
    %259 = vector.shape_cast %258 : vector<2x64xf32> to vector<2x1x64xf32>
    %c0_120 = arith.constant 0 : index
    %c0_121 = arith.constant 0 : index
    %c0_122 = arith.constant 0 : index
    %260 = vector.load %arg24[%c0_120, %c0_121, %c0_122] : memref<2x1x64xf32, #tpu.memory_space<vmem>>, vector<2x1x64xf32>
    tpu.vector_store %arg24[%c0_120, %c0_121, %c0_122], %259 {strides = array<i32>} : memref<2x1x64xf32, #tpu.memory_space<vmem>>, vector<2x1x64xf32>,
    return
  }
  func.func @transform_0(%arg0: i32) -> (i32, i32, i32) {
    %c0_i32 = arith.constant 0 : i32
    %c0_i32_0 = arith.constant 0 : i32
    %c0_i32_1 = arith.constant 0 : i32
    return %arg0, %c0_i32, %c0_i32_0 : i32, i32, i32
  }
  func.func @transform_1(%arg0: i32) -> (i32, i32, i32) {
    %c0_i32 = arith.constant 0 : i32
    %c0_i32_0 = arith.constant 0 : i32
    %c0_i32_1 = arith.constant 0 : i32
    return %arg0, %c0_i32, %c0_i32_0 : i32, i32, i32
  }
  func.func @transform_2(%arg0: i32) -> (i32, i32, i32) {
    %c0_i32 = arith.constant 0 : i32
    %c0_i32_0 = arith.constant 0 : i32
    %c0_i32_1 = arith.constant 0 : i32
    return %arg0, %c0_i32, %c0_i32_0 : i32, i32, i32
  }
  func.func @transform_3(%arg0: i32) -> (i32, i32) {
    %c0_i32 = arith.constant 0 : i32
    %c0_i32_0 = arith.constant 0 : i32
    %c0_i32_1 = arith.constant 0 : i32
    return %c0_i32, %c0_i32_0 : i32, i32
  }
  func.func @transform_4(%arg0: i32) -> (i32, i32) {
    %c0_i32 = arith.constant 0 : i32
    %c0_i32_0 = arith.constant 0 : i32
    %c0_i32_1 = arith.constant 0 : i32
    return %c0_i32, %c0_i32_0 : i32, i32
  }
  func.func @transform_5(%arg0: i32) -> (i32, i32) {
    %c0_i32 = arith.constant 0 : i32
    %c0_i32_0 = arith.constant 0 : i32
    %c0_i32_1 = arith.constant 0 : i32
    return %c0_i32, %c0_i32_0 : i32, i32
  }
  func.func @transform_6(%arg0: i32) -> (i32, i32) {
    %c0_i32 = arith.constant 0 : i32
    %c0_i32_0 = arith.constant 0 : i32
    %c0_i32_1 = arith.constant 0 : i32
    return %c0_i32, %c0_i32_0 : i32, i32
  }
  func.func @transform_7(%arg0: i32) -> (i32, i32) {
    %c0_i32 = arith.constant 0 : i32
    %c0_i32_0 = arith.constant 0 : i32
    %c0_i32_1 = arith.constant 0 : i32
    return %c0_i32, %c0_i32_0 : i32, i32
  }
  func.func @transform_8(%arg0: i32) -> (i32, i32) {
    %c0_i32 = arith.constant 0 : i32
    %c0_i32_0 = arith.constant 0 : i32
    %c0_i32_1 = arith.constant 0 : i32
    return %c0_i32, %c0_i32_0 : i32, i32
  }
  func.func @transform_9(%arg0: i32) -> (i32, i32) {
    %c0_i32 = arith.constant 0 : i32
    %c0_i32_0 = arith.constant 0 : i32
    %c0_i32_1 = arith.constant 0 : i32
    return %c0_i32, %c0_i32_0 : i32, i32
  }
  func.func @transform_10(%arg0: i32) -> (i32, i32) {
    %c0_i32 = arith.constant 0 : i32
    %c0_i32_0 = arith.constant 0 : i32
    %c0_i32_1 = arith.constant 0 : i32
    return %c0_i32, %c0_i32_0 : i32, i32
  }
  func.func @transform_11(%arg0: i32) -> (i32, i32) {
    %c0_i32 = arith.constant 0 : i32
    %c0_i32_0 = arith.constant 0 : i32
    %c0_i32_1 = arith.constant 0 : i32
    return %c0_i32, %c0_i32_0 : i32, i32
  }
  func.func @transform_12(%arg0: i32) -> (i32, i32) {
    %c0_i32 = arith.constant 0 : i32
    %c0_i32_0 = arith.constant 0 : i32
    %c0_i32_1 = arith.constant 0 : i32
    return %c0_i32, %c0_i32_0 : i32, i32
  }
  func.func @transform_13(%arg0: i32) -> (i32, i32) {
    %c0_i32 = arith.constant 0 : i32
    %c0_i32_0 = arith.constant 0 : i32
    %c0_i32_1 = arith.constant 0 : i32
    return %c0_i32, %c0_i32_0 : i32, i32
  }
  func.func @transform_14(%arg0: i32) -> (i32, i32) {
    %c0_i32 = arith.constant 0 : i32
    %c0_i32_0 = arith.constant 0 : i32
    %c0_i32_1 = arith.constant 0 : i32
    return %c0_i32, %c0_i32_0 : i32, i32
  }
  func.func @transform_15(%arg0: i32) -> (i32, i32) {
    %c0_i32 = arith.constant 0 : i32
    %c0_i32_0 = arith.constant 0 : i32
    %c0_i32_1 = arith.constant 0 : i32
    return %c0_i32, %c0_i32_0 : i32, i32
  }
  func.func @transform_23(%arg0: i32) -> (i32, i32, i32) {
    %c0_i32 = arith.constant 0 : i32
    %c0_i32_0 = arith.constant 0 : i32
    %c0_i32_1 = arith.constant 0 : i32
    return %arg0, %c0_i32, %c0_i32_0 : i32, i32, i32
  }
}

</mosaic_0001>

<bundles_post_ra>
// kernel: tpu_custom_call.1
= control target key start
LH: loop header
LB: loop body
LE: loop exit
PB: predicated region body
PF: predicated region fallthrough
CT: control target
= control target key end

     0   :  { %s13714_s0 = inlined_call_operand.vmem [shape: bf16[2,64,9], index: 0, kind: input, shape index: {}]   ;;  %s13715_s1 = inlined_call_operand.vmem [shape: bf16[2,32,8], index: 1, kind: input, shape index: {}]   ;;  %s13716_s2 = inlined_call_operand.vmem [shape: f32[2,1,64], index: 2, kind: input, shape index: {}]   ;;  %s13717_s3 = inlined_call_operand.hbm [shape: bf16[9,128], index: 3, kind: input, shape index: {}]   ;;  %s13718_s4 = inlined_call_operand.hbm [shape: bf16[128,256], index: 4, kind: input, shape index: {}]   ;;  %s13719_s5 = inlined_call_operand.hbm [shape: bf16[256,512], index: 5, kind: input, shape index: {}]   ;;  %s13720_s6 = inlined_call_operand.hbm [shape: f32[1,128], index: 6, kind: input, shape index: {}]   ;;  %s13721_s7 = inlined_call_operand.hbm [shape: bf16[8,192], index: 7, kind: input, shape index: {}]   ;;  %s13722_s8 = inlined_call_operand.vmem [shape: bf16[192,384], index: 8, kind: input, shape index: {}]   ;;  %s13723_s9 = inlined_call_operand.hbm [shape: bf16[64,256], index: 9, kind: input, shape index: {}]   ;;  %s13724_s10 = inlined_call_operand.hbm [shape: bf16[64,256], index: 10, kind: input, shape index: {}]   ;;  %s13725_s11 = inlined_call_operand.hbm [shape: bf16[512,256], index: 11, kind: input, shape index: {}]   ;;  %s13726_s12 = inlined_call_operand.hbm [shape: bf16[256,256], index: 12, kind: input, shape index: {}]   ;;  %s13727_s13 = inlined_call_operand.vmem [shape: bf16[64,256], index: 13, kind: input, shape index: {}]   ;;  %s13728_s14 = inlined_call_operand.vmem [shape: bf16[256,64], index: 14, kind: input, shape index: {}]   ;;  %s13729_s15 = inlined_call_operand.hbm [shape: f32[16,1024], index: 15, kind: input, shape index: {}]   ;;  %s13730_s16 = inlined_call_operand.hbm [shape: bf16[512,512], index: 16, kind: input, shape index: {}]   ;;  %s13731_s17 = inlined_call_operand.hbm [shape: bf16[512,1024], index: 17, kind: input, shape index: {}]   ;;  %s13732_s18 = inlined_call_operand.hbm [shape: bf16[1024,128], index: 18, kind: input, shape index: {}]   ;;  %s13733_s19 = inlined_call_operand.hbm [shape: bf16[384,512], index: 19, kind: input, shape index: {}]   ;;  %s13734_s20 = inlined_call_operand.hbm [shape: bf16[512,256], index: 20, kind: input, shape index: {}]   ;;  %s13735_s21 = inlined_call_operand.hbm [shape: bf16[256,512], index: 21, kind: input, shape index: {}]   ;;  %s13736_s22 = inlined_call_operand.hbm [shape: bf16[512,256], index: 22, kind: input, shape index: {}]   ;;  %s13737_s23 = inlined_call_operand.hbm [shape: f32[2,1,64], index: 23, kind: output, shape index: {}]  }
   0x1   :  { %13830 = sst [smem:[#allocation232_spill]] %s13714_s0 }
   0x2   :  { %13831 = sst [smem:[#allocation233_spill]] %s13715_s1 }
   0x3   :  { %13832 = sst [smem:[#allocation234_spill]] %s13716_s2 }
   0x4   :  { %13833 = sst [smem:[#allocation235_spill]] %s13717_s3 }
   0x5   :  { %13834 = sst [smem:[#allocation236_spill]] %s13718_s4 }
   0x6   :  { %13835 = sst [smem:[#allocation237_spill]] %s13719_s5 }
   0x7   :  { %13836 = sst [smem:[#allocation238_spill]] %s13720_s6 }
   0x8   :  { %13837 = sst [smem:[#allocation239_spill]] %s13721_s7 }
   0x9   :  { %13838 = sst [smem:[#allocation240_spill]] %s13727_s13 }
   0xa   :  { %13839 = sst [smem:[#allocation241_spill]] %s13728_s14 }
   0xb   :  { %13840 = sst [smem:[#allocation242_spill]] %s13737_s23 }
   0xc   :  { %28 = vsyncpa [#allocation11], 0 }
   0xd   :  { %29 = vsyncpa [#allocation14], 0 }
   0xe   :  { %30 = vsyncpa [#allocation17], 0 }
   0xf   :  { %31 = vsyncpa [#allocation20], 0 }
  0x10   :  { %32 = vsyncpa [#allocation23], 0 }
  0x11   :  { %33 = vsyncpa [#allocation26], 0 }
  0x12   :  { %34 = vsyncpa [#allocation12], 0  ;;  %s10764_s4 = smov [#allocation13]   ;;  %s13841_s5 = sld [smem:[#allocation236_spill]] }
  0x13   :  { %s58_s30 = sshll.u32 %s10764_s4, 4  ;;  %s59_s30 = int_to_ptr.vmem [resolvable:$true] %s58_s30 }
  0x18   :  { %s10472_s1 = scalar_lea.hbm %s13841_s5, 2048 }
  0x19   :  { %p10473_p0 = scmp.ne.s32.totalorder %s13841_s5, %s10472_s1  ;;  %p10476_p1 = scmp.lt.u32.totalorder %s10472_s1, %s13841_s5 }
  0x1b   :  { %p10478_p2 = pnand %p10476_p1, %p10473_p0 }
  0x1d   :  { %10481 = shalt.err (!%p10478_p2)
}
  0x1e   :  { %s10482_s7 = scalar_lea.vmem %s59_s30, 2048  ;;  %p10487_p4 = scmp.lt.s32.totalorder %s59_s30, %s59_s30 }
  0x1f   :  { %p10483_p3 = scmp.ne.s32.totalorder %s59_s30, %s10482_s7  ;;  %p10488_p5 = scmp.lt.s32.totalorder %s10482_s7, %s10482_s7 }
  0x21   :  { %p10489_p6 = por %p10488_p5, %p10487_p4 }
  0x23   :  { %p10490_p7 = pnand %p10489_p6, %p10483_p3 }
  0x25   :  { %10493 = shalt.err (!%p10490_p7)
}
  0x26   :  { %s10765_s28 = smov 128   ;;  %s10766_s29 = smov 8  }
  0x27   :  { %64 = dma.hbm_to_vmem [thread:$0]  %s13841_s5, 2048, %s59_s30, [#allocation14], %s10765_s28, %s10765_s28, %s10766_s29  }
  0x28   :  { %s10767_s4 = smov [#allocation16]   ;;  %s10768_s25 = smov [#allocation19]  }
  0x29   :  { %s83_s24 = sshll.u32 %s10767_s4, 4  ;;  %s104_s1 = sshll.u32 %s10768_s25, 4  ;;  %s84_s24 = int_to_ptr.vmem [resolvable:$true] %s83_s24  ;;  %s105_s1 = int_to_ptr.vmem [resolvable:$true] %s104_s1 }
  0x2a   :  { %s13842_s6 = sld [smem:[#allocation238_spill]] }
  0x30   :  { %s10494_s27 = scalar_lea.hbm %s13842_s6, 16 }
  0x31   :  { %p10495_p8 = scmp.ne.s32.totalorder %s13842_s6, %s10494_s27  ;;  %p10498_p9 = scmp.lt.u32.totalorder %s10494_s27, %s13842_s6 }
  0x33   :  { %p10500_p10 = pnand %p10498_p9, %p10495_p8 }
  0x35   :  { %10503 = shalt.err (!%p10500_p10)
}
  0x36   :  { %s10504_s30 = scalar_lea.vmem %s84_s24, 16  ;;  %s10508_s5 = scalar_lea.vmem %s84_s24, 32 }
  0x37   :  { %p10505_p11 = scmp.ne.s32.totalorder %s84_s24, %s10504_s30  ;;  %p10509_p12 = scmp.lt.s32.totalorder %s84_s24, %s84_s24 }
  0x38   :  { %p10510_p13 = scmp.lt.s32.totalorder %s10508_s5, %s10504_s30 }
  0x3a   :  { %p10511_p0 = por %p10510_p13, %p10509_p12 }
  0x3c   :  { %p10512_p1 = pnand %p10511_p0, %p10505_p11 }
  0x3e   :  { %10515 = shalt.err (!%p10512_p1)
}
  0x3f   :  { %86 = dma.hbm_to_vmem [thread:$0]  %s13842_s6, 16, %s84_s24, [#allocation17]  }
  0x40   :  { %s10516_s13 = scalar_lea.hbm %s13723_s9, 1024 }
  0x41   :  { %p10517_p2 = scmp.ne.s32.totalorder %s13723_s9, %s10516_s13  ;;  %p10520_p3 = scmp.lt.u32.totalorder %s10516_s13, %s13723_s9 }
  0x43   :  { %p10522_p4 = pnand %p10520_p3, %p10517_p2 }
  0x45   :  { %10525 = shalt.err (!%p10522_p4)
}
  0x46   :  { %s10526_s27 = scalar_lea.vmem %s105_s1, 1024  ;;  %p10531_p6 = scmp.lt.s32.totalorder %s105_s1, %s105_s1 }
  0x47   :  { %p10527_p5 = scmp.ne.s32.totalorder %s105_s1, %s10526_s27  ;;  %p10532_p7 = scmp.lt.s32.totalorder %s10526_s27, %s10526_s27 }
  0x49   :  { %p10533_p8 = por %p10532_p7, %p10531_p6 }
  0x4b   :  { %p10534_p9 = pnand %p10533_p8, %p10527_p5 }
  0x4d   :  { %10537 = shalt.err (!%p10534_p9)
}
  0x4e   :  { %110 = dma.hbm_to_vmem [thread:$0]  %s13723_s9, 1024, %s105_s1, [#allocation20], %s10765_s28, %s10765_s28, %s10766_s29  }
  0x4f   :  { %s10769_s7 = smov [#allocation22]   ;;  %s10770_s5 = smov [#allocation10]  }
  0x50   :  { %s128_s30 = sshll.u32 %s10769_s7, 4  ;;  %s46_s3 = sshll.u32 %s10770_s5, 4  ;;  %s129_s30 = int_to_ptr.vmem [resolvable:$true] %s128_s30  ;;  %s47_s3 = int_to_ptr.vmem [resolvable:$true] %s46_s3 }
  0x51   :  { %s10538_s4 = scalar_lea.hbm %s13725_s11, 8192 }
  0x52   :  { %p10539_p10 = scmp.ne.s32.totalorder %s13725_s11, %s10538_s4  ;;  %p10542_p11 = scmp.lt.u32.totalorder %s10538_s4, %s13725_s11 }
  0x54   :  { %p10544_p12 = pnand %p10542_p11, %p10539_p10 }
  0x56   :  { %10547 = shalt.err (!%p10544_p12)
}
  0x57   :  { %s10548_s9 = scalar_lea.vmem %s129_s30, 8192  ;;  %p10553_p0 = scmp.lt.s32.totalorder %s129_s30, %s129_s30 }
  0x58   :  { %p10549_p13 = scmp.ne.s32.totalorder %s129_s30, %s10548_s9  ;;  %p10554_p1 = scmp.lt.s32.totalorder %s10548_s9, %s10548_s9 }
  0x5a   :  { %p10555_p2 = por %p10554_p1, %p10553_p0 }
  0x5c   :  { %p10556_p3 = pnand %p10555_p2, %p10549_p13 }
  0x5e   :  { %10559 = shalt.err (!%p10556_p3)
}
  0x5f   :  { %134 = dma.hbm_to_vmem [thread:$0]  %s13725_s11, 8192, %s129_s30, [#allocation23], %s10765_s28, %s10765_s28, %s10766_s29  }
  0x60   :  { %s13843_s6 = sld [smem:[#allocation235_spill]] }
  0x66   :  { %s10560_s7 = scalar_lea.hbm %s13843_s6, 128 }
  0x67   :  { %p10561_p4 = scmp.ne.s32.totalorder %s13843_s6, %s10560_s7  ;;  %p10564_p5 = scmp.lt.u32.totalorder %s10560_s7, %s13843_s6 }
  0x69   :  { %p10566_p6 = pnand %p10564_p5, %p10561_p4 }
  0x6b   :  { %10569 = shalt.err (!%p10566_p6)
}
  0x6c   :  { %s10570_s13 = scalar_lea.vmem %s47_s3, 128  ;;  %p10575_p8 = scmp.lt.s32.totalorder %s47_s3, %s47_s3 }
  0x6d   :  { %p10571_p7 = scmp.ne.s32.totalorder %s47_s3, %s10570_s13  ;;  %p10576_p9 = scmp.lt.s32.totalorder %s10570_s13, %s10570_s13 }
  0x6f   :  { %p10577_p10 = por %p10576_p9, %p10575_p8 }
  0x71   :  { %p10578_p11 = pnand %p10577_p10, %p10571_p7 }
  0x73   :  { %10581 = shalt.err (!%p10578_p11)
}
  0x74   :  { %s13751_s11 = smov 64   ;;  %s13749_s30 = smov 4  }
  0x75   :  { %52 = dma.hbm_to_vmem [thread:$0]  %s13843_s6, 128, %s47_s3, [#allocation11], %s13751_s11, %s13751_s11, %s13749_s30  }
  0x76   :  { %s10773_s26 = smov [#allocation15]   ;;  %s13844_s27 = sld [smem:[#allocation237_spill]] }
  0x77   :  { %s70_s9 = sshll.u32 %s10773_s26, 4  ;;  %s71_s9 = int_to_ptr.vmem [resolvable:$true] %s70_s9 }
  0x7c   :  { %s10582_s24 = scalar_lea.hbm %s13844_s27, 8192 }
  0x7d   :  { %p10583_p12 = scmp.ne.s32.totalorder %s13844_s27, %s10582_s24  ;;  %p10586_p13 = scmp.lt.u32.totalorder %s10582_s24, %s13844_s27 }
  0x7f   :  { %p10588_p0 = pnand %p10586_p13, %p10583_p12 }
  0x81   :  { %10591 = shalt.err (!%p10588_p0)
}
  0x82   :  { %s10592_s4 = scalar_lea.vmem %s71_s9, 8192  ;;  %p10597_p2 = scmp.lt.s32.totalorder %s71_s9, %s71_s9 }
  0x83   :  { %p10593_p1 = scmp.ne.s32.totalorder %s71_s9, %s10592_s4  ;;  %p10598_p3 = scmp.lt.s32.totalorder %s10592_s4, %s10592_s4 }
  0x85   :  { %p10599_p4 = por %p10598_p3, %p10597_p2 }
  0x87   :  { %p10600_p5 = pnand %p10599_p4, %p10593_p1 }
  0x89   :  { %10603 = shalt.err (!%p10600_p5)
}
  0x8a   :  { %s10774_s3 = smov 256   ;;  %s10775_s6 = smov 16  }
  0x8b   :  { %76 = dma.hbm_to_vmem [thread:$0]  %s13844_s27, 8192, %s71_s9, [#allocation14], %s10774_s3, %s10774_s3, %s10775_s6  }
  0x8c   :  { %s10776_s25 = smov [#allocation18]   ;;  %s10777_s1 = smov [#allocation21]  }
  0x8d   :  { %s93_s26 = sshll.u32 %s10776_s25, 4  ;;  %s116_s2 = sshll.u32 %s10777_s1, 4  ;;  %s94_s26 = int_to_ptr.vmem [resolvable:$true] %s93_s26  ;;  %s11014_s2 = int_to_ptr.vmem [resolvable:$true] %s116_s2 }
  0x8e   :  { %s13845_s5 = sld [smem:[#allocation239_spill]] }
  0x94   :  { %s10604_s0 = scalar_lea.hbm %s13845_s5, 128 }
  0x95   :  { %p10605_p6 = scmp.ne.s32.totalorder %s13845_s5, %s10604_s0  ;;  %p10608_p7 = scmp.lt.u32.totalorder %s10604_s0, %s13845_s5 }
  0x97   :  { %p10610_p8 = pnand %p10608_p7, %p10605_p6 }
  0x99   :  { %10613 = shalt.err (!%p10610_p8)
}
  0x9a   :  { %s10614_s9 = scalar_lea.vmem %s94_s26, 128  ;;  %p10619_p10 = scmp.lt.s32.totalorder %s94_s26, %s94_s26 }
  0x9b   :  { %p10615_p9 = scmp.ne.s32.totalorder %s94_s26, %s10614_s9  ;;  %p10620_p11 = scmp.lt.s32.totalorder %s10614_s9, %s10614_s9 }
  0x9d   :  { %p10621_p12 = por %p10620_p11, %p10619_p10 }
  0x9f   :  { %p10622_p13 = pnand %p10621_p12, %p10615_p9 }
  0xa1   :  { %10625 = shalt.err (!%p10622_p13)
}
  0xa2   :  { %96 = dma.hbm_to_vmem [thread:$0]  %s13845_s5, 128, %s94_s26, [#allocation17]  }
  0xa3   :  { %s10626_s1 = scalar_lea.hbm %s13724_s10, 1024 }
  0xa4   :  { %p10627_p0 = scmp.ne.s32.totalorder %s13724_s10, %s10626_s1  ;;  %p10630_p1 = scmp.lt.u32.totalorder %s10626_s1, %s13724_s10 }
  0xa6   :  { %p10632_p2 = pnand %p10630_p1, %p10627_p0 }
  0xa8   :  { %10635 = shalt.err (!%p10632_p2)
}
  0xa9   :  { %s10636_s0 = scalar_lea.vmem %s11014_s2, 1024  ;;  %p10641_p4 = scmp.lt.s32.totalorder %s11014_s2, %s11014_s2 }
  0xaa   :  { %p10637_p3 = scmp.ne.s32.totalorder %s11014_s2, %s10636_s0  ;;  %p10642_p5 = scmp.lt.s32.totalorder %s10636_s0, %s10636_s0 }
  0xac   :  { %p10643_p6 = por %p10642_p5, %p10641_p4 }
  0xae   :  { %p10644_p7 = pnand %p10643_p6, %p10637_p3 }
  0xb0   :  { %10647 = shalt.err (!%p10644_p7)
}
  0xb1   :  { %122 = dma.hbm_to_vmem [thread:$0]  %s13724_s10, 1024, %s11014_s2, [#allocation20], %s10765_s28, %s10765_s28, %s10766_s29  }
  0xb2   :  { %s10778_s23 = smov [#allocation24]   ;;  %s10779_s9 = smov [#allocation25]  }
  0xb3   :  { %s140_s4 = sshll.u32 %s10778_s23, 4  ;;  %s156_s27 = sshll.u32 %s10779_s9, 4  ;;  %s141_s4 = int_to_ptr.vmem [resolvable:$true] %s140_s4  ;;  %s11048_s27 = int_to_ptr.vmem [resolvable:$true] %s156_s27 }
  0xb4   :  { %s10648_s25 = scalar_lea.hbm %s13726_s12, 4096 }
  0xb5   :  { %p10649_p8 = scmp.ne.s32.totalorder %s13726_s12, %s10648_s25  ;;  %p10652_p9 = scmp.lt.u32.totalorder %s10648_s25, %s13726_s12 }
  0xb7   :  { %p10654_p10 = pnand %p10652_p9, %p10649_p8 }
  0xb9   :  { %10657 = shalt.err (!%p10654_p10)
}
  0xba   :  { %s10658_s10 = scalar_lea.vmem %s141_s4, 4096  ;;  %p10663_p12 = scmp.lt.s32.totalorder %s141_s4, %s141_s4 }
  0xbb   :  { %p10659_p11 = scmp.ne.s32.totalorder %s141_s4, %s10658_s10  ;;  %p10664_p13 = scmp.lt.s32.totalorder %s10658_s10, %s10658_s10 }
  0xbd   :  { %p10665_p0 = por %p10664_p13, %p10663_p12 }
  0xbf   :  { %p10666_p1 = pnand %p10665_p0, %p10659_p11 }
  0xc1   :  { %10669 = shalt.err (!%p10666_p1)
}
  0xc2   :  { %146 = dma.hbm_to_vmem [thread:$0]  %s13726_s12, 4096, %s141_s4, [#allocation23], %s10765_s28, %s10765_s28, %s10766_s29  }
  0xc3   :  { %s10670_s5 = scalar_lea.hbm %s13729_s15, 2048 }
  0xc4   :  { %p10671_p2 = scmp.ne.s32.totalorder %s13729_s15, %s10670_s5  ;;  %p10674_p3 = scmp.lt.u32.totalorder %s10670_s5, %s13729_s15 }
  0xc6   :  { %p10676_p4 = pnand %p10674_p3, %p10671_p2 }
  0xc8   :  { %10679 = shalt.err (!%p10676_p4)
}
  0xc9   :  { %s10680_s25 = scalar_lea.vmem %s11048_s27, 2048  ;;  %p10685_p6 = scmp.lt.s32.totalorder %s11048_s27, %s11048_s27 }
  0xca   :  { %p10681_p5 = scmp.ne.s32.totalorder %s11048_s27, %s10680_s25  ;;  %p10686_p7 = scmp.lt.s32.totalorder %s10680_s25, %s10680_s25 }
  0xcc   :  { %p10687_p8 = por %p10686_p7, %p10685_p6 }
  0xce   :  { %p10688_p9 = pnand %p10687_p8, %p10681_p5 }
  0xd0   :  { %10691 = shalt.err (!%p10688_p9)
}
  0xd1   :  { %s10780_s12 = smov 1024   ;;  %s13846_s4 = smov 64  }
  0xd2   :  { %162 = dma.hbm_to_vmem [thread:$0]  %s13729_s15, 2048, %s11048_s27, [#allocation26], %s10780_s12, %s10780_s12, %s13846_s4  }
  0xd3   :  { %10736 = dma.done.wait [#allocation11], 128  }
  0xd4   :  { %10737 = vsyncadd [#allocation11], 4294967168 }
  0xd5   :  { %10738 = dma.done.wait [#allocation14], 10240  }
  0xd6   :  { %10739 = vsyncadd [#allocation14], 4294957056 }
  0xd7   :  { %10740 = dma.done.wait [#allocation17], 144  }
  0xd8   :  { %10741 = vsyncadd [#allocation17], 4294967152 }
  0xd9   :  { %10742 = dma.done.wait [#allocation20], 2048  }
  0xda   :  { %10743 = vsyncadd [#allocation20], 4294965248 }
  0xdb   :  { %10744 = dma.done.wait [#allocation23], 12288  }
  0xdc   :  { %10745 = vsyncadd [#allocation23], 4294955008 }
  0xdd   :  { %10746 = dma.done.wait [#allocation26], 2048  }
  0xde   :  { %10747 = vsyncadd [#allocation26], 4294965248  ;;  %s198_s11 = sld [smem:[#allocation0]]   ;;  %s10781_s30 = smov 512  }
  0xdf   :  { %210 = sst [smem:[#allocation29]] %s10781_s30  ;;  %s13847_s10 = smov 4  }
  0xe0   :  { %212 = sst [smem:[#allocation29 + $0x1]] %s10781_s30  ;;  %s10782_s15 = smov [#allocation2]  }
  0xe1   :  { %214 = sst [smem:[#allocation29 + $0x2]] %s13847_s10  ;;  %s206_s27 = sshll.u32 %s10782_s15, 4  ;;  %s207_s27 = int_to_ptr.vmem [resolvable:$true] %s206_s27 }
  0xe2   :  { %216 = sst [smem:[#allocation29 + $0x3]] %s13846_s4  ;;  %s10783_s2 = smov 2  }
  0xe3   :  { %218 = sst [smem:[#allocation29 + $0x4]] %s10765_s28  ;;  %s10784_s26 = smov [#allocation9]  }
  0xe4   :  { %220 = sst [smem:[#allocation29 + $0x5]] %s10783_s2  ;;  %s8884_s7 = sshll.u32 %s198_s11, 26 }
  0xe5   :  { %222 = sst [smem:[#allocation29 + $0x6]] %s10774_s3  ;;  %s11092_s0 = sadd.s32 134217728, %s8884_s7 }
  0xe6   :  { %224 = sst [smem:[#allocation29 + $0x7]] %s13846_s4  ;;  %s10785_s5 = smov [#allocation28]  }
  0xe7   :  { %226 = sst [smem:[#allocation29 + $0x8]] %s13847_s10  ;;  %s10786_s13 = smov [#allocation3]  }
  0xe8   :  { %228 = dma.general %s13730_s16, 16384, %s207_s27, %s10784_s26, %s10785_s5, [#allocation29], %s11092_s0, 0  }
  0xe9   :  { %245 = sst [smem:[#allocation31]] %s10780_s12  ;;  %s241_s14 = sshll.u32 %s10786_s13, 4  ;;  %s242_s14 = int_to_ptr.vmem [resolvable:$true] %s241_s14 }
  0xea   :  { %247 = sst [smem:[#allocation31 + $0x1]] %s10780_s12  ;;  %s10787_s16 = smov [#allocation9 + $0x1]  }
  0xeb   :  { %249 = sst [smem:[#allocation31 + $0x2]] %s10766_s29  ;;  %s10788_s25 = smov [#allocation30]  }
  0xec   :  { %251 = sst [smem:[#allocation31 + $0x3]] %s13846_s4  ;;  %s10789_s29 = smov [#allocation4]  }
  0xed   :  { %253 = sst [smem:[#allocation31 + $0x4]] %s10765_s28  ;;  %s272_s24 = sshll.u32 %s10789_s29, 4  ;;  %s273_s24 = int_to_ptr.vmem [resolvable:$true] %s272_s24 }
  0xee   :  { %255 = sst [smem:[#allocation31 + $0x5]] %s10783_s2  ;;  %s10790_s11 = smov [#allocation5]  }
  0xef   :  { %257 = sst [smem:[#allocation31 + $0x6]] %s10781_s30  ;;  %s288_s15 = sshll.u32 %s10790_s11, 4  ;;  %s289_s15 = int_to_ptr.vmem [resolvable:$true] %s288_s15 }
  0xf0   :  { %259 = sst [smem:[#allocation31 + $0x7]] %s13846_s4  ;;  %s10692_s7 = scalar_lea.hbm %s13732_s18, 8192 }
  0xf1   :  { %261 = sst [smem:[#allocation31 + $0x8]] %s13847_s10  ;;  %p10693_p10 = scmp.ne.s32.totalorder %s13732_s18, %s10692_s7 }
  0xf2   :  { %263 = dma.general %s13731_s17, 32768, %s242_s14, %s10787_s16, %s10788_s25, [#allocation31], %s11092_s0, 0  }
  0xf3   :  { %292 = sst [smem:[#allocation37]] %s10781_s30  ;;  %p10696_p11 = scmp.lt.u32.totalorder %s10692_s7, %s13732_s18 }
  0xf4   :  { %294 = sst [smem:[#allocation37 + $0x1]] %s10781_s30 }
  0xf5   :  { %296 = sst [smem:[#allocation37 + $0x2]] %s13847_s10  ;;  %p10698_p12 = pnand %p10696_p11, %p10693_p10 }
  0xf6   :  { %298 = sst [smem:[#allocation37 + $0x3]] %s13846_s4 }
  0xf7   :  { %300 = sst [smem:[#allocation37 + $0x4]] %s10765_s28 }
  0xf8   :  { %302 = sst [smem:[#allocation37 + $0x5]] %s10783_s2 }
  0xf9   :  { %304 = sst [smem:[#allocation37 + $0x6]] %s10774_s3 }
  0xfa   :  { %306 = sst [smem:[#allocation37 + $0x7]] %s13846_s4 }
  0xfb   :  { %308 = sst [smem:[#allocation37 + $0x8]] %s13847_s10 }
  0xfc   :  { %10701 = shalt.err (!%p10698_p12)  }
  0xfd   :  { %s10702_s13 = scalar_lea.vmem %s273_s24, 8192  ;;  %p10707_p0 = scmp.lt.s32.totalorder %s273_s24, %s273_s24 }
  0xfe   :  { %p10703_p13 = scmp.ne.s32.totalorder %s273_s24, %s10702_s13  ;;  %p10708_p1 = scmp.lt.s32.totalorder %s10702_s13, %s10702_s13 }
 0x100   :  { %p10709_p2 = por %p10708_p1, %p10707_p0 }
 0x102   :  { %p10710_p3 = pnand %p10709_p2, %p10703_p13 }
 0x104   :  { %10713 = shalt.err (!%p10710_p3)  }
 0x105   :  { %275 = dma.hbm_to_vmem [thread:$0]  %s13732_s18, 8192, %s273_s24, [#allocation9 + $0x2]  ;;  %vm505_vm0 = vcmask 1043456   ;;  %vm506_vm1 = vcmask 1044480   ;;  %v10802_v0 = vmov 65535   ;;  %vm480_vm2 = vcmask 72704  }
 0x106   :  { %s10791_s25 = smov [#allocation9 + $0x3]   ;;  %s10792_s12 = smov [#allocation36]   ;;  %v507_v1 = vsel %vm505_vm0, 4294967295, %v10802_v0  ;;  %v13753_v29 = vmov 0  }
 0x107   :  { %310 = dma.general %s13733_s19, 12288, %s289_s15, %s10791_s25, %s10792_s12, [#allocation37], %s11092_s0, 0   ;;  %v508_v2 = vsel %vm506_vm1, %v507_v1, 0 }
 0x108   :  { %327 = sst [smem:[#allocation39]] %s10774_s3  ;;  %s10793_s11 = smov [#allocation6]  }
 0x109   :  { %329 = sst [smem:[#allocation39 + $0x1]] %s10774_s3  ;;  %s323_s17 = sshll.u32 %s10793_s11, 4  ;;  %s324_s17 = int_to_ptr.vmem [resolvable:$true] %s323_s17 }
 0x10a   :  { %331 = sst [smem:[#allocation39 + $0x2]] %s10783_s2  ;;  %s10794_s18 = smov [#allocation9 + $0x4]  }
 0x10b   :  { %333 = sst [smem:[#allocation39 + $0x3]] %s13846_s4  ;;  %s10795_s19 = smov [#allocation38]  }
 0x10c   :  { %335 = sst [smem:[#allocation39 + $0x4]] %s10765_s28  ;;  %s10796_s27 = smov [#allocation7]  }
 0x10d   :  { %337 = sst [smem:[#allocation39 + $0x5]] %s10783_s2  ;;  %s358_s7 = sshll.u32 %s10796_s27, 4  ;;  %s359_s7 = int_to_ptr.vmem [resolvable:$true] %s358_s7 }
 0x10e   :  { %339 = sst [smem:[#allocation39 + $0x6]] %s10765_s28  ;;  %s10798_s26 = smov [#allocation40]  }
 0x10f   :  { %341 = sst [smem:[#allocation39 + $0x7]] %s13846_s4  ;;  %s10799_s23 = smov [#allocation8]  }
 0x110   :  { %343 = sst [smem:[#allocation39 + $0x8]] %s13847_s10  ;;  %s393_s9 = sshll.u32 %s10799_s23, 4  ;;  %s394_s9 = int_to_ptr.vmem [resolvable:$true] %s393_s9 }
 0x111   :  { %345 = dma.general %s13734_s20, 8192, %s324_s17, %s10794_s18, %s10795_s19, [#allocation39], %s11092_s0, 0  }
 0x112   :  { %362 = sst [smem:[#allocation41]] %s10781_s30  ;;  %s10797_s20 = smov [#allocation9 + $0x5]  }
 0x113   :  { %364 = sst [smem:[#allocation41 + $0x1]] %s10781_s30  ;;  %s10801_s13 = smov [#allocation42]  }
 0x114   :  { %366 = sst [smem:[#allocation41 + $0x2]] %s13847_s10 }
 0x115   :  { %368 = sst [smem:[#allocation41 + $0x3]] %s13846_s4 }
 0x116   :  { %370 = sst [smem:[#allocation41 + $0x4]] %s10765_s28 }
 0x117   :  { %372 = sst [smem:[#allocation41 + $0x5]] %s10783_s2 }
 0x118   :  { %374 = sst [smem:[#allocation41 + $0x6]] %s10774_s3 }
 0x119   :  { %376 = sst [smem:[#allocation41 + $0x7]] %s13846_s4 }
 0x11a   :  { %378 = sst [smem:[#allocation41 + $0x8]] %s13847_s10 }
 0x11b   :  { %380 = dma.general %s13735_s21, 8192, %s359_s7, %s10797_s20, %s10798_s26, [#allocation41], %s11092_s0, 0  }
 0x11c   :  { %397 = sst [smem:[#allocation43]] %s10774_s3  ;;  %s10800_s21 = smov [#allocation9 + $0x6]  }
 0x11d   :  { %399 = sst [smem:[#allocation43 + $0x1]] %s10774_s3 }
 0x11e   :  { %401 = sst [smem:[#allocation43 + $0x2]] %s10783_s2 }
 0x11f   :  { %403 = sst [smem:[#allocation43 + $0x3]] %s13846_s4 }
 0x120   :  { %405 = sst [smem:[#allocation43 + $0x4]] %s10765_s28 }
 0x121   :  { %407 = sst [smem:[#allocation43 + $0x5]] %s10783_s2 }
 0x122   :  { %409 = sst [smem:[#allocation43 + $0x6]] %s10765_s28 }
 0x123   :  { %411 = sst [smem:[#allocation43 + $0x7]] %s13846_s4 }
 0x124   :  { %413 = sst [smem:[#allocation43 + $0x8]] %s13847_s10 }
 0x125   :  { %415 = dma.general %s13736_s22, 8192, %s394_s9, %s10800_s21, %s10801_s13, [#allocation43], %s11092_s0, 0  }
 0x126   :  { %v10055_v3 = vld [vmem:[#allocation10] sm:$0x1f]   ;;  %s13848_s16 = sld [smem:[#allocation232_spill]]  ;;  %v10064_v8 = vld [vmem:[#allocation13] ss:$8 sps:$4 sm:$0xff]   ;;  %s13852_s26 = sld [smem:[#allocation233_spill]] }
 0x127   :  { %v510_v5 = vand.u32 %v10055_v3, %v508_v2  ;;  %v10066_v9 = vld [vmem:[#allocation13 + $0x4] ss:$8 sps:$4 sm:$0xff]   ;;  %v10069_v10 = vld [vmem:[#allocation13 + $0x14] ss:$8 sps:$4 sm:$0xff]   ;;  %v10067_v13 = vld [vmem:[#allocation13 + $0x10] ss:$8 sps:$4 sm:$0xff]  }
 0x128   :  { %v10072_v14 = vld [vmem:[#allocation13 + $0x24] ss:$8 sps:$4 sm:$0xff]   ;;  %v10070_v15 = vld [vmem:[#allocation13 + $0x20] ss:$8 sps:$4 sm:$0xff]   ;;  %v10075_v16 = vld [vmem:[#allocation13 + $0x34] ss:$8 sps:$4 sm:$0xff]  }
 0x129   :  { %9482 = vmatprep.subr.bf16.mxu1 %v510_v5  ;;  %v10073_v19 = vld [vmem:[#allocation13 + $0x30] ss:$8 sps:$4 sm:$0xff]   ;;  %v10078_v20 = vld [vmem:[#allocation13 + $0x44] ss:$8 sps:$4 sm:$0xff]   ;;  %v10076_v21 = vld [vmem:[#allocation13 + $0x40] ss:$8 sps:$4 sm:$0xff]  }
 0x12a   :  { %9483 = vmatpush3.bf16.msra.mxu1 %v510_v5  ;;  %v10081_v22 = vld [vmem:[#allocation13 + $0x54] ss:$8 sps:$4 sm:$0xff]   ;;  %v10079_v24 = vld [vmem:[#allocation13 + $0x50] ss:$8 sps:$4 sm:$0xff]   ;;  %v10084_v25 = vld [vmem:[#allocation13 + $0x64] ss:$8 sps:$4 sm:$0xff]  }
 0x12b   :  { %774 = vmatprep.subr.bf16.mxu1 %v10066_v9  ;;  %v10082_v26 = vld [vmem:[#allocation13 + $0x60] ss:$8 sps:$4 sm:$0xff]   ;;  %v10087_v27 = vld [vmem:[#allocation13 + $0x74] ss:$8 sps:$4 sm:$0xff]   ;;  %v10085_v28 = vld [vmem:[#allocation13 + $0x70] ss:$8 sps:$4 sm:$0xff]  }
 0x12c   :  { %v10056_v4 = vld [vmem:[%s13848_s16] sm:$0xff]   ;;  %v10057_v6 = vld [vmem:[%s13848_s16 + $0x8] sm:$0xff]   ;;  %v10058_v7 = vld [vmem:[%s13848_s16 + $0x10] sm:$0xff]  }
 0x12d   :  { %9484 = vmatprep.mubr.msk.bf16.mxu1 %vm480_vm2, %v10056_v4  ;;  %v10059_v11 = vld [vmem:[%s13848_s16 + $0x18] sm:$0xff]   ;;  %v10060_v12 = vld [vmem:[%s13848_s16 + $0x20] sm:$0xff]   ;;  %v10061_v17 = vld [vmem:[%s13848_s16 + $0x28] sm:$0xff]  }
 0x12e   :  { %9485 = vmatmul.mubr.msk.bf16.vlgmr.msra.gmra.mrb[0].mxu1 %vm480_vm2, %v10057_v6  ;;  %v10062_v18 = vld [vmem:[%s13848_s16 + $0x30] sm:$0xff]   ;;  %v10063_v23 = vld [vmem:[%s13848_s16 + $0x38] sm:$0xff]  }
 0x12f   :  { %9488 = vmatprep.mubr.msk.bf16.mxu1 %vm480_vm2, %v10058_v7  ;;  %775 = vmatpush1.bf16.msra.mxu1 %v10064_v8  ;;  %v10088_v30 = vld [vmem:[#allocation15 + $0x4] ss:$16 sps:$4 sm:$0xff]   ;;  %v10090_v31 = vld [vmem:[#allocation15] ss:$16 sps:$4 sm:$0xff]   ;;  %v10093_v32 = vld [vmem:[#allocation15 + $0xc] ss:$16 sps:$4 sm:$0xff]  }
 0x130   :  { %776 = vmatprep.subr.bf16.mxu1 %v10069_v10  ;;  %v10094_v33 = vld [vmem:[#allocation15 + $0x24] ss:$16 sps:$4 sm:$0xff]   ;;  %1406 = vmatprep.subr.bf16.mxu0 %v10088_v30  ;;  %v10096_v34 = vld [vmem:[#allocation15 + $0x20] ss:$16 sps:$4 sm:$0xff]   ;;  %v11211_v58 = vld [vmem:[#allocation25] ss:$0 sm:$0xff] }
 0x131   :  { %1407 = vmatpush1.bf16.msra.mxu0 %v10090_v31  ;;  %v10100_v35 = vld [vmem:[#allocation15 + $0x44] ss:$16 sps:$4 sm:$0xff]   ;;  %v10102_v36 = vld [vmem:[#allocation15 + $0x40] ss:$16 sps:$4 sm:$0xff]  }
 0x132   :  { %1408 = vmatprep.subr.bf16.mxu0 %v10094_v33  ;;  %v10106_v37 = vld [vmem:[#allocation15 + $0x64] ss:$16 sps:$4 sm:$0xff]   ;;  %v10108_v38 = vld [vmem:[#allocation15 + $0x60] ss:$16 sps:$4 sm:$0xff]  }
 0x133   :  { %777 = vmatpush1.bf16.msra.mxu1 %v10067_v13  ;;  %v10112_v39 = vld [vmem:[#allocation15 + $0x84] ss:$16 sps:$4 sm:$0xff]   ;;  %v10114_v40 = vld [vmem:[#allocation15 + $0x80] ss:$16 sps:$4 sm:$0xff]   ;;  %v10091_v13 = vld [vmem:[#allocation15 + $0x8] ss:$16 sps:$4 sm:$0xff]  }
 0x134   :  { %778 = vmatprep.subr.bf16.mxu1 %v10072_v14  ;;  %v10118_v41 = vld [vmem:[#allocation15 + $0xa4] ss:$16 sps:$4 sm:$0xff]   ;;  %v10120_v42 = vld [vmem:[#allocation15 + $0xa0] ss:$16 sps:$4 sm:$0xff]  }
 0x135   :  { %1409 = vmatpush1.bf16.msra.mxu0 %v10096_v34  ;;  %v10124_v43 = vld [vmem:[#allocation15 + $0xc4] ss:$16 sps:$4 sm:$0xff]   ;;  %v10126_v44 = vld [vmem:[#allocation15 + $0xc0] ss:$16 sps:$4 sm:$0xff]  }
 0x136   :  { %9489 = vmatmul.mubr.msk.bf16.gmra.mrb[4].mxu1 %vm480_vm2, %v10059_v11  ;;  %1410 = vmatprep.subr.bf16.mxu0 %v10100_v35  ;;  %v10130_v45 = vld [vmem:[#allocation15 + $0xe4] ss:$16 sps:$4 sm:$0xff]   ;;  %v10132_v46 = vld [vmem:[#allocation15 + $0xe0] ss:$16 sps:$4 sm:$0xff]  }
 0x137   :  { %9492 = vmatprep.mubr.msk.bf16.mxu1 %vm480_vm2, %v10060_v12  ;;  %779 = vmatpush1.bf16.msra.mxu1 %v10070_v15  ;;  %v10136_v47 = vld [vmem:[#allocation15 + $0x104] ss:$16 sps:$4 sm:$0xff]   ;;  %v10138_v48 = vld [vmem:[#allocation15 + $0x100] ss:$16 sps:$4 sm:$0xff]  }
 0x138   :  { %780 = vmatprep.subr.bf16.mxu1 %v10075_v16  ;;  %v10142_v49 = vld [vmem:[#allocation15 + $0x124] ss:$16 sps:$4 sm:$0xff]   ;;  %v10144_v50 = vld [vmem:[#allocation15 + $0x120] ss:$16 sps:$4 sm:$0xff]  }
 0x139   :  { %1411 = vmatpush1.bf16.msra.mxu0 %v10102_v36  ;;  %v10148_v51 = vld [vmem:[#allocation15 + $0x144] ss:$16 sps:$4 sm:$0xff]   ;;  %v10150_v52 = vld [vmem:[#allocation15 + $0x140] ss:$16 sps:$4 sm:$0xff]   ;;  %v10103_v36 = vld [vmem:[#allocation15 + $0x48] ss:$16 sps:$4 sm:$0xff]  }
 0x13a   :  { %1412 = vmatprep.subr.bf16.mxu0 %v10106_v37  ;;  %v10154_v53 = vld [vmem:[#allocation15 + $0x164] ss:$16 sps:$4 sm:$0xff]   ;;  %v10156_v54 = vld [vmem:[#allocation15 + $0x160] ss:$16 sps:$4 sm:$0xff]  }
 0x13b   :  { %781 = vmatpush1.bf16.msra.mxu1 %v10073_v19  ;;  %v10160_v55 = vld [vmem:[#allocation15 + $0x184] ss:$16 sps:$4 sm:$0xff]   ;;  %v10162_v56 = vld [vmem:[#allocation15 + $0x180] ss:$16 sps:$4 sm:$0xff]  }
 0x13c   :  { %782 = vmatprep.subr.bf16.mxu1 %v10078_v20  ;;  %v10166_v57 = vld [vmem:[#allocation15 + $0x1a4] ss:$16 sps:$4 sm:$0xff]  }
 0x13d   :  { %1413 = vmatpush1.bf16.msra.mxu0 %v10108_v38 }
 0x13e   :  { %9493 = vmatmul.mubr.msk.bf16.gmra.mrb[8].mxu1 %vm480_vm2, %v10061_v17  ;;  %1414 = vmatprep.subr.bf16.mxu0 %v10112_v39  ;;  %v10099_v17 = vld [vmem:[#allocation15 + $0x2c] ss:$16 sps:$4 sm:$0xff]  }
 0x13f   :  { %9496 = vmatprep.mubr.msk.bf16.mxu1 %vm480_vm2, %v10062_v18  ;;  %783 = vmatpush1.bf16.msra.mxu1 %v10076_v21 }
 0x140   :  { %784 = vmatprep.subr.bf16.mxu1 %v10081_v22 }
 0x141   :  { %1415 = vmatpush1.bf16.msra.mxu0 %v10114_v40  ;;  %v10111_v40 = vld [vmem:[#allocation15 + $0x6c] ss:$16 sps:$4 sm:$0xff]  }
 0x142   :  { %1416 = vmatprep.subr.bf16.mxu0 %v10118_v41 }
 0x143   :  { %785 = vmatpush1.bf16.msra.mxu1 %v10079_v24 }
 0x144   :  { %786 = vmatprep.subr.bf16.mxu1 %v10084_v25  ;;  %v10097_v25 = vld [vmem:[#allocation15 + $0x28] ss:$16 sps:$4 sm:$0xff]  }
 0x145   :  { %1417 = vmatpush1.bf16.msra.mxu0 %v10120_v42 }
 0x146   :  { %9497 = vmatmul.mubr.msk.bf16.gmra.mrb[12].mxu1 %vm480_vm2, %v10063_v23  ;;  %1418 = vmatprep.subr.bf16.mxu0 %v10124_v43 }
 0x147   :  { %787 = vmatpush1.bf16.msra.mxu1 %v10082_v26  ;;  %806 = vmatprep.mubr.bf16.mxu1 %v13753_v29 }
 0x148   :  { %788 = vmatprep.subr.bf16.mxu1 %v10087_v27 }
 0x149   :  { %1419 = vmatpush1.bf16.msra.mxu0 %v10126_v44 }
 0x14a   :  { %1420 = vmatprep.subr.bf16.mxu0 %v10130_v45 }
 0x14b   :  { %789 = vmatpush1.bf16.msra.mxu1 %v10085_v28  ;;  %v10105_v28 = vld [vmem:[#allocation15 + $0x4c] ss:$16 sps:$4 sm:$0xff]  }
 0x14c   :  { %1519 = vmatprep.subr.bf16.mxu1 %v10093_v32 }
 0x14d   :  { %1421 = vmatpush1.bf16.msra.mxu0 %v10132_v46 }
 0x14e   :  { %1422 = vmatprep.subr.bf16.mxu0 %v10136_v47 }
 0x151   :  { %1423 = vmatpush1.bf16.msra.mxu0 %v10138_v48  ;;  %v10109_v48 = vld [vmem:[#allocation15 + $0x68] ss:$16 sps:$4 sm:$0xff]  }
 0x152   :  { %1424 = vmatprep.subr.bf16.mxu0 %v10142_v49 }
 0x155   :  { %1425 = vmatpush1.bf16.msra.mxu0 %v10144_v50 }
 0x156   :  { %1426 = vmatprep.subr.bf16.mxu0 %v10148_v51  ;;  %v10117_v51 = vld [vmem:[#allocation15 + $0x8c] ss:$16 sps:$4 sm:$0xff]  }
 0x159   :  { %1427 = vmatpush1.bf16.msra.mxu0 %v10150_v52 }
 0x15a   :  { %1428 = vmatprep.subr.bf16.mxu0 %v10154_v53 }
 0x15d   :  { %1429 = vmatpush1.bf16.msra.mxu0 %v10156_v54 }
 0x15e   :  { %1430 = vmatprep.subr.bf16.mxu0 %v10160_v55 }
 0x161   :  { %1431 = vmatpush1.bf16.msra.mxu0 %v10162_v56 }
 0x162   :  { %1432 = vmatprep.subr.bf16.mxu0 %v10166_v57 }
 0x201   :  { %v9486_v59 = vpop.f32.mrb[0].mxu1 }
 0x202   :  { %v555_v60 = vadd.f32 %v9486_v59, %v11211_v58  ;;  %v546_v61 = vpop.f32.mrb[1].mxu1  ;;  %v10115_v59 = vld [vmem:[#allocation15 + $0x88] ss:$16 sps:$4 sm:$0xff]  }
 0x203   :  { %v547_v62 = vadd.f32 %v546_v61, %v11211_v58  ;;  %v9487_v63 = vpop.f32.mrb[2].mxu1 }
 0x204   :  { %v627_v0 = vmul.f32 0.01, %v555_v60  ;;  %v558_v1 = vadd.f32 %v9487_v63, %v11211_v58  ;;  %v549_v2 = vpop.f32.mrb[3].mxu1  ;;  %vm611_vm3 = vcmp.ge.f32.partialorder %v555_v60, 0.0  ;;  %v10123_v63 = vld [vmem:[#allocation15 + $0xac] ss:$16 sps:$4 sm:$0xff]  }
 0x205   :  { %v625_v3 = vmul.f32 0.01, %v547_v62  ;;  %v550_v4 = vadd.f32 %v549_v2, %v11211_v58  ;;  %vm609_vm4 = vcmp.ge.f32.partialorder %v547_v62, 0.0 }
 0x206   :  { %vm612_vm5 = vcmp.ge.f32.partialorder %v558_v1, 0.0  ;;  %v628_v5 = vmul.f32 0.01, %v558_v1  ;;  %v643_v7 = vsel %vm611_vm3, %v555_v60, %v627_v0 }
 0x207   :  { %vm610_vm6 = vcmp.ge.f32.partialorder %v550_v4, 0.0  ;;  %v626_v6 = vmul.f32 0.01, %v550_v4  ;;  %v641_v9 = vsel %vm609_vm4, %v547_v62, %v625_v3 }
 0x208   :  { %v644_v8 = vsel %vm612_vm5, %v558_v1, %v628_v5 }
 0x209   :  { %v642_v10 = vsel %vm610_vm6, %v550_v4, %v626_v6  ;;  %v9490_v11 = vpop.f32.mrb[4].mxu1  ;;  %v658_v12 = vpack.c.bf16 %v644_v8, %v643_v7  ;;  %v10121_v7 = vld [vmem:[#allocation15 + $0xa8] ss:$16 sps:$4 sm:$0xff]  }
 0x20a   :  { %v657_v14 = vpack.c.bf16 %v642_v10, %v641_v9  ;;  %v571_v15 = vadd.f32 %v9490_v11, %v11211_v58  ;;  %v562_v16 = vpop.f32.mrb[5].mxu1  ;;  %v10129_v10 = vld [vmem:[#allocation15 + $0xcc] ss:$16 sps:$4 sm:$0xff]  }
 0x20b   :  { %v563_v18 = vadd.f32 %v562_v16, %v11211_v58  ;;  %v9491_v19 = vpop.f32.mrb[6].mxu1  ;;  %v10127_v16 = vld [vmem:[#allocation15 + $0xc8] ss:$16 sps:$4 sm:$0xff]  }
 0x20c   :  { %vm615_vm7 = vcmp.ge.f32.partialorder %v571_v15, 0.0  ;;  %v631_v20 = vmul.f32 0.01, %v571_v15  ;;  %807 = vmatmul.mubr.bf16.vlgmr.msra.gmra.mrb[16].mxu1 %v657_v14  ;;  %v574_v21 = vadd.f32 %v9491_v19, %v11211_v58  ;;  %v565_v22 = vpop.f32.mrb[7].mxu1  ;;  %v10141_v19 = vld [vmem:[#allocation15 + $0x10c] ss:$16 sps:$4 sm:$0xff]  }
 0x20d   :  { %vm613_vm8 = vcmp.ge.f32.partialorder %v563_v18, 0.0  ;;  %v629_v23 = vmul.f32 0.01, %v563_v18  ;;  %v566_v24 = vadd.f32 %v565_v22, %v11211_v58  ;;  %816 = vmatprep.mubr.bf16.mxu1 %v13753_v29  ;;  %1520 = vmatpush1.bf16.msra.mxu1 %v10091_v13  ;;  %v10145_v22 = vld [vmem:[#allocation15 + $0x128] ss:$16 sps:$4 sm:$0xff]  }
 0x20e   :  { %vm616_vm9 = vcmp.ge.f32.partialorder %v574_v21, 0.0  ;;  %v632_v26 = vmul.f32 0.01, %v574_v21  ;;  %v11222_v27 = vsel %vm615_vm7, %v571_v15, %v631_v20  ;;  %1521 = vmatprep.subr.bf16.mxu1 %v10099_v17  ;;  %v10139_v20 = vld [vmem:[#allocation15 + $0x108] ss:$16 sps:$4 sm:$0xff]  }
 0x20f   :  { %vm614_vm10 = vcmp.ge.f32.partialorder %v566_v24, 0.0  ;;  %v630_v30 = vmul.f32 0.01, %v566_v24  ;;  %v645_v31 = vsel %vm613_vm8, %v563_v18, %v629_v23  ;;  %v10135_v18 = vld [vmem:[#allocation15 + $0xec] ss:$16 sps:$4 sm:$0xff]  }
 0x210   :  { %v11224_v32 = vsel %vm616_vm9, %v574_v21, %v632_v26  ;;  %v10147_v21 = vld [vmem:[#allocation15 + $0x12c] ss:$16 sps:$4 sm:$0xff]   ;;  %v10157_v26 = vld [vmem:[#allocation15 + $0x168] ss:$16 sps:$4 sm:$0xff]  }
 0x211   :  { %v9494_v33 = vpop.f32.mrb[8].mxu1  ;;  %v646_v34 = vsel %vm614_vm10, %v566_v24, %v630_v30  ;;  %v660_v35 = vpack.c.bf16 %v11224_v32, %v11222_v27  ;;  %1522 = vmatpush1.bf16.msra.mxu1 %v10097_v25  ;;  %v10153_v23 = vld [vmem:[#allocation15 + $0x14c] ss:$16 sps:$4 sm:$0xff]   ;;  %v10151_v24 = vld [vmem:[#allocation15 + $0x148] ss:$16 sps:$4 sm:$0xff]  }
 0x212   :  { %v587_v37 = vadd.f32 %v9494_v33, %v11211_v58  ;;  %v659_v38 = vpack.c.bf16 %v646_v34, %v645_v31  ;;  %v578_v39 = vpop.f32.mrb[9].mxu1  ;;  %1523 = vmatprep.subr.bf16.mxu1 %v10105_v28  ;;  %v10159_v25 = vld [vmem:[#allocation15 + $0x16c] ss:$16 sps:$4 sm:$0xff]   ;;  %v10163_v28 = vld [vmem:[#allocation15 + $0x188] ss:$16 sps:$4 sm:$0xff]  }
 0x213   :  { %v579_v41 = vadd.f32 %v578_v39, %v11211_v58  ;;  %v9495_v42 = vpop.f32.mrb[10].mxu1  ;;  %v10165_v27 = vld [vmem:[#allocation15 + $0x18c] ss:$16 sps:$4 sm:$0xff]   ;;  %v10168_v31 = vld [vmem:[#allocation15 + $0x1a0] ss:$16 sps:$4 sm:$0xff]  }
 0x214   :  { %817 = vmatmul.mubr.bf16.gmra.mrb[20].mxu1 %v658_v12  ;;  %vm619_vm11 = vcmp.ge.f32.partialorder %v587_v37, 0.0  ;;  %v635_v43 = vmul.f32 0.01, %v587_v37  ;;  %v590_v44 = vadd.f32 %v9495_v42, %v11211_v58  ;;  %v581_v45 = vpop.f32.mrb[11].mxu1  ;;  %v10171_v30 = vld [vmem:[#allocation15 + $0x1ac] ss:$16 sps:$4 sm:$0xff]   ;;  %1433 = vmatpush1.bf16.msra.mxu0 %v10168_v31 }
 0x215   :  { %826 = vmatprep.mubr.bf16.mxu1 %v13753_v29  ;;  %vm617_vm12 = vcmp.ge.f32.partialorder %v579_v41, 0.0  ;;  %v633_v46 = vmul.f32 0.01, %v579_v41  ;;  %v582_v47 = vadd.f32 %v581_v45, %v11211_v58  ;;  %1524 = vmatpush1.bf16.msra.mxu1 %v10103_v36  ;;  %v10169_v32 = vld [vmem:[#allocation15 + $0x1a8] ss:$16 sps:$4 sm:$0xff]  }
 0x216   :  { %vm620_vm13 = vcmp.ge.f32.partialorder %v590_v44, 0.0  ;;  %v636_v49 = vmul.f32 0.01, %v590_v44  ;;  %v11233_v50 = vsel %vm619_vm11, %v587_v37, %v635_v43  ;;  %1525 = vmatprep.subr.bf16.mxu1 %v10111_v40  ;;  %v10172_v33 = vld [vmem:[#allocation15 + $0x1c4] ss:$16 sps:$4 sm:$0xff]   ;;  %v684_v43 = vlaneseq }
 0x217   :  { %vm618_vm14 = vcmp.ge.f32.partialorder %v582_v47, 0.0  ;;  %v634_v52 = vmul.f32 0.01, %v582_v47  ;;  %v649_v53 = vsel %vm617_vm12, %v579_v41, %v633_v46  ;;  %v10177_v34 = vld [vmem:[#allocation15 + $0x1cc] ss:$16 sps:$4 sm:$0xff]   ;;  %1434 = vmatprep.subr.bf16.mxu0 %v10172_v33  ;;  %v1832_v41 = vld [vmem:[#allocation18] sm:$0xff] }
 0x218   :  { %v652_v54 = vsel %vm620_vm13, %v590_v44, %v636_v49  ;;  %v10175_v36 = vld [vmem:[#allocation15 + $0x1c8] ss:$16 sps:$4 sm:$0xff]   ;;  %v10178_v37 = vld [vmem:[#allocation15 + $0x1e4] ss:$16 sps:$4 sm:$0xff]   ;;  %v10180_v39 = vld [vmem:[#allocation15 + $0x1e0] ss:$16 sps:$4 sm:$0xff]   ;;  %v8998_v42 = vcombine.high %v1832_v41, %v1832_v41 }
 0x219   :  { %v9498_v55 = vpop.f32.mrb[12].mxu1  ;;  %v650_v56 = vsel %vm618_vm14, %v582_v47, %v634_v52  ;;  %v662_v57 = vpack.c.bf16 %v652_v54, %v11233_v50  ;;  %1526 = vmatpush1.bf16.msra.mxu1 %v10109_v48  ;;  %v10181_v40 = vld [vmem:[#allocation15 + $0x1e8] ss:$16 sps:$4 sm:$0xff]   ;;  %v11249_v44 = vshrl.u32 %v684_v43, 7 }
 0x21a   :  { %v603_v60 = vadd.f32 %v9498_v55, %v11211_v58  ;;  %v661_v61 = vpack.c.bf16 %v650_v56, %v649_v53  ;;  %v594_v62 = vpop.f32.mrb[13].mxu1  ;;  %1527 = vmatprep.subr.bf16.mxu1 %v10117_v51  ;;  %v682_v46 = vld [vmem:[#allocation25 + $0x1] ss:$8 sm:$0x3] }
 0x21b   :  { %v595_v0 = vadd.f32 %v594_v62, %v11211_v58  ;;  %v9499_v1 = vpop.f32.mrb[14].mxu1  ;;  %13849 = vst [vmem:[#allocation58_spill] sm:$0xff] %v11249_v44  ;;  %v11252_v45 = vsub.s32 0, %v11249_v44  ;;  %v11255_v47 = vsub.s32 1, %v11249_v44 }
 0x21c   :  { %827 = vmatmul.mubr.bf16.gmra.mrb[24].mxu1 %v659_v38  ;;  %vm623_vm15 = vcmp.ge.f32.partialorder %v603_v60, 0.0  ;;  %v639_v2 = vmul.f32 0.01, %v603_v60  ;;  %v606_v3 = vadd.f32 %v9499_v1, %v11211_v58  ;;  %v597_v4 = vpop.f32.mrb[15].mxu1  ;;  %v10183_v38 = vld [vmem:[#allocation15 + $0x1ec] ss:$16 sps:$4 sm:$0xff]  }
 0x21d   :  { %836 = vmatprep.mubr.bf16.mxu1 %v13753_v29  ;;  %vm621_vm1 = vcmp.ge.f32.partialorder %v595_v0, 0.0  ;;  %v637_v5 = vmul.f32 0.01, %v595_v0  ;;  %v598_v6 = vadd.f32 %v597_v4, %v11211_v58  ;;  %1528 = vmatpush1.bf16.msra.mxu1 %v10115_v59  ;;  %v10133_v58 = vld [vmem:[#allocation15 + $0xe8] ss:$16 sps:$4 sm:$0xff]   ;;  %13850 = vst [vmem:[#allocation59_spill] sm:$0xff] %v11252_v45  ;;  %v11258_v48 = vrot.slane %v682_v46, %v11252_v45 }
 0x21e   :  { %vm624_vm2 = vcmp.ge.f32.partialorder %v606_v3, 0.0  ;;  %v640_v8 = vmul.f32 0.01, %v606_v3  ;;  %v655_v9 = vsel %vm623_vm15, %v603_v60, %v639_v2  ;;  %1529 = vmatprep.subr.bf16.mxu1 %v10123_v63  ;;  %13851 = vst [vmem:[#allocation60_spill] sm:$0xff] %v11255_v47  ;;  %v11261_v49 = vrot.slane %v682_v46, %v11255_v47 }
 0x21f   :  { %vm622_vm3 = vcmp.ge.f32.partialorder %v598_v6, 0.0  ;;  %v638_v11 = vmul.f32 0.01, %v598_v6  ;;  %v653_v12 = vsel %vm621_vm1, %v595_v0, %v637_v5  ;;  %v8997_v63 = vcombine.low %v1832_v41, %v1832_v41 }
 0x220   :  { %v656_v13 = vsel %vm624_vm2, %v606_v3, %v640_v8 }
 0x221   :  { %v654_v14 = vsel %vm622_vm3, %v598_v6, %v638_v11  ;;  %v664_v15 = vpack.c.bf16 %v656_v13, %v655_v9  ;;  %1530 = vmatpush1.bf16.msra.mxu1 %v10121_v7  ;;  %v1885_v11 = vsel %vm505_vm0, %v8997_v63, 0 }
 0x222   :  { %v663_v17 = vpack.c.bf16 %v654_v14, %v653_v12  ;;  %1531 = vmatprep.subr.bf16.mxu1 %v10129_v10 }
 0x224   :  { %837 = vmatmul.mubr.bf16.gmra.mrb[28].mxu1 %v660_v35  ;;  %v10174_v35 = vld [vmem:[#allocation15 + $0x1c0] ss:$16 sps:$4 sm:$0xff]  }
 0x225   :  { %846 = vmatprep.mubr.bf16.mxu1 %v13753_v29  ;;  %1532 = vmatpush1.bf16.msra.mxu1 %v10127_v16 }
 0x226   :  { %1533 = vmatprep.subr.bf16.mxu1 %v10135_v18  ;;  %1435 = vmatpush1.bf16.msra.mxu0 %v10174_v35 }
 0x227   :  { %1436 = vmatprep.subr.bf16.mxu0 %v10178_v37 }
 0x229   :  { %1534 = vmatpush1.bf16.msra.mxu1 %v10133_v58 }
 0x22a   :  { %1535 = vmatprep.subr.bf16.mxu1 %v10141_v19  ;;  %1437 = vmatpush1.bf16.msra.mxu0 %v10180_v39 }
 0x22b   :  { %8999 = vmatprep.subr.msk.bf16.mxu0 %vm505_vm0, %v8998_v42 }
 0x22c   :  { %847 = vmatmul.mubr.bf16.gmra.mrb[32].mxu1 %v661_v61 }
 0x22d   :  { %856 = vmatprep.mubr.bf16.mxu1 %v13753_v29  ;;  %1536 = vmatpush1.bf16.msra.mxu1 %v10139_v20 }
 0x22e   :  { %1537 = vmatprep.subr.bf16.mxu1 %v10147_v21 }
 0x231   :  { %1538 = vmatpush1.bf16.msra.mxu1 %v10145_v22 }
 0x232   :  { %1539 = vmatprep.subr.bf16.mxu1 %v10153_v23 }
 0x234   :  { %857 = vmatmul.mubr.bf16.gmra.mrb[36].mxu1 %v662_v57 }
 0x235   :  { %866 = vmatprep.mubr.bf16.mxu1 %v13753_v29  ;;  %1540 = vmatpush1.bf16.msra.mxu1 %v10151_v24 }
 0x236   :  { %1541 = vmatprep.subr.bf16.mxu1 %v10159_v25 }
 0x239   :  { %1542 = vmatpush1.bf16.msra.mxu1 %v10157_v26 }
 0x23a   :  { %1543 = vmatprep.subr.bf16.mxu1 %v10165_v27 }
 0x23c   :  { %867 = vmatmul.mubr.bf16.gmra.mrb[40].mxu1 %v663_v17 }
 0x23d   :  { %876 = vmatprep.mubr.bf16.mxu1 %v13753_v29  ;;  %1544 = vmatpush1.bf16.msra.mxu1 %v10163_v28 }
 0x23e   :  { %1545 = vmatprep.subr.bf16.mxu1 %v10171_v30 }
 0x241   :  { %1546 = vmatpush1.bf16.msra.mxu1 %v10169_v32 }
 0x242   :  { %1547 = vmatprep.subr.bf16.mxu1 %v10177_v34 }
 0x244   :  { %877 = vmatmul.mubr.bf16.gmra.mrb[44].mxu1 %v664_v15 }
 0x245   :  { %1548 = vmatpush1.bf16.msra.mxu1 %v10175_v36 }
 0x246   :  { %1549 = vmatprep.subr.bf16.mxu1 %v10183_v38 }
 0x249   :  { %1550 = vmatpush1.bf16.msra.mxu1 %v10181_v40 }
 0x2df   :  { %v808_v50 = vpop.f32.mrb[16].mxu1 }
 0x2e0   :  { %v809_v51 = vadd.f32 %v808_v50, %v11258_v48  ;;  %v810_v52 = vpop.f32.mrb[17].mxu1 }
 0x2e1   :  { %v811_v53 = vadd.f32 %v810_v52, %v11261_v49  ;;  %v812_v54 = vpop.f32.mrb[18].mxu1 }
 0x2e2   :  { %v919_v55 = vmul.f32 0.01, %v809_v51  ;;  %v813_v56 = vadd.f32 %v812_v54, %v11258_v48  ;;  %v814_v57 = vpop.f32.mrb[19].mxu1  ;;  %vm887_vm4 = vcmp.ge.f32.partialorder %v809_v51, 0.0 }
 0x2e3   :  { %v920_v59 = vmul.f32 0.01, %v811_v53  ;;  %v815_v60 = vadd.f32 %v814_v57, %v11261_v49  ;;  %vm888_vm6 = vcmp.ge.f32.partialorder %v811_v53, 0.0 }
 0x2e4   :  { %vm889_vm5 = vcmp.ge.f32.partialorder %v813_v56, 0.0  ;;  %v921_v61 = vmul.f32 0.01, %v813_v56  ;;  %v951_v0 = vsel %vm887_vm4, %v809_v51, %v919_v55 }
 0x2e5   :  { %v922_v62 = vmul.f32 0.01, %v815_v60  ;;  %vm890_vm7 = vcmp.ge.f32.partialorder %v815_v60, 0.0  ;;  %v952_v3 = vsel %vm888_vm6, %v811_v53, %v920_v59 }
 0x2e6   :  { %v953_v1 = vsel %vm889_vm5, %v813_v56, %v921_v61 }
 0x2e7   :  { %v818_v2 = vpop.f32.mrb[20].mxu1  ;;  %v954_v4 = vsel %vm890_vm7, %v815_v60, %v922_v62  ;;  %v983_v5 = vpack.c.bf16 %v953_v1, %v951_v0 }
 0x2e8   :  { %v819_v6 = vadd.f32 %v818_v2, %v11258_v48  ;;  %v820_v7 = vpop.f32.mrb[21].mxu1  ;;  %v984_v8 = vpack.c.bf16 %v954_v4, %v952_v3 }
 0x2e9   :  { %v821_v9 = vadd.f32 %v820_v7, %v11261_v49  ;;  %v822_v10 = vpop.f32.mrb[22].mxu1 }
 0x2ea   :  { %v923_v12 = vmul.f32 0.01, %v819_v6  ;;  %v823_v13 = vadd.f32 %v822_v10, %v11258_v48  ;;  %v824_v14 = vpop.f32.mrb[23].mxu1  ;;  %1438 = vmatprep.mubr.bf16.mxu0 %v984_v8  ;;  %1551 = vmatprep.mubr.bf16.mxu1 %v984_v8  ;;  %vm891_vm8 = vcmp.ge.f32.partialorder %v819_v6, 0.0 }
 0x2eb   :  { %v924_v15 = vmul.f32 0.01, %v821_v9  ;;  %v825_v16 = vadd.f32 %v824_v14, %v11261_v49  ;;  %1439 = vmatmul.mubr.bf16.vlgmr.msra.gmra.mrb[0].mxu0 %v983_v5  ;;  %1552 = vmatmul.mubr.bf16.vlgmr.msra.gmra.mrb[48].mxu1 %v983_v5  ;;  %vm892_vm9 = vcmp.ge.f32.partialorder %v821_v9, 0.0 }
 0x2ec   :  { %vm893_vm10 = vcmp.ge.f32.partialorder %v823_v13, 0.0  ;;  %v925_v17 = vmul.f32 0.01, %v823_v13  ;;  %1891 = vmatpush1.bf16.msra.mxu0 %v1885_v11  ;;  %v955_v58 = vsel %vm891_vm8, %v819_v6, %v923_v12 }
 0x2ed   :  { %vm894_vm11 = vcmp.ge.f32.partialorder %v825_v16, 0.0  ;;  %v926_v18 = vmul.f32 0.01, %v825_v16  ;;  %2363 = vmatprep.subr.bf16.mxu0 %v13753_v29  ;;  %v956_v21 = vsel %vm892_vm9, %v821_v9, %v924_v15 }
 0x2ee   :  { %v957_v19 = vsel %vm893_vm10, %v823_v13, %v925_v17 }
 0x2ef   :  { %v828_v20 = vpop.f32.mrb[24].mxu1  ;;  %v958_v22 = vsel %vm894_vm11, %v825_v16, %v926_v18  ;;  %v985_v23 = vpack.c.bf16 %v957_v19, %v955_v58 }
 0x2f0   :  { %v829_v24 = vadd.f32 %v828_v20, %v11258_v48  ;;  %v830_v25 = vpop.f32.mrb[25].mxu1  ;;  %v986_v26 = vpack.c.bf16 %v958_v22, %v956_v21 }
 0x2f1   :  { %v831_v27 = vadd.f32 %v830_v25, %v11261_v49  ;;  %v832_v28 = vpop.f32.mrb[26].mxu1 }
 0x2f2   :  { %v927_v30 = vmul.f32 0.01, %v829_v24  ;;  %v833_v31 = vadd.f32 %v832_v28, %v11258_v48  ;;  %v834_v32 = vpop.f32.mrb[27].mxu1  ;;  %1448 = vmatprep.mubr.bf16.mxu0 %v986_v26  ;;  %1561 = vmatprep.mubr.bf16.mxu1 %v986_v26  ;;  %vm895_vm0 = vcmp.ge.f32.partialorder %v829_v24, 0.0 }
 0x2f3   :  { %v928_v33 = vmul.f32 0.01, %v831_v27  ;;  %v835_v34 = vadd.f32 %v834_v32, %v11261_v49  ;;  %1449 = vmatmul.mubr.bf16.gmra.mrb[4].mxu0 %v985_v23  ;;  %1562 = vmatmul.mubr.bf16.gmra.mrb[52].mxu1 %v985_v23  ;;  %vm896_vm12 = vcmp.ge.f32.partialorder %v831_v27, 0.0 }
 0x2f4   :  { %vm897_vm13 = vcmp.ge.f32.partialorder %v833_v31, 0.0  ;;  %v929_v35 = vmul.f32 0.01, %v833_v31  ;;  %v959_v37 = vsel %vm895_vm0, %v829_v24, %v927_v30 }
 0x2f5   :  { %vm898_vm14 = vcmp.ge.f32.partialorder %v835_v34, 0.0  ;;  %v930_v36 = vmul.f32 0.01, %v835_v34  ;;  %v960_v40 = vsel %vm896_vm12, %v831_v27, %v928_v33 }
 0x2f6   :  { %v961_v38 = vsel %vm897_vm13, %v833_v31, %v929_v35 }
 0x2f7   :  { %v838_v39 = vpop.f32.mrb[28].mxu1  ;;  %v962_v41 = vsel %vm898_vm14, %v835_v34, %v930_v36  ;;  %v987_v42 = vpack.c.bf16 %v961_v38, %v959_v37 }
 0x2f8   :  { %v839_v43 = vadd.f32 %v838_v39, %v11258_v48  ;;  %v840_v46 = vpop.f32.mrb[29].mxu1  ;;  %v988_v50 = vpack.c.bf16 %v962_v41, %v960_v40 }
 0x2f9   :  { %v841_v51 = vadd.f32 %v840_v46, %v11261_v49  ;;  %v842_v52 = vpop.f32.mrb[30].mxu1 }
 0x2fa   :  { %v931_v53 = vmul.f32 0.01, %v839_v43  ;;  %v843_v54 = vadd.f32 %v842_v52, %v11258_v48  ;;  %v844_v55 = vpop.f32.mrb[31].mxu1  ;;  %1458 = vmatprep.mubr.bf16.mxu0 %v988_v50  ;;  %1571 = vmatprep.mubr.bf16.mxu1 %v988_v50  ;;  %vm899_vm15 = vcmp.ge.f32.partialorder %v839_v43, 0.0 }
 0x2fb   :  { %v932_v56 = vmul.f32 0.01, %v841_v51  ;;  %v845_v57 = vadd.f32 %v844_v55, %v11261_v49  ;;  %1459 = vmatmul.mubr.bf16.gmra.mrb[8].mxu0 %v987_v42  ;;  %1572 = vmatmul.mubr.bf16.gmra.mrb[56].mxu1 %v987_v42  ;;  %vm900_vm1 = vcmp.ge.f32.partialorder %v841_v51, 0.0 }
 0x2fc   :  { %vm901_vm2 = vcmp.ge.f32.partialorder %v843_v54, 0.0  ;;  %v933_v59 = vmul.f32 0.01, %v843_v54  ;;  %v963_v61 = vsel %vm899_vm15, %v839_v43, %v931_v53 }
 0x2fd   :  { %vm902_vm3 = vcmp.ge.f32.partialorder %v845_v57, 0.0  ;;  %v934_v60 = vmul.f32 0.01, %v845_v57  ;;  %v964_v0 = vsel %vm900_vm1, %v841_v51, %v932_v56 }
 0x2fe   :  { %v965_v62 = vsel %vm901_vm2, %v843_v54, %v933_v59 }
 0x2ff   :  { %v848_v63 = vpop.f32.mrb[32].mxu1  ;;  %v966_v1 = vsel %vm902_vm3, %v845_v57, %v934_v60  ;;  %v989_v2 = vpack.c.bf16 %v965_v62, %v963_v61 }
 0x300   :  { %v849_v3 = vadd.f32 %v848_v63, %v11258_v48  ;;  %v850_v4 = vpop.f32.mrb[33].mxu1  ;;  %v990_v5 = vpack.c.bf16 %v966_v1, %v964_v0 }
 0x301   :  { %v851_v6 = vadd.f32 %v850_v4, %v11261_v49  ;;  %v852_v7 = vpop.f32.mrb[34].mxu1 }
 0x302   :  { %v935_v8 = vmul.f32 0.01, %v849_v3  ;;  %v853_v9 = vadd.f32 %v852_v7, %v11258_v48  ;;  %v854_v10 = vpop.f32.mrb[35].mxu1  ;;  %1468 = vmatprep.mubr.bf16.mxu0 %v990_v5  ;;  %1581 = vmatprep.mubr.bf16.mxu1 %v990_v5  ;;  %vm903_vm4 = vcmp.ge.f32.partialorder %v849_v3, 0.0 }
 0x303   :  { %v936_v11 = vmul.f32 0.01, %v851_v6  ;;  %v855_v12 = vadd.f32 %v854_v10, %v11261_v49  ;;  %1469 = vmatmul.mubr.bf16.gmra.mrb[12].mxu0 %v989_v2  ;;  %1582 = vmatmul.mubr.bf16.gmra.mrb[60].mxu1 %v989_v2  ;;  %vm904_vm5 = vcmp.ge.f32.partialorder %v851_v6, 0.0 }
 0x304   :  { %vm905_vm6 = vcmp.ge.f32.partialorder %v853_v9, 0.0  ;;  %v937_v13 = vmul.f32 0.01, %v853_v9  ;;  %v967_v15 = vsel %vm903_vm4, %v849_v3, %v935_v8  ;;  %vm1871_vm4 = vcmask 64512  }
 0x305   :  { %vm906_vm7 = vcmp.ge.f32.partialorder %v855_v12, 0.0  ;;  %v938_v14 = vmul.f32 0.01, %v855_v12  ;;  %v968_v18 = vsel %vm904_vm5, %v851_v6, %v936_v11 }
 0x306   :  { %v969_v16 = vsel %vm905_vm6, %v853_v9, %v937_v13 }
 0x307   :  { %v858_v17 = vpop.f32.mrb[36].mxu1  ;;  %v970_v58 = vsel %vm906_vm7, %v855_v12, %v938_v14  ;;  %v991_v19 = vpack.c.bf16 %v969_v16, %v967_v15  ;;  %v10187_v16 = vld [vmem:[%s13852_s26 + $0x8] sm:$0xff]  }
 0x308   :  { %v859_v20 = vadd.f32 %v858_v17, %v11258_v48  ;;  %v860_v21 = vpop.f32.mrb[37].mxu1  ;;  %v992_v22 = vpack.c.bf16 %v970_v58, %v968_v18  ;;  %v10188_v17 = vld [vmem:[%s13852_s26 + $0x10] sm:$0xff]   ;;  %v10189_v18 = vld [vmem:[%s13852_s26 + $0x18] sm:$0xff]   ;;  %v10190_v58 = vld [vmem:[%s13722_s8] ss:$12 sps:$4 sm:$0xff]  }
 0x309   :  { %v861_v23 = vadd.f32 %v860_v21, %v11261_v49  ;;  %v862_v24 = vpop.f32.mrb[38].mxu1  ;;  %v10195_v21 = vld [vmem:[%s13722_s8 + $0x1c] ss:$12 sps:$4 sm:$0xff]  }
 0x30a   :  { %v939_v25 = vmul.f32 0.01, %v859_v20  ;;  %v863_v26 = vadd.f32 %v862_v24, %v11258_v48  ;;  %v864_v27 = vpop.f32.mrb[39].mxu1  ;;  %1478 = vmatprep.mubr.bf16.mxu0 %v992_v22  ;;  %1591 = vmatprep.mubr.bf16.mxu1 %v992_v22  ;;  %vm907_vm8 = vcmp.ge.f32.partialorder %v859_v20, 0.0  ;;  %v10196_v22 = vld [vmem:[%s13722_s8 + $0x30] ss:$12 sps:$4 sm:$0xff]  }
 0x30b   :  { %v940_v28 = vmul.f32 0.01, %v861_v23  ;;  %v865_v30 = vadd.f32 %v864_v27, %v11261_v49  ;;  %1479 = vmatmul.mubr.bf16.gmra.mrb[16].mxu0 %v991_v19  ;;  %1592 = vmatmul.mubr.bf16.gmra.mrb[64].mxu1 %v991_v19  ;;  %vm908_vm9 = vcmp.ge.f32.partialorder %v861_v23, 0.0  ;;  %v10192_v19 = vld [vmem:[%s13722_s8 + $0x4] ss:$12 sps:$4 sm:$0xff]  }
 0x30c   :  { %vm909_vm10 = vcmp.ge.f32.partialorder %v863_v26, 0.0  ;;  %v941_v31 = vmul.f32 0.01, %v863_v26  ;;  %v971_v33 = vsel %vm907_vm8, %v859_v20, %v939_v25  ;;  %2290 = vmatprep.subr.bf16.mxu1 %v10192_v19  ;;  %v10193_v20 = vld [vmem:[%s13722_s8 + $0x18] ss:$12 sps:$4 sm:$0xff]  }
 0x30d   :  { %vm910_vm11 = vcmp.ge.f32.partialorder %v865_v30, 0.0  ;;  %v942_v32 = vmul.f32 0.01, %v865_v30  ;;  %v972_v36 = vsel %vm908_vm9, %v861_v23, %v940_v28  ;;  %2291 = vmatpush1.bf16.msra.mxu1 %v10190_v58  ;;  %v10198_v23 = vld [vmem:[%s13722_s8 + $0x34] ss:$12 sps:$4 sm:$0xff]  }
 0x30e   :  { %v973_v34 = vsel %vm909_vm10, %v863_v26, %v941_v31  ;;  %2292 = vmatprep.subr.bf16.mxu1 %v10195_v21  ;;  %v10202_v24 = vld [vmem:[%s13722_s8 + $0x8] ss:$12 sps:$4 sm:$0xff]   ;;  %v10206_v25 = vld [vmem:[%s13722_s8 + $0x20] ss:$12 sps:$4 sm:$0xff]   ;;  %v10207_v28 = vld [vmem:[%s13722_s8 + $0x38] ss:$12 sps:$4 sm:$0xff]  }
 0x30f   :  { %v868_v35 = vpop.f32.mrb[40].mxu1  ;;  %v974_v37 = vsel %vm910_vm11, %v865_v30, %v942_v32  ;;  %v993_v38 = vpack.c.bf16 %v973_v34, %v971_v33  ;;  %v10199_v26 = vld [vmem:[%s13722_s8 + $0x48] ss:$12 sps:$4 sm:$0xff]   ;;  %v10201_v27 = vld [vmem:[%s13722_s8 + $0x4c] ss:$12 sps:$4 sm:$0xff]  }
 0x310   :  { %v869_v39 = vadd.f32 %v868_v35, %v11258_v48  ;;  %v870_v40 = vpop.f32.mrb[41].mxu1  ;;  %v994_v41 = vpack.c.bf16 %v974_v37, %v972_v36  ;;  %v10203_v30 = vld [vmem:[%s13722_s8 + $0x60] ss:$12 sps:$4 sm:$0xff]   ;;  %v10205_v31 = vld [vmem:[%s13722_s8 + $0x64] ss:$12 sps:$4 sm:$0xff]  }
 0x311   :  { %v871_v42 = vadd.f32 %v870_v40, %v11261_v49  ;;  %v872_v43 = vpop.f32.mrb[42].mxu1  ;;  %2293 = vmatpush1.bf16.msra.mxu1 %v10193_v20  ;;  %v10211_v32 = vld [vmem:[%s13722_s8 + $0x50] ss:$12 sps:$4 sm:$0xff]   ;;  %v10208_v33 = vld [vmem:[%s13722_s8 + $0x78] ss:$12 sps:$4 sm:$0xff]  }
 0x312   :  { %v943_v46 = vmul.f32 0.01, %v869_v39  ;;  %v873_v50 = vadd.f32 %v872_v43, %v11258_v48  ;;  %v874_v51 = vpop.f32.mrb[43].mxu1  ;;  %1488 = vmatprep.mubr.bf16.mxu0 %v994_v41  ;;  %1601 = vmatprep.mubr.bf16.mxu1 %v994_v41  ;;  %vm911_vm0 = vcmp.ge.f32.partialorder %v869_v39, 0.0  ;;  %v10210_v34 = vld [vmem:[%s13722_s8 + $0x7c] ss:$12 sps:$4 sm:$0xff]  }
 0x313   :  { %v944_v52 = vmul.f32 0.01, %v871_v42  ;;  %v875_v53 = vadd.f32 %v874_v51, %v11261_v49  ;;  %1489 = vmatmul.mubr.bf16.gmra.mrb[20].mxu0 %v993_v38  ;;  %1602 = vmatmul.mubr.bf16.gmra.mrb[68].mxu1 %v993_v38  ;;  %vm912_vm12 = vcmp.ge.f32.partialorder %v871_v42, 0.0  ;;  %v10215_v35 = vld [vmem:[%s13722_s8 + $0x68] ss:$12 sps:$4 sm:$0xff]  }
 0x314   :  { %vm913_vm13 = vcmp.ge.f32.partialorder %v873_v50, 0.0  ;;  %v945_v54 = vmul.f32 0.01, %v873_v50  ;;  %v975_v56 = vsel %vm911_vm0, %v869_v39, %v943_v46  ;;  %2294 = vmatprep.subr.bf16.mxu1 %v10198_v23  ;;  %v10219_v36 = vld [vmem:[%s13722_s8 + $0x80] ss:$12 sps:$4 sm:$0xff]  }
 0x315   :  { %vm914_vm14 = vcmp.ge.f32.partialorder %v875_v53, 0.0  ;;  %v946_v55 = vmul.f32 0.01, %v875_v53  ;;  %v976_v60 = vsel %vm912_vm12, %v871_v42, %v944_v52  ;;  %2295 = vmatpush1.bf16.msra.mxu1 %v10196_v22  ;;  %v10212_v37 = vld [vmem:[%s13722_s8 + $0x90] ss:$12 sps:$4 sm:$0xff]  }
 0x316   :  { %v977_v57 = vsel %vm913_vm13, %v873_v50, %v945_v54  ;;  %2296 = vmatprep.subr.bf16.mxu1 %v10201_v27  ;;  %v10214_v38 = vld [vmem:[%s13722_s8 + $0x94] ss:$12 sps:$4 sm:$0xff]   ;;  %v10220_v39 = vld [vmem:[%s13722_s8 + $0x98] ss:$12 sps:$4 sm:$0xff]   ;;  %v10224_v42 = vld [vmem:[%s13722_s8 + $0xb0] ss:$12 sps:$4 sm:$0xff]  }
 0x317   :  { %v878_v59 = vpop.f32.mrb[44].mxu1  ;;  %v978_v61 = vsel %vm914_vm14, %v875_v53, %v946_v55  ;;  %v995_v62 = vpack.c.bf16 %v977_v57, %v975_v56  ;;  %v10216_v40 = vld [vmem:[%s13722_s8 + $0xa8] ss:$12 sps:$4 sm:$0xff]   ;;  %v10218_v41 = vld [vmem:[%s13722_s8 + $0xac] ss:$12 sps:$4 sm:$0xff]  }
 0x318   :  { %v879_v63 = vadd.f32 %v878_v59, %v11258_v48  ;;  %v880_v0 = vpop.f32.mrb[45].mxu1  ;;  %v996_v1 = vpack.c.bf16 %v978_v61, %v976_v60  ;;  %v10221_v43 = vld [vmem:[%s13722_s8 + $0xc0] ss:$12 sps:$4 sm:$0xff]   ;;  %v10223_v46 = vld [vmem:[%s13722_s8 + $0xc4] ss:$12 sps:$4 sm:$0xff]   ;;  %v11433_v61 = vsub.s32 2, %v11249_v44 }
 0x319   :  { %v881_v2 = vadd.f32 %v880_v0, %v11261_v49  ;;  %v882_v3 = vpop.f32.mrb[46].mxu1  ;;  %2297 = vmatpush1.bf16.msra.mxu1 %v10199_v26  ;;  %v10228_v50 = vld [vmem:[%s13722_s8 + $0xc8] ss:$12 sps:$4 sm:$0xff]   ;;  %v10225_v52 = vld [vmem:[%s13722_s8 + $0xd8] ss:$12 sps:$4 sm:$0xff]  }
 0x31a   :  { %v947_v4 = vmul.f32 0.01, %v879_v63  ;;  %v883_v5 = vadd.f32 %v882_v3, %v11258_v48  ;;  %v884_v6 = vpop.f32.mrb[47].mxu1  ;;  %1498 = vmatprep.mubr.bf16.mxu0 %v996_v1  ;;  %1611 = vmatprep.mubr.bf16.mxu1 %v996_v1  ;;  %vm915_vm15 = vcmp.ge.f32.partialorder %v879_v63, 0.0  ;;  %v10227_v51 = vld [vmem:[%s13722_s8 + $0xdc] ss:$12 sps:$4 sm:$0xff]  }
 0x31b   :  { %v948_v7 = vmul.f32 0.01, %v881_v2  ;;  %v885_v8 = vadd.f32 %v884_v6, %v11261_v49  ;;  %1499 = vmatmul.mubr.bf16.gmra.mrb[24].mxu0 %v995_v62  ;;  %1612 = vmatmul.mubr.bf16.gmra.mrb[72].mxu1 %v995_v62  ;;  %vm916_vm1 = vcmp.ge.f32.partialorder %v881_v2, 0.0  ;;  %v10186_v49 = vld [vmem:[%s13852_s26] sm:$0xff]   ;;  %v10229_v55 = vld [vmem:[%s13722_s8 + $0xf0] ss:$12 sps:$4 sm:$0xff]  }
 0x31c   :  { %vm917_vm2 = vcmp.ge.f32.partialorder %v883_v5, 0.0  ;;  %v949_v9 = vmul.f32 0.01, %v883_v5  ;;  %v979_v11 = vsel %vm915_vm15, %v879_v63, %v947_v4  ;;  %2298 = vmatprep.subr.bf16.mxu1 %v10205_v31  ;;  %v10232_v53 = vld [vmem:[%s13722_s8 + $0xe0] ss:$12 sps:$4 sm:$0xff]   ;;  %13853 = vst [vmem:[#allocation61_spill] sm:$0xff] %v11433_v61 }
 0x31d   :  { %vm918_vm3 = vcmp.ge.f32.partialorder %v885_v8, 0.0  ;;  %v950_v10 = vmul.f32 0.01, %v885_v8  ;;  %v980_v13 = vsel %vm916_vm1, %v881_v2, %v948_v7  ;;  %2299 = vmatpush1.bf16.msra.mxu1 %v10203_v30  ;;  %v10231_v54 = vld [vmem:[%s13722_s8 + $0xf4] ss:$12 sps:$4 sm:$0xff]   ;;  %v11436_v63 = vsub.s32 3, %v11249_v44 }
 0x31e   :  { %v981_v12 = vsel %vm917_vm2, %v883_v5, %v949_v9  ;;  %2300 = vmatprep.subr.bf16.mxu1 %v10210_v34  ;;  %v10233_v56 = vld [vmem:[%s13722_s8 + $0xf8] ss:$12 sps:$4 sm:$0xff]   ;;  %v10234_v59 = vld [vmem:[%s13722_s8 + $0x108] ss:$12 sps:$4 sm:$0xff]   ;;  %v10237_v60 = vld [vmem:[%s13722_s8 + $0x110] ss:$12 sps:$4 sm:$0xff]  }
 0x31f   :  { %v982_v14 = vsel %vm918_vm3, %v885_v8, %v950_v10  ;;  %v997_v15 = vpack.c.bf16 %v981_v12, %v979_v11  ;;  %v10236_v57 = vld [vmem:[%s13722_s8 + $0x10c] ss:$12 sps:$4 sm:$0xff]   ;;  %13854 = vst [vmem:[#allocation62_spill] sm:$0xff] %v11436_v63 }
 0x320   :  { %v998_v48 = vpack.c.bf16 %v982_v14, %v980_v13  ;;  %v1064_v62 = vld [vmem:[#allocation25 + $0x2] ss:$8 sm:$0xf] }
 0x321   :  { %2301 = vmatpush1.bf16.msra.mxu1 %v10208_v33  ;;  %v11439_v0 = vrot.slane %v1064_v62, %v11252_v45  ;;  %v11442_v1 = vrot.slane %v1064_v62, %v11433_v61  ;;  %v11445_v2 = vrot.slane %v1064_v62, %v11255_v47  ;;  %v11448_v3 = vrot.slane %v1064_v62, %v11436_v63 }
 0x322   :  { %1508 = vmatprep.mubr.bf16.mxu0 %v998_v48  ;;  %1621 = vmatprep.mubr.bf16.mxu1 %v998_v48 }
 0x323   :  { %1509 = vmatmul.mubr.bf16.gmra.mrb[28].mxu0 %v997_v15  ;;  %1622 = vmatmul.mubr.bf16.gmra.mrb[76].mxu1 %v997_v15 }
 0x324   :  { %1922 = vmatprep.mubr.bf16.mxu0 %v13753_v29  ;;  %2302 = vmatprep.subr.bf16.mxu1 %v10214_v38 }
 0x325   :  { %2303 = vmatpush1.bf16.msra.mxu1 %v10212_v37 }
 0x326   :  { %2304 = vmatprep.subr.bf16.mxu1 %v10218_v41 }
 0x329   :  { %2305 = vmatpush1.bf16.msra.mxu1 %v10216_v40 }
 0x32a   :  { %2306 = vmatprep.subr.bf16.mxu1 %v10223_v46 }
 0x32b   :  { %9000 = vmatmul.mubr.msk.bf16.vlgmr.msra.gmra.mrb[32].mxu0 %vm1871_vm4, %v10186_v49 }
 0x32c   :  { %1932 = vmatprep.mubr.bf16.mxu0 %v13753_v29  ;;  %2364 = vmatpush1.bf16.msra.mxu0 %v10202_v24 }
 0x32d   :  { %2365 = vmatprep.subr.bf16.mxu0 %v13753_v29  ;;  %2307 = vmatpush1.bf16.msra.mxu1 %v10221_v43 }
 0x32e   :  { %2308 = vmatprep.subr.bf16.mxu1 %v10227_v51 }
 0x330   :  { %2366 = vmatpush1.bf16.msra.mxu0 %v10206_v25 }
 0x331   :  { %2367 = vmatprep.subr.bf16.mxu0 %v13753_v29  ;;  %2309 = vmatpush1.bf16.msra.mxu1 %v10225_v52 }
 0x332   :  { %2310 = vmatprep.subr.bf16.mxu1 %v10231_v54 }
 0x333   :  { %9001 = vmatmul.mubr.msk.bf16.gmra.mrb[36].mxu0 %vm1871_vm4, %v10187_v16 }
 0x334   :  { %1942 = vmatprep.mubr.bf16.mxu0 %v13753_v29  ;;  %2368 = vmatpush1.bf16.msra.mxu0 %v10207_v28 }
 0x335   :  { %2369 = vmatprep.subr.bf16.mxu0 %v13753_v29  ;;  %2311 = vmatpush1.bf16.msra.mxu1 %v10229_v55 }
 0x336   :  { %2312 = vmatprep.subr.bf16.mxu1 %v10236_v57 }
 0x338   :  { %2370 = vmatpush1.bf16.msra.mxu0 %v10211_v32 }
 0x339   :  { %2371 = vmatprep.subr.bf16.mxu0 %v13753_v29  ;;  %2313 = vmatpush1.bf16.msra.mxu1 %v10234_v59 }
 0x33b   :  { %9002 = vmatmul.mubr.msk.bf16.gmra.mrb[40].mxu0 %vm1871_vm4, %v10188_v17 }
 0x33c   :  { %1952 = vmatprep.mubr.bf16.mxu0 %v13753_v29  ;;  %2372 = vmatpush1.bf16.msra.mxu0 %v10215_v35 }
 0x33d   :  { %2373 = vmatprep.subr.bf16.mxu0 %v13753_v29 }
 0x340   :  { %2374 = vmatpush1.bf16.msra.mxu0 %v10219_v36 }
 0x341   :  { %2375 = vmatprep.subr.bf16.mxu0 %v13753_v29 }
 0x343   :  { %9003 = vmatmul.mubr.msk.bf16.gmra.mrb[44].mxu0 %vm1871_vm4, %v10189_v18 }
 0x344   :  { %2376 = vmatpush1.bf16.msra.mxu0 %v10220_v39 }
 0x345   :  { %2377 = vmatprep.subr.bf16.mxu0 %v13753_v29 }
 0x348   :  { %2378 = vmatpush1.bf16.msra.mxu0 %v10224_v42 }
 0x349   :  { %2379 = vmatprep.subr.bf16.mxu0 %v13753_v29 }
 0x34c   :  { %2380 = vmatpush1.bf16.msra.mxu0 %v10228_v50 }
 0x34d   :  { %2381 = vmatprep.subr.bf16.mxu0 %v13753_v29 }
 0x350   :  { %2382 = vmatpush1.bf16.msra.mxu0 %v10232_v53 }
 0x351   :  { %2383 = vmatprep.subr.bf16.mxu0 %v13753_v29 }
 0x354   :  { %2384 = vmatpush1.bf16.msra.mxu0 %v10233_v56 }
 0x355   :  { %2385 = vmatprep.subr.bf16.mxu0 %v13753_v29 }
 0x358   :  { %2386 = vmatpush1.bf16.msra.mxu0 %v10237_v60 }
 0x3be   :  { %v1440_v4 = vpop.f32.mrb[0].mxu0  ;;  %v1553_v5 = vpop.f32.mrb[48].mxu1 }
 0x3bf   :  { %v1441_v6 = vadd.f32 %v1440_v4, %v11439_v0  ;;  %v1554_v7 = vadd.f32 %v1553_v5, %v11442_v1  ;;  %v1442_v8 = vpop.f32.mrb[1].mxu0  ;;  %v1555_v9 = vpop.f32.mrb[49].mxu1 }
 0x3c0   :  { %v1443_v10 = vadd.f32 %v1442_v8, %v11445_v2  ;;  %v1556_v11 = vadd.f32 %v1555_v9, %v11448_v3  ;;  %v1444_v12 = vpop.f32.mrb[2].mxu0  ;;  %v1557_v13 = vpop.f32.mrb[50].mxu1 }
 0x3c1   :  { %vm1632_vm5 = vcmp.ge.f32.partialorder %v1441_v6, 0.0  ;;  %v1696_v14 = vmul.f32 0.01, %v1441_v6  ;;  %vm1634_vm6 = vcmp.ge.f32.partialorder %v1554_v7, 0.0  ;;  %v1698_v15 = vmul.f32 0.01, %v1554_v7 }
 0x3c2   :  { %vm1633_vm7 = vcmp.ge.f32.partialorder %v1443_v10, 0.0  ;;  %v1697_v48 = vmul.f32 0.01, %v1443_v10  ;;  %vm1635_vm8 = vcmp.ge.f32.partialorder %v1556_v11, 0.0  ;;  %v1699_v49 = vmul.f32 0.01, %v1556_v11 }
 0x3c3   :  { %v11454_v16 = vsel %vm1632_vm5, %v1441_v6, %v1696_v14  ;;  %v11456_v17 = vsel %vm1634_vm6, %v1554_v7, %v1698_v15  ;;  %v1445_v18 = vadd.f32 %v1444_v12, %v11439_v0  ;;  %v1558_v58 = vadd.f32 %v1557_v13, %v11442_v1  ;;  %v1446_v19 = vpop.f32.mrb[3].mxu0  ;;  %v1559_v20 = vpop.f32.mrb[51].mxu1  ;;  %v1834_v6 = vld [vmem:[#allocation25 + $0x7] ss:$8 sm:$0x3] }
 0x3c4   :  { %13855 = vst [vmem:[#allocation63_spill] sm:$0xff] %v11454_v16  ;;  %13856 = vst [vmem:[#allocation64_spill] sm:$0xff] %v11456_v17  ;;  %v11460_v21 = vsel %vm1633_vm7, %v1443_v10, %v1697_v48  ;;  %v11462_v22 = vsel %vm1635_vm8, %v1556_v11, %v1699_v49  ;;  %v1447_v23 = vadd.f32 %v1446_v19, %v11445_v2 }
 0x3c5   :  { %13857 = vst [vmem:[#allocation65_spill] sm:$0xff] %v11460_v21  ;;  %13858 = vst [vmem:[#allocation66_spill] sm:$0xff] %v11462_v22  ;;  %v1560_v24 = vadd.f32 %v1559_v20, %v11448_v3  ;;  %vm1636_vm9 = vcmp.ge.f32.partialorder %v1445_v18, 0.0  ;;  %v1700_v25 = vmul.f32 0.01, %v1445_v18  ;;  %vm1638_vm10 = vcmp.ge.f32.partialorder %v1558_v58, 0.0 }
 0x3c6   :  { %v1702_v26 = vmul.f32 0.01, %v1558_v58  ;;  %vm1637_vm11 = vcmp.ge.f32.partialorder %v1447_v23, 0.0  ;;  %v1701_v27 = vmul.f32 0.01, %v1447_v23  ;;  %v1450_v32 = vpop.f32.mrb[4].mxu0 }
 0x3c7   :  { %vm1639_vm0 = vcmp.ge.f32.partialorder %v1560_v24, 0.0  ;;  %v1703_v28 = vmul.f32 0.01, %v1560_v24  ;;  %v11466_v30 = vsel %vm1636_vm9, %v1445_v18, %v1700_v25  ;;  %v1563_v33 = vpop.f32.mrb[52].mxu1  ;;  %v1451_v36 = vadd.f32 %v1450_v32, %v11439_v0  ;;  %v1452_v38 = vpop.f32.mrb[5].mxu0 }
 0x3c8   :  { %13859 = vst [vmem:[#allocation67_spill] sm:$0xff] %v11466_v30  ;;  %v11468_v31 = vsel %vm1638_vm10, %v1558_v58, %v1702_v26  ;;  %v11470_v34 = vsel %vm1637_vm11, %v1447_v23, %v1701_v27  ;;  %v1564_v37 = vadd.f32 %v1563_v33, %v11442_v1  ;;  %v1565_v39 = vpop.f32.mrb[53].mxu1  ;;  %v1453_v40 = vadd.f32 %v1452_v38, %v11445_v2  ;;  %v1454_v42 = vpop.f32.mrb[6].mxu0 }
 0x3c9   :  { %13860 = vst [vmem:[#allocation68_spill] sm:$0xff] %v11468_v31  ;;  %13861 = vst [vmem:[#allocation69_spill] sm:$0xff] %v11470_v34  ;;  %v11472_v35 = vsel %vm1639_vm0, %v1560_v24, %v1703_v28  ;;  %v1566_v41 = vadd.f32 %v1565_v39, %v11448_v3  ;;  %v1567_v43 = vpop.f32.mrb[54].mxu1  ;;  %vm1640_vm12 = vcmp.ge.f32.partialorder %v1451_v36, 0.0  ;;  %v1704_v46 = vmul.f32 0.01, %v1451_v36 }
 0x3ca   :  { %13862 = vst [vmem:[#allocation70_spill] sm:$0xff] %v11472_v35  ;;  %vm1642_vm13 = vcmp.ge.f32.partialorder %v1564_v37, 0.0  ;;  %v1706_v50 = vmul.f32 0.01, %v1564_v37  ;;  %vm1641_vm14 = vcmp.ge.f32.partialorder %v1453_v40, 0.0  ;;  %v1455_v55 = vadd.f32 %v1454_v42, %v11439_v0  ;;  %v1456_v57 = vpop.f32.mrb[7].mxu0 }
 0x3cb   :  { %v1705_v51 = vmul.f32 0.01, %v1453_v40  ;;  %vm1643_vm15 = vcmp.ge.f32.partialorder %v1566_v41, 0.0  ;;  %v1707_v52 = vmul.f32 0.01, %v1566_v41  ;;  %v11478_v53 = vsel %vm1640_vm12, %v1451_v36, %v1704_v46  ;;  %v1569_v59 = vpop.f32.mrb[55].mxu1 }
 0x3cc   :  { %13863 = vst [vmem:[#allocation71_spill] sm:$0xff] %v11478_v53  ;;  %v11480_v54 = vsel %vm1642_vm13, %v1564_v37, %v1706_v50  ;;  %v1568_v56 = vadd.f32 %v1567_v43, %v11442_v1  ;;  %v1457_v4 = vadd.f32 %v1456_v57, %v11445_v2  ;;  %v1570_v5 = vadd.f32 %v1569_v59, %v11448_v3 }
 0x3cd   :  { %13864 = vst [vmem:[#allocation72_spill] sm:$0xff] %v11480_v54  ;;  %v11484_v60 = vsel %vm1641_vm14, %v1453_v40, %v1705_v51  ;;  %v11486_v62 = vsel %vm1643_vm15, %v1566_v41, %v1707_v52  ;;  %vm1644_vm1 = vcmp.ge.f32.partialorder %v1455_v55, 0.0  ;;  %v1708_v7 = vmul.f32 0.01, %v1455_v55 }
 0x3ce   :  { %13865 = vst [vmem:[#allocation73_spill] sm:$0xff] %v11484_v60  ;;  %13866 = vst [vmem:[#allocation74_spill] sm:$0xff] %v11486_v62  ;;  %vm1646_vm2 = vcmp.ge.f32.partialorder %v1568_v56, 0.0  ;;  %v1710_v8 = vmul.f32 0.01, %v1568_v56  ;;  %vm1645_vm3 = vcmp.ge.f32.partialorder %v1457_v4, 0.0  ;;  %v11503_v26 = vrot.slane %v1834_v6, %v11252_v45 }
 0x3cf   :  { %v1709_v9 = vmul.f32 0.01, %v1457_v4  ;;  %vm1647_vm4 = vcmp.ge.f32.partialorder %v1570_v5, 0.0  ;;  %v1711_v10 = vmul.f32 0.01, %v1570_v5  ;;  %v11490_v11 = vsel %vm1644_vm1, %v1455_v55, %v1708_v7  ;;  %v1460_v13 = vpop.f32.mrb[8].mxu0 }
 0x3d0   :  { %13867 = vst [vmem:[#allocation75_spill] sm:$0xff] %v11490_v11  ;;  %v11492_v12 = vsel %vm1646_vm2, %v1568_v56, %v1710_v8  ;;  %v1573_v14 = vpop.f32.mrb[56].mxu1  ;;  %v1461_v49 = vadd.f32 %v1460_v13, %v11439_v0  ;;  %v1462_v58 = vpop.f32.mrb[9].mxu0  ;;  %v11506_v27 = vrot.slane %v1834_v6, %v11255_v47 }
 0x3d1   :  { %13868 = vst [vmem:[#allocation76_spill] sm:$0xff] %v11492_v12  ;;  %v11494_v15 = vsel %vm1645_vm3, %v1457_v4, %v1709_v9  ;;  %v11496_v48 = vsel %vm1647_vm4, %v1570_v5, %v1711_v10  ;;  %v1574_v18 = vadd.f32 %v1573_v14, %v11442_v1  ;;  %v1575_v19 = vpop.f32.mrb[57].mxu1  ;;  %v1463_v20 = vadd.f32 %v1462_v58, %v11445_v2  ;;  %v1464_v24 = vpop.f32.mrb[10].mxu0 }
 0x3d2   :  { %13869 = vst [vmem:[#allocation77_spill] sm:$0xff] %v11494_v15  ;;  %13870 = vst [vmem:[#allocation78_spill] sm:$0xff] %v11496_v48  ;;  %v1576_v23 = vadd.f32 %v1575_v19, %v11448_v3  ;;  %v1577_v25 = vpop.f32.mrb[58].mxu1  ;;  %vm1648_vm5 = vcmp.ge.f32.partialorder %v1461_v49, 0.0  ;;  %v1712_v28 = vmul.f32 0.01, %v1461_v49  ;;  %v1465_v39 = vadd.f32 %v1464_v24, %v11439_v0 }
 0x3d3   :  { %vm1650_vm6 = vcmp.ge.f32.partialorder %v1574_v18, 0.0  ;;  %v1714_v32 = vmul.f32 0.01, %v1574_v18  ;;  %vm1649_vm7 = vcmp.ge.f32.partialorder %v1463_v20, 0.0  ;;  %v1713_v33 = vmul.f32 0.01, %v1463_v20 }
 0x3d4   :  { %vm1651_vm8 = vcmp.ge.f32.partialorder %v1576_v23, 0.0  ;;  %v1715_v36 = vmul.f32 0.01, %v1576_v23  ;;  %v11508_v37 = vsel %vm1648_vm5, %v1461_v49, %v1712_v28  ;;  %v1578_v40 = vadd.f32 %v1577_v25, %v11442_v1  ;;  %v1466_v41 = vpop.f32.mrb[11].mxu0  ;;  %v1579_v42 = vpop.f32.mrb[59].mxu1 }
 0x3d5   :  { %13871 = vst [vmem:[#allocation79_spill] sm:$0xff] %v11508_v37  ;;  %v11510_v38 = vsel %vm1650_vm6, %v1574_v18, %v1714_v32  ;;  %v11514_v43 = vsel %vm1649_vm7, %v1463_v20, %v1713_v33  ;;  %v1467_v50 = vadd.f32 %v1466_v41, %v11445_v2  ;;  %v1580_v51 = vadd.f32 %v1579_v42, %v11448_v3 }
 0x3d6   :  { %13872 = vst [vmem:[#allocation80_spill] sm:$0xff] %v11510_v38  ;;  %13873 = vst [vmem:[#allocation81_spill] sm:$0xff] %v11514_v43  ;;  %v11516_v46 = vsel %vm1651_vm8, %v1576_v23, %v1715_v36  ;;  %v1470_v52 = vpop.f32.mrb[12].mxu0  ;;  %v1583_v55 = vpop.f32.mrb[60].mxu1  ;;  %vm1652_vm9 = vcmp.ge.f32.partialorder %v1465_v39, 0.0  ;;  %vm1654_vm10 = vcmp.ge.f32.partialorder %v1578_v40, 0.0 }
 0x3d7   :  { %13874 = vst [vmem:[#allocation82_spill] sm:$0xff] %v11516_v46  ;;  %v1716_v56 = vmul.f32 0.01, %v1465_v39  ;;  %v1718_v57 = vmul.f32 0.01, %v1578_v40  ;;  %vm1653_vm11 = vcmp.ge.f32.partialorder %v1467_v50, 0.0  ;;  %v1471_v7 = vadd.f32 %v1470_v52, %v11439_v0 }
 0x3d8   :  { %v1717_v59 = vmul.f32 0.01, %v1467_v50  ;;  %vm1655_vm0 = vcmp.ge.f32.partialorder %v1580_v51, 0.0  ;;  %v1719_v4 = vmul.f32 0.01, %v1580_v51  ;;  %v1584_v8 = vadd.f32 %v1583_v55, %v11442_v1  ;;  %v1472_v9 = vpop.f32.mrb[13].mxu0 }
 0x3d9   :  { %v11520_v5 = vsel %vm1652_vm9, %v1465_v39, %v1716_v56  ;;  %v11522_v6 = vsel %vm1654_vm10, %v1578_v40, %v1718_v57  ;;  %v1585_v10 = vpop.f32.mrb[61].mxu1  ;;  %v1473_v49 = vadd.f32 %v1472_v9, %v11445_v2  ;;  %v1474_v58 = vpop.f32.mrb[14].mxu0  ;;  %vm1656_vm12 = vcmp.ge.f32.partialorder %v1471_v7, 0.0 }
 0x3da   :  { %13875 = vst [vmem:[#allocation83_spill] sm:$0xff] %v11520_v5  ;;  %13876 = vst [vmem:[#allocation84_spill] sm:$0xff] %v11522_v6  ;;  %v11526_v13 = vsel %vm1653_vm11, %v1467_v50, %v1717_v59  ;;  %v11528_v14 = vsel %vm1655_vm0, %v1580_v51, %v1719_v4  ;;  %v1586_v18 = vadd.f32 %v1585_v10, %v11448_v3  ;;  %v1587_v19 = vpop.f32.mrb[62].mxu1  ;;  %v1720_v20 = vmul.f32 0.01, %v1471_v7  ;;  %v1476_v39 = vpop.f32.mrb[15].mxu0 }
 0x3db   :  { %13877 = vst [vmem:[#allocation85_spill] sm:$0xff] %v11526_v13  ;;  %13878 = vst [vmem:[#allocation86_spill] sm:$0xff] %v11528_v14  ;;  %vm1658_vm13 = vcmp.ge.f32.partialorder %v1584_v8, 0.0  ;;  %v1722_v23 = vmul.f32 0.01, %v1584_v8  ;;  %vm1657_vm14 = vcmp.ge.f32.partialorder %v1473_v49, 0.0  ;;  %v1475_v33 = vadd.f32 %v1474_v58, %v11439_v0 }
 0x3dc   :  { %v1721_v24 = vmul.f32 0.01, %v1473_v49  ;;  %vm1659_vm15 = vcmp.ge.f32.partialorder %v1586_v18, 0.0  ;;  %v1723_v25 = vmul.f32 0.01, %v1586_v18  ;;  %v11532_v28 = vsel %vm1656_vm12, %v1471_v7, %v1720_v20  ;;  %v1589_v40 = vpop.f32.mrb[63].mxu1 }
 0x3dd   :  { %13879 = vst [vmem:[#allocation87_spill] sm:$0xff] %v11532_v28  ;;  %v11534_v32 = vsel %vm1658_vm13, %v1584_v8, %v1722_v23  ;;  %v1588_v36 = vadd.f32 %v1587_v19, %v11442_v1  ;;  %v1477_v50 = vadd.f32 %v1476_v39, %v11445_v2  ;;  %v1590_v51 = vadd.f32 %v1589_v40, %v11448_v3 }
 0x3de   :  { %13880 = vst [vmem:[#allocation88_spill] sm:$0xff] %v11534_v32  ;;  %v11538_v41 = vsel %vm1657_vm14, %v1473_v49, %v1721_v24  ;;  %v11540_v42 = vsel %vm1659_vm15, %v1586_v18, %v1723_v25  ;;  %v1480_v52 = vpop.f32.mrb[16].mxu0  ;;  %v1593_v55 = vpop.f32.mrb[64].mxu1  ;;  %vm1660_vm1 = vcmp.ge.f32.partialorder %v1475_v33, 0.0  ;;  %v1724_v56 = vmul.f32 0.01, %v1475_v33 }
 0x3df   :  { %13881 = vst [vmem:[#allocation89_spill] sm:$0xff] %v11538_v41  ;;  %13882 = vst [vmem:[#allocation90_spill] sm:$0xff] %v11540_v42  ;;  %vm1662_vm2 = vcmp.ge.f32.partialorder %v1588_v36, 0.0  ;;  %v1726_v57 = vmul.f32 0.01, %v1588_v36  ;;  %vm1661_vm3 = vcmp.ge.f32.partialorder %v1477_v50, 0.0  ;;  %v1481_v9 = vadd.f32 %v1480_v52, %v11439_v0 }
 0x3e0   :  { %v1725_v59 = vmul.f32 0.01, %v1477_v50  ;;  %vm1663_vm4 = vcmp.ge.f32.partialorder %v1590_v51, 0.0  ;;  %v1727_v4 = vmul.f32 0.01, %v1590_v51  ;;  %v11544_v7 = vsel %vm1660_vm1, %v1475_v33, %v1724_v56  ;;  %v1482_v49 = vpop.f32.mrb[17].mxu0 }
 0x3e1   :  { %13883 = vst [vmem:[#allocation91_spill] sm:$0xff] %v11544_v7  ;;  %v11546_v8 = vsel %vm1662_vm2, %v1588_v36, %v1726_v57  ;;  %v1594_v10 = vadd.f32 %v1593_v55, %v11442_v1  ;;  %v1595_v18 = vpop.f32.mrb[65].mxu1  ;;  %v1483_v20 = vadd.f32 %v1482_v49, %v11445_v2  ;;  %v1484_v24 = vpop.f32.mrb[18].mxu0  ;;  %vm1664_vm5 = vcmp.ge.f32.partialorder %v1481_v9, 0.0 }
 0x3e2   :  { %13884 = vst [vmem:[#allocation92_spill] sm:$0xff] %v11546_v8  ;;  %v11550_v58 = vsel %vm1661_vm3, %v1477_v50, %v1725_v59  ;;  %v11552_v19 = vsel %vm1663_vm4, %v1590_v51, %v1727_v4  ;;  %v1596_v23 = vadd.f32 %v1595_v18, %v11448_v3  ;;  %v1597_v25 = vpop.f32.mrb[66].mxu1  ;;  %v1728_v33 = vmul.f32 0.01, %v1481_v9  ;;  %v1486_v56 = vpop.f32.mrb[19].mxu0 }
 0x3e3   :  { %13885 = vst [vmem:[#allocation93_spill] sm:$0xff] %v11550_v58  ;;  %13886 = vst [vmem:[#allocation94_spill] sm:$0xff] %v11552_v19  ;;  %vm1666_vm6 = vcmp.ge.f32.partialorder %v1594_v10, 0.0  ;;  %v1730_v36 = vmul.f32 0.01, %v1594_v10  ;;  %vm1665_vm7 = vcmp.ge.f32.partialorder %v1483_v20, 0.0  ;;  %v1485_v51 = vadd.f32 %v1484_v24, %v11439_v0 }
 0x3e4   :  { %v1729_v39 = vmul.f32 0.01, %v1483_v20  ;;  %vm1667_vm8 = vcmp.ge.f32.partialorder %v1596_v23, 0.0  ;;  %v1731_v40 = vmul.f32 0.01, %v1596_v23  ;;  %v11556_v52 = vsel %vm1664_vm5, %v1481_v9, %v1728_v33  ;;  %v1599_v57 = vpop.f32.mrb[67].mxu1 }
 0x3e5   :  { %13887 = vst [vmem:[#allocation95_spill] sm:$0xff] %v11556_v52  ;;  %v11558_v50 = vsel %vm1666_vm6, %v1594_v10, %v1730_v36  ;;  %v1598_v55 = vadd.f32 %v1597_v25, %v11442_v1  ;;  %v1487_v49 = vadd.f32 %v1486_v56, %v11445_v2  ;;  %v1600_v18 = vadd.f32 %v1599_v57, %v11448_v3 }
 0x3e6   :  { %13888 = vst [vmem:[#allocation96_spill] sm:$0xff] %v11558_v50  ;;  %v11562_v59 = vsel %vm1665_vm7, %v1483_v20, %v1729_v39  ;;  %v11564_v4 = vsel %vm1667_vm8, %v1596_v23, %v1731_v40  ;;  %v1490_v29 = vpop.f32.mrb[20].mxu0  ;;  %v1603_v44 = vpop.f32.mrb[68].mxu1  ;;  %vm1668_vm9 = vcmp.ge.f32.partialorder %v1485_v51, 0.0  ;;  %v1732_v9 = vmul.f32 0.01, %v1485_v51 }
 0x3e7   :  { %13889 = vst [vmem:[#allocation97_spill] sm:$0xff] %v11562_v59  ;;  %13890 = vst [vmem:[#allocation98_spill] sm:$0xff] %v11564_v4  ;;  %vm1670_vm10 = vcmp.ge.f32.partialorder %v1598_v55, 0.0  ;;  %v1734_v10 = vmul.f32 0.01, %v1598_v55  ;;  %vm1669_vm11 = vcmp.ge.f32.partialorder %v1487_v49, 0.0  ;;  %v1491_v23 = vadd.f32 %v1490_v29, %v11439_v0 }
 0x3e8   :  { %v1733_v24 = vmul.f32 0.01, %v1487_v49  ;;  %vm1671_vm0 = vcmp.ge.f32.partialorder %v1600_v18, 0.0  ;;  %v1735_v25 = vmul.f32 0.01, %v1600_v18  ;;  %v11568_v33 = vsel %vm1668_vm9, %v1485_v51, %v1732_v9  ;;  %v1492_v39 = vpop.f32.mrb[21].mxu0 }
 0x3e9   :  { %13891 = vst [vmem:[#allocation99_spill] sm:$0xff] %v11568_v33  ;;  %v11570_v20 = vsel %vm1670_vm10, %v1598_v55, %v1734_v10  ;;  %v1604_v36 = vadd.f32 %v1603_v44, %v11442_v1  ;;  %v1605_v40 = vpop.f32.mrb[69].mxu1  ;;  %v1493_v63 = vadd.f32 %v1492_v39, %v11445_v2  ;;  %v1494_v4 = vpop.f32.mrb[22].mxu0  ;;  %vm1672_vm12 = vcmp.ge.f32.partialorder %v1491_v23, 0.0 }
 0x3ea   :  { %13892 = vst [vmem:[#allocation100_spill] sm:$0xff] %v11570_v20  ;;  %v11574_v56 = vsel %vm1669_vm11, %v1487_v49, %v1733_v24  ;;  %v11576_v57 = vsel %vm1671_vm0, %v1600_v18, %v1735_v25  ;;  %v1606_v50 = vadd.f32 %v1605_v40, %v11448_v3  ;;  %v1607_v8 = vpop.f32.mrb[70].mxu1  ;;  %v1736_v51 = vmul.f32 0.01, %v1491_v23  ;;  %v1496_v24 = vpop.f32.mrb[23].mxu0 }
 0x3eb   :  { %13893 = vst [vmem:[#allocation101_spill] sm:$0xff] %v11574_v56  ;;  %13894 = vst [vmem:[#allocation102_spill] sm:$0xff] %v11576_v57  ;;  %vm1674_vm13 = vcmp.ge.f32.partialorder %v1604_v36, 0.0  ;;  %v1738_v55 = vmul.f32 0.01, %v1604_v36  ;;  %vm1673_vm14 = vcmp.ge.f32.partialorder %v1493_v63, 0.0  ;;  %v1495_v18 = vadd.f32 %v1494_v4, %v11439_v0 }
 0x3ec   :  { %v1737_v29 = vmul.f32 0.01, %v1493_v63  ;;  %vm1675_vm15 = vcmp.ge.f32.partialorder %v1606_v50, 0.0  ;;  %v1739_v44 = vmul.f32 0.01, %v1606_v50  ;;  %v11580_v9 = vsel %vm1672_vm12, %v1491_v23, %v1736_v51  ;;  %v1609_v25 = vpop.f32.mrb[71].mxu1 }
 0x3ed   :  { %13895 = vst [vmem:[#allocation103_spill] sm:$0xff] %v11580_v9  ;;  %v11582_v49 = vsel %vm1674_vm13, %v1604_v36, %v1738_v55  ;;  %v1608_v10 = vadd.f32 %v1607_v8, %v11442_v1  ;;  %v1497_v20 = vadd.f32 %v1496_v24, %v11445_v2  ;;  %v1610_v57 = vadd.f32 %v1609_v25, %v11448_v3 }
 0x3ee   :  { %13896 = vst [vmem:[#allocation104_spill] sm:$0xff] %v11582_v49  ;;  %v11586_v39 = vsel %vm1673_vm14, %v1493_v63, %v1737_v29  ;;  %v11588_v40 = vsel %vm1675_vm15, %v1606_v50, %v1739_v44  ;;  %v1500_v32 = vpop.f32.mrb[24].mxu0  ;;  %v1613_v19 = vpop.f32.mrb[72].mxu1  ;;  %vm1676_vm1 = vcmp.ge.f32.partialorder %v1495_v18, 0.0  ;;  %v1740_v23 = vmul.f32 0.01, %v1495_v18 }
 0x3ef   :  { %13897 = vst [vmem:[#allocation105_spill] sm:$0xff] %v11586_v39  ;;  %13898 = vst [vmem:[#allocation106_spill] sm:$0xff] %v11588_v40  ;;  %vm1678_vm2 = vcmp.ge.f32.partialorder %v1608_v10, 0.0  ;;  %v1742_v36 = vmul.f32 0.01, %v1608_v10  ;;  %vm1677_vm3 = vcmp.ge.f32.partialorder %v1497_v20, 0.0  ;;  %v1501_v50 = vadd.f32 %v1500_v32, %v11439_v0 }
 0x3f0   :  { %v1741_v4 = vmul.f32 0.01, %v1497_v20  ;;  %vm1679_vm4 = vcmp.ge.f32.partialorder %v1610_v57, 0.0  ;;  %v1743_v8 = vmul.f32 0.01, %v1610_v57  ;;  %v11592_v51 = vsel %vm1676_vm1, %v1495_v18, %v1740_v23  ;;  %v1502_v29 = vpop.f32.mrb[25].mxu0 }
 0x3f1   :  { %13899 = vst [vmem:[#allocation107_spill] sm:$0xff] %v11592_v51  ;;  %v11594_v63 = vsel %vm1678_vm2, %v1608_v10, %v1742_v36  ;;  %v1614_v55 = vadd.f32 %v1613_v19, %v11442_v1  ;;  %v1615_v44 = vpop.f32.mrb[73].mxu1  ;;  %v1503_v49 = vadd.f32 %v1502_v29, %v11445_v2  ;;  %v1504_v42 = vpop.f32.mrb[26].mxu0  ;;  %vm1680_vm5 = vcmp.ge.f32.partialorder %v1501_v50, 0.0 }
 0x3f2   :  { %13900 = vst [vmem:[#allocation108_spill] sm:$0xff] %v11594_v63  ;;  %v11598_v24 = vsel %vm1677_vm3, %v1497_v20, %v1741_v4  ;;  %v11600_v25 = vsel %vm1679_vm4, %v1610_v57, %v1743_v8  ;;  %v1616_v40 = vadd.f32 %v1615_v44, %v11448_v3  ;;  %v1617_v6 = vpop.f32.mrb[74].mxu1  ;;  %v1744_v18 = vmul.f32 0.01, %v1501_v50  ;;  %v1506_v4 = vpop.f32.mrb[27].mxu0 }
 0x3f3   :  { %13901 = vst [vmem:[#allocation109_spill] sm:$0xff] %v11598_v24  ;;  %13902 = vst [vmem:[#allocation110_spill] sm:$0xff] %v11600_v25  ;;  %vm1682_vm6 = vcmp.ge.f32.partialorder %v1614_v55, 0.0  ;;  %v1746_v10 = vmul.f32 0.01, %v1614_v55  ;;  %vm1681_vm7 = vcmp.ge.f32.partialorder %v1503_v49, 0.0  ;;  %v1505_v57 = vadd.f32 %v1504_v42, %v11439_v0 }
 0x3f4   :  { %v1745_v32 = vmul.f32 0.01, %v1503_v49  ;;  %vm1683_vm8 = vcmp.ge.f32.partialorder %v1616_v40, 0.0  ;;  %v1747_v19 = vmul.f32 0.01, %v1616_v40  ;;  %v11604_v23 = vsel %vm1680_vm5, %v1501_v50, %v1744_v18  ;;  %v1619_v8 = vpop.f32.mrb[75].mxu1 }
 0x3f5   :  { %13903 = vst [vmem:[#allocation111_spill] sm:$0xff] %v11604_v23  ;;  %v11606_v20 = vsel %vm1682_vm6, %v1614_v55, %v1746_v10  ;;  %v1618_v36 = vadd.f32 %v1617_v6, %v11442_v1  ;;  %v1507_v63 = vadd.f32 %v1506_v4, %v11445_v2  ;;  %v1620_v25 = vadd.f32 %v1619_v8, %v11448_v3 }
 0x3f6   :  { %13904 = vst [vmem:[#allocation112_spill] sm:$0xff] %v11606_v20  ;;  %v11610_v29 = vsel %vm1681_vm7, %v1503_v49, %v1745_v32  ;;  %v11612_v44 = vsel %vm1683_vm8, %v1616_v40, %v1747_v19  ;;  %v1510_v38 = vpop.f32.mrb[28].mxu0  ;;  %v1623_v14 = vpop.f32.mrb[76].mxu1  ;;  %vm1684_vm9 = vcmp.ge.f32.partialorder %v1505_v57, 0.0  ;;  %v1748_v50 = vmul.f32 0.01, %v1505_v57 }
 0x3f7   :  { %13905 = vst [vmem:[#allocation113_spill] sm:$0xff] %v11610_v29  ;;  %13906 = vst [vmem:[#allocation114_spill] sm:$0xff] %v11612_v44  ;;  %vm1686_vm10 = vcmp.ge.f32.partialorder %v1618_v36, 0.0  ;;  %v1750_v55 = vmul.f32 0.01, %v1618_v36  ;;  %vm1685_vm11 = vcmp.ge.f32.partialorder %v1507_v63, 0.0  ;;  %v1511_v40 = vadd.f32 %v1510_v38, %v11439_v0 }
 0x3f8   :  { %v1749_v42 = vmul.f32 0.01, %v1507_v63  ;;  %vm1687_vm0 = vcmp.ge.f32.partialorder %v1620_v25, 0.0  ;;  %v1751_v6 = vmul.f32 0.01, %v1620_v25  ;;  %v11616_v18 = vsel %vm1684_vm9, %v1505_v57, %v1748_v50  ;;  %v1512_v32 = vpop.f32.mrb[29].mxu0 }
 0x3f9   :  { %13907 = vst [vmem:[#allocation115_spill] sm:$0xff] %v11616_v18  ;;  %v11618_v49 = vsel %vm1686_vm10, %v1618_v36, %v1750_v55  ;;  %v1624_v10 = vadd.f32 %v1623_v14, %v11442_v1  ;;  %v1625_v19 = vpop.f32.mrb[77].mxu1  ;;  %v1513_v20 = vadd.f32 %v1512_v32, %v11445_v2  ;;  %v1514_v46 = vpop.f32.mrb[30].mxu0  ;;  %vm1688_vm12 = vcmp.ge.f32.partialorder %v1511_v40, 0.0 }
 0x3fa   :  { %13908 = vst [vmem:[#allocation116_spill] sm:$0xff] %v11618_v49  ;;  %v11622_v4 = vsel %vm1685_vm11, %v1507_v63, %v1749_v42  ;;  %v11624_v8 = vsel %vm1687_vm0, %v1620_v25, %v1751_v6  ;;  %v1626_v44 = vadd.f32 %v1625_v19, %v11448_v3  ;;  %v1627_v12 = vpop.f32.mrb[78].mxu1  ;;  %v1752_v57 = vmul.f32 0.01, %v1511_v40  ;;  %v1516_v42 = vpop.f32.mrb[31].mxu0 }
 0x3fb   :  { %13909 = vst [vmem:[#allocation117_spill] sm:$0xff] %v11622_v4  ;;  %13910 = vst [vmem:[#allocation118_spill] sm:$0xff] %v11624_v8  ;;  %vm1690_vm13 = vcmp.ge.f32.partialorder %v1624_v10, 0.0  ;;  %v1754_v36 = vmul.f32 0.01, %v1624_v10  ;;  %vm1689_vm14 = vcmp.ge.f32.partialorder %v1513_v20, 0.0  ;;  %v1515_v25 = vadd.f32 %v1514_v46, %v11439_v0 }
 0x3fc   :  { %v1753_v38 = vmul.f32 0.01, %v1513_v20  ;;  %vm1691_vm15 = vcmp.ge.f32.partialorder %v1626_v44, 0.0  ;;  %v1755_v14 = vmul.f32 0.01, %v1626_v44  ;;  %v11628_v50 = vsel %vm1688_vm12, %v1511_v40, %v1752_v57  ;;  %v1629_v6 = vpop.f32.mrb[79].mxu1 }
 0x3fd   :  { %13911 = vst [vmem:[#allocation119_spill] sm:$0xff] %v11628_v50  ;;  %v11630_v63 = vsel %vm1690_vm13, %v1624_v10, %v1754_v36  ;;  %v1628_v55 = vadd.f32 %v1627_v12, %v11442_v1  ;;  %v1517_v49 = vadd.f32 %v1516_v42, %v11445_v2  ;;  %v1630_v8 = vadd.f32 %v1629_v6, %v11448_v3 }
 0x3fe   :  { %13912 = vst [vmem:[#allocation120_spill] sm:$0xff] %v11630_v63  ;;  %v11634_v32 = vsel %vm1689_vm14, %v1513_v20, %v1753_v38  ;;  %v11636_v19 = vsel %vm1691_vm15, %v1626_v44, %v1755_v14  ;;  %v1924_v54 = vpop.f32.mrb[32].mxu0  ;;  %vm1692_vm1 = vcmp.ge.f32.partialorder %v1515_v25, 0.0  ;;  %v1756_v40 = vmul.f32 0.01, %v1515_v25 }
 0x3ff   :  { %13913 = vst [vmem:[#allocation121_spill] sm:$0xff] %v11634_v32  ;;  %13914 = vst [vmem:[#allocation122_spill] sm:$0xff] %v11636_v19  ;;  %vm1694_vm2 = vcmp.ge.f32.partialorder %v1628_v55, 0.0  ;;  %v1758_v10 = vmul.f32 0.01, %v1628_v55  ;;  %vm1693_vm3 = vcmp.ge.f32.partialorder %v1517_v49, 0.0  ;;  %v1925_v46 = vadd.f32 %v1924_v54, %v11503_v26 }
 0x400   :  { %v1757_v57 = vmul.f32 0.01, %v1517_v49  ;;  %vm1695_vm4 = vcmp.ge.f32.partialorder %v1630_v8, 0.0  ;;  %v1759_v0 = vmul.f32 0.01, %v1630_v8  ;;  %v11640_v1 = vsel %vm1692_vm1, %v1515_v25, %v1756_v40  ;;  %v1926_v20 = vpop.f32.mrb[33].mxu0 }
 0x401   :  { %13915 = vst [vmem:[#allocation123_spill] sm:$0xff] %v11640_v1  ;;  %v11642_v12 = vsel %vm1694_vm2, %v1628_v55, %v1758_v10  ;;  %v1927_v3 = vadd.f32 %v1926_v20, %v11506_v27  ;;  %v1928_v36 = vpop.f32.mrb[34].mxu0  ;;  %v1979_v38 = vmul.f32 0.01, %v1925_v46  ;;  %vm1963_vm5 = vcmp.ge.f32.partialorder %v1925_v46, 0.0 }
 0x402   :  { %13916 = vst [vmem:[#allocation124_spill] sm:$0xff] %v11642_v12  ;;  %v11645_v44 = vsel %vm1693_vm3, %v1517_v49, %v1757_v57  ;;  %v11647_v2 = vsel %vm1695_vm4, %v1630_v8, %v1759_v0  ;;  %v1929_v14 = vadd.f32 %v1928_v36, %v11503_v26  ;;  %v1930_v42 = vpop.f32.mrb[35].mxu0  ;;  %vm2277_vm9 = vcmask 523264  }
 0x403   :  { %13917 = vst [vmem:[#allocation125_spill] sm:$0xff] %v11645_v44  ;;  %13918 = vst [vmem:[#allocation126_spill] sm:$0xff] %v11647_v2  ;;  %v1980_v6 = vmul.f32 0.01, %v1927_v3  ;;  %v1931_v25 = vadd.f32 %v1930_v42, %v11506_v27  ;;  %vm1964_vm6 = vcmp.ge.f32.partialorder %v1927_v3, 0.0  ;;  %v1995_v40 = vsel %vm1963_vm5, %v1925_v46, %v1979_v38 }
 0x404   :  { %vm1965_vm7 = vcmp.ge.f32.partialorder %v1929_v14, 0.0  ;;  %v1981_v55 = vmul.f32 0.01, %v1929_v14 }
 0x405   :  { %vm1966_vm8 = vcmp.ge.f32.partialorder %v1931_v25, 0.0  ;;  %v1982_v54 = vmul.f32 0.01, %v1931_v25  ;;  %v1996_v0 = vsel %vm1964_vm6, %v1927_v3, %v1980_v6 }
 0x406   :  { %v1934_v49 = vpop.f32.mrb[36].mxu0  ;;  %v1997_v8 = vsel %vm1965_vm7, %v1929_v14, %v1981_v55 }
 0x407   :  { %v1935_v10 = vadd.f32 %v1934_v49, %v11503_v26  ;;  %v1936_v57 = vpop.f32.mrb[37].mxu0  ;;  %v2011_v20 = vpack.c.bf16 %v1997_v8, %v1995_v40  ;;  %v1998_v36 = vsel %vm1966_vm8, %v1931_v25, %v1982_v54 }
 0x408   :  { %v1937_v12 = vadd.f32 %v1936_v57, %v11506_v27  ;;  %v1938_v63 = vpop.f32.mrb[38].mxu0  ;;  %v2012_v2 = vpack.c.bf16 %v1998_v36, %v1996_v0 }
 0x409   :  { %v1983_v42 = vmul.f32 0.01, %v1935_v10  ;;  %v1939_v19 = vadd.f32 %v1938_v63, %v11503_v26  ;;  %v1940_v48 = vpop.f32.mrb[39].mxu0  ;;  %vm1967_vm10 = vcmp.ge.f32.partialorder %v1935_v10, 0.0 }
 0x40a   :  { %v1984_v62 = vmul.f32 0.01, %v1937_v12  ;;  %v1941_v46 = vadd.f32 %v1940_v48, %v11506_v27  ;;  %vm1968_vm11 = vcmp.ge.f32.partialorder %v1937_v12, 0.0  ;;  %9040 = vmatprep.mubr.msk.bf16.mxu1 %vm2277_vm9, %v2012_v2  ;;  %9044 = vmatprep.mubr.msk.bf16.mxu0 %vm2277_vm9, %v2012_v2 }
 0x40b   :  { %vm1969_vm0 = vcmp.ge.f32.partialorder %v1939_v19, 0.0  ;;  %v1985_v38 = vmul.f32 0.01, %v1939_v19  ;;  %2323 = vmatmul.mubr.bf16.vlgmr.msra.gmra.mrb[80].mxu1 %v2011_v20  ;;  %2396 = vmatmul.mubr.bf16.vlgmr.msra.gmra.mrb[48].mxu0 %v2011_v20  ;;  %v1999_v14 = vsel %vm1967_vm10, %v1935_v10, %v1983_v42 }
 0x40c   :  { %vm1970_vm12 = vcmp.ge.f32.partialorder %v1941_v46, 0.0  ;;  %v1986_v3 = vmul.f32 0.01, %v1941_v46  ;;  %v2000_v25 = vsel %vm1968_vm11, %v1937_v12, %v1984_v62 }
 0x40d   :  { %v2001_v6 = vsel %vm1969_vm0, %v1939_v19, %v1985_v38 }
 0x40e   :  { %v2002_v63 = vsel %vm1970_vm12, %v1941_v46, %v1986_v3  ;;  %v1944_v55 = vpop.f32.mrb[40].mxu0  ;;  %v2013_v54 = vpack.c.bf16 %v2001_v6, %v1999_v14 }
 0x40f   :  { %v2014_v49 = vpack.c.bf16 %v2002_v63, %v2000_v25  ;;  %v1945_v48 = vadd.f32 %v1944_v55, %v11503_v26  ;;  %v1946_v40 = vpop.f32.mrb[41].mxu0 }
 0x410   :  { %v1947_v8 = vadd.f32 %v1946_v40, %v11506_v27  ;;  %v1948_v57 = vpop.f32.mrb[42].mxu0 }
 0x411   :  { %v1987_v0 = vmul.f32 0.01, %v1945_v48  ;;  %v1949_v2 = vadd.f32 %v1948_v57, %v11503_v26  ;;  %v1950_v36 = vpop.f32.mrb[43].mxu0  ;;  %9041 = vmatprep.mubr.msk.bf16.mxu1 %vm2277_vm9, %v2014_v49  ;;  %9045 = vmatprep.mubr.msk.bf16.mxu0 %vm2277_vm9, %v2014_v49  ;;  %vm1971_vm13 = vcmp.ge.f32.partialorder %v1945_v48, 0.0 }
 0x412   :  { %v1988_v62 = vmul.f32 0.01, %v1947_v8  ;;  %v1951_v19 = vadd.f32 %v1950_v36, %v11506_v27  ;;  %vm1972_vm14 = vcmp.ge.f32.partialorder %v1947_v8, 0.0 }
 0x413   :  { %vm1973_vm15 = vcmp.ge.f32.partialorder %v1949_v2, 0.0  ;;  %v1989_v12 = vmul.f32 0.01, %v1949_v2  ;;  %2333 = vmatmul.mubr.bf16.gmra.mrb[84].mxu1 %v2013_v54  ;;  %2404 = vmatmul.mubr.bf16.gmra.mrb[52].mxu0 %v2013_v54  ;;  %v2003_v20 = vsel %vm1971_vm13, %v1945_v48, %v1987_v0 }
 0x414   :  { %vm1974_vm1 = vcmp.ge.f32.partialorder %v1951_v19, 0.0  ;;  %v1990_v10 = vmul.f32 0.01, %v1951_v19  ;;  %v2004_v46 = vsel %vm1972_vm14, %v1947_v8, %v1988_v62 }
 0x415   :  { %v2005_v42 = vsel %vm1973_vm15, %v1949_v2, %v1989_v12 }
 0x416   :  { %v2006_v38 = vsel %vm1974_vm1, %v1951_v19, %v1990_v10  ;;  %v1954_v3 = vpop.f32.mrb[44].mxu0  ;;  %v2015_v14 = vpack.c.bf16 %v2005_v42, %v2003_v20 }
 0x417   :  { %v2016_v6 = vpack.c.bf16 %v2006_v38, %v2004_v46  ;;  %v1955_v25 = vadd.f32 %v1954_v3, %v11503_v26  ;;  %v1956_v63 = vpop.f32.mrb[45].mxu0 }
 0x418   :  { %v1957_v55 = vadd.f32 %v1956_v63, %v11506_v27  ;;  %v1958_v49 = vpop.f32.mrb[46].mxu0 }
 0x419   :  { %v1991_v40 = vmul.f32 0.01, %v1955_v25  ;;  %v1959_v57 = vadd.f32 %v1958_v49, %v11503_v26  ;;  %v1960_v36 = vpop.f32.mrb[47].mxu0  ;;  %9042 = vmatprep.mubr.msk.bf16.mxu1 %vm2277_vm9, %v2016_v6  ;;  %9046 = vmatprep.mubr.msk.bf16.mxu0 %vm2277_vm9, %v2016_v6  ;;  %vm1975_vm2 = vcmp.ge.f32.partialorder %v1955_v25, 0.0 }
 0x41a   :  { %v1992_v54 = vmul.f32 0.01, %v1957_v55  ;;  %v1961_v48 = vadd.f32 %v1960_v36, %v11506_v27  ;;  %vm1976_vm3 = vcmp.ge.f32.partialorder %v1957_v55, 0.0  ;;  %v2068_v27 = vld [vmem:[#allocation25 + $0x40] ss:$8 sm:$0x7] }
 0x41b   :  { %vm1977_vm4 = vcmp.ge.f32.partialorder %v1959_v57, 0.0  ;;  %v1993_v8 = vmul.f32 0.01, %v1959_v57  ;;  %2343 = vmatmul.mubr.bf16.gmra.mrb[88].mxu1 %v2015_v14  ;;  %2412 = vmatmul.mubr.bf16.gmra.mrb[56].mxu0 %v2015_v14  ;;  %v2007_v2 = vsel %vm1975_vm2, %v1955_v25, %v1991_v40  ;;  %v11673_v20 = vrot.slane %v2068_v27, %v11252_v45 }
 0x41c   :  { %vm1978_vm5 = vcmp.ge.f32.partialorder %v1961_v48, 0.0  ;;  %v1994_v0 = vmul.f32 0.01, %v1961_v48  ;;  %v2008_v19 = vsel %vm1976_vm3, %v1957_v55, %v1992_v54  ;;  %v11676_v42 = vrot.slane %v2068_v27, %v11433_v61 }
 0x41d   :  { %v2009_v62 = vsel %vm1977_vm4, %v1959_v57, %v1993_v8  ;;  %v11679_v46 = vrot.slane %v2068_v27, %v11255_v47 }
 0x41e   :  { %v2010_v26 = vsel %vm1978_vm5, %v1961_v48, %v1994_v0  ;;  %v2017_v12 = vpack.c.bf16 %v2009_v62, %v2007_v2 }
 0x41f   :  { %v2018_v10 = vpack.c.bf16 %v2010_v26, %v2008_v19 }
 0x421   :  { %9043 = vmatprep.mubr.msk.bf16.mxu1 %vm2277_vm9, %v2018_v10  ;;  %9047 = vmatprep.mubr.msk.bf16.mxu0 %vm2277_vm9, %v2018_v10 }
 0x423   :  { %2353 = vmatmul.mubr.bf16.gmra.mrb[92].mxu1 %v2017_v12  ;;  %2420 = vmatmul.mubr.bf16.gmra.mrb[60].mxu0 %v2017_v12 }
 0x4de   :  { %v2324_v38 = vpop.f32.mrb[80].mxu1  ;;  %v2397_v3 = vpop.f32.mrb[48].mxu0 }
 0x4df   :  { %v2325_v14 = vadd.f32 %v2324_v38, %v11673_v20  ;;  %v2398_v6 = vadd.f32 %v2397_v3, %v11676_v42  ;;  %v2326_v25 = vpop.f32.mrb[81].mxu1  ;;  %v2399_v63 = vpop.f32.mrb[49].mxu0 }
 0x4e0   :  { %v2327_v55 = vadd.f32 %v2326_v25, %v11679_v46  ;;  %v2328_v49 = vpop.f32.mrb[82].mxu1  ;;  %v2400_v40 = vpop.f32.mrb[50].mxu0 }
 0x4e1   :  { %vm2428_vm6 = vcmp.ge.f32.partialorder %v2325_v14, 0.0  ;;  %v2452_v57 = vmul.f32 0.01, %v2325_v14  ;;  %vm2430_vm7 = vcmp.ge.f32.partialorder %v2398_v6, 0.0  ;;  %v2454_v36 = vmul.f32 0.01, %v2398_v6 }
 0x4e2   :  { %vm2429_vm8 = vcmp.ge.f32.partialorder %v2327_v55, 0.0  ;;  %v2453_v54 = vmul.f32 0.01, %v2327_v55  ;;  %v2329_v48 = vadd.f32 %v2328_v49, %v11673_v20  ;;  %v2401_v8 = vadd.f32 %v2400_v40, %v11676_v42  ;;  %v2330_v0 = vpop.f32.mrb[83].mxu1  ;;  %v2402_v2 = vpop.f32.mrb[51].mxu0 }
 0x4e3   :  { %v11686_v62 = vsel %vm2428_vm6, %v2325_v14, %v2452_v57  ;;  %v11688_v19 = vsel %vm2430_vm7, %v2398_v6, %v2454_v36  ;;  %v2331_v26 = vadd.f32 %v2330_v0, %v11679_v46 }
 0x4e4   :  { %13919 = vst [vmem:[#allocation127_spill] sm:$0xff] %v11686_v62  ;;  %13920 = vst [vmem:[#allocation128_spill] sm:$0xff] %v11688_v19  ;;  %v11691_v12 = vsel %vm2429_vm8, %v2327_v55, %v2453_v54  ;;  %vm2431_vm10 = vcmp.ge.f32.partialorder %v2329_v48, 0.0  ;;  %v2455_v10 = vmul.f32 0.01, %v2329_v48  ;;  %vm2433_vm11 = vcmp.ge.f32.partialorder %v2401_v8, 0.0 }
 0x4e5   :  { %13921 = vst [vmem:[#allocation129_spill] sm:$0xff] %v11691_v12  ;;  %v2457_v27 = vmul.f32 0.01, %v2401_v8  ;;  %vm2432_vm0 = vcmp.ge.f32.partialorder %v2331_v26, 0.0  ;;  %v2456_v38 = vmul.f32 0.01, %v2331_v26 }
 0x4e6   :  { %v11693_v3 = vsel %vm2431_vm10, %v2329_v48, %v2455_v10  ;;  %v2334_v25 = vpop.f32.mrb[84].mxu1  ;;  %v2405_v63 = vpop.f32.mrb[52].mxu0 }
 0x4e7   :  { %13922 = vst [vmem:[#allocation130_spill] sm:$0xff] %v11693_v3  ;;  %v11695_v49 = vsel %vm2433_vm11, %v2401_v8, %v2457_v27  ;;  %v11697_v14 = vsel %vm2432_vm0, %v2331_v26, %v2456_v38  ;;  %v2335_v6 = vadd.f32 %v2334_v25, %v11673_v20  ;;  %v2406_v40 = vadd.f32 %v2405_v63, %v11676_v42  ;;  %v2336_v55 = vpop.f32.mrb[85].mxu1  ;;  %v2407_v57 = vpop.f32.mrb[53].mxu0 }
 0x4e8   :  { %13923 = vst [vmem:[#allocation131_spill] sm:$0xff] %v11695_v49  ;;  %13924 = vst [vmem:[#allocation132_spill] sm:$0xff] %v11697_v14  ;;  %v2337_v36 = vadd.f32 %v2336_v55, %v11679_v46  ;;  %v2338_v54 = vpop.f32.mrb[86].mxu1  ;;  %v2408_v0 = vpop.f32.mrb[54].mxu0 }
 0x4e9   :  { %vm2434_vm12 = vcmp.ge.f32.partialorder %v2335_v6, 0.0  ;;  %v2458_v2 = vmul.f32 0.01, %v2335_v6  ;;  %vm2436_vm13 = vcmp.ge.f32.partialorder %v2406_v40, 0.0  ;;  %v2460_v48 = vmul.f32 0.01, %v2406_v40 }
 0x4ea   :  { %vm2435_vm14 = vcmp.ge.f32.partialorder %v2337_v36, 0.0  ;;  %v2459_v10 = vmul.f32 0.01, %v2337_v36  ;;  %v2339_v8 = vadd.f32 %v2338_v54, %v11673_v20  ;;  %v2409_v26 = vadd.f32 %v2408_v0, %v11676_v42  ;;  %v2340_v27 = vpop.f32.mrb[87].mxu1  ;;  %v2410_v38 = vpop.f32.mrb[55].mxu0 }
 0x4eb   :  { %v11704_v25 = vsel %vm2434_vm12, %v2335_v6, %v2458_v2  ;;  %v11706_v63 = vsel %vm2436_vm13, %v2406_v40, %v2460_v48  ;;  %v2341_v55 = vadd.f32 %v2340_v27, %v11679_v46 }
 0x4ec   :  { %13925 = vst [vmem:[#allocation133_spill] sm:$0xff] %v11704_v25  ;;  %13926 = vst [vmem:[#allocation134_spill] sm:$0xff] %v11706_v63  ;;  %v11709_v57 = vsel %vm2435_vm14, %v2337_v36, %v2459_v10  ;;  %vm2437_vm15 = vcmp.ge.f32.partialorder %v2339_v8, 0.0  ;;  %v2461_v49 = vmul.f32 0.01, %v2339_v8  ;;  %vm2439_vm1 = vcmp.ge.f32.partialorder %v2409_v26, 0.0 }
 0x4ed   :  { %13927 = vst [vmem:[#allocation135_spill] sm:$0xff] %v11709_v57  ;;  %v2463_v19 = vmul.f32 0.01, %v2409_v26  ;;  %vm2438_vm2 = vcmp.ge.f32.partialorder %v2341_v55, 0.0  ;;  %v2462_v3 = vmul.f32 0.01, %v2341_v55 }
 0x4ee   :  { %v11711_v62 = vsel %vm2437_vm15, %v2339_v8, %v2461_v49  ;;  %v2344_v54 = vpop.f32.mrb[88].mxu1  ;;  %v2413_v0 = vpop.f32.mrb[56].mxu0 }
 0x4ef   :  { %13928 = vst [vmem:[#allocation136_spill] sm:$0xff] %v11711_v62  ;;  %v11713_v14 = vsel %vm2439_vm1, %v2409_v26, %v2463_v19  ;;  %v11715_v6 = vsel %vm2438_vm2, %v2341_v55, %v2462_v3  ;;  %v2345_v40 = vadd.f32 %v2344_v54, %v11673_v20  ;;  %v2414_v2 = vadd.f32 %v2413_v0, %v11676_v42  ;;  %v2346_v36 = vpop.f32.mrb[89].mxu1  ;;  %v2415_v48 = vpop.f32.mrb[57].mxu0 }
 0x4f0   :  { %13929 = vst [vmem:[#allocation137_spill] sm:$0xff] %v11713_v14  ;;  %13930 = vst [vmem:[#allocation138_spill] sm:$0xff] %v11715_v6  ;;  %v2347_v10 = vadd.f32 %v2346_v36, %v11679_v46  ;;  %v2348_v27 = vpop.f32.mrb[90].mxu1  ;;  %v2416_v38 = vpop.f32.mrb[58].mxu0 }
 0x4f1   :  { %vm2440_vm3 = vcmp.ge.f32.partialorder %v2345_v40, 0.0  ;;  %v2464_v63 = vmul.f32 0.01, %v2345_v40  ;;  %vm2442_vm4 = vcmp.ge.f32.partialorder %v2414_v2, 0.0  ;;  %v2466_v49 = vmul.f32 0.01, %v2414_v2 }
 0x4f2   :  { %vm2441_vm5 = vcmp.ge.f32.partialorder %v2347_v10, 0.0  ;;  %v2465_v8 = vmul.f32 0.01, %v2347_v10  ;;  %v2349_v19 = vadd.f32 %v2348_v27, %v11673_v20  ;;  %v2417_v3 = vadd.f32 %v2416_v38, %v11676_v42  ;;  %v2350_v26 = vpop.f32.mrb[91].mxu1  ;;  %v2418_v55 = vpop.f32.mrb[59].mxu0 }
 0x4f3   :  { %v11722_v54 = vsel %vm2440_vm3, %v2345_v40, %v2464_v63  ;;  %v11724_v0 = vsel %vm2442_vm4, %v2414_v2, %v2466_v49  ;;  %v2351_v36 = vadd.f32 %v2350_v26, %v11679_v46 }
 0x4f4   :  { %13931 = vst [vmem:[#allocation139_spill] sm:$0xff] %v11722_v54  ;;  %13932 = vst [vmem:[#allocation140_spill] sm:$0xff] %v11724_v0  ;;  %v11727_v48 = vsel %vm2441_vm5, %v2347_v10, %v2465_v8  ;;  %vm2443_vm6 = vcmp.ge.f32.partialorder %v2349_v19, 0.0  ;;  %v2467_v14 = vmul.f32 0.01, %v2349_v19  ;;  %vm2445_vm7 = vcmp.ge.f32.partialorder %v2417_v3, 0.0 }
 0x4f5   :  { %13933 = vst [vmem:[#allocation141_spill] sm:$0xff] %v11727_v48  ;;  %v2469_v62 = vmul.f32 0.01, %v2417_v3  ;;  %vm2444_vm8 = vcmp.ge.f32.partialorder %v2351_v36, 0.0  ;;  %v2468_v25 = vmul.f32 0.01, %v2351_v36 }
 0x4f6   :  { %v11729_v6 = vsel %vm2443_vm6, %v2349_v19, %v2467_v14  ;;  %v2354_v27 = vpop.f32.mrb[92].mxu1  ;;  %v2421_v38 = vpop.f32.mrb[60].mxu0 }
 0x4f7   :  { %13934 = vst [vmem:[#allocation142_spill] sm:$0xff] %v11729_v6  ;;  %v11731_v57 = vsel %vm2445_vm7, %v2417_v3, %v2469_v62  ;;  %v11733_v63 = vsel %vm2444_vm8, %v2351_v36, %v2468_v25  ;;  %v2355_v40 = vadd.f32 %v2354_v27, %v11673_v20  ;;  %v2422_v2 = vadd.f32 %v2421_v38, %v11676_v42  ;;  %v2356_v10 = vpop.f32.mrb[93].mxu1  ;;  %v2423_v49 = vpop.f32.mrb[61].mxu0 }
 0x4f8   :  { %13935 = vst [vmem:[#allocation143_spill] sm:$0xff] %v11731_v57  ;;  %13936 = vst [vmem:[#allocation144_spill] sm:$0xff] %v11733_v63  ;;  %v2357_v8 = vadd.f32 %v2356_v10, %v11679_v46  ;;  %v2358_v26 = vpop.f32.mrb[94].mxu1  ;;  %v2424_v55 = vpop.f32.mrb[62].mxu0 }
 0x4f9   :  { %vm2446_vm10 = vcmp.ge.f32.partialorder %v2355_v40, 0.0  ;;  %v2470_v0 = vmul.f32 0.01, %v2355_v40  ;;  %vm2448_vm11 = vcmp.ge.f32.partialorder %v2422_v2, 0.0  ;;  %v2472_v14 = vmul.f32 0.01, %v2422_v2 }
 0x4fa   :  { %vm2447_vm0 = vcmp.ge.f32.partialorder %v2357_v8, 0.0  ;;  %v2471_v19 = vmul.f32 0.01, %v2357_v8  ;;  %v2359_v62 = vadd.f32 %v2358_v26, %v11673_v20  ;;  %v2425_v25 = vadd.f32 %v2424_v55, %v11676_v42  ;;  %v2360_v3 = vpop.f32.mrb[95].mxu1  ;;  %v2426_v36 = vpop.f32.mrb[63].mxu0 }
 0x4fb   :  { %v11740_v27 = vsel %vm2446_vm10, %v2355_v40, %v2470_v0  ;;  %v11742_v38 = vsel %vm2448_vm11, %v2422_v2, %v2472_v14  ;;  %v2361_v10 = vadd.f32 %v2360_v3, %v11679_v46 }
 0x4fc   :  { %13937 = vst [vmem:[#allocation145_spill] sm:$0xff] %v11740_v27  ;;  %13938 = vst [vmem:[#allocation146_spill] sm:$0xff] %v11742_v38  ;;  %v11745_v49 = vsel %vm2447_vm0, %v2357_v8, %v2471_v19  ;;  %vm2449_vm12 = vcmp.ge.f32.partialorder %v2359_v62, 0.0  ;;  %v2473_v57 = vmul.f32 0.01, %v2359_v62  ;;  %vm2451_vm13 = vcmp.ge.f32.partialorder %v2425_v25, 0.0 }
 0x4fd   :  { %13939 = vst [vmem:[#allocation147_spill] sm:$0xff] %v11745_v49  ;;  %v2475_v6 = vmul.f32 0.01, %v2425_v25  ;;  %vm2450_vm14 = vcmp.ge.f32.partialorder %v2361_v10, 0.0  ;;  %v2474_v54 = vmul.f32 0.01, %v2361_v10 }
 0x4fe   :  { %v11747_v63 = vsel %vm2449_vm12, %v2359_v62, %v2473_v57 }
 0x4ff   :  { %13940 = vst [vmem:[#allocation148_spill] sm:$0xff] %v11747_v63  ;;  %v11749_v20 = vsel %vm2451_vm13, %v2425_v25, %v2475_v6  ;;  %v11751_v42 = vsel %vm2450_vm14, %v2361_v10, %v2474_v54 }
 0x500   :  { %13941 = vst [vmem:[#allocation149_spill] sm:$0xff] %v11749_v20  ;;  %13942 = vst [vmem:[#allocation150_spill] sm:$0xff] %v11751_v42 }
 0x501   :  { %10748 = dma.done.wait [#allocation9], 16384 }
 0x502   :  { %10749 = vsyncadd [#allocation9], 4294950912  ;;  %v2505_v0 = vpack.c.bf16 %v11470_v34, %v11460_v21  ;;  %v2537_v46 = vld [vmem:[#allocation2 + $0x8] sm:$0xff]  ;;  %v2539_v40 = vld [vmem:[#allocation2 + $0x18] sm:$0xff] }
 0x503   :  { %v2536_v2 = vld [vmem:[#allocation2] sm:$0xff]  ;;  %2687 = vmatprep.subr.bf16.mxu1 %v2537_v46  ;;  %2913 = vmatprep.subr.bf16.mxu0 %v2539_v40  ;;  %v2538_v8 = vld [vmem:[#allocation2 + $0x10] sm:$0xff]  ;;  %v2541_v26 = vld [vmem:[#allocation2 + $0x28] sm:$0xff] }
 0x504   :  { %2719 = vmatprep.mubr.bf16.mxu1 %v2505_v0  ;;  %2945 = vmatprep.mubr.bf16.mxu0 %v2505_v0  ;;  %v2543_v57 = vld [vmem:[#allocation2 + $0x38] sm:$0xff]  ;;  %v2540_v6 = vld [vmem:[#allocation2 + $0x20] sm:$0xff]  ;;  %v2542_v54 = vld [vmem:[#allocation2 + $0x30] sm:$0xff] }
 0x505   :  { %2688 = vmatpush1.bf16.msra.mxu1 %v2536_v2  ;;  %2914 = vmatpush1.bf16.msra.mxu0 %v2538_v8  ;;  %v2545_v55 = vld [vmem:[#allocation2 + $0x48] sm:$0xff]  ;;  %v2547_v14 = vld [vmem:[#allocation2 + $0x58] sm:$0xff]  ;;  %v2544_v19 = vld [vmem:[#allocation2 + $0x40] sm:$0xff] }
 0x506   :  { %2689 = vmatprep.subr.bf16.mxu1 %v2541_v26  ;;  %2915 = vmatprep.subr.bf16.mxu0 %v2543_v57  ;;  %v2546_v62 = vld [vmem:[#allocation2 + $0x50] sm:$0xff]  ;;  %v2549_v25 = vld [vmem:[#allocation2 + $0x68] sm:$0xff]  ;;  %v2551_v3 = vld [vmem:[#allocation2 + $0x78] sm:$0xff] }
 0x507   :  { %v2548_v36 = vld [vmem:[#allocation2 + $0x60] sm:$0xff]  ;;  %v2550_v10 = vld [vmem:[#allocation2 + $0x70] sm:$0xff]  ;;  %v2553_v0 = vld [vmem:[#allocation2 + $0x88] sm:$0xff] }
 0x508   :  { %v2555_v46 = vld [vmem:[#allocation2 + $0x98] sm:$0xff]  ;;  %v2552_v40 = vld [vmem:[#allocation2 + $0x80] sm:$0xff]  ;;  %v2554_v2 = vld [vmem:[#allocation2 + $0x90] sm:$0xff] }
 0x509   :  { %2690 = vmatpush1.bf16.msra.mxu1 %v2540_v6  ;;  %2916 = vmatpush1.bf16.msra.mxu0 %v2542_v54  ;;  %v2557_v8 = vld [vmem:[#allocation2 + $0xa8] sm:$0xff]  ;;  %v2559_v26 = vld [vmem:[#allocation2 + $0xb8] sm:$0xff]  ;;  %v2556_v57 = vld [vmem:[#allocation2 + $0xa0] sm:$0xff] }
 0x50a   :  { %2691 = vmatprep.subr.bf16.mxu1 %v2545_v55  ;;  %2917 = vmatprep.subr.bf16.mxu0 %v2547_v14  ;;  %v2558_v6 = vld [vmem:[#allocation2 + $0xb0] sm:$0xff]  ;;  %v2561_v54 = vld [vmem:[#allocation2 + $0xc8] sm:$0xff]  ;;  %v2563_v55 = vld [vmem:[#allocation2 + $0xd8] sm:$0xff] }
 0x50b   :  { %v2560_v14 = vld [vmem:[#allocation2 + $0xc0] sm:$0xff]  ;;  %v13955_v20 = vld [vmem:[#allocation98_spill] sm:$0xff] }
 0x50c   :  { %v13956_v38 = vld [vmem:[#allocation102_spill] sm:$0xff] }
 0x50d   :  { %2692 = vmatpush1.bf16.msra.mxu1 %v2544_v19  ;;  %2918 = vmatpush1.bf16.msra.mxu0 %v2546_v62  ;;  %v2562_v19 = vld [vmem:[#allocation2 + $0xd0] sm:$0xff]  ;;  %v2565_v62 = vld [vmem:[#allocation2 + $0xe8] sm:$0xff]  ;;  %v2523_v63 = vpack.c.bf16 %v13956_v38, %v13955_v20 }
 0x50e   :  { %2693 = vmatprep.subr.bf16.mxu1 %v2549_v25  ;;  %2919 = vmatprep.subr.bf16.mxu0 %v2551_v3  ;;  %v2567_v25 = vld [vmem:[#allocation2 + $0xf8] sm:$0xff]  ;;  %v2564_v3 = vld [vmem:[#allocation2 + $0xe0] sm:$0xff] }
 0x50f   :  { %v13959_v42 = vld [vmem:[#allocation106_spill] sm:$0xff] }
 0x510   :  { %v13960_v49 = vld [vmem:[#allocation110_spill] sm:$0xff] }
 0x511   :  { %2694 = vmatpush1.bf16.msra.mxu1 %v2548_v36  ;;  %2920 = vmatpush1.bf16.msra.mxu0 %v2550_v10  ;;  %v2566_v36 = vld [vmem:[#allocation2 + $0xf0] sm:$0xff]  ;;  %v2569_v10 = vld [vmem:[#allocation2 + $0x108] sm:$0xff]  ;;  %v2527_v48 = vpack.c.bf16 %v13960_v49, %v13959_v42 }
 0x512   :  { %2695 = vmatprep.subr.bf16.mxu1 %v2553_v0  ;;  %2921 = vmatprep.subr.bf16.mxu0 %v2555_v46  ;;  %v2571_v0 = vld [vmem:[#allocation2 + $0x118] sm:$0xff]  ;;  %v2568_v46 = vld [vmem:[#allocation2 + $0x100] sm:$0xff] }
 0x515   :  { %2696 = vmatpush1.bf16.msra.mxu1 %v2552_v40  ;;  %2922 = vmatpush1.bf16.msra.mxu0 %v2554_v2  ;;  %v2570_v40 = vld [vmem:[#allocation2 + $0x110] sm:$0xff]  ;;  %v2573_v2 = vld [vmem:[#allocation2 + $0x128] sm:$0xff] }
 0x516   :  { %2697 = vmatprep.subr.bf16.mxu1 %v2557_v8  ;;  %2923 = vmatprep.subr.bf16.mxu0 %v2559_v26  ;;  %v2575_v8 = vld [vmem:[#allocation2 + $0x138] sm:$0xff]  ;;  %v2572_v26 = vld [vmem:[#allocation2 + $0x120] sm:$0xff] }
 0x519   :  { %2698 = vmatpush1.bf16.msra.mxu1 %v2556_v57  ;;  %2924 = vmatpush1.bf16.msra.mxu0 %v2558_v6  ;;  %v2574_v57 = vld [vmem:[#allocation2 + $0x130] sm:$0xff]  ;;  %v2577_v6 = vld [vmem:[#allocation2 + $0x148] sm:$0xff] }
 0x51a   :  { %2699 = vmatprep.subr.bf16.mxu1 %v2561_v54  ;;  %2925 = vmatprep.subr.bf16.mxu0 %v2563_v55  ;;  %v2579_v54 = vld [vmem:[#allocation2 + $0x158] sm:$0xff]  ;;  %v2576_v55 = vld [vmem:[#allocation2 + $0x140] sm:$0xff] }
 0x51d   :  { %2700 = vmatpush1.bf16.msra.mxu1 %v2560_v14  ;;  %2926 = vmatpush1.bf16.msra.mxu0 %v2562_v19  ;;  %v2578_v14 = vld [vmem:[#allocation2 + $0x150] sm:$0xff]  ;;  %v2581_v19 = vld [vmem:[#allocation2 + $0x168] sm:$0xff] }
 0x51e   :  { %2701 = vmatprep.subr.bf16.mxu1 %v2565_v62  ;;  %2927 = vmatprep.subr.bf16.mxu0 %v2567_v25  ;;  %v2583_v62 = vld [vmem:[#allocation2 + $0x178] sm:$0xff]  ;;  %v2580_v25 = vld [vmem:[#allocation2 + $0x160] sm:$0xff] }
 0x521   :  { %2702 = vmatpush1.bf16.msra.mxu1 %v2564_v3  ;;  %2928 = vmatpush1.bf16.msra.mxu0 %v2566_v36  ;;  %v2582_v3 = vld [vmem:[#allocation2 + $0x170] sm:$0xff]  ;;  %v2585_v36 = vld [vmem:[#allocation2 + $0x188] sm:$0xff] }
 0x522   :  { %2703 = vmatprep.subr.bf16.mxu1 %v2569_v10  ;;  %2929 = vmatprep.subr.bf16.mxu0 %v2571_v0  ;;  %v2587_v10 = vld [vmem:[#allocation2 + $0x198] sm:$0xff]  ;;  %v2584_v0 = vld [vmem:[#allocation2 + $0x180] sm:$0xff] }
 0x525   :  { %2704 = vmatpush1.bf16.msra.mxu1 %v2568_v46  ;;  %2930 = vmatpush1.bf16.msra.mxu0 %v2570_v40  ;;  %v2586_v46 = vld [vmem:[#allocation2 + $0x190] sm:$0xff]  ;;  %v2589_v40 = vld [vmem:[#allocation2 + $0x1a8] sm:$0xff] }
 0x526   :  { %2705 = vmatprep.subr.bf16.mxu1 %v2573_v2  ;;  %2931 = vmatprep.subr.bf16.mxu0 %v2575_v8  ;;  %v2591_v2 = vld [vmem:[#allocation2 + $0x1b8] sm:$0xff]  ;;  %v2588_v8 = vld [vmem:[#allocation2 + $0x1a0] sm:$0xff] }
 0x529   :  { %2706 = vmatpush1.bf16.msra.mxu1 %v2572_v26  ;;  %2932 = vmatpush1.bf16.msra.mxu0 %v2574_v57  ;;  %v2590_v26 = vld [vmem:[#allocation2 + $0x1b0] sm:$0xff]  ;;  %v2593_v57 = vld [vmem:[#allocation2 + $0x1c8] sm:$0xff] }
 0x52a   :  { %2707 = vmatprep.subr.bf16.mxu1 %v2577_v6  ;;  %2933 = vmatprep.subr.bf16.mxu0 %v2579_v54  ;;  %v2595_v6 = vld [vmem:[#allocation2 + $0x1d8] sm:$0xff]  ;;  %v2592_v54 = vld [vmem:[#allocation2 + $0x1c0] sm:$0xff] }
 0x52d   :  { %2708 = vmatpush1.bf16.msra.mxu1 %v2576_v55  ;;  %2934 = vmatpush1.bf16.msra.mxu0 %v2578_v14  ;;  %v2594_v55 = vld [vmem:[#allocation2 + $0x1d0] sm:$0xff]  ;;  %v2597_v14 = vld [vmem:[#allocation2 + $0x1e8] sm:$0xff] }
 0x52e   :  { %2709 = vmatprep.subr.bf16.mxu1 %v2581_v19  ;;  %2935 = vmatprep.subr.bf16.mxu0 %v2583_v62  ;;  %v2599_v19 = vld [vmem:[#allocation2 + $0x1f8] sm:$0xff]  ;;  %v2596_v62 = vld [vmem:[#allocation2 + $0x1e0] sm:$0xff] }
 0x531   :  { %2710 = vmatpush1.bf16.msra.mxu1 %v2580_v25  ;;  %2936 = vmatpush1.bf16.msra.mxu0 %v2582_v3  ;;  %v2598_v25 = vld [vmem:[#allocation2 + $0x1f0] sm:$0xff]  ;;  %v2601_v3 = vld [vmem:[#allocation2 + $0x208] sm:$0xff] }
 0x532   :  { %2711 = vmatprep.subr.bf16.mxu1 %v2585_v36  ;;  %2937 = vmatprep.subr.bf16.mxu0 %v2587_v10  ;;  %v2603_v36 = vld [vmem:[#allocation2 + $0x218] sm:$0xff]  ;;  %v2504_v10 = vpack.c.bf16 %v11466_v30, %v11454_v16 }
 0x535   :  { %2712 = vmatpush1.bf16.msra.mxu1 %v2584_v0  ;;  %2938 = vmatpush1.bf16.msra.mxu0 %v2586_v46  ;;  %v2600_v0 = vld [vmem:[#allocation2 + $0x200] sm:$0xff]  ;;  %v2602_v46 = vld [vmem:[#allocation2 + $0x210] sm:$0xff] }
 0x536   :  { %2713 = vmatprep.subr.bf16.mxu1 %v2589_v40  ;;  %2939 = vmatprep.subr.bf16.mxu0 %v2591_v2  ;;  %v2605_v40 = vld [vmem:[#allocation2 + $0x228] sm:$0xff]  ;;  %v2607_v2 = vld [vmem:[#allocation2 + $0x238] sm:$0xff] }
 0x539   :  { %2714 = vmatpush1.bf16.msra.mxu1 %v2588_v8  ;;  %2940 = vmatpush1.bf16.msra.mxu0 %v2590_v26  ;;  %v2509_v8 = vpack.c.bf16 %v11494_v15, %v11484_v60  ;;  %v2604_v26 = vld [vmem:[#allocation2 + $0x220] sm:$0xff] }
 0x53a   :  { %2715 = vmatprep.subr.bf16.mxu1 %v2593_v57  ;;  %2941 = vmatprep.subr.bf16.mxu0 %v2595_v6  ;;  %v2606_v57 = vld [vmem:[#allocation2 + $0x230] sm:$0xff]  ;;  %v2609_v6 = vld [vmem:[#allocation2 + $0x248] sm:$0xff] }
 0x53d   :  { %2716 = vmatpush1.bf16.msra.mxu1 %v2592_v54  ;;  %2942 = vmatpush1.bf16.msra.mxu0 %v2594_v55  ;;  %v2611_v54 = vld [vmem:[#allocation2 + $0x258] sm:$0xff]  ;;  %v2508_v55 = vpack.c.bf16 %v11490_v11, %v11478_v53 }
 0x53e   :  { %2717 = vmatprep.subr.bf16.mxu1 %v2597_v14  ;;  %2943 = vmatprep.subr.bf16.mxu0 %v2599_v19  ;;  %v2608_v14 = vld [vmem:[#allocation2 + $0x240] sm:$0xff]  ;;  %v2610_v19 = vld [vmem:[#allocation2 + $0x250] sm:$0xff] }
 0x541   :  { %2718 = vmatpush1.bf16.msra.mxu1 %v2596_v62  ;;  %2944 = vmatpush1.bf16.msra.mxu0 %v2598_v25  ;;  %v2613_v62 = vld [vmem:[#allocation2 + $0x268] sm:$0xff]  ;;  %v2615_v25 = vld [vmem:[#allocation2 + $0x278] sm:$0xff] }
 0x542   :  { %2800 = vmatprep.subr.bf16.mxu1 %v2601_v3  ;;  %3026 = vmatprep.subr.bf16.mxu0 %v2603_v36  ;;  %v2513_v3 = vpack.c.bf16 %v11526_v13, %v11514_v43  ;;  %v2612_v36 = vld [vmem:[#allocation2 + $0x260] sm:$0xff] }
 0x544   :  { %2720 = vmatmul.mubr.bf16.vlgmr.msra.gmra.mrb[96].mxu1 %v2504_v10  ;;  %2946 = vmatmul.mubr.bf16.vlgmr.msra.gmra.mrb[64].mxu0 %v2504_v10  ;;  %v2614_v10 = vld [vmem:[#allocation2 + $0x270] sm:$0xff] }
 0x545   :  { %2801 = vmatpush1.bf16.msra.mxu1 %v2600_v0  ;;  %3027 = vmatpush1.bf16.msra.mxu0 %v2602_v46  ;;  %v2617_v0 = vld [vmem:[#allocation2 + $0x288] sm:$0xff]  ;;  %v2619_v46 = vld [vmem:[#allocation2 + $0x298] sm:$0xff] }
 0x546   :  { %2802 = vmatprep.subr.bf16.mxu1 %v2605_v40  ;;  %3028 = vmatprep.subr.bf16.mxu0 %v2607_v2  ;;  %v2512_v40 = vpack.c.bf16 %v11520_v5, %v11508_v37  ;;  %v2616_v2 = vld [vmem:[#allocation2 + $0x280] sm:$0xff] }
 0x547   :  { %2729 = vmatprep.mubr.bf16.mxu1 %v2509_v8  ;;  %2955 = vmatprep.mubr.bf16.mxu0 %v2509_v8  ;;  %v2618_v8 = vld [vmem:[#allocation2 + $0x290] sm:$0xff] }
 0x549   :  { %2803 = vmatpush1.bf16.msra.mxu1 %v2604_v26  ;;  %3029 = vmatpush1.bf16.msra.mxu0 %v2606_v57  ;;  %v2621_v26 = vld [vmem:[#allocation2 + $0x2a8] sm:$0xff]  ;;  %v2623_v57 = vld [vmem:[#allocation2 + $0x2b8] sm:$0xff] }
 0x54a   :  { %2804 = vmatprep.subr.bf16.mxu1 %v2609_v6  ;;  %3030 = vmatprep.subr.bf16.mxu0 %v2611_v54  ;;  %v2517_v6 = vpack.c.bf16 %v11550_v58, %v11538_v41  ;;  %v2620_v54 = vld [vmem:[#allocation2 + $0x2a0] sm:$0xff] }
 0x54c   :  { %2730 = vmatmul.mubr.bf16.gmra.mrb[100].mxu1 %v2508_v55  ;;  %2956 = vmatmul.mubr.bf16.gmra.mrb[68].mxu0 %v2508_v55  ;;  %v2622_v55 = vld [vmem:[#allocation2 + $0x2b0] sm:$0xff] }
 0x54d   :  { %2805 = vmatpush1.bf16.msra.mxu1 %v2608_v14  ;;  %3031 = vmatpush1.bf16.msra.mxu0 %v2610_v19  ;;  %v2625_v14 = vld [vmem:[#allocation2 + $0x2c8] sm:$0xff]  ;;  %v2627_v19 = vld [vmem:[#allocation2 + $0x2d8] sm:$0xff] }
 0x54e   :  { %2806 = vmatprep.subr.bf16.mxu1 %v2613_v62  ;;  %3032 = vmatprep.subr.bf16.mxu0 %v2615_v25  ;;  %v2516_v62 = vpack.c.bf16 %v11544_v7, %v11532_v28  ;;  %v2624_v25 = vld [vmem:[#allocation2 + $0x2c0] sm:$0xff] }
 0x54f   :  { %2739 = vmatprep.mubr.bf16.mxu1 %v2513_v3  ;;  %2965 = vmatprep.mubr.bf16.mxu0 %v2513_v3  ;;  %v2626_v3 = vld [vmem:[#allocation2 + $0x2d0] sm:$0xff] }
 0x551   :  { %2807 = vmatpush1.bf16.msra.mxu1 %v2612_v36  ;;  %3033 = vmatpush1.bf16.msra.mxu0 %v2614_v10  ;;  %v2629_v36 = vld [vmem:[#allocation2 + $0x2e8] sm:$0xff]  ;;  %v2631_v10 = vld [vmem:[#allocation2 + $0x2f8] sm:$0xff] }
 0x552   :  { %2808 = vmatprep.subr.bf16.mxu1 %v2617_v0  ;;  %3034 = vmatprep.subr.bf16.mxu0 %v2619_v46  ;;  %v2521_v0 = vpack.c.bf16 %v11574_v56, %v11562_v59  ;;  %v2628_v46 = vld [vmem:[#allocation2 + $0x2e0] sm:$0xff] }
 0x554   :  { %2740 = vmatmul.mubr.bf16.gmra.mrb[104].mxu1 %v2512_v40  ;;  %2966 = vmatmul.mubr.bf16.gmra.mrb[72].mxu0 %v2512_v40  ;;  %v2630_v40 = vld [vmem:[#allocation2 + $0x2f0] sm:$0xff] }
 0x555   :  { %2809 = vmatpush1.bf16.msra.mxu1 %v2616_v2  ;;  %3035 = vmatpush1.bf16.msra.mxu0 %v2618_v8  ;;  %v2633_v2 = vld [vmem:[#allocation2 + $0x308] sm:$0xff]  ;;  %v2635_v8 = vld [vmem:[#allocation2 + $0x318] sm:$0xff] }
 0x556   :  { %2810 = vmatprep.subr.bf16.mxu1 %v2621_v26  ;;  %3036 = vmatprep.subr.bf16.mxu0 %v2623_v57  ;;  %v2520_v26 = vpack.c.bf16 %v11568_v33, %v11556_v52  ;;  %v2632_v57 = vld [vmem:[#allocation2 + $0x300] sm:$0xff] }
 0x557   :  { %2749 = vmatprep.mubr.bf16.mxu1 %v2517_v6  ;;  %2975 = vmatprep.mubr.bf16.mxu0 %v2517_v6  ;;  %v2634_v6 = vld [vmem:[#allocation2 + $0x310] sm:$0xff] }
 0x559   :  { %2811 = vmatpush1.bf16.msra.mxu1 %v2620_v54  ;;  %3037 = vmatpush1.bf16.msra.mxu0 %v2622_v55  ;;  %v2637_v54 = vld [vmem:[#allocation2 + $0x328] sm:$0xff]  ;;  %v2639_v55 = vld [vmem:[#allocation2 + $0x338] sm:$0xff] }
 0x55a   :  { %2812 = vmatprep.subr.bf16.mxu1 %v2625_v14  ;;  %3038 = vmatprep.subr.bf16.mxu0 %v2627_v19  ;;  %v2525_v14 = vpack.c.bf16 %v11598_v24, %v11586_v39  ;;  %v2636_v19 = vld [vmem:[#allocation2 + $0x320] sm:$0xff] }
 0x55c   :  { %2750 = vmatmul.mubr.bf16.gmra.mrb[108].mxu1 %v2516_v62  ;;  %2976 = vmatmul.mubr.bf16.gmra.mrb[76].mxu0 %v2516_v62  ;;  %v2638_v62 = vld [vmem:[#allocation2 + $0x330] sm:$0xff] }
 0x55d   :  { %2813 = vmatpush1.bf16.msra.mxu1 %v2624_v25  ;;  %3039 = vmatpush1.bf16.msra.mxu0 %v2626_v3  ;;  %v2641_v25 = vld [vmem:[#allocation2 + $0x348] sm:$0xff]  ;;  %v2643_v3 = vld [vmem:[#allocation2 + $0x358] sm:$0xff] }
 0x55e   :  { %2814 = vmatprep.subr.bf16.mxu1 %v2629_v36  ;;  %3040 = vmatprep.subr.bf16.mxu0 %v2631_v10  ;;  %v2524_v36 = vpack.c.bf16 %v11592_v51, %v11580_v9  ;;  %v2640_v10 = vld [vmem:[#allocation2 + $0x340] sm:$0xff] }
 0x55f   :  { %2759 = vmatprep.mubr.bf16.mxu1 %v2521_v0  ;;  %2985 = vmatprep.mubr.bf16.mxu0 %v2521_v0  ;;  %v2642_v0 = vld [vmem:[#allocation2 + $0x350] sm:$0xff] }
 0x561   :  { %2815 = vmatpush1.bf16.msra.mxu1 %v2628_v46  ;;  %3041 = vmatpush1.bf16.msra.mxu0 %v2630_v40  ;;  %v2645_v46 = vld [vmem:[#allocation2 + $0x368] sm:$0xff]  ;;  %v2647_v40 = vld [vmem:[#allocation2 + $0x378] sm:$0xff] }
 0x562   :  { %2816 = vmatprep.subr.bf16.mxu1 %v2633_v2  ;;  %3042 = vmatprep.subr.bf16.mxu0 %v2635_v8  ;;  %v2529_v2 = vpack.c.bf16 %v11622_v4, %v11610_v29  ;;  %v2644_v8 = vld [vmem:[#allocation2 + $0x360] sm:$0xff] }
 0x564   :  { %2760 = vmatmul.mubr.bf16.gmra.mrb[112].mxu1 %v2520_v26  ;;  %2986 = vmatmul.mubr.bf16.gmra.mrb[80].mxu0 %v2520_v26  ;;  %v2646_v26 = vld [vmem:[#allocation2 + $0x370] sm:$0xff] }
 0x565   :  { %2817 = vmatpush1.bf16.msra.mxu1 %v2632_v57  ;;  %3043 = vmatpush1.bf16.msra.mxu0 %v2634_v6  ;;  %v2649_v57 = vld [vmem:[#allocation2 + $0x388] sm:$0xff]  ;;  %v2651_v6 = vld [vmem:[#allocation2 + $0x398] sm:$0xff] }
 0x566   :  { %2818 = vmatprep.subr.bf16.mxu1 %v2637_v54  ;;  %3044 = vmatprep.subr.bf16.mxu0 %v2639_v55  ;;  %v2528_v54 = vpack.c.bf16 %v11616_v18, %v11604_v23  ;;  %v2648_v55 = vld [vmem:[#allocation2 + $0x380] sm:$0xff] }
 0x567   :  { %2769 = vmatprep.mubr.bf16.mxu1 %v2525_v14  ;;  %2995 = vmatprep.mubr.bf16.mxu0 %v2525_v14  ;;  %v2650_v14 = vld [vmem:[#allocation2 + $0x390] sm:$0xff] }
 0x569   :  { %2819 = vmatpush1.bf16.msra.mxu1 %v2636_v19  ;;  %3045 = vmatpush1.bf16.msra.mxu0 %v2638_v62  ;;  %v2653_v19 = vld [vmem:[#allocation2 + $0x3a8] sm:$0xff]  ;;  %v2655_v62 = vld [vmem:[#allocation2 + $0x3b8] sm:$0xff] }
 0x56a   :  { %2820 = vmatprep.subr.bf16.mxu1 %v2641_v25  ;;  %3046 = vmatprep.subr.bf16.mxu0 %v2643_v3  ;;  %v2533_v25 = vpack.c.bf16 %v11645_v44, %v11634_v32  ;;  %v2652_v3 = vld [vmem:[#allocation2 + $0x3a0] sm:$0xff] }
 0x56b   :  { %v2665_v44 = vld [vmem:[#allocation25 + $0x3] ss:$8 sm:$0xf] }
 0x56c   :  { %2770 = vmatmul.mubr.bf16.gmra.mrb[116].mxu1 %v2524_v36  ;;  %2996 = vmatmul.mubr.bf16.gmra.mrb[84].mxu0 %v2524_v36  ;;  %v2654_v36 = vld [vmem:[#allocation2 + $0x3b0] sm:$0xff] }
 0x56d   :  { %2821 = vmatpush1.bf16.msra.mxu1 %v2640_v10  ;;  %3047 = vmatpush1.bf16.msra.mxu0 %v2642_v0  ;;  %v2657_v10 = vld [vmem:[#allocation2 + $0x3c8] sm:$0xff]  ;;  %v2659_v0 = vld [vmem:[#allocation2 + $0x3d8] sm:$0xff] }
 0x56e   :  { %2822 = vmatprep.subr.bf16.mxu1 %v2645_v46  ;;  %3048 = vmatprep.subr.bf16.mxu0 %v2647_v40  ;;  %v2532_v46 = vpack.c.bf16 %v11640_v1, %v11628_v50  ;;  %v2656_v40 = vld [vmem:[#allocation2 + $0x3c0] sm:$0xff]  ;;  %v11824_v1 = vrot.slane %v2665_v44, %v11255_v47 }
 0x56f   :  { %2779 = vmatprep.mubr.bf16.mxu1 %v2529_v2  ;;  %3005 = vmatprep.mubr.bf16.mxu0 %v2529_v2  ;;  %v2658_v2 = vld [vmem:[#allocation2 + $0x3d0] sm:$0xff] }
 0x571   :  { %2823 = vmatpush1.bf16.msra.mxu1 %v2644_v8  ;;  %3049 = vmatpush1.bf16.msra.mxu0 %v2646_v26  ;;  %v2661_v8 = vld [vmem:[#allocation2 + $0x3e8] sm:$0xff]  ;;  %v2663_v26 = vld [vmem:[#allocation2 + $0x3f8] sm:$0xff] }
 0x572   :  { %2824 = vmatprep.subr.bf16.mxu1 %v2649_v57  ;;  %3050 = vmatprep.subr.bf16.mxu0 %v2651_v6  ;;  %v2507_v57 = vpack.c.bf16 %v11472_v35, %v11462_v22  ;;  %v2660_v6 = vld [vmem:[#allocation2 + $0x3e0] sm:$0xff] }
 0x574   :  { %2780 = vmatmul.mubr.bf16.gmra.mrb[120].mxu1 %v2528_v54  ;;  %3006 = vmatmul.mubr.bf16.gmra.mrb[88].mxu0 %v2528_v54  ;;  %v2662_v54 = vld [vmem:[#allocation2 + $0x3f0] sm:$0xff] }
 0x575   :  { %2825 = vmatpush1.bf16.msra.mxu1 %v2648_v55  ;;  %3051 = vmatpush1.bf16.msra.mxu0 %v2650_v14  ;;  %v2506_v55 = vpack.c.bf16 %v11468_v31, %v11456_v17  ;;  %v13943_v14 = vld [vmem:[#allocation74_spill] sm:$0xff] }
 0x576   :  { %2826 = vmatprep.subr.bf16.mxu1 %v2653_v19  ;;  %3052 = vmatprep.subr.bf16.mxu0 %v2655_v62  ;;  %v13944_v19 = vld [vmem:[#allocation78_spill] sm:$0xff] }
 0x577   :  { %2789 = vmatprep.mubr.bf16.mxu1 %v2533_v25  ;;  %3015 = vmatprep.mubr.bf16.mxu0 %v2533_v25  ;;  %v2511_v62 = vpack.c.bf16 %v13944_v19, %v13943_v14  ;;  %v13945_v25 = vld [vmem:[#allocation72_spill] sm:$0xff] }
 0x579   :  { %2827 = vmatpush1.bf16.msra.mxu1 %v2652_v3  ;;  %3053 = vmatpush1.bf16.msra.mxu0 %v2654_v36  ;;  %v13946_v3 = vld [vmem:[#allocation76_spill] sm:$0xff] }
 0x57a   :  { %2828 = vmatprep.subr.bf16.mxu1 %v2657_v10  ;;  %3054 = vmatprep.subr.bf16.mxu0 %v2659_v0  ;;  %v2510_v36 = vpack.c.bf16 %v13946_v3, %v13945_v25  ;;  %v13947_v10 = vld [vmem:[#allocation82_spill] sm:$0xff] }
 0x57b   :  { %v13948_v0 = vld [vmem:[#allocation86_spill] sm:$0xff] }
 0x57c   :  { %2790 = vmatmul.mubr.bf16.gmra.mrb[124].mxu1 %v2532_v46  ;;  %3016 = vmatmul.mubr.bf16.gmra.mrb[92].mxu0 %v2532_v46  ;;  %v2515_v46 = vpack.c.bf16 %v13948_v0, %v13947_v10 }
 0x57d   :  { %2829 = vmatpush1.bf16.msra.mxu1 %v2656_v40  ;;  %3055 = vmatpush1.bf16.msra.mxu0 %v2658_v2  ;;  %v13949_v40 = vld [vmem:[#allocation80_spill] sm:$0xff] }
 0x57e   :  { %2830 = vmatprep.subr.bf16.mxu1 %v2661_v8  ;;  %3056 = vmatprep.subr.bf16.mxu0 %v2663_v26  ;;  %v13950_v2 = vld [vmem:[#allocation84_spill] sm:$0xff]  ;;  %v13951_v26 = vld [vmem:[#allocation90_spill] sm:$0xff] }
 0x57f   :  { %2832 = vmatprep.mubr.bf16.mxu1 %v2507_v57  ;;  %3058 = vmatprep.mubr.bf16.mxu0 %v2507_v57  ;;  %v2514_v8 = vpack.c.bf16 %v13950_v2, %v13949_v40  ;;  %v13952_v57 = vld [vmem:[#allocation94_spill] sm:$0xff] }
 0x581   :  { %2831 = vmatpush1.bf16.msra.mxu1 %v2660_v6  ;;  %3057 = vmatpush1.bf16.msra.mxu0 %v2662_v54  ;;  %v2519_v6 = vpack.c.bf16 %v13952_v57, %v13951_v26  ;;  %v13953_v54 = vld [vmem:[#allocation88_spill] sm:$0xff]  ;;  %v13963_v57 = vld [vmem:[#allocation114_spill] sm:$0xff] }
 0x582   :  { %v13967_v26 = vld [vmem:[#allocation122_spill] sm:$0xff] }
 0x584   :  { %2833 = vmatmul.mubr.bf16.vlgmr.msra.gmra.mrb[96].mxu1 %v2506_v55  ;;  %3059 = vmatmul.mubr.bf16.vlgmr.msra.gmra.mrb[64].mxu0 %v2506_v55  ;;  %v13954_v55 = vld [vmem:[#allocation92_spill] sm:$0xff] }
 0x585   :  { %2842 = vmatprep.mubr.bf16.mxu1 %v2511_v62  ;;  %3068 = vmatprep.mubr.bf16.mxu0 %v2511_v62  ;;  %v2518_v62 = vpack.c.bf16 %v13954_v55, %v13953_v54  ;;  %v13964_v55 = vld [vmem:[#allocation118_spill] sm:$0xff] }
 0x586   :  { %v2531_v58 = vpack.c.bf16 %v13964_v55, %v13963_v57  ;;  %v13968_v54 = vld [vmem:[#allocation126_spill] sm:$0xff] }
 0x587   :  { %v2535_v41 = vpack.c.bf16 %v13968_v54, %v13967_v26  ;;  %v13971_v54 = vld [vmem:[#allocation62_spill] sm:$0xff] }
 0x588   :  { %v11827_v26 = vrot.slane %v2665_v44, %v13971_v54 }
 0x58c   :  { %2843 = vmatmul.mubr.bf16.gmra.mrb[100].mxu1 %v2510_v36  ;;  %3069 = vmatmul.mubr.bf16.gmra.mrb[68].mxu0 %v2510_v36  ;;  %v13957_v36 = vld [vmem:[#allocation96_spill] sm:$0xff] }
 0x58d   :  { %2852 = vmatprep.mubr.bf16.mxu1 %v2515_v46  ;;  %3078 = vmatprep.mubr.bf16.mxu0 %v2515_v46  ;;  %v13958_v46 = vld [vmem:[#allocation100_spill] sm:$0xff] }
 0x58e   :  { %v2522_v27 = vpack.c.bf16 %v13958_v46, %v13957_v36 }
 0x594   :  { %2853 = vmatmul.mubr.bf16.gmra.mrb[104].mxu1 %v2514_v8  ;;  %3079 = vmatmul.mubr.bf16.gmra.mrb[72].mxu0 %v2514_v8  ;;  %v13961_v8 = vld [vmem:[#allocation104_spill] sm:$0xff] }
 0x595   :  { %2862 = vmatprep.mubr.bf16.mxu1 %v2519_v6  ;;  %3088 = vmatprep.mubr.bf16.mxu0 %v2519_v6  ;;  %v13962_v6 = vld [vmem:[#allocation108_spill] sm:$0xff] }
 0x596   :  { %v2526_v12 = vpack.c.bf16 %v13962_v6, %v13961_v8 }
 0x59c   :  { %2863 = vmatmul.mubr.bf16.gmra.mrb[108].mxu1 %v2518_v62  ;;  %3089 = vmatmul.mubr.bf16.gmra.mrb[76].mxu0 %v2518_v62  ;;  %v13966_v62 = vld [vmem:[#allocation116_spill] sm:$0xff] }
 0x59d   :  { %2872 = vmatprep.mubr.bf16.mxu1 %v2523_v63  ;;  %3098 = vmatprep.mubr.bf16.mxu0 %v2523_v63  ;;  %v13965_v63 = vld [vmem:[#allocation112_spill] sm:$0xff] }
 0x59e   :  { %v2530_v7 = vpack.c.bf16 %v13966_v62, %v13965_v63 }
 0x5a4   :  { %2873 = vmatmul.mubr.bf16.gmra.mrb[112].mxu1 %v2522_v27  ;;  %3099 = vmatmul.mubr.bf16.gmra.mrb[80].mxu0 %v2522_v27  ;;  %v13970_v27 = vld [vmem:[#allocation124_spill] sm:$0xff] }
 0x5a5   :  { %2882 = vmatprep.mubr.bf16.mxu1 %v2527_v48  ;;  %3108 = vmatprep.mubr.bf16.mxu0 %v2527_v48  ;;  %v13969_v48 = vld [vmem:[#allocation120_spill] sm:$0xff] }
 0x5a6   :  { %v2534_v28 = vpack.c.bf16 %v13970_v27, %v13969_v48 }
 0x5ac   :  { %2883 = vmatmul.mubr.bf16.gmra.mrb[116].mxu1 %v2526_v12  ;;  %3109 = vmatmul.mubr.bf16.gmra.mrb[84].mxu0 %v2526_v12  ;;  %v11818_v12 = vrot.slane %v2665_v44, %v11252_v45 }
 0x5ad   :  { %2892 = vmatprep.mubr.bf16.mxu1 %v2531_v58  ;;  %3118 = vmatprep.mubr.bf16.mxu0 %v2531_v58  ;;  %v11821_v58 = vrot.slane %v2665_v44, %v11433_v61 }
 0x5b4   :  { %2893 = vmatmul.mubr.bf16.gmra.mrb[120].mxu1 %v2530_v7  ;;  %3119 = vmatmul.mubr.bf16.gmra.mrb[88].mxu0 %v2530_v7 }
 0x5b5   :  { %2902 = vmatprep.mubr.bf16.mxu1 %v2535_v41  ;;  %3128 = vmatprep.mubr.bf16.mxu0 %v2535_v41 }
 0x5bc   :  { %2903 = vmatmul.mubr.bf16.gmra.mrb[124].mxu1 %v2534_v28  ;;  %3129 = vmatmul.mubr.bf16.gmra.mrb[92].mxu0 %v2534_v28 }
 0x657   :  { %v2834_v7 = vpop.f32.mrb[96].mxu1  ;;  %v3060_v41 = vpop.f32.mrb[64].mxu0 }
 0x658   :  { %v9500_v32 = vadd.f32 %v2834_v7, %v11818_v12  ;;  %v9532_v27 = vadd.f32 %v3060_v41, %v11821_v58  ;;  %v2836_v28 = vpop.f32.mrb[97].mxu1  ;;  %v3062_v48 = vpop.f32.mrb[65].mxu0 }
 0x659   :  { %v9501_v50 = vadd.f32 %v2836_v28, %v11824_v1  ;;  %v9533_v49 = vadd.f32 %v3062_v48, %v11827_v26  ;;  %v2838_v6 = vpop.f32.mrb[98].mxu1  ;;  %v3064_v24 = vpop.f32.mrb[66].mxu0 }
 0x65a   :  { %vm3139_vm15 = vcmp.ge.f32.partialorder %v9500_v32, 0.0  ;;  %v3203_v51 = vmul.f32 0.01, %v9500_v32  ;;  %vm3141_vm1 = vcmp.ge.f32.partialorder %v9532_v27, 0.0  ;;  %v3205_v55 = vmul.f32 0.01, %v9532_v27 }
 0x65b   :  { %vm3140_vm2 = vcmp.ge.f32.partialorder %v9501_v50, 0.0  ;;  %v3204_v44 = vmul.f32 0.01, %v9501_v50  ;;  %vm3142_vm3 = vcmp.ge.f32.partialorder %v9533_v49, 0.0  ;;  %v3206_v62 = vmul.f32 0.01, %v9533_v49 }
 0x65c   :  { %v11833_v4 = vsel %vm3139_vm15, %v9500_v32, %v3203_v51  ;;  %v11835_v7 = vsel %vm3141_vm1, %v9532_v27, %v3205_v55  ;;  %v9502_v41 = vadd.f32 %v2838_v6, %v11818_v12  ;;  %v9534_v28 = vadd.f32 %v3064_v24, %v11821_v58  ;;  %v2840_v18 = vpop.f32.mrb[99].mxu1  ;;  %v3066_v48 = vpop.f32.mrb[67].mxu0 }
 0x65d   :  { %v11839_v42 = vsel %vm3140_vm2, %v9501_v50, %v3204_v44  ;;  %v11841_v8 = vsel %vm3142_vm3, %v9533_v49, %v3206_v62  ;;  %v9503_v39 = vadd.f32 %v2840_v18, %v11824_v1  ;;  %v9535_v9 = vadd.f32 %v3066_v48, %v11827_v26 }
 0x65e   :  { %vm3143_vm4 = vcmp.ge.f32.partialorder %v9502_v41, 0.0  ;;  %v3207_v57 = vmul.f32 0.01, %v9502_v41  ;;  %vm3145_vm5 = vcmp.ge.f32.partialorder %v9534_v28, 0.0  ;;  %v3209_v51 = vmul.f32 0.01, %v9534_v28 }
 0x65f   :  { %vm3144_vm6 = vcmp.ge.f32.partialorder %v9503_v39, 0.0  ;;  %v3208_v32 = vmul.f32 0.01, %v9503_v39  ;;  %vm3146_vm7 = vcmp.ge.f32.partialorder %v9535_v9, 0.0  ;;  %v3210_v55 = vmul.f32 0.01, %v9535_v9 }
 0x660   :  { %v11845_v6 = vsel %vm3143_vm4, %v9502_v41, %v3207_v57  ;;  %v11847_v24 = vsel %vm3145_vm5, %v9534_v28, %v3209_v51  ;;  %v2844_v50 = vpop.f32.mrb[100].mxu1  ;;  %v3070_v27 = vpop.f32.mrb[68].mxu0 }
 0x661   :  { %v11849_v49 = vsel %vm3144_vm6, %v9503_v39, %v3208_v32  ;;  %v11851_v62 = vsel %vm3146_vm7, %v9535_v9, %v3210_v55  ;;  %v9504_v18 = vadd.f32 %v2844_v50, %v11818_v12  ;;  %v9536_v44 = vadd.f32 %v3070_v27, %v11821_v58  ;;  %v2846_v48 = vpop.f32.mrb[101].mxu1  ;;  %v3072_v63 = vpop.f32.mrb[69].mxu0 }
 0x662   :  { %v9505_v29 = vadd.f32 %v2846_v48, %v11824_v1  ;;  %v9537_v23 = vadd.f32 %v3072_v63, %v11827_v26  ;;  %v2848_v57 = vpop.f32.mrb[102].mxu1  ;;  %v3074_v41 = vpop.f32.mrb[70].mxu0 }
 0x663   :  { %vm3147_vm8 = vcmp.ge.f32.partialorder %v9504_v18, 0.0  ;;  %v3211_v28 = vmul.f32 0.01, %v9504_v18  ;;  %vm3149_vm10 = vcmp.ge.f32.partialorder %v9536_v44, 0.0  ;;  %v3213_v51 = vmul.f32 0.01, %v9536_v44 }
 0x664   :  { %vm3148_vm11 = vcmp.ge.f32.partialorder %v9505_v29, 0.0  ;;  %v3212_v39 = vmul.f32 0.01, %v9505_v29  ;;  %vm3150_vm0 = vcmp.ge.f32.partialorder %v9537_v23, 0.0  ;;  %v3214_v9 = vmul.f32 0.01, %v9537_v23 }
 0x665   :  { %v11857_v32 = vsel %vm3147_vm8, %v9504_v18, %v3211_v28  ;;  %v11859_v55 = vsel %vm3149_vm10, %v9536_v44, %v3213_v51  ;;  %v9506_v50 = vadd.f32 %v2848_v57, %v11818_v12  ;;  %v9538_v27 = vadd.f32 %v3074_v41, %v11821_v58  ;;  %v2850_v48 = vpop.f32.mrb[103].mxu1  ;;  %v3076_v63 = vpop.f32.mrb[71].mxu0 }
 0x666   :  { %v11863_v20 = vsel %vm3148_vm11, %v9505_v29, %v3212_v39  ;;  %v11865_v36 = vsel %vm3150_vm0, %v9537_v23, %v3214_v9  ;;  %v9507_v59 = vadd.f32 %v2850_v48, %v11824_v1  ;;  %v9539_v52 = vadd.f32 %v3076_v63, %v11827_v26 }
 0x667   :  { %vm3151_vm12 = vcmp.ge.f32.partialorder %v9506_v50, 0.0  ;;  %v3215_v38 = vmul.f32 0.01, %v9506_v50  ;;  %vm3153_vm13 = vcmp.ge.f32.partialorder %v9538_v27, 0.0  ;;  %v3217_v18 = vmul.f32 0.01, %v9538_v27 }
 0x668   :  { %vm3152_vm14 = vcmp.ge.f32.partialorder %v9507_v59, 0.0  ;;  %v3216_v44 = vmul.f32 0.01, %v9507_v59  ;;  %vm3154_vm15 = vcmp.ge.f32.partialorder %v9539_v52, 0.0  ;;  %v3218_v57 = vmul.f32 0.01, %v9539_v52 }
 0x669   :  { %v11869_v28 = vsel %vm3151_vm12, %v9506_v50, %v3215_v38  ;;  %v11871_v41 = vsel %vm3153_vm13, %v9538_v27, %v3217_v18  ;;  %v2854_v29 = vpop.f32.mrb[104].mxu1  ;;  %v3080_v51 = vpop.f32.mrb[72].mxu0 }
 0x66a   :  { %v11873_v23 = vsel %vm3152_vm14, %v9507_v59, %v3216_v44  ;;  %v11875_v39 = vsel %vm3154_vm15, %v9539_v52, %v3218_v57  ;;  %v9508_v9 = vadd.f32 %v2854_v29, %v11818_v12  ;;  %v9540_v48 = vadd.f32 %v3080_v51, %v11821_v58  ;;  %v2856_v63 = vpop.f32.mrb[105].mxu1  ;;  %v3082_v46 = vpop.f32.mrb[73].mxu0 }
 0x66b   :  { %v9509_v56 = vadd.f32 %v2856_v63, %v11824_v1  ;;  %v9541_v33 = vadd.f32 %v3082_v46, %v11827_v26  ;;  %v2858_v38 = vpop.f32.mrb[106].mxu1  ;;  %v3084_v50 = vpop.f32.mrb[74].mxu0 }
 0x66c   :  { %vm3155_vm1 = vcmp.ge.f32.partialorder %v9508_v9, 0.0  ;;  %v3219_v27 = vmul.f32 0.01, %v9508_v9  ;;  %vm3157_vm2 = vcmp.ge.f32.partialorder %v9540_v48, 0.0  ;;  %v3221_v18 = vmul.f32 0.01, %v9540_v48 }
 0x66d   :  { %vm3156_vm3 = vcmp.ge.f32.partialorder %v9509_v56, 0.0  ;;  %v3220_v59 = vmul.f32 0.01, %v9509_v56  ;;  %vm3158_vm4 = vcmp.ge.f32.partialorder %v9541_v33, 0.0  ;;  %v3222_v52 = vmul.f32 0.01, %v9541_v33 }
 0x66e   :  { %v11881_v44 = vsel %vm3155_vm1, %v9508_v9, %v3219_v27  ;;  %v11883_v57 = vsel %vm3157_vm2, %v9540_v48, %v3221_v18  ;;  %v9510_v29 = vadd.f32 %v2858_v38, %v11818_v12  ;;  %v9542_v51 = vadd.f32 %v3084_v50, %v11821_v58  ;;  %v2860_v63 = vpop.f32.mrb[107].mxu1  ;;  %v3086_v46 = vpop.f32.mrb[75].mxu0 }
 0x66f   :  { %v11887_v0 = vsel %vm3156_vm3, %v9509_v56, %v3220_v59  ;;  %v11889_v2 = vsel %vm3158_vm4, %v9541_v33, %v3222_v52  ;;  %v9511_v13 = vadd.f32 %v2860_v63, %v11824_v1  ;;  %v9543_v5 = vadd.f32 %v3086_v46, %v11827_v26  ;;  %v2864_v10 = vpop.f32.mrb[108].mxu1  ;;  %v3090_v40 = vpop.f32.mrb[76].mxu0 }
 0x670   :  { %vm3159_vm5 = vcmp.ge.f32.partialorder %v9510_v29, 0.0  ;;  %v3223_v9 = vmul.f32 0.01, %v9510_v29  ;;  %vm3161_vm6 = vcmp.ge.f32.partialorder %v9542_v51, 0.0  ;;  %v3225_v48 = vmul.f32 0.01, %v9542_v51 }
 0x671   :  { %vm3160_vm7 = vcmp.ge.f32.partialorder %v9511_v13, 0.0  ;;  %v3224_v38 = vmul.f32 0.01, %v9511_v13  ;;  %vm3162_vm8 = vcmp.ge.f32.partialorder %v9543_v5, 0.0  ;;  %v3226_v50 = vmul.f32 0.01, %v9543_v5 }
 0x672   :  { %v11893_v27 = vsel %vm3159_vm5, %v9510_v29, %v3223_v9  ;;  %v11895_v56 = vsel %vm3161_vm6, %v9542_v51, %v3225_v48  ;;  %v9512_v33 = vadd.f32 %v2864_v10, %v11818_v12  ;;  %v9544_v18 = vadd.f32 %v3090_v40, %v11821_v58  ;;  %v2866_v59 = vpop.f32.mrb[109].mxu1  ;;  %v3092_v52 = vpop.f32.mrb[77].mxu0 }
 0x673   :  { %13972 = vst [vmem:[#allocation151_spill] sm:$0xff] %v11895_v56  ;;  %v11899_v63 = vsel %vm3160_vm7, %v9511_v13, %v3224_v38  ;;  %v11901_v46 = vsel %vm3162_vm8, %v9543_v5, %v3226_v50  ;;  %v9513_v43 = vadd.f32 %v2866_v59, %v11824_v1  ;;  %v9545_v37 = vadd.f32 %v3092_v52, %v11827_v26  ;;  %v2868_v19 = vpop.f32.mrb[110].mxu1  ;;  %v3094_v3 = vpop.f32.mrb[78].mxu0 }
 0x674   :  { %vm3163_vm10 = vcmp.ge.f32.partialorder %v9512_v33, 0.0  ;;  %v3227_v29 = vmul.f32 0.01, %v9512_v33  ;;  %vm3165_vm11 = vcmp.ge.f32.partialorder %v9544_v18, 0.0  ;;  %v3229_v51 = vmul.f32 0.01, %v9544_v18 }
 0x675   :  { %vm3164_vm0 = vcmp.ge.f32.partialorder %v9513_v43, 0.0  ;;  %v3228_v10 = vmul.f32 0.01, %v9513_v43  ;;  %vm3166_vm12 = vcmp.ge.f32.partialorder %v9545_v37, 0.0  ;;  %v3230_v40 = vmul.f32 0.01, %v9545_v37 }
 0x676   :  { %v11905_v9 = vsel %vm3163_vm10, %v9512_v33, %v3227_v29  ;;  %v11907_v13 = vsel %vm3165_vm11, %v9544_v18, %v3229_v51  ;;  %v9514_v5 = vadd.f32 %v2868_v19, %v11818_v12  ;;  %v9546_v48 = vadd.f32 %v3094_v3, %v11821_v58  ;;  %v2870_v38 = vpop.f32.mrb[111].mxu1  ;;  %v3096_v50 = vpop.f32.mrb[79].mxu0 }
 0x677   :  { %13973 = vst [vmem:[#allocation152_spill] sm:$0xff] %v11907_v13  ;;  %v11911_v59 = vsel %vm3164_vm0, %v9513_v43, %v3228_v10  ;;  %v11913_v52 = vsel %vm3166_vm12, %v9545_v37, %v3230_v40  ;;  %v9515_v15 = vadd.f32 %v2870_v38, %v11824_v1  ;;  %v9547_v11 = vadd.f32 %v3096_v50, %v11827_v26  ;;  %v2874_v14 = vpop.f32.mrb[112].mxu1  ;;  %v3100_v25 = vpop.f32.mrb[80].mxu0 }
 0x678   :  { %13974 = vst [vmem:[#allocation153_spill] sm:$0xff] %v11913_v52  ;;  %vm3167_vm13 = vcmp.ge.f32.partialorder %v9514_v5, 0.0  ;;  %v3231_v33 = vmul.f32 0.01, %v9514_v5  ;;  %vm3169_vm14 = vcmp.ge.f32.partialorder %v9546_v48, 0.0  ;;  %v9516_v37 = vadd.f32 %v2874_v14, %v11818_v12  ;;  %v2876_v10 = vpop.f32.mrb[113].mxu1 }
 0x679   :  { %v3233_v18 = vmul.f32 0.01, %v9546_v48  ;;  %vm3168_vm15 = vcmp.ge.f32.partialorder %v9515_v15, 0.0  ;;  %v3232_v19 = vmul.f32 0.01, %v9515_v15  ;;  %vm3170_vm1 = vcmp.ge.f32.partialorder %v9547_v11, 0.0 }
 0x67a   :  { %v3234_v3 = vmul.f32 0.01, %v9547_v11  ;;  %v11917_v29 = vsel %vm3167_vm13, %v9514_v5, %v3231_v33  ;;  %v9548_v51 = vadd.f32 %v3100_v25, %v11821_v58  ;;  %v3102_v40 = vpop.f32.mrb[81].mxu0  ;;  %v9517_v60 = vadd.f32 %v2876_v10, %v11824_v1  ;;  %v2878_v22 = vpop.f32.mrb[114].mxu1 }
 0x67b   :  { %v11919_v43 = vsel %vm3169_vm14, %v9546_v48, %v3233_v18  ;;  %v11923_v38 = vsel %vm3168_vm15, %v9515_v15, %v3232_v19  ;;  %v9549_v53 = vadd.f32 %v3102_v40, %v11827_v26  ;;  %v3104_v17 = vpop.f32.mrb[82].mxu0  ;;  %vm3171_vm2 = vcmp.ge.f32.partialorder %v9516_v37, 0.0  ;;  %v2880_v19 = vpop.f32.mrb[115].mxu1 }
 0x67c   :  { %13975 = vst [vmem:[#allocation154_spill] sm:$0xff] %v11919_v43  ;;  %v11925_v50 = vsel %vm3170_vm1, %v9547_v11, %v3234_v3  ;;  %v3235_v5 = vmul.f32 0.01, %v9516_v37  ;;  %vm3173_vm3 = vcmp.ge.f32.partialorder %v9548_v51, 0.0  ;;  %v3237_v48 = vmul.f32 0.01, %v9548_v51 }
 0x67d   :  { %13976 = vst [vmem:[#allocation155_spill] sm:$0xff] %v11925_v50  ;;  %vm3172_vm4 = vcmp.ge.f32.partialorder %v9517_v60, 0.0  ;;  %v3236_v14 = vmul.f32 0.01, %v9517_v60  ;;  %vm3174_vm5 = vcmp.ge.f32.partialorder %v9549_v53, 0.0  ;;  %v9518_v11 = vadd.f32 %v2878_v22, %v11818_v12  ;;  %v3106_v3 = vpop.f32.mrb[83].mxu0 }
 0x67e   :  { %v3238_v25 = vmul.f32 0.01, %v9549_v53  ;;  %v11929_v33 = vsel %vm3171_vm2, %v9516_v37, %v3235_v5  ;;  %v11931_v15 = vsel %vm3173_vm3, %v9548_v51, %v3237_v48  ;;  %v9550_v18 = vadd.f32 %v3104_v17, %v11821_v58 }
 0x67f   :  { %13977 = vst [vmem:[#allocation156_spill] sm:$0xff] %v11931_v15  ;;  %v11935_v10 = vsel %vm3172_vm4, %v9517_v60, %v3236_v14  ;;  %v9519_v21 = vadd.f32 %v2880_v19, %v11824_v1  ;;  %v9551_v16 = vadd.f32 %v3106_v3, %v11827_v26  ;;  %v2884_v35 = vpop.f32.mrb[116].mxu1  ;;  %v3110_v31 = vpop.f32.mrb[84].mxu0  ;;  %vm3175_vm6 = vcmp.ge.f32.partialorder %v9518_v11, 0.0 }
 0x680   :  { %v11937_v40 = vsel %vm3174_vm5, %v9549_v53, %v3238_v25  ;;  %v3239_v37 = vmul.f32 0.01, %v9518_v11  ;;  %vm3177_vm7 = vcmp.ge.f32.partialorder %v9550_v18, 0.0  ;;  %v3241_v51 = vmul.f32 0.01, %v9550_v18  ;;  %v2886_v14 = vpop.f32.mrb[117].mxu1 }
 0x681   :  { %13978 = vst [vmem:[#allocation157_spill] sm:$0xff] %v11937_v40  ;;  %vm3176_vm8 = vcmp.ge.f32.partialorder %v9519_v21, 0.0  ;;  %v3240_v22 = vmul.f32 0.01, %v9519_v21  ;;  %vm3178_vm10 = vcmp.ge.f32.partialorder %v9551_v16, 0.0  ;;  %v9520_v53 = vadd.f32 %v2884_v35, %v11818_v12  ;;  %v3112_v25 = vpop.f32.mrb[85].mxu0 }
 0x682   :  { %v3242_v17 = vmul.f32 0.01, %v9551_v16  ;;  %v11941_v5 = vsel %vm3175_vm6, %v9518_v11, %v3239_v37  ;;  %v11943_v60 = vsel %vm3177_vm7, %v9550_v18, %v3241_v51  ;;  %v9552_v48 = vadd.f32 %v3110_v31, %v11821_v58  ;;  %v2888_v54 = vpop.f32.mrb[118].mxu1  ;;  %v3114_v47 = vpop.f32.mrb[86].mxu0 }
 0x683   :  { %13979 = vst [vmem:[#allocation158_spill] sm:$0xff] %v11943_v60  ;;  %v11947_v19 = vsel %vm3176_vm8, %v9519_v21, %v3240_v22  ;;  %v9521_v34 = vadd.f32 %v2886_v14, %v11824_v1  ;;  %v9553_v30 = vadd.f32 %v3112_v25, %v11827_v26  ;;  %vm3179_vm11 = vcmp.ge.f32.partialorder %v9520_v53, 0.0  ;;  %v2890_v22 = vpop.f32.mrb[119].mxu1 }
 0x684   :  { %v11949_v3 = vsel %vm3178_vm10, %v9551_v16, %v3242_v17  ;;  %v3243_v11 = vmul.f32 0.01, %v9520_v53  ;;  %vm3181_vm0 = vcmp.ge.f32.partialorder %v9552_v48, 0.0  ;;  %v3245_v18 = vmul.f32 0.01, %v9552_v48  ;;  %v3116_v17 = vpop.f32.mrb[87].mxu0 }
 0x685   :  { %13980 = vst [vmem:[#allocation159_spill] sm:$0xff] %v11949_v3  ;;  %vm3180_vm12 = vcmp.ge.f32.partialorder %v9521_v34, 0.0  ;;  %v3244_v35 = vmul.f32 0.01, %v9521_v34  ;;  %vm3182_vm13 = vcmp.ge.f32.partialorder %v9553_v30, 0.0  ;;  %v9522_v16 = vadd.f32 %v2888_v54, %v11818_v12 }
 0x686   :  { %v3246_v31 = vmul.f32 0.01, %v9553_v30  ;;  %v11953_v37 = vsel %vm3179_vm11, %v9520_v53, %v3243_v11  ;;  %v11955_v21 = vsel %vm3181_vm0, %v9552_v48, %v3245_v18  ;;  %v9554_v51 = vadd.f32 %v3114_v47, %v11821_v58 }
 0x687   :  { %13981 = vst [vmem:[#allocation160_spill] sm:$0xff] %v11955_v21  ;;  %v11959_v14 = vsel %vm3180_vm12, %v9521_v34, %v3244_v35  ;;  %v9523_v61 = vadd.f32 %v2890_v22, %v11824_v1  ;;  %v9555_v45 = vadd.f32 %v3116_v17, %v11827_v26  ;;  %v2894_v60 = vpop.f32.mrb[120].mxu1  ;;  %v3120_v15 = vpop.f32.mrb[88].mxu0  ;;  %vm3183_vm14 = vcmp.ge.f32.partialorder %v9522_v16, 0.0 }
 0x688   :  { %v11961_v25 = vsel %vm3182_vm13, %v9553_v30, %v3246_v31  ;;  %v3247_v53 = vmul.f32 0.01, %v9522_v16  ;;  %vm3185_vm15 = vcmp.ge.f32.partialorder %v9554_v51, 0.0  ;;  %v3249_v48 = vmul.f32 0.01, %v9554_v51  ;;  %v2896_v35 = vpop.f32.mrb[121].mxu1 }
 0x689   :  { %13982 = vst [vmem:[#allocation161_spill] sm:$0xff] %v11961_v25  ;;  %vm3184_vm1 = vcmp.ge.f32.partialorder %v9523_v61, 0.0  ;;  %v3248_v54 = vmul.f32 0.01, %v9523_v61  ;;  %vm3186_vm2 = vcmp.ge.f32.partialorder %v9555_v45, 0.0  ;;  %v9524_v30 = vadd.f32 %v2894_v60, %v11818_v12  ;;  %v3122_v31 = vpop.f32.mrb[89].mxu0 }
 0x68a   :  { %v3250_v47 = vmul.f32 0.01, %v9555_v45  ;;  %v11965_v11 = vsel %vm3183_vm14, %v9522_v16, %v3247_v53  ;;  %v11967_v34 = vsel %vm3185_vm15, %v9554_v51, %v3249_v48  ;;  %v9556_v18 = vadd.f32 %v3120_v15, %v11821_v58  ;;  %v2898_v3 = vpop.f32.mrb[122].mxu1  ;;  %v3124_v40 = vpop.f32.mrb[90].mxu0 }
 0x68b   :  { %13983 = vst [vmem:[#allocation162_spill] sm:$0xff] %v11967_v34  ;;  %v11971_v22 = vsel %vm3184_vm1, %v9523_v61, %v3248_v54  ;;  %v9525_v21 = vadd.f32 %v2896_v35, %v11824_v1  ;;  %v9557_v25 = vadd.f32 %v3122_v31, %v11827_v26  ;;  %vm3187_vm3 = vcmp.ge.f32.partialorder %v9524_v30, 0.0  ;;  %v2900_v54 = vpop.f32.mrb[123].mxu1 }
 0x68c   :  { %v11973_v17 = vsel %vm3186_vm2, %v9555_v45, %v3250_v47  ;;  %v3251_v16 = vmul.f32 0.01, %v9524_v30  ;;  %vm3189_vm4 = vcmp.ge.f32.partialorder %v9556_v18, 0.0  ;;  %v3253_v51 = vmul.f32 0.01, %v9556_v18  ;;  %v3126_v47 = vpop.f32.mrb[91].mxu0 }
 0x68d   :  { %13984 = vst [vmem:[#allocation163_spill] sm:$0xff] %v11973_v17  ;;  %vm3188_vm5 = vcmp.ge.f32.partialorder %v9525_v21, 0.0  ;;  %v3252_v60 = vmul.f32 0.01, %v9525_v21  ;;  %vm3190_vm6 = vcmp.ge.f32.partialorder %v9557_v25, 0.0  ;;  %v9526_v45 = vadd.f32 %v2898_v3, %v11818_v12 }
 0x68e   :  { %v3254_v15 = vmul.f32 0.01, %v9557_v25  ;;  %v11977_v53 = vsel %vm3187_vm3, %v9524_v30, %v3251_v16  ;;  %v11979_v61 = vsel %vm3189_vm4, %v9556_v18, %v3253_v51  ;;  %v9558_v48 = vadd.f32 %v3124_v40, %v11821_v58 }
 0x68f   :  { %13985 = vst [vmem:[#allocation164_spill] sm:$0xff] %v11979_v61  ;;  %v11983_v35 = vsel %vm3188_vm5, %v9525_v21, %v3252_v60  ;;  %v9527_v34 = vadd.f32 %v2900_v54, %v11824_v1  ;;  %v9559_v17 = vadd.f32 %v3126_v47, %v11827_v26  ;;  %v2904_v43 = vpop.f32.mrb[124].mxu1  ;;  %v3130_v13 = vpop.f32.mrb[92].mxu0  ;;  %vm3191_vm7 = vcmp.ge.f32.partialorder %v9526_v45, 0.0 }
 0x690   :  { %v11985_v31 = vsel %vm3190_vm6, %v9557_v25, %v3254_v15  ;;  %v3255_v30 = vmul.f32 0.01, %v9526_v45  ;;  %vm3193_vm8 = vcmp.ge.f32.partialorder %v9558_v48, 0.0  ;;  %v3257_v18 = vmul.f32 0.01, %v9558_v48  ;;  %v2906_v60 = vpop.f32.mrb[125].mxu1 }
 0x691   :  { %13986 = vst [vmem:[#allocation165_spill] sm:$0xff] %v11985_v31  ;;  %vm3192_vm10 = vcmp.ge.f32.partialorder %v9527_v34, 0.0  ;;  %v3256_v3 = vmul.f32 0.01, %v9527_v34  ;;  %vm3194_vm11 = vcmp.ge.f32.partialorder %v9559_v17, 0.0  ;;  %v9528_v25 = vadd.f32 %v2904_v43, %v11818_v12  ;;  %v3132_v15 = vpop.f32.mrb[93].mxu0 }
 0x692   :  { %v3258_v40 = vmul.f32 0.01, %v9559_v17  ;;  %v11989_v16 = vsel %vm3191_vm7, %v9526_v45, %v3255_v30  ;;  %v11991_v21 = vsel %vm3193_vm8, %v9558_v48, %v3257_v18  ;;  %v9560_v51 = vadd.f32 %v3130_v13, %v11821_v58  ;;  %v2908_v50 = vpop.f32.mrb[126].mxu1  ;;  %v3134_v52 = vpop.f32.mrb[94].mxu0 }
 0x693   :  { %13987 = vst [vmem:[#allocation166_spill] sm:$0xff] %v11991_v21  ;;  %v11995_v54 = vsel %vm3192_vm10, %v9527_v34, %v3256_v3  ;;  %v9529_v61 = vadd.f32 %v2906_v60, %v11824_v1  ;;  %v9561_v31 = vadd.f32 %v3132_v15, %v11827_v26  ;;  %vm3195_vm0 = vcmp.ge.f32.partialorder %v9528_v25, 0.0  ;;  %v2910_v3 = vpop.f32.mrb[127].mxu1 }
 0x694   :  { %v11997_v47 = vsel %vm3194_vm11, %v9559_v17, %v3258_v40  ;;  %v3259_v45 = vmul.f32 0.01, %v9528_v25  ;;  %vm3197_vm12 = vcmp.ge.f32.partialorder %v9560_v51, 0.0  ;;  %v3261_v48 = vmul.f32 0.01, %v9560_v51  ;;  %v3136_v40 = vpop.f32.mrb[95].mxu0 }
 0x695   :  { %13988 = vst [vmem:[#allocation167_spill] sm:$0xff] %v11997_v47  ;;  %vm3196_vm13 = vcmp.ge.f32.partialorder %v9529_v61, 0.0  ;;  %v3260_v43 = vmul.f32 0.01, %v9529_v61  ;;  %vm3198_vm14 = vcmp.ge.f32.partialorder %v9561_v31, 0.0  ;;  %v9530_v17 = vadd.f32 %v2908_v50, %v11818_v12 }
 0x696   :  { %v3262_v13 = vmul.f32 0.01, %v9561_v31  ;;  %v12001_v30 = vsel %vm3195_vm0, %v9528_v25, %v3259_v45  ;;  %v12003_v34 = vsel %vm3197_vm12, %v9560_v51, %v3261_v48  ;;  %v9562_v18 = vadd.f32 %v3134_v52, %v11821_v58 }
 0x697   :  { %v12007_v60 = vsel %vm3196_vm13, %v9529_v61, %v3260_v43  ;;  %v9531_v21 = vadd.f32 %v2910_v3, %v11824_v1  ;;  %v9563_v47 = vadd.f32 %v3136_v40, %v11827_v26  ;;  %vm3199_vm15 = vcmp.ge.f32.partialorder %v9530_v17, 0.0 }
 0x698   :  { %v12009_v15 = vsel %vm3198_vm14, %v9561_v31, %v3262_v13  ;;  %v3263_v56 = vmul.f32 0.01, %v9530_v17  ;;  %vm3201_vm1 = vcmp.ge.f32.partialorder %v9562_v18, 0.0  ;;  %v3265_v25 = vmul.f32 0.01, %v9562_v18 }
 0x699   :  { %vm3200_vm2 = vcmp.ge.f32.partialorder %v9531_v21, 0.0  ;;  %v3264_v51 = vmul.f32 0.01, %v9531_v21  ;;  %vm3202_vm3 = vcmp.ge.f32.partialorder %v9563_v47, 0.0  ;;  %v3266_v12 = vmul.f32 0.01, %v9563_v47 }
 0x69a   :  { %v12013_v50 = vsel %vm3199_vm15, %v9530_v17, %v3263_v56  ;;  %v12015_v58 = vsel %vm3201_vm1, %v9562_v18, %v3265_v25 }
 0x69b   :  { %v12017_v52 = vsel %vm3200_vm2, %v9531_v21, %v3264_v51  ;;  %v12019_v61 = vsel %vm3202_vm3, %v9563_v47, %v3266_v12 }
 0x69c   :  { %10750 = dma.done.wait [#allocation9 + $0x1], 32768 }
 0x69d   :  { %10751 = vsyncadd [#allocation9 + $0x1], 4294934528  ;;  %v12023_v1 = vpack.c.bf16 %v11849_v49, %v11839_v42  ;;  %v3367_v26 = vld [vmem:[#allocation3 + $0x8] sm:$0xff]  ;;  %v3369_v31 = vld [vmem:[#allocation3 + $0x18] sm:$0xff] }
 0x69e   :  { %v3366_v56 = vld [vmem:[#allocation3] sm:$0xff]  ;;  %3667 = vmatprep.subr.bf16.mxu1 %v3367_v26  ;;  %3893 = vmatprep.subr.bf16.mxu0 %v3369_v31  ;;  %v3368_v45 = vld [vmem:[#allocation3 + $0x10] sm:$0xff]  ;;  %v3375_v21 = vld [vmem:[#allocation3 + $0x48] sm:$0xff] }
 0x69f   :  { %3699 = vmatprep.mubr.bf16.mxu1 %v12023_v1  ;;  %3925 = vmatprep.mubr.bf16.mxu0 %v12023_v1  ;;  %v3377_v48 = vld [vmem:[#allocation3 + $0x58] sm:$0xff]  ;;  %v3374_v47 = vld [vmem:[#allocation3 + $0x40] sm:$0xff]  ;;  %v3376_v43 = vld [vmem:[#allocation3 + $0x50] sm:$0xff] }
 0x6a0   :  { %3668 = vmatpush1.bf16.msra.mxu1 %v3366_v56  ;;  %3894 = vmatpush1.bf16.msra.mxu0 %v3368_v45  ;;  %v3383_v42 = vld [vmem:[#allocation3 + $0x88] sm:$0xff]  ;;  %v3385_v49 = vld [vmem:[#allocation3 + $0x98] sm:$0xff]  ;;  %v3382_v13 = vld [vmem:[#allocation3 + $0x80] sm:$0xff] }
 0x6a1   :  { %3669 = vmatprep.subr.bf16.mxu1 %v3375_v21  ;;  %3895 = vmatprep.subr.bf16.mxu0 %v3377_v48  ;;  %v3384_v17 = vld [vmem:[#allocation3 + $0x90] sm:$0xff]  ;;  %v3391_v18 = vld [vmem:[#allocation3 + $0xc8] sm:$0xff]  ;;  %v3393_v3 = vld [vmem:[#allocation3 + $0xd8] sm:$0xff] }
 0x6a2   :  { %v3390_v40 = vld [vmem:[#allocation3 + $0xc0] sm:$0xff]  ;;  %v3392_v25 = vld [vmem:[#allocation3 + $0xd0] sm:$0xff]  ;;  %v3399_v51 = vld [vmem:[#allocation3 + $0x108] sm:$0xff] }
 0x6a3   :  { %v3401_v12 = vld [vmem:[#allocation3 + $0x118] sm:$0xff]  ;;  %v3398_v26 = vld [vmem:[#allocation3 + $0x100] sm:$0xff]  ;;  %v3400_v31 = vld [vmem:[#allocation3 + $0x110] sm:$0xff] }
 0x6a4   :  { %3670 = vmatpush1.bf16.msra.mxu1 %v3374_v47  ;;  %3896 = vmatpush1.bf16.msra.mxu0 %v3376_v43  ;;  %v3407_v56 = vld [vmem:[#allocation3 + $0x148] sm:$0xff]  ;;  %v3409_v45 = vld [vmem:[#allocation3 + $0x158] sm:$0xff]  ;;  %v3406_v21 = vld [vmem:[#allocation3 + $0x140] sm:$0xff] }
 0x6a5   :  { %3671 = vmatprep.subr.bf16.mxu1 %v3383_v42  ;;  %3897 = vmatprep.subr.bf16.mxu0 %v3385_v49  ;;  %v3408_v48 = vld [vmem:[#allocation3 + $0x150] sm:$0xff]  ;;  %v3415_v47 = vld [vmem:[#allocation3 + $0x188] sm:$0xff]  ;;  %v3417_v43 = vld [vmem:[#allocation3 + $0x198] sm:$0xff] }
 0x6a6   :  { %v3414_v42 = vld [vmem:[#allocation3 + $0x180] sm:$0xff]  ;;  %v3416_v49 = vld [vmem:[#allocation3 + $0x190] sm:$0xff] }
 0x6a8   :  { %3672 = vmatpush1.bf16.msra.mxu1 %v3382_v13  ;;  %3898 = vmatpush1.bf16.msra.mxu0 %v3384_v17  ;;  %v3423_v13 = vld [vmem:[#allocation3 + $0x1c8] sm:$0xff]  ;;  %v3425_v17 = vld [vmem:[#allocation3 + $0x1d8] sm:$0xff] }
 0x6a9   :  { %3673 = vmatprep.subr.bf16.mxu1 %v3391_v18  ;;  %3899 = vmatprep.subr.bf16.mxu0 %v3393_v3  ;;  %v3422_v18 = vld [vmem:[#allocation3 + $0x1c0] sm:$0xff]  ;;  %v3424_v3 = vld [vmem:[#allocation3 + $0x1d0] sm:$0xff] }
 0x6ac   :  { %3674 = vmatpush1.bf16.msra.mxu1 %v3390_v40  ;;  %3900 = vmatpush1.bf16.msra.mxu0 %v3392_v25  ;;  %v3431_v40 = vld [vmem:[#allocation3 + $0x208] sm:$0xff]  ;;  %v3433_v25 = vld [vmem:[#allocation3 + $0x218] sm:$0xff] }
 0x6ad   :  { %3675 = vmatprep.subr.bf16.mxu1 %v3399_v51  ;;  %3901 = vmatprep.subr.bf16.mxu0 %v3401_v12  ;;  %v3430_v51 = vld [vmem:[#allocation3 + $0x200] sm:$0xff]  ;;  %v3432_v12 = vld [vmem:[#allocation3 + $0x210] sm:$0xff] }
 0x6b0   :  { %3676 = vmatpush1.bf16.msra.mxu1 %v3398_v26  ;;  %3902 = vmatpush1.bf16.msra.mxu0 %v3400_v31  ;;  %v3439_v26 = vld [vmem:[#allocation3 + $0x248] sm:$0xff]  ;;  %v3441_v31 = vld [vmem:[#allocation3 + $0x258] sm:$0xff] }
 0x6b1   :  { %3677 = vmatprep.subr.bf16.mxu1 %v3407_v56  ;;  %3903 = vmatprep.subr.bf16.mxu0 %v3409_v45  ;;  %v3438_v56 = vld [vmem:[#allocation3 + $0x240] sm:$0xff]  ;;  %v3440_v45 = vld [vmem:[#allocation3 + $0x250] sm:$0xff] }
 0x6b4   :  { %3678 = vmatpush1.bf16.msra.mxu1 %v3406_v21  ;;  %3904 = vmatpush1.bf16.msra.mxu0 %v3408_v48  ;;  %v3447_v21 = vld [vmem:[#allocation3 + $0x288] sm:$0xff]  ;;  %v3449_v48 = vld [vmem:[#allocation3 + $0x298] sm:$0xff] }
 0x6b5   :  { %3679 = vmatprep.subr.bf16.mxu1 %v3415_v47  ;;  %3905 = vmatprep.subr.bf16.mxu0 %v3417_v43  ;;  %v3446_v47 = vld [vmem:[#allocation3 + $0x280] sm:$0xff]  ;;  %v3448_v43 = vld [vmem:[#allocation3 + $0x290] sm:$0xff] }
 0x6b8   :  { %3680 = vmatpush1.bf16.msra.mxu1 %v3414_v42  ;;  %3906 = vmatpush1.bf16.msra.mxu0 %v3416_v49  ;;  %v3455_v42 = vld [vmem:[#allocation3 + $0x2c8] sm:$0xff]  ;;  %v3457_v49 = vld [vmem:[#allocation3 + $0x2d8] sm:$0xff] }
 0x6b9   :  { %3681 = vmatprep.subr.bf16.mxu1 %v3423_v13  ;;  %3907 = vmatprep.subr.bf16.mxu0 %v3425_v17  ;;  %v3454_v13 = vld [vmem:[#allocation3 + $0x2c0] sm:$0xff]  ;;  %v3456_v17 = vld [vmem:[#allocation3 + $0x2d0] sm:$0xff] }
 0x6bc   :  { %3682 = vmatpush1.bf16.msra.mxu1 %v3422_v18  ;;  %3908 = vmatpush1.bf16.msra.mxu0 %v3424_v3  ;;  %v3463_v18 = vld [vmem:[#allocation3 + $0x308] sm:$0xff]  ;;  %v3465_v3 = vld [vmem:[#allocation3 + $0x318] sm:$0xff] }
 0x6bd   :  { %3683 = vmatprep.subr.bf16.mxu1 %v3431_v40  ;;  %3909 = vmatprep.subr.bf16.mxu0 %v3433_v25  ;;  %v3462_v40 = vld [vmem:[#allocation3 + $0x300] sm:$0xff]  ;;  %v3464_v25 = vld [vmem:[#allocation3 + $0x310] sm:$0xff] }
 0x6c0   :  { %3684 = vmatpush1.bf16.msra.mxu1 %v3430_v51  ;;  %3910 = vmatpush1.bf16.msra.mxu0 %v3432_v12  ;;  %v3471_v51 = vld [vmem:[#allocation3 + $0x348] sm:$0xff]  ;;  %v3473_v12 = vld [vmem:[#allocation3 + $0x358] sm:$0xff] }
 0x6c1   :  { %3685 = vmatprep.subr.bf16.mxu1 %v3439_v26  ;;  %3911 = vmatprep.subr.bf16.mxu0 %v3441_v31  ;;  %v3470_v26 = vld [vmem:[#allocation3 + $0x340] sm:$0xff]  ;;  %v3472_v31 = vld [vmem:[#allocation3 + $0x350] sm:$0xff] }
 0x6c4   :  { %3686 = vmatpush1.bf16.msra.mxu1 %v3438_v56  ;;  %3912 = vmatpush1.bf16.msra.mxu0 %v3440_v45  ;;  %v3479_v56 = vld [vmem:[#allocation3 + $0x388] sm:$0xff]  ;;  %v3481_v45 = vld [vmem:[#allocation3 + $0x398] sm:$0xff] }
 0x6c5   :  { %3687 = vmatprep.subr.bf16.mxu1 %v3447_v21  ;;  %3913 = vmatprep.subr.bf16.mxu0 %v3449_v48  ;;  %v3478_v21 = vld [vmem:[#allocation3 + $0x380] sm:$0xff]  ;;  %v3480_v48 = vld [vmem:[#allocation3 + $0x390] sm:$0xff] }
 0x6c8   :  { %3688 = vmatpush1.bf16.msra.mxu1 %v3446_v47  ;;  %3914 = vmatpush1.bf16.msra.mxu0 %v3448_v43  ;;  %v3487_v47 = vld [vmem:[#allocation3 + $0x3c8] sm:$0xff]  ;;  %v3489_v43 = vld [vmem:[#allocation3 + $0x3d8] sm:$0xff] }
 0x6c9   :  { %3689 = vmatprep.subr.bf16.mxu1 %v3455_v42  ;;  %3915 = vmatprep.subr.bf16.mxu0 %v3457_v49  ;;  %v3486_v42 = vld [vmem:[#allocation3 + $0x3c0] sm:$0xff]  ;;  %v3488_v49 = vld [vmem:[#allocation3 + $0x3d0] sm:$0xff] }
 0x6cc   :  { %3690 = vmatpush1.bf16.msra.mxu1 %v3454_v13  ;;  %3916 = vmatpush1.bf16.msra.mxu0 %v3456_v17  ;;  %v3495_v13 = vld [vmem:[#allocation3 + $0x408] sm:$0xff]  ;;  %v3497_v17 = vld [vmem:[#allocation3 + $0x418] sm:$0xff] }
 0x6cd   :  { %3691 = vmatprep.subr.bf16.mxu1 %v3463_v18  ;;  %3917 = vmatprep.subr.bf16.mxu0 %v3465_v3  ;;  %v12029_v18 = vpack.c.bf16 %v11845_v6, %v11833_v4  ;;  %v3494_v3 = vld [vmem:[#allocation3 + $0x400] sm:$0xff]  ;;  %v3504_v6 = vld [vmem:[#allocation3 + $0x450] sm:$0xff] }
 0x6ce   :  { %v3502_v4 = vld [vmem:[#allocation3 + $0x440] sm:$0xff] }
 0x6d0   :  { %3692 = vmatpush1.bf16.msra.mxu1 %v3462_v40  ;;  %3918 = vmatpush1.bf16.msra.mxu0 %v3464_v25  ;;  %v3496_v40 = vld [vmem:[#allocation3 + $0x410] sm:$0xff]  ;;  %v3503_v25 = vld [vmem:[#allocation3 + $0x448] sm:$0xff] }
 0x6d1   :  { %3693 = vmatprep.subr.bf16.mxu1 %v3471_v51  ;;  %3919 = vmatprep.subr.bf16.mxu0 %v3473_v12  ;;  %v3505_v51 = vld [vmem:[#allocation3 + $0x458] sm:$0xff]  ;;  %v12033_v12 = vpack.c.bf16 %v11873_v23, %v11863_v20  ;;  %v12041_v20 = vpack.c.bf16 %v11869_v28, %v11857_v32  ;;  %v3510_v23 = vld [vmem:[#allocation3 + $0x480] sm:$0xff]  ;;  %v3520_v28 = vld [vmem:[#allocation3 + $0x4d0] sm:$0xff] }
 0x6d2   :  { %v3518_v32 = vld [vmem:[#allocation3 + $0x4c0] sm:$0xff] }
 0x6d4   :  { %3694 = vmatpush1.bf16.msra.mxu1 %v3470_v26  ;;  %3920 = vmatpush1.bf16.msra.mxu0 %v3472_v31  ;;  %v3511_v26 = vld [vmem:[#allocation3 + $0x488] sm:$0xff]  ;;  %v3513_v31 = vld [vmem:[#allocation3 + $0x498] sm:$0xff] }
 0x6d5   :  { %3695 = vmatprep.subr.bf16.mxu1 %v3479_v56  ;;  %3921 = vmatprep.subr.bf16.mxu0 %v3481_v45  ;;  %v3512_v56 = vld [vmem:[#allocation3 + $0x490] sm:$0xff]  ;;  %v3519_v45 = vld [vmem:[#allocation3 + $0x4c8] sm:$0xff] }
 0x6d8   :  { %3696 = vmatpush1.bf16.msra.mxu1 %v3478_v21  ;;  %3922 = vmatpush1.bf16.msra.mxu0 %v3480_v48  ;;  %v3521_v21 = vld [vmem:[#allocation3 + $0x4d8] sm:$0xff]  ;;  %v12045_v48 = vpack.c.bf16 %v11899_v63, %v11887_v0  ;;  %v12053_v0 = vpack.c.bf16 %v11893_v27, %v11881_v44  ;;  %v3526_v63 = vld [vmem:[#allocation3 + $0x500] sm:$0xff]  ;;  %v3536_v27 = vld [vmem:[#allocation3 + $0x550] sm:$0xff] }
 0x6d9   :  { %3697 = vmatprep.subr.bf16.mxu1 %v3487_v47  ;;  %3923 = vmatprep.subr.bf16.mxu0 %v3489_v43  ;;  %v3527_v47 = vld [vmem:[#allocation3 + $0x508] sm:$0xff]  ;;  %v3529_v43 = vld [vmem:[#allocation3 + $0x518] sm:$0xff]  ;;  %v3534_v44 = vld [vmem:[#allocation3 + $0x540] sm:$0xff] }
 0x6dc   :  { %3698 = vmatpush1.bf16.msra.mxu1 %v3486_v42  ;;  %3924 = vmatpush1.bf16.msra.mxu0 %v3488_v49  ;;  %v3528_v42 = vld [vmem:[#allocation3 + $0x510] sm:$0xff]  ;;  %v3535_v49 = vld [vmem:[#allocation3 + $0x548] sm:$0xff] }
 0x6dd   :  { %3780 = vmatprep.subr.bf16.mxu1 %v3495_v13  ;;  %4006 = vmatprep.subr.bf16.mxu0 %v3497_v17  ;;  %v3537_v13 = vld [vmem:[#allocation3 + $0x558] sm:$0xff]  ;;  %v12057_v17 = vpack.c.bf16 %v11923_v38, %v11911_v59  ;;  %v12065_v59 = vpack.c.bf16 %v11917_v29, %v11905_v9  ;;  %v3542_v38 = vld [vmem:[#allocation3 + $0x580] sm:$0xff]  ;;  %v3552_v29 = vld [vmem:[#allocation3 + $0x5d0] sm:$0xff] }
 0x6de   :  { %v3550_v9 = vld [vmem:[#allocation3 + $0x5c0] sm:$0xff] }
 0x6df   :  { %3700 = vmatmul.mubr.bf16.vlgmr.msra.gmra.mrb[128].mxu1 %v12029_v18  ;;  %3926 = vmatmul.mubr.bf16.vlgmr.msra.gmra.mrb[96].mxu0 %v12029_v18 }
 0x6e0   :  { %3781 = vmatpush1.bf16.msra.mxu1 %v3494_v3  ;;  %4007 = vmatpush1.bf16.msra.mxu0 %v3496_v40  ;;  %v3543_v3 = vld [vmem:[#allocation3 + $0x588] sm:$0xff]  ;;  %v3545_v40 = vld [vmem:[#allocation3 + $0x598] sm:$0xff] }
 0x6e1   :  { %3782 = vmatprep.subr.bf16.mxu1 %v3503_v25  ;;  %4008 = vmatprep.subr.bf16.mxu0 %v3505_v51  ;;  %v3544_v25 = vld [vmem:[#allocation3 + $0x590] sm:$0xff]  ;;  %v3551_v51 = vld [vmem:[#allocation3 + $0x5c8] sm:$0xff] }
 0x6e2   :  { %3709 = vmatprep.mubr.bf16.mxu1 %v12033_v12  ;;  %3935 = vmatprep.mubr.bf16.mxu0 %v12033_v12 }
 0x6e4   :  { %3783 = vmatpush1.bf16.msra.mxu1 %v3502_v4  ;;  %4009 = vmatpush1.bf16.msra.mxu0 %v3504_v6  ;;  %v3553_v4 = vld [vmem:[#allocation3 + $0x5d8] sm:$0xff]  ;;  %v12069_v6 = vpack.c.bf16 %v11947_v19, %v11935_v10  ;;  %v12077_v10 = vpack.c.bf16 %v11941_v5, %v11929_v33  ;;  %v3558_v19 = vld [vmem:[#allocation3 + $0x600] sm:$0xff]  ;;  %v3568_v5 = vld [vmem:[#allocation3 + $0x650] sm:$0xff] }
 0x6e5   :  { %3784 = vmatprep.subr.bf16.mxu1 %v3511_v26  ;;  %4010 = vmatprep.subr.bf16.mxu0 %v3513_v31  ;;  %v3559_v26 = vld [vmem:[#allocation3 + $0x608] sm:$0xff]  ;;  %v3561_v31 = vld [vmem:[#allocation3 + $0x618] sm:$0xff]  ;;  %v3566_v33 = vld [vmem:[#allocation3 + $0x640] sm:$0xff] }
 0x6e7   :  { %3710 = vmatmul.mubr.bf16.gmra.mrb[132].mxu1 %v12041_v20  ;;  %3936 = vmatmul.mubr.bf16.gmra.mrb[100].mxu0 %v12041_v20 }
 0x6e8   :  { %3785 = vmatpush1.bf16.msra.mxu1 %v3510_v23  ;;  %4011 = vmatpush1.bf16.msra.mxu0 %v3512_v56  ;;  %v3560_v23 = vld [vmem:[#allocation3 + $0x610] sm:$0xff]  ;;  %v3567_v56 = vld [vmem:[#allocation3 + $0x648] sm:$0xff] }
 0x6e9   :  { %3786 = vmatprep.subr.bf16.mxu1 %v3519_v45  ;;  %4012 = vmatprep.subr.bf16.mxu0 %v3521_v21  ;;  %v3569_v45 = vld [vmem:[#allocation3 + $0x658] sm:$0xff]  ;;  %v12081_v21 = vpack.c.bf16 %v11971_v22, %v11959_v14  ;;  %v12089_v14 = vpack.c.bf16 %v11965_v11, %v11953_v37  ;;  %v3574_v22 = vld [vmem:[#allocation3 + $0x680] sm:$0xff]  ;;  %v3584_v11 = vld [vmem:[#allocation3 + $0x6d0] sm:$0xff] }
 0x6ea   :  { %3719 = vmatprep.mubr.bf16.mxu1 %v12045_v48  ;;  %3945 = vmatprep.mubr.bf16.mxu0 %v12045_v48  ;;  %v3582_v37 = vld [vmem:[#allocation3 + $0x6c0] sm:$0xff] }
 0x6ec   :  { %3787 = vmatpush1.bf16.msra.mxu1 %v3518_v32  ;;  %4013 = vmatpush1.bf16.msra.mxu0 %v3520_v28  ;;  %v3575_v32 = vld [vmem:[#allocation3 + $0x688] sm:$0xff]  ;;  %v3577_v28 = vld [vmem:[#allocation3 + $0x698] sm:$0xff] }
 0x6ed   :  { %3788 = vmatprep.subr.bf16.mxu1 %v3527_v47  ;;  %4014 = vmatprep.subr.bf16.mxu0 %v3529_v43  ;;  %v3576_v47 = vld [vmem:[#allocation3 + $0x690] sm:$0xff]  ;;  %v3583_v43 = vld [vmem:[#allocation3 + $0x6c8] sm:$0xff] }
 0x6ef   :  { %3720 = vmatmul.mubr.bf16.gmra.mrb[136].mxu1 %v12053_v0  ;;  %3946 = vmatmul.mubr.bf16.gmra.mrb[104].mxu0 %v12053_v0 }
 0x6f0   :  { %3789 = vmatpush1.bf16.msra.mxu1 %v3526_v63  ;;  %4015 = vmatpush1.bf16.msra.mxu0 %v3528_v42  ;;  %v3585_v63 = vld [vmem:[#allocation3 + $0x6d8] sm:$0xff]  ;;  %v12093_v42 = vpack.c.bf16 %v11995_v54, %v11983_v35  ;;  %v12101_v35 = vpack.c.bf16 %v11989_v16, %v11977_v53  ;;  %v3590_v54 = vld [vmem:[#allocation3 + $0x700] sm:$0xff]  ;;  %v3600_v16 = vld [vmem:[#allocation3 + $0x750] sm:$0xff] }
 0x6f1   :  { %3790 = vmatprep.subr.bf16.mxu1 %v3535_v49  ;;  %4016 = vmatprep.subr.bf16.mxu0 %v3537_v13  ;;  %v3591_v49 = vld [vmem:[#allocation3 + $0x708] sm:$0xff]  ;;  %v3593_v13 = vld [vmem:[#allocation3 + $0x718] sm:$0xff]  ;;  %v3598_v53 = vld [vmem:[#allocation3 + $0x740] sm:$0xff] }
 0x6f2   :  { %3729 = vmatprep.mubr.bf16.mxu1 %v12057_v17  ;;  %3955 = vmatprep.mubr.bf16.mxu0 %v12057_v17 }
 0x6f4   :  { %3791 = vmatpush1.bf16.msra.mxu1 %v3534_v44  ;;  %4017 = vmatpush1.bf16.msra.mxu0 %v3536_v27  ;;  %v3592_v44 = vld [vmem:[#allocation3 + $0x710] sm:$0xff]  ;;  %v3599_v27 = vld [vmem:[#allocation3 + $0x748] sm:$0xff] }
 0x6f5   :  { %3792 = vmatprep.subr.bf16.mxu1 %v3543_v3  ;;  %4018 = vmatprep.subr.bf16.mxu0 %v3545_v40  ;;  %v3601_v3 = vld [vmem:[#allocation3 + $0x758] sm:$0xff]  ;;  %v12105_v40 = vpack.c.bf16 %v12017_v52, %v12007_v60  ;;  %v12113_v60 = vpack.c.bf16 %v12013_v50, %v12001_v30  ;;  %v3606_v52 = vld [vmem:[#allocation3 + $0x780] sm:$0xff]  ;;  %v3616_v50 = vld [vmem:[#allocation3 + $0x7d0] sm:$0xff] }
 0x6f6   :  { %v3614_v30 = vld [vmem:[#allocation3 + $0x7c0] sm:$0xff] }
 0x6f7   :  { %3730 = vmatmul.mubr.bf16.gmra.mrb[140].mxu1 %v12065_v59  ;;  %3956 = vmatmul.mubr.bf16.gmra.mrb[108].mxu0 %v12065_v59 }
 0x6f8   :  { %3793 = vmatpush1.bf16.msra.mxu1 %v3542_v38  ;;  %4019 = vmatpush1.bf16.msra.mxu0 %v3544_v25  ;;  %v3607_v38 = vld [vmem:[#allocation3 + $0x788] sm:$0xff]  ;;  %v3609_v25 = vld [vmem:[#allocation3 + $0x798] sm:$0xff] }
 0x6f9   :  { %3794 = vmatprep.subr.bf16.mxu1 %v3551_v51  ;;  %4020 = vmatprep.subr.bf16.mxu0 %v3553_v4  ;;  %v3608_v51 = vld [vmem:[#allocation3 + $0x790] sm:$0xff]  ;;  %v3615_v4 = vld [vmem:[#allocation3 + $0x7c8] sm:$0xff] }
 0x6fa   :  { %3739 = vmatprep.mubr.bf16.mxu1 %v12069_v6  ;;  %3965 = vmatprep.mubr.bf16.mxu0 %v12069_v6 }
 0x6fc   :  { %3795 = vmatpush1.bf16.msra.mxu1 %v3550_v9  ;;  %4021 = vmatpush1.bf16.msra.mxu0 %v3552_v29  ;;  %v3617_v9 = vld [vmem:[#allocation3 + $0x7d8] sm:$0xff]  ;;  %v12117_v29 = vpack.c.bf16 %v11851_v62, %v11841_v8  ;;  %v12125_v8 = vpack.c.bf16 %v11847_v24, %v11835_v7  ;;  %v3370_v62 = vld [vmem:[#allocation3 + $0x20] sm:$0xff]  ;;  %v3380_v24 = vld [vmem:[#allocation3 + $0x70] sm:$0xff] }
 0x6fd   :  { %3796 = vmatprep.subr.bf16.mxu1 %v3559_v26  ;;  %4022 = vmatprep.subr.bf16.mxu0 %v3561_v31  ;;  %v3371_v26 = vld [vmem:[#allocation3 + $0x28] sm:$0xff]  ;;  %v3373_v31 = vld [vmem:[#allocation3 + $0x38] sm:$0xff]  ;;  %v3378_v7 = vld [vmem:[#allocation3 + $0x60] sm:$0xff] }
 0x6ff   :  { %3740 = vmatmul.mubr.bf16.gmra.mrb[144].mxu1 %v12077_v10  ;;  %3966 = vmatmul.mubr.bf16.gmra.mrb[112].mxu0 %v12077_v10 }
 0x700   :  { %3797 = vmatpush1.bf16.msra.mxu1 %v3558_v19  ;;  %4023 = vmatpush1.bf16.msra.mxu0 %v3560_v23  ;;  %v3372_v19 = vld [vmem:[#allocation3 + $0x30] sm:$0xff]  ;;  %v3379_v23 = vld [vmem:[#allocation3 + $0x68] sm:$0xff] }
 0x701   :  { %3798 = vmatprep.subr.bf16.mxu1 %v3567_v56  ;;  %4024 = vmatprep.subr.bf16.mxu0 %v3569_v45  ;;  %v3381_v56 = vld [vmem:[#allocation3 + $0x78] sm:$0xff]  ;;  %v12129_v45 = vpack.c.bf16 %v11875_v39, %v11865_v36  ;;  %v12137_v36 = vpack.c.bf16 %v11871_v41, %v11859_v55  ;;  %v3386_v39 = vld [vmem:[#allocation3 + $0xa0] sm:$0xff]  ;;  %v3396_v41 = vld [vmem:[#allocation3 + $0xf0] sm:$0xff] }
 0x702   :  { %3749 = vmatprep.mubr.bf16.mxu1 %v12081_v21  ;;  %3975 = vmatprep.mubr.bf16.mxu0 %v12081_v21  ;;  %v3394_v55 = vld [vmem:[#allocation3 + $0xe0] sm:$0xff] }
 0x704   :  { %3799 = vmatpush1.bf16.msra.mxu1 %v3566_v33  ;;  %4025 = vmatpush1.bf16.msra.mxu0 %v3568_v5  ;;  %v3387_v33 = vld [vmem:[#allocation3 + $0xa8] sm:$0xff]  ;;  %v3389_v5 = vld [vmem:[#allocation3 + $0xb8] sm:$0xff] }
 0x705   :  { %3800 = vmatprep.subr.bf16.mxu1 %v3575_v32  ;;  %4026 = vmatprep.subr.bf16.mxu0 %v3577_v28  ;;  %v3388_v32 = vld [vmem:[#allocation3 + $0xb0] sm:$0xff]  ;;  %v3395_v28 = vld [vmem:[#allocation3 + $0xe8] sm:$0xff] }
 0x707   :  { %3750 = vmatmul.mubr.bf16.gmra.mrb[148].mxu1 %v12089_v14  ;;  %3976 = vmatmul.mubr.bf16.gmra.mrb[116].mxu0 %v12089_v14 }
 0x708   :  { %3801 = vmatpush1.bf16.msra.mxu1 %v3574_v22  ;;  %4027 = vmatpush1.bf16.msra.mxu0 %v3576_v47  ;;  %v3397_v22 = vld [vmem:[#allocation3 + $0xf8] sm:$0xff]  ;;  %v12141_v47 = vpack.c.bf16 %v11901_v46, %v11889_v2  ;;  %v3402_v46 = vld [vmem:[#allocation3 + $0x120] sm:$0xff] }
 0x709   :  { %3802 = vmatprep.subr.bf16.mxu1 %v3583_v43  ;;  %4028 = vmatprep.subr.bf16.mxu0 %v3585_v63  ;;  %v3403_v43 = vld [vmem:[#allocation3 + $0x128] sm:$0xff]  ;;  %v3405_v63 = vld [vmem:[#allocation3 + $0x138] sm:$0xff] }
 0x70a   :  { %3759 = vmatprep.mubr.bf16.mxu1 %v12093_v42  ;;  %3985 = vmatprep.mubr.bf16.mxu0 %v12093_v42 }
 0x70c   :  { %3803 = vmatpush1.bf16.msra.mxu1 %v3582_v37  ;;  %4029 = vmatpush1.bf16.msra.mxu0 %v3584_v11  ;;  %v13989_v37 = vld [vmem:[#allocation151_spill] sm:$0xff]  ;;  %v3404_v11 = vld [vmem:[#allocation3 + $0x130] sm:$0xff] }
 0x70d   :  { %3804 = vmatprep.subr.bf16.mxu1 %v3591_v49  ;;  %4030 = vmatprep.subr.bf16.mxu0 %v3593_v13  ;;  %v12149_v2 = vpack.c.bf16 %v13989_v37, %v11883_v57  ;;  %v3411_v49 = vld [vmem:[#allocation3 + $0x168] sm:$0xff]  ;;  %v3413_v13 = vld [vmem:[#allocation3 + $0x178] sm:$0xff]  ;;  %v3410_v57 = vld [vmem:[#allocation3 + $0x160] sm:$0xff] }
 0x70e   :  { %v3451_v37 = vld [vmem:[#allocation3 + $0x2a8] sm:$0xff] }
 0x70f   :  { %3760 = vmatmul.mubr.bf16.gmra.mrb[152].mxu1 %v12101_v35  ;;  %3986 = vmatmul.mubr.bf16.gmra.mrb[120].mxu0 %v12101_v35 }
 0x710   :  { %3805 = vmatpush1.bf16.msra.mxu1 %v3590_v54  ;;  %4031 = vmatpush1.bf16.msra.mxu0 %v3592_v44  ;;  %v13990_v54 = vld [vmem:[#allocation153_spill] sm:$0xff]  ;;  %v13991_v44 = vld [vmem:[#allocation155_spill] sm:$0xff] }
 0x711   :  { %3806 = vmatprep.subr.bf16.mxu1 %v3599_v27  ;;  %4032 = vmatprep.subr.bf16.mxu0 %v3601_v3  ;;  %v12153_v27 = vpack.c.bf16 %v13991_v44, %v13990_v54  ;;  %v3412_v3 = vld [vmem:[#allocation3 + $0x170] sm:$0xff]  ;;  %v3450_v54 = vld [vmem:[#allocation3 + $0x2a0] sm:$0xff] }
 0x712   :  { %3769 = vmatprep.mubr.bf16.mxu1 %v12105_v40  ;;  %3995 = vmatprep.mubr.bf16.mxu0 %v12105_v40  ;;  %v3452_v44 = vld [vmem:[#allocation3 + $0x2b0] sm:$0xff] }
 0x714   :  { %3807 = vmatpush1.bf16.msra.mxu1 %v3598_v53  ;;  %4033 = vmatpush1.bf16.msra.mxu0 %v3600_v16  ;;  %v3419_v53 = vld [vmem:[#allocation3 + $0x1a8] sm:$0xff]  ;;  %v3421_v16 = vld [vmem:[#allocation3 + $0x1b8] sm:$0xff] }
 0x715   :  { %3808 = vmatprep.subr.bf16.mxu1 %v3607_v38  ;;  %4034 = vmatprep.subr.bf16.mxu0 %v3609_v25  ;;  %v13992_v38 = vld [vmem:[#allocation152_spill] sm:$0xff]  ;;  %v13993_v25 = vld [vmem:[#allocation154_spill] sm:$0xff] }
 0x717   :  { %3770 = vmatmul.mubr.bf16.gmra.mrb[156].mxu1 %v12113_v60  ;;  %3996 = vmatmul.mubr.bf16.gmra.mrb[124].mxu0 %v12113_v60 }
 0x718   :  { %3809 = vmatpush1.bf16.msra.mxu1 %v3606_v52  ;;  %4035 = vmatpush1.bf16.msra.mxu0 %v3608_v51  ;;  %v12161_v52 = vpack.c.bf16 %v13993_v25, %v13992_v38  ;;  %v3418_v51 = vld [vmem:[#allocation3 + $0x1a0] sm:$0xff] }
 0x719   :  { %3810 = vmatprep.subr.bf16.mxu1 %v3615_v4  ;;  %4036 = vmatprep.subr.bf16.mxu0 %v3617_v9  ;;  %v3420_v4 = vld [vmem:[#allocation3 + $0x1b0] sm:$0xff]  ;;  %v3427_v9 = vld [vmem:[#allocation3 + $0x1e8] sm:$0xff]  ;;  %v3458_v25 = vld [vmem:[#allocation3 + $0x2e0] sm:$0xff] }
 0x71a   :  { %3812 = vmatprep.mubr.bf16.mxu1 %v12117_v29  ;;  %4038 = vmatprep.mubr.bf16.mxu0 %v12117_v29 }
 0x71c   :  { %3811 = vmatpush1.bf16.msra.mxu1 %v3614_v30  ;;  %4037 = vmatpush1.bf16.msra.mxu0 %v3616_v50  ;;  %v3429_v30 = vld [vmem:[#allocation3 + $0x1f8] sm:$0xff]  ;;  %v13994_v50 = vld [vmem:[#allocation157_spill] sm:$0xff] }
 0x71d   :  { %4119 = vmatprep.subr.bf16.mxu1 %v3371_v26  ;;  %4345 = vmatprep.subr.bf16.mxu0 %v3373_v31  ;;  %v13995_v26 = vld [vmem:[#allocation159_spill] sm:$0xff] }
 0x71e   :  { %v12165_v31 = vpack.c.bf16 %v13995_v26, %v13994_v50  ;;  %v14005_v50 = vld [vmem:[#allocation166_spill] sm:$0xff] }
 0x71f   :  { %3813 = vmatmul.mubr.bf16.vlgmr.msra.gmra.mrb[128].mxu1 %v12125_v8  ;;  %4039 = vmatmul.mubr.bf16.vlgmr.msra.gmra.mrb[96].mxu0 %v12125_v8 }
 0x720   :  { %4120 = vmatpush1.bf16.msra.mxu1 %v3370_v62  ;;  %4346 = vmatpush1.bf16.msra.mxu0 %v3372_v19  ;;  %v3426_v62 = vld [vmem:[#allocation3 + $0x1e0] sm:$0xff]  ;;  %v3428_v19 = vld [vmem:[#allocation3 + $0x1f0] sm:$0xff] }
 0x721   :  { %4121 = vmatprep.subr.bf16.mxu1 %v3379_v23  ;;  %4347 = vmatprep.subr.bf16.mxu0 %v3381_v56  ;;  %v3435_v23 = vld [vmem:[#allocation3 + $0x228] sm:$0xff]  ;;  %v3437_v56 = vld [vmem:[#allocation3 + $0x238] sm:$0xff] }
 0x722   :  { %3822 = vmatprep.mubr.bf16.mxu1 %v12129_v45  ;;  %4048 = vmatprep.mubr.bf16.mxu0 %v12129_v45 }
 0x724   :  { %4122 = vmatpush1.bf16.msra.mxu1 %v3378_v7  ;;  %4348 = vmatpush1.bf16.msra.mxu0 %v3380_v24  ;;  %v13996_v7 = vld [vmem:[#allocation156_spill] sm:$0xff]  ;;  %v13997_v24 = vld [vmem:[#allocation158_spill] sm:$0xff] }
 0x725   :  { %4123 = vmatprep.subr.bf16.mxu1 %v3387_v33  ;;  %4349 = vmatprep.subr.bf16.mxu0 %v3389_v5  ;;  %v12173_v33 = vpack.c.bf16 %v13997_v24, %v13996_v7  ;;  %v3434_v5 = vld [vmem:[#allocation3 + $0x220] sm:$0xff]  ;;  %v12201_v7 = vpack.c.bf16 %v12019_v61, %v12009_v15  ;;  %v12209_v15 = vpack.c.bf16 %v12015_v58, %v12003_v34  ;;  %v3499_v34 = vld [vmem:[#allocation3 + $0x428] sm:$0xff]  ;;  %v3501_v58 = vld [vmem:[#allocation3 + $0x438] sm:$0xff] }
 0x726   :  { %v3474_v24 = vld [vmem:[#allocation3 + $0x360] sm:$0xff] }
 0x727   :  { %3823 = vmatmul.mubr.bf16.gmra.mrb[132].mxu1 %v12137_v36  ;;  %4049 = vmatmul.mubr.bf16.gmra.mrb[100].mxu0 %v12137_v36  ;;  %v3482_v61 = vld [vmem:[#allocation3 + $0x3a0] sm:$0xff] }
 0x728   :  { %4124 = vmatpush1.bf16.msra.mxu1 %v3386_v39  ;;  %4350 = vmatpush1.bf16.msra.mxu0 %v3388_v32  ;;  %v3436_v39 = vld [vmem:[#allocation3 + $0x230] sm:$0xff]  ;;  %v3443_v32 = vld [vmem:[#allocation3 + $0x268] sm:$0xff] }
 0x729   :  { %4125 = vmatprep.subr.bf16.mxu1 %v3395_v28  ;;  %4351 = vmatprep.subr.bf16.mxu0 %v3397_v22  ;;  %v3445_v28 = vld [vmem:[#allocation3 + $0x278] sm:$0xff]  ;;  %v13998_v22 = vld [vmem:[#allocation161_spill] sm:$0xff] }
 0x72a   :  { %3832 = vmatprep.mubr.bf16.mxu1 %v12141_v47  ;;  %4058 = vmatprep.mubr.bf16.mxu0 %v12141_v47 }
 0x72c   :  { %4126 = vmatpush1.bf16.msra.mxu1 %v3394_v55  ;;  %4352 = vmatpush1.bf16.msra.mxu0 %v3396_v41  ;;  %v13999_v55 = vld [vmem:[#allocation163_spill] sm:$0xff] }
 0x72d   :  { %4127 = vmatprep.subr.bf16.mxu1 %v3403_v43  ;;  %4353 = vmatprep.subr.bf16.mxu0 %v3405_v63  ;;  %v12177_v41 = vpack.c.bf16 %v13999_v55, %v13998_v22  ;;  %v3442_v43 = vld [vmem:[#allocation3 + $0x260] sm:$0xff]  ;;  %v3444_v63 = vld [vmem:[#allocation3 + $0x270] sm:$0xff]  ;;  %v3491_v22 = vld [vmem:[#allocation3 + $0x3e8] sm:$0xff] }
 0x72e   :  { %v3493_v55 = vld [vmem:[#allocation3 + $0x3f8] sm:$0xff] }
 0x72f   :  { %3833 = vmatmul.mubr.bf16.gmra.mrb[136].mxu1 %v12149_v2  ;;  %4059 = vmatmul.mubr.bf16.gmra.mrb[104].mxu0 %v12149_v2 }
 0x730   :  { %4128 = vmatpush1.bf16.msra.mxu1 %v3402_v46  ;;  %4354 = vmatpush1.bf16.msra.mxu0 %v3404_v11  ;;  %v3453_v46 = vld [vmem:[#allocation3 + $0x2b8] sm:$0xff]  ;;  %v14000_v11 = vld [vmem:[#allocation160_spill] sm:$0xff] }
 0x731   :  { %4129 = vmatprep.subr.bf16.mxu1 %v3411_v49  ;;  %4355 = vmatprep.subr.bf16.mxu0 %v3413_v13  ;;  %v14001_v49 = vld [vmem:[#allocation162_spill] sm:$0xff] }
 0x732   :  { %3842 = vmatprep.mubr.bf16.mxu1 %v12153_v27  ;;  %4068 = vmatprep.mubr.bf16.mxu0 %v12153_v27  ;;  %v12185_v13 = vpack.c.bf16 %v14001_v49, %v14000_v11  ;;  %v3507_v11 = vld [vmem:[#allocation3 + $0x468] sm:$0xff]  ;;  %v3509_v49 = vld [vmem:[#allocation3 + $0x478] sm:$0xff] }
 0x734   :  { %4130 = vmatpush1.bf16.msra.mxu1 %v3410_v57  ;;  %4356 = vmatpush1.bf16.msra.mxu0 %v3412_v3  ;;  %v3459_v57 = vld [vmem:[#allocation3 + $0x2e8] sm:$0xff]  ;;  %v3461_v3 = vld [vmem:[#allocation3 + $0x2f8] sm:$0xff] }
 0x735   :  { %4131 = vmatprep.subr.bf16.mxu1 %v3419_v53  ;;  %4357 = vmatprep.subr.bf16.mxu0 %v3421_v16  ;;  %v14002_v53 = vld [vmem:[#allocation165_spill] sm:$0xff]  ;;  %v14003_v16 = vld [vmem:[#allocation167_spill] sm:$0xff] }
 0x736   :  { %v12189_v38 = vpack.c.bf16 %v14003_v16, %v14002_v53  ;;  %v3516_v53 = vld [vmem:[#allocation3 + $0x4b0] sm:$0xff]  ;;  %v3523_v16 = vld [vmem:[#allocation3 + $0x4e8] sm:$0xff] }
 0x737   :  { %3843 = vmatmul.mubr.bf16.gmra.mrb[140].mxu1 %v12161_v52  ;;  %4069 = vmatmul.mubr.bf16.gmra.mrb[108].mxu0 %v12161_v52 }
 0x738   :  { %4132 = vmatpush1.bf16.msra.mxu1 %v3418_v51  ;;  %4358 = vmatpush1.bf16.msra.mxu0 %v3420_v4  ;;  %v3460_v51 = vld [vmem:[#allocation3 + $0x2f0] sm:$0xff]  ;;  %v3467_v4 = vld [vmem:[#allocation3 + $0x328] sm:$0xff] }
 0x739   :  { %4133 = vmatprep.subr.bf16.mxu1 %v3427_v9  ;;  %4359 = vmatprep.subr.bf16.mxu0 %v3429_v30  ;;  %v3469_v9 = vld [vmem:[#allocation3 + $0x338] sm:$0xff]  ;;  %v14004_v30 = vld [vmem:[#allocation164_spill] sm:$0xff] }
 0x73a   :  { %3852 = vmatprep.mubr.bf16.mxu1 %v12165_v31  ;;  %4078 = vmatprep.mubr.bf16.mxu0 %v12165_v31  ;;  %v12197_v26 = vpack.c.bf16 %v14005_v50, %v14004_v30  ;;  %v3532_v30 = vld [vmem:[#allocation3 + $0x530] sm:$0xff]  ;;  %v3539_v50 = vld [vmem:[#allocation3 + $0x568] sm:$0xff] }
 0x73c   :  { %4134 = vmatpush1.bf16.msra.mxu1 %v3426_v62  ;;  %4360 = vmatpush1.bf16.msra.mxu0 %v3428_v19  ;;  %v3466_v62 = vld [vmem:[#allocation3 + $0x320] sm:$0xff]  ;;  %v3468_v19 = vld [vmem:[#allocation3 + $0x330] sm:$0xff] }
 0x73d   :  { %4135 = vmatprep.subr.bf16.mxu1 %v3435_v23  ;;  %4361 = vmatprep.subr.bf16.mxu0 %v3437_v56  ;;  %v3475_v23 = vld [vmem:[#allocation3 + $0x368] sm:$0xff]  ;;  %v3477_v56 = vld [vmem:[#allocation3 + $0x378] sm:$0xff] }
 0x73f   :  { %3853 = vmatmul.mubr.bf16.gmra.mrb[144].mxu1 %v12173_v33  ;;  %4079 = vmatmul.mubr.bf16.gmra.mrb[112].mxu0 %v12173_v33 }
 0x740   :  { %4136 = vmatpush1.bf16.msra.mxu1 %v3434_v5  ;;  %4362 = vmatpush1.bf16.msra.mxu0 %v3436_v39  ;;  %v3476_v5 = vld [vmem:[#allocation3 + $0x370] sm:$0xff]  ;;  %v3483_v39 = vld [vmem:[#allocation3 + $0x3a8] sm:$0xff] }
 0x741   :  { %4137 = vmatprep.subr.bf16.mxu1 %v3443_v32  ;;  %4363 = vmatprep.subr.bf16.mxu0 %v3445_v28  ;;  %v3485_v32 = vld [vmem:[#allocation3 + $0x3b8] sm:$0xff]  ;;  %v3484_v28 = vld [vmem:[#allocation3 + $0x3b0] sm:$0xff] }
 0x742   :  { %3862 = vmatprep.mubr.bf16.mxu1 %v12177_v41  ;;  %4088 = vmatprep.mubr.bf16.mxu0 %v12177_v41 }
 0x744   :  { %4138 = vmatpush1.bf16.msra.mxu1 %v3442_v43  ;;  %4364 = vmatpush1.bf16.msra.mxu0 %v3444_v63  ;;  %v3490_v43 = vld [vmem:[#allocation3 + $0x3e0] sm:$0xff]  ;;  %v3492_v63 = vld [vmem:[#allocation3 + $0x3f0] sm:$0xff] }
 0x745   :  { %4139 = vmatprep.subr.bf16.mxu1 %v3451_v37  ;;  %4365 = vmatprep.subr.bf16.mxu0 %v3453_v46  ;;  %v3498_v37 = vld [vmem:[#allocation3 + $0x420] sm:$0xff]  ;;  %v3500_v46 = vld [vmem:[#allocation3 + $0x430] sm:$0xff] }
 0x747   :  { %3863 = vmatmul.mubr.bf16.gmra.mrb[148].mxu1 %v12185_v13  ;;  %4089 = vmatmul.mubr.bf16.gmra.mrb[116].mxu0 %v12185_v13 }
 0x748   :  { %4140 = vmatpush1.bf16.msra.mxu1 %v3450_v54  ;;  %4366 = vmatpush1.bf16.msra.mxu0 %v3452_v44  ;;  %v3506_v54 = vld [vmem:[#allocation3 + $0x460] sm:$0xff]  ;;  %v3515_v44 = vld [vmem:[#allocation3 + $0x4a8] sm:$0xff] }
 0x749   :  { %4141 = vmatprep.subr.bf16.mxu1 %v3459_v57  ;;  %4367 = vmatprep.subr.bf16.mxu0 %v3461_v3  ;;  %v3517_v57 = vld [vmem:[#allocation3 + $0x4b8] sm:$0xff]  ;;  %v3514_v3 = vld [vmem:[#allocation3 + $0x4a0] sm:$0xff] }
 0x74a   :  { %3872 = vmatprep.mubr.bf16.mxu1 %v12189_v38  ;;  %4098 = vmatprep.mubr.bf16.mxu0 %v12189_v38 }
 0x74c   :  { %4142 = vmatpush1.bf16.msra.mxu1 %v3458_v25  ;;  %4368 = vmatpush1.bf16.msra.mxu0 %v3460_v51  ;;  %v3522_v25 = vld [vmem:[#allocation3 + $0x4e0] sm:$0xff]  ;;  %v3531_v51 = vld [vmem:[#allocation3 + $0x528] sm:$0xff] }
 0x74d   :  { %4143 = vmatprep.subr.bf16.mxu1 %v3467_v4  ;;  %4369 = vmatprep.subr.bf16.mxu0 %v3469_v9  ;;  %v3533_v4 = vld [vmem:[#allocation3 + $0x538] sm:$0xff]  ;;  %v3530_v9 = vld [vmem:[#allocation3 + $0x520] sm:$0xff] }
 0x74f   :  { %3873 = vmatmul.mubr.bf16.gmra.mrb[152].mxu1 %v12197_v26  ;;  %4099 = vmatmul.mubr.bf16.gmra.mrb[120].mxu0 %v12197_v26 }
 0x750   :  { %4144 = vmatpush1.bf16.msra.mxu1 %v3466_v62  ;;  %4370 = vmatpush1.bf16.msra.mxu0 %v3468_v19  ;;  %v3538_v62 = vld [vmem:[#allocation3 + $0x560] sm:$0xff]  ;;  %v3547_v19 = vld [vmem:[#allocation3 + $0x5a8] sm:$0xff] }
 0x751   :  { %4145 = vmatprep.subr.bf16.mxu1 %v3475_v23  ;;  %4371 = vmatprep.subr.bf16.mxu0 %v3477_v56  ;;  %v3549_v23 = vld [vmem:[#allocation3 + $0x5b8] sm:$0xff]  ;;  %v3546_v56 = vld [vmem:[#allocation3 + $0x5a0] sm:$0xff] }
 0x752   :  { %3882 = vmatprep.mubr.bf16.mxu1 %v12201_v7  ;;  %4108 = vmatprep.mubr.bf16.mxu0 %v12201_v7 }
 0x754   :  { %4146 = vmatpush1.bf16.msra.mxu1 %v3474_v24  ;;  %4372 = vmatpush1.bf16.msra.mxu0 %v3476_v5  ;;  %v3548_v24 = vld [vmem:[#allocation3 + $0x5b0] sm:$0xff]  ;;  %v3555_v5 = vld [vmem:[#allocation3 + $0x5e8] sm:$0xff] }
 0x755   :  { %4147 = vmatprep.subr.bf16.mxu1 %v3483_v39  ;;  %4373 = vmatprep.subr.bf16.mxu0 %v3485_v32  ;;  %v3554_v39 = vld [vmem:[#allocation3 + $0x5e0] sm:$0xff]  ;;  %v3563_v32 = vld [vmem:[#allocation3 + $0x628] sm:$0xff] }
 0x757   :  { %3883 = vmatmul.mubr.bf16.gmra.mrb[156].mxu1 %v12209_v15  ;;  %4109 = vmatmul.mubr.bf16.gmra.mrb[124].mxu0 %v12209_v15 }
 0x758   :  { %4148 = vmatpush1.bf16.msra.mxu1 %v3482_v61  ;;  %4374 = vmatpush1.bf16.msra.mxu0 %v3484_v28  ;;  %v3565_v61 = vld [vmem:[#allocation3 + $0x638] sm:$0xff]  ;;  %v3562_v28 = vld [vmem:[#allocation3 + $0x620] sm:$0xff] }
 0x759   :  { %4149 = vmatprep.subr.bf16.mxu1 %v3491_v22  ;;  %4375 = vmatprep.subr.bf16.mxu0 %v3493_v55  ;;  %v3564_v22 = vld [vmem:[#allocation3 + $0x630] sm:$0xff]  ;;  %v3571_v55 = vld [vmem:[#allocation3 + $0x668] sm:$0xff] }
 0x75a   :  { %4151 = vmatprep.mubr.bf16.mxu1 %v12023_v1  ;;  %4377 = vmatprep.mubr.bf16.mxu0 %v12023_v1  ;;  %v3508_v1 = vld [vmem:[#allocation3 + $0x470] sm:$0xff] }
 0x75c   :  { %4150 = vmatpush1.bf16.msra.mxu1 %v3490_v43  ;;  %4376 = vmatpush1.bf16.msra.mxu0 %v3492_v63  ;;  %v3570_v43 = vld [vmem:[#allocation3 + $0x660] sm:$0xff]  ;;  %v3579_v63 = vld [vmem:[#allocation3 + $0x6a8] sm:$0xff] }
 0x75d   :  { %4232 = vmatprep.subr.bf16.mxu1 %v3499_v34  ;;  %4458 = vmatprep.subr.bf16.mxu0 %v3501_v58  ;;  %v3581_v34 = vld [vmem:[#allocation3 + $0x6b8] sm:$0xff]  ;;  %v3578_v58 = vld [vmem:[#allocation3 + $0x6a0] sm:$0xff] }
 0x75f   :  { %4152 = vmatmul.mubr.bf16.vlgmr.msra.gmra.mrb[160].mxu1 %v12029_v18  ;;  %4378 = vmatmul.mubr.bf16.vlgmr.msra.gmra.mrb[128].mxu0 %v12029_v18  ;;  %v3525_v18 = vld [vmem:[#allocation3 + $0x4f8] sm:$0xff] }
 0x760   :  { %4233 = vmatpush1.bf16.msra.mxu1 %v3498_v37  ;;  %4459 = vmatpush1.bf16.msra.mxu0 %v3500_v46  ;;  %v3580_v37 = vld [vmem:[#allocation3 + $0x6b0] sm:$0xff]  ;;  %v3587_v46 = vld [vmem:[#allocation3 + $0x6e8] sm:$0xff] }
 0x761   :  { %4234 = vmatprep.subr.bf16.mxu1 %v3507_v11  ;;  %4460 = vmatprep.subr.bf16.mxu0 %v3509_v49  ;;  %v3586_v11 = vld [vmem:[#allocation3 + $0x6e0] sm:$0xff]  ;;  %v3595_v49 = vld [vmem:[#allocation3 + $0x728] sm:$0xff] }
 0x762   :  { %4161 = vmatprep.mubr.bf16.mxu1 %v12033_v12  ;;  %4387 = vmatprep.mubr.bf16.mxu0 %v12033_v12  ;;  %v3524_v12 = vld [vmem:[#allocation3 + $0x4f0] sm:$0xff] }
 0x764   :  { %4235 = vmatpush1.bf16.msra.mxu1 %v3506_v54  ;;  %4461 = vmatpush1.bf16.msra.mxu0 %v3508_v1  ;;  %v3597_v54 = vld [vmem:[#allocation3 + $0x738] sm:$0xff]  ;;  %v3594_v1 = vld [vmem:[#allocation3 + $0x720] sm:$0xff] }
 0x765   :  { %4236 = vmatprep.subr.bf16.mxu1 %v3515_v44  ;;  %4462 = vmatprep.subr.bf16.mxu0 %v3517_v57  ;;  %v3596_v44 = vld [vmem:[#allocation3 + $0x730] sm:$0xff]  ;;  %v3603_v57 = vld [vmem:[#allocation3 + $0x768] sm:$0xff] }
 0x767   :  { %4162 = vmatmul.mubr.bf16.gmra.mrb[164].mxu1 %v12041_v20  ;;  %4388 = vmatmul.mubr.bf16.gmra.mrb[132].mxu0 %v12041_v20  ;;  %v3541_v20 = vld [vmem:[#allocation3 + $0x578] sm:$0xff] }
 0x768   :  { %4237 = vmatpush1.bf16.msra.mxu1 %v3514_v3  ;;  %4463 = vmatpush1.bf16.msra.mxu0 %v3516_v53  ;;  %v3602_v3 = vld [vmem:[#allocation3 + $0x760] sm:$0xff]  ;;  %v3611_v53 = vld [vmem:[#allocation3 + $0x7a8] sm:$0xff] }
 0x769   :  { %4238 = vmatprep.subr.bf16.mxu1 %v3523_v16  ;;  %4464 = vmatprep.subr.bf16.mxu0 %v3525_v18  ;;  %v3613_v16 = vld [vmem:[#allocation3 + $0x7b8] sm:$0xff]  ;;  %v3610_v18 = vld [vmem:[#allocation3 + $0x7a0] sm:$0xff] }
 0x76a   :  { %4171 = vmatprep.mubr.bf16.mxu1 %v12045_v48  ;;  %4397 = vmatprep.mubr.bf16.mxu0 %v12045_v48  ;;  %v3540_v48 = vld [vmem:[#allocation3 + $0x570] sm:$0xff] }
 0x76c   :  { %4239 = vmatpush1.bf16.msra.mxu1 %v3522_v25  ;;  %4465 = vmatpush1.bf16.msra.mxu0 %v3524_v12  ;;  %v3612_v25 = vld [vmem:[#allocation3 + $0x7b0] sm:$0xff]  ;;  %v3619_v12 = vld [vmem:[#allocation3 + $0x7e8] sm:$0xff] }
 0x76d   :  { %4240 = vmatprep.subr.bf16.mxu1 %v3531_v51  ;;  %4466 = vmatprep.subr.bf16.mxu0 %v3533_v4  ;;  %v3618_v51 = vld [vmem:[#allocation3 + $0x7e0] sm:$0xff] }
 0x76f   :  { %4172 = vmatmul.mubr.bf16.gmra.mrb[168].mxu1 %v12053_v0  ;;  %4398 = vmatmul.mubr.bf16.gmra.mrb[136].mxu0 %v12053_v0  ;;  %v3557_v0 = vld [vmem:[#allocation3 + $0x5f8] sm:$0xff] }
 0x770   :  { %4241 = vmatpush1.bf16.msra.mxu1 %v3530_v9  ;;  %4467 = vmatpush1.bf16.msra.mxu0 %v3532_v30 }
 0x771   :  { %4242 = vmatprep.subr.bf16.mxu1 %v3539_v50  ;;  %4468 = vmatprep.subr.bf16.mxu0 %v3541_v20 }
 0x772   :  { %4181 = vmatprep.mubr.bf16.mxu1 %v12057_v17  ;;  %4407 = vmatprep.mubr.bf16.mxu0 %v12057_v17  ;;  %v3556_v17 = vld [vmem:[#allocation3 + $0x5f0] sm:$0xff] }
 0x774   :  { %4243 = vmatpush1.bf16.msra.mxu1 %v3538_v62  ;;  %4469 = vmatpush1.bf16.msra.mxu0 %v3540_v48 }
 0x775   :  { %4244 = vmatprep.subr.bf16.mxu1 %v3547_v19  ;;  %4470 = vmatprep.subr.bf16.mxu0 %v3549_v23 }
 0x777   :  { %4182 = vmatmul.mubr.bf16.gmra.mrb[172].mxu1 %v12065_v59  ;;  %4408 = vmatmul.mubr.bf16.gmra.mrb[140].mxu0 %v12065_v59  ;;  %v3573_v59 = vld [vmem:[#allocation3 + $0x678] sm:$0xff] }
 0x778   :  { %4245 = vmatpush1.bf16.msra.mxu1 %v3546_v56  ;;  %4471 = vmatpush1.bf16.msra.mxu0 %v3548_v24 }
 0x779   :  { %4246 = vmatprep.subr.bf16.mxu1 %v3555_v5  ;;  %4472 = vmatprep.subr.bf16.mxu0 %v3557_v0 }
 0x77a   :  { %4191 = vmatprep.mubr.bf16.mxu1 %v12069_v6  ;;  %4417 = vmatprep.mubr.bf16.mxu0 %v12069_v6  ;;  %v3572_v6 = vld [vmem:[#allocation3 + $0x670] sm:$0xff] }
 0x77c   :  { %4247 = vmatpush1.bf16.msra.mxu1 %v3554_v39  ;;  %4473 = vmatpush1.bf16.msra.mxu0 %v3556_v17 }
 0x77d   :  { %4248 = vmatprep.subr.bf16.mxu1 %v3563_v32  ;;  %4474 = vmatprep.subr.bf16.mxu0 %v3565_v61 }
 0x77f   :  { %4192 = vmatmul.mubr.bf16.gmra.mrb[176].mxu1 %v12077_v10  ;;  %4418 = vmatmul.mubr.bf16.gmra.mrb[144].mxu0 %v12077_v10  ;;  %v3589_v10 = vld [vmem:[#allocation3 + $0x6f8] sm:$0xff] }
 0x780   :  { %4249 = vmatpush1.bf16.msra.mxu1 %v3562_v28  ;;  %4475 = vmatpush1.bf16.msra.mxu0 %v3564_v22 }
 0x781   :  { %4250 = vmatprep.subr.bf16.mxu1 %v3571_v55  ;;  %4476 = vmatprep.subr.bf16.mxu0 %v3573_v59 }
 0x782   :  { %4201 = vmatprep.mubr.bf16.mxu1 %v12081_v21  ;;  %4427 = vmatprep.mubr.bf16.mxu0 %v12081_v21  ;;  %v3588_v21 = vld [vmem:[#allocation3 + $0x6f0] sm:$0xff] }
 0x784   :  { %4251 = vmatpush1.bf16.msra.mxu1 %v3570_v43  ;;  %4477 = vmatpush1.bf16.msra.mxu0 %v3572_v6 }
 0x785   :  { %4252 = vmatprep.subr.bf16.mxu1 %v3579_v63  ;;  %4478 = vmatprep.subr.bf16.mxu0 %v3581_v34 }
 0x787   :  { %4202 = vmatmul.mubr.bf16.gmra.mrb[180].mxu1 %v12089_v14  ;;  %4428 = vmatmul.mubr.bf16.gmra.mrb[148].mxu0 %v12089_v14  ;;  %v3605_v14 = vld [vmem:[#allocation3 + $0x778] sm:$0xff] }
 0x788   :  { %4253 = vmatpush1.bf16.msra.mxu1 %v3578_v58  ;;  %4479 = vmatpush1.bf16.msra.mxu0 %v3580_v37 }
 0x789   :  { %4254 = vmatprep.subr.bf16.mxu1 %v3587_v46  ;;  %4480 = vmatprep.subr.bf16.mxu0 %v3589_v10 }
 0x78a   :  { %4211 = vmatprep.mubr.bf16.mxu1 %v12093_v42  ;;  %4437 = vmatprep.mubr.bf16.mxu0 %v12093_v42  ;;  %v3604_v42 = vld [vmem:[#allocation3 + $0x770] sm:$0xff] }
 0x78c   :  { %4255 = vmatpush1.bf16.msra.mxu1 %v3586_v11  ;;  %4481 = vmatpush1.bf16.msra.mxu0 %v3588_v21 }
 0x78d   :  { %4256 = vmatprep.subr.bf16.mxu1 %v3595_v49  ;;  %4482 = vmatprep.subr.bf16.mxu0 %v3597_v54 }
 0x78f   :  { %4212 = vmatmul.mubr.bf16.gmra.mrb[184].mxu1 %v12101_v35  ;;  %4438 = vmatmul.mubr.bf16.gmra.mrb[152].mxu0 %v12101_v35  ;;  %v3621_v35 = vld [vmem:[#allocation3 + $0x7f8] sm:$0xff] }
 0x790   :  { %4257 = vmatpush1.bf16.msra.mxu1 %v3594_v1  ;;  %4483 = vmatpush1.bf16.msra.mxu0 %v3596_v44 }
 0x791   :  { %4258 = vmatprep.subr.bf16.mxu1 %v3603_v57  ;;  %4484 = vmatprep.subr.bf16.mxu0 %v3605_v14 }
 0x792   :  { %4221 = vmatprep.mubr.bf16.mxu1 %v12105_v40  ;;  %4447 = vmatprep.mubr.bf16.mxu0 %v12105_v40  ;;  %v3620_v40 = vld [vmem:[#allocation3 + $0x7f0] sm:$0xff] }
 0x794   :  { %4259 = vmatpush1.bf16.msra.mxu1 %v3602_v3  ;;  %4485 = vmatpush1.bf16.msra.mxu0 %v3604_v42 }
 0x795   :  { %4260 = vmatprep.subr.bf16.mxu1 %v3611_v53  ;;  %4486 = vmatprep.subr.bf16.mxu0 %v3613_v16 }
 0x797   :  { %4222 = vmatmul.mubr.bf16.gmra.mrb[188].mxu1 %v12113_v60  ;;  %4448 = vmatmul.mubr.bf16.gmra.mrb[156].mxu0 %v12113_v60  ;;  %v3623_v60 = vld [vmem:[#allocation25 + $0x4] ss:$8 sm:$0xf] }
 0x798   :  { %4261 = vmatpush1.bf16.msra.mxu1 %v3610_v18  ;;  %4487 = vmatpush1.bf16.msra.mxu0 %v3612_v25 }
 0x799   :  { %4262 = vmatprep.subr.bf16.mxu1 %v3619_v12  ;;  %4488 = vmatprep.subr.bf16.mxu0 %v3621_v35 }
 0x79a   :  { %4264 = vmatprep.mubr.bf16.mxu1 %v12117_v29  ;;  %4490 = vmatprep.mubr.bf16.mxu0 %v12117_v29  ;;  %v3624_v29 = vld [vmem:[#allocation25 + $0x4] ss:$8 sm:$0xf0] }
 0x79c   :  { %4263 = vmatpush1.bf16.msra.mxu1 %v3618_v51  ;;  %4489 = vmatpush1.bf16.msra.mxu0 %v3620_v40 }
 0x79f   :  { %4265 = vmatmul.mubr.bf16.vlgmr.msra.gmra.mrb[160].mxu1 %v12125_v8  ;;  %4491 = vmatmul.mubr.bf16.vlgmr.msra.gmra.mrb[128].mxu0 %v12125_v8  ;;  %v12277_v8 = vor.u32 %v3624_v29, %v3623_v60 }
 0x7a0   :  { %4274 = vmatprep.mubr.bf16.mxu1 %v12129_v45  ;;  %4500 = vmatprep.mubr.bf16.mxu0 %v12129_v45  ;;  %v14006_v45 = vld [vmem:[#allocation59_spill] sm:$0xff] }
 0x7a7   :  { %4275 = vmatmul.mubr.bf16.gmra.mrb[164].mxu1 %v12137_v36  ;;  %4501 = vmatmul.mubr.bf16.gmra.mrb[132].mxu0 %v12137_v36  ;;  %v12281_v36 = vrot.slane %v12277_v8, %v14006_v45 }
 0x7a8   :  { %4284 = vmatprep.mubr.bf16.mxu1 %v12141_v47  ;;  %4510 = vmatprep.mubr.bf16.mxu0 %v12141_v47  ;;  %v14007_v47 = vld [vmem:[#allocation61_spill] sm:$0xff] }
 0x7af   :  { %4285 = vmatmul.mubr.bf16.gmra.mrb[168].mxu1 %v12149_v2  ;;  %4511 = vmatmul.mubr.bf16.gmra.mrb[136].mxu0 %v12149_v2  ;;  %v12285_v2 = vrot.slane %v12277_v8, %v14007_v47 }
 0x7b0   :  { %4294 = vmatprep.mubr.bf16.mxu1 %v12153_v27  ;;  %4520 = vmatprep.mubr.bf16.mxu0 %v12153_v27  ;;  %v14008_v27 = vld [vmem:[#allocation60_spill] sm:$0xff] }
 0x7b7   :  { %4295 = vmatmul.mubr.bf16.gmra.mrb[172].mxu1 %v12161_v52  ;;  %4521 = vmatmul.mubr.bf16.gmra.mrb[140].mxu0 %v12161_v52  ;;  %v12289_v52 = vrot.slane %v12277_v8, %v14008_v27 }
 0x7b8   :  { %4304 = vmatprep.mubr.bf16.mxu1 %v12165_v31  ;;  %4530 = vmatprep.mubr.bf16.mxu0 %v12165_v31  ;;  %v14009_v31 = vld [vmem:[#allocation62_spill] sm:$0xff] }
 0x7bf   :  { %4305 = vmatmul.mubr.bf16.gmra.mrb[176].mxu1 %v12173_v33  ;;  %4531 = vmatmul.mubr.bf16.gmra.mrb[144].mxu0 %v12173_v33  ;;  %v12293_v33 = vrot.slane %v12277_v8, %v14009_v31 }
 0x7c0   :  { %4314 = vmatprep.mubr.bf16.mxu1 %v12177_v41  ;;  %4540 = vmatprep.mubr.bf16.mxu0 %v12177_v41 }
 0x7c7   :  { %4315 = vmatmul.mubr.bf16.gmra.mrb[180].mxu1 %v12185_v13  ;;  %4541 = vmatmul.mubr.bf16.gmra.mrb[148].mxu0 %v12185_v13 }
 0x7c8   :  { %4324 = vmatprep.mubr.bf16.mxu1 %v12189_v38  ;;  %4550 = vmatprep.mubr.bf16.mxu0 %v12189_v38 }
 0x7cf   :  { %4325 = vmatmul.mubr.bf16.gmra.mrb[184].mxu1 %v12197_v26  ;;  %4551 = vmatmul.mubr.bf16.gmra.mrb[152].mxu0 %v12197_v26 }
 0x7d0   :  { %4334 = vmatprep.mubr.bf16.mxu1 %v12201_v7  ;;  %4560 = vmatprep.mubr.bf16.mxu0 %v12201_v7 }
 0x7d7   :  { %4335 = vmatmul.mubr.bf16.gmra.mrb[188].mxu1 %v12209_v15  ;;  %4561 = vmatmul.mubr.bf16.gmra.mrb[156].mxu0 %v12209_v15 }
 0x7f2   :  { %v3814_v41 = vpop.f32.mrb[128].mxu1  ;;  %v4040_v13 = vpop.f32.mrb[96].mxu0 }
 0x7f3   :  { %v9564_v38 = vadd.f32 %v3814_v41, %v12281_v36  ;;  %v9596_v26 = vadd.f32 %v4040_v13, %v12285_v2  ;;  %v3816_v7 = vpop.f32.mrb[129].mxu1  ;;  %v4042_v15 = vpop.f32.mrb[97].mxu0 }
 0x7f4   :  { %v9565_v4 = vadd.f32 %v3816_v7, %v12289_v52  ;;  %v9597_v9 = vadd.f32 %v4042_v15, %v12293_v33  ;;  %v3818_v30 = vpop.f32.mrb[130].mxu1  ;;  %v4044_v50 = vpop.f32.mrb[98].mxu0 }
 0x7f5   :  { %vm4571_vm4 = vcmp.ge.f32.partialorder %v9564_v38, 0.0  ;;  %v4699_v20 = vmul.f32 0.01, %v9564_v38  ;;  %vm4573_vm5 = vcmp.ge.f32.partialorder %v9596_v26, 0.0  ;;  %v4701_v62 = vmul.f32 0.01, %v9596_v26 }
 0x7f6   :  { %vm4572_vm6 = vcmp.ge.f32.partialorder %v9565_v4, 0.0  ;;  %v4700_v48 = vmul.f32 0.01, %v9565_v4  ;;  %vm4574_vm7 = vcmp.ge.f32.partialorder %v9597_v9, 0.0  ;;  %v4702_v19 = vmul.f32 0.01, %v9597_v9 }
 0x7f7   :  { %v12299_v23 = vsel %vm4571_vm4, %v9564_v38, %v4699_v20  ;;  %v12301_v56 = vsel %vm4573_vm5, %v9596_v26, %v4701_v62  ;;  %v9566_v24 = vadd.f32 %v3818_v30, %v12281_v36  ;;  %v9598_v5 = vadd.f32 %v4044_v50, %v12285_v2  ;;  %v3820_v0 = vpop.f32.mrb[131].mxu1  ;;  %v4046_v39 = vpop.f32.mrb[99].mxu0 }
 0x7f8   :  { %v12305_v17 = vsel %vm4572_vm6, %v9565_v4, %v4700_v48  ;;  %v12307_v32 = vsel %vm4574_vm7, %v9597_v9, %v4702_v19  ;;  %v9567_v61 = vadd.f32 %v3820_v0, %v12289_v52  ;;  %v9599_v28 = vadd.f32 %v4046_v39, %v12293_v33 }
 0x7f9   :  { %vm4579_vm8 = vcmp.ge.f32.partialorder %v9566_v24, 0.0  ;;  %v4707_v22 = vmul.f32 0.01, %v9566_v24  ;;  %vm4581_vm10 = vcmp.ge.f32.partialorder %v9598_v5, 0.0  ;;  %v4709_v55 = vmul.f32 0.01, %v9598_v5 }
 0x7fa   :  { %vm4580_vm11 = vcmp.ge.f32.partialorder %v9567_v61, 0.0  ;;  %v4708_v59 = vmul.f32 0.01, %v9567_v61  ;;  %vm4582_vm0 = vcmp.ge.f32.partialorder %v9599_v28, 0.0  ;;  %v4710_v43 = vmul.f32 0.01, %v9599_v28 }
 0x7fb   :  { %v12311_v6 = vsel %vm4579_vm8, %v9566_v24, %v4707_v22  ;;  %v12313_v63 = vsel %vm4581_vm10, %v9598_v5, %v4709_v55  ;;  %v3824_v34 = vpop.f32.mrb[132].mxu1  ;;  %v4050_v58 = vpop.f32.mrb[100].mxu0 }
 0x7fc   :  { %v12315_v37 = vsel %vm4580_vm11, %v9567_v61, %v4708_v59  ;;  %v12317_v46 = vsel %vm4582_vm0, %v9599_v28, %v4710_v43  ;;  %v9568_v10 = vadd.f32 %v3824_v34, %v12281_v36  ;;  %v9600_v11 = vadd.f32 %v4050_v58, %v12285_v2  ;;  %v3826_v21 = vpop.f32.mrb[133].mxu1  ;;  %v4052_v49 = vpop.f32.mrb[101].mxu0 }
 0x7fd   :  { %v9569_v54 = vadd.f32 %v3826_v21, %v12289_v52  ;;  %v9601_v1 = vadd.f32 %v4052_v49, %v12293_v33  ;;  %v3828_v44 = vpop.f32.mrb[134].mxu1  ;;  %v4054_v57 = vpop.f32.mrb[102].mxu0 }
 0x7fe   :  { %vm4587_vm12 = vcmp.ge.f32.partialorder %v9568_v10, 0.0  ;;  %v4715_v14 = vmul.f32 0.01, %v9568_v10  ;;  %vm4589_vm13 = vcmp.ge.f32.partialorder %v9600_v11, 0.0  ;;  %v4717_v3 = vmul.f32 0.01, %v9600_v11 }
 0x7ff   :  { %vm4588_vm14 = vcmp.ge.f32.partialorder %v9569_v54, 0.0  ;;  %v4716_v42 = vmul.f32 0.01, %v9569_v54  ;;  %vm4590_vm15 = vcmp.ge.f32.partialorder %v9601_v1, 0.0  ;;  %v4718_v53 = vmul.f32 0.01, %v9601_v1 }
 0x800   :  { %v12323_v16 = vsel %vm4587_vm12, %v9568_v10, %v4715_v14  ;;  %v12325_v18 = vsel %vm4589_vm13, %v9600_v11, %v4717_v3  ;;  %v9570_v25 = vadd.f32 %v3828_v44, %v12281_v36  ;;  %v9602_v12 = vadd.f32 %v4054_v57, %v12285_v2  ;;  %v3830_v35 = vpop.f32.mrb[135].mxu1  ;;  %v4056_v51 = vpop.f32.mrb[103].mxu0 }
 0x801   :  { %v12329_v40 = vsel %vm4588_vm14, %v9569_v54, %v4716_v42  ;;  %v12331_v60 = vsel %vm4590_vm15, %v9601_v1, %v4718_v53  ;;  %v9571_v29 = vadd.f32 %v3830_v35, %v12289_v52  ;;  %v9603_v41 = vadd.f32 %v4056_v51, %v12293_v33 }
 0x802   :  { %vm4595_vm1 = vcmp.ge.f32.partialorder %v9570_v25, 0.0  ;;  %v4723_v13 = vmul.f32 0.01, %v9570_v25  ;;  %vm4597_vm2 = vcmp.ge.f32.partialorder %v9602_v12, 0.0  ;;  %v4725_v38 = vmul.f32 0.01, %v9602_v12 }
 0x803   :  { %vm4596_vm3 = vcmp.ge.f32.partialorder %v9571_v29, 0.0  ;;  %v4724_v26 = vmul.f32 0.01, %v9571_v29  ;;  %vm4598_vm4 = vcmp.ge.f32.partialorder %v9603_v41, 0.0  ;;  %v4726_v7 = vmul.f32 0.01, %v9603_v41 }
 0x804   :  { %v12335_v15 = vsel %vm4595_vm1, %v9570_v25, %v4723_v13  ;;  %v12337_v4 = vsel %vm4597_vm2, %v9602_v12, %v4725_v38  ;;  %v3834_v9 = vpop.f32.mrb[136].mxu1  ;;  %v4060_v30 = vpop.f32.mrb[104].mxu0 }
 0x805   :  { %v12339_v50 = vsel %vm4596_vm3, %v9571_v29, %v4724_v26  ;;  %v12341_v20 = vsel %vm4598_vm4, %v9603_v41, %v4726_v7  ;;  %v9572_v62 = vadd.f32 %v3834_v9, %v12281_v36  ;;  %v9604_v48 = vadd.f32 %v4060_v30, %v12285_v2  ;;  %v3836_v19 = vpop.f32.mrb[137].mxu1  ;;  %v4062_v24 = vpop.f32.mrb[105].mxu0 }
 0x806   :  { %v9573_v5 = vadd.f32 %v3836_v19, %v12289_v52  ;;  %v9605_v0 = vadd.f32 %v4062_v24, %v12293_v33  ;;  %v3838_v39 = vpop.f32.mrb[138].mxu1  ;;  %v4064_v61 = vpop.f32.mrb[106].mxu0 }
 0x807   :  { %vm4603_vm5 = vcmp.ge.f32.partialorder %v9572_v62, 0.0  ;;  %v4731_v28 = vmul.f32 0.01, %v9572_v62  ;;  %vm4605_vm6 = vcmp.ge.f32.partialorder %v9604_v48, 0.0  ;;  %v4733_v22 = vmul.f32 0.01, %v9604_v48 }
 0x808   :  { %vm4604_vm7 = vcmp.ge.f32.partialorder %v9573_v5, 0.0  ;;  %v4732_v55 = vmul.f32 0.01, %v9573_v5  ;;  %vm4606_vm8 = vcmp.ge.f32.partialorder %v9605_v0, 0.0  ;;  %v4734_v59 = vmul.f32 0.01, %v9605_v0 }
 0x809   :  { %v12347_v43 = vsel %vm4603_vm5, %v9572_v62, %v4731_v28  ;;  %v12349_v34 = vsel %vm4605_vm6, %v9604_v48, %v4733_v22  ;;  %v9574_v58 = vadd.f32 %v3838_v39, %v12281_v36  ;;  %v9606_v10 = vadd.f32 %v4064_v61, %v12285_v2  ;;  %v3840_v11 = vpop.f32.mrb[139].mxu1  ;;  %v4066_v21 = vpop.f32.mrb[107].mxu0 }
 0x80a   :  { %v12353_v49 = vsel %vm4604_vm7, %v9573_v5, %v4732_v55  ;;  %v12355_v54 = vsel %vm4606_vm8, %v9605_v0, %v4734_v59  ;;  %v9575_v1 = vadd.f32 %v3840_v11, %v12289_v52  ;;  %v9607_v44 = vadd.f32 %v4066_v21, %v12293_v33  ;;  %v3844_v57 = vpop.f32.mrb[140].mxu1  ;;  %v4070_v14 = vpop.f32.mrb[108].mxu0 }
 0x80b   :  { %vm4611_vm10 = vcmp.ge.f32.partialorder %v9574_v58, 0.0  ;;  %v4739_v3 = vmul.f32 0.01, %v9574_v58  ;;  %vm4613_vm11 = vcmp.ge.f32.partialorder %v9606_v10, 0.0  ;;  %v4741_v42 = vmul.f32 0.01, %v9606_v10 }
 0x80c   :  { %vm4612_vm0 = vcmp.ge.f32.partialorder %v9575_v1, 0.0  ;;  %v4740_v53 = vmul.f32 0.01, %v9575_v1  ;;  %vm4614_vm12 = vcmp.ge.f32.partialorder %v9607_v44, 0.0  ;;  %v4742_v25 = vmul.f32 0.01, %v9607_v44 }
 0x80d   :  { %v12359_v12 = vsel %vm4611_vm10, %v9574_v58, %v4739_v3  ;;  %v12361_v35 = vsel %vm4613_vm11, %v9606_v10, %v4741_v42  ;;  %v9576_v51 = vadd.f32 %v3844_v57, %v12281_v36  ;;  %v9608_v29 = vadd.f32 %v4070_v14, %v12285_v2  ;;  %v3846_v41 = vpop.f32.mrb[141].mxu1  ;;  %v4072_v13 = vpop.f32.mrb[109].mxu0 }
 0x80e   :  { %v12365_v38 = vsel %vm4612_vm0, %v9575_v1, %v4740_v53  ;;  %v12367_v26 = vsel %vm4614_vm12, %v9607_v44, %v4742_v25  ;;  %v9577_v7 = vadd.f32 %v3846_v41, %v12289_v52  ;;  %v9609_v9 = vadd.f32 %v4072_v13, %v12293_v33  ;;  %v3848_v30 = vpop.f32.mrb[142].mxu1  ;;  %v4074_v62 = vpop.f32.mrb[110].mxu0 }
 0x80f   :  { %vm4619_vm13 = vcmp.ge.f32.partialorder %v9576_v51, 0.0  ;;  %v4747_v48 = vmul.f32 0.01, %v9576_v51  ;;  %vm4621_vm14 = vcmp.ge.f32.partialorder %v9608_v29, 0.0  ;;  %v4749_v19 = vmul.f32 0.01, %v9608_v29 }
 0x810   :  { %vm4620_vm15 = vcmp.ge.f32.partialorder %v9577_v7, 0.0  ;;  %v4748_v24 = vmul.f32 0.01, %v9577_v7  ;;  %vm4622_vm1 = vcmp.ge.f32.partialorder %v9609_v9, 0.0  ;;  %v4750_v5 = vmul.f32 0.01, %v9609_v9 }
 0x811   :  { %v12371_v0 = vsel %vm4619_vm13, %v9576_v51, %v4747_v48  ;;  %v12373_v39 = vsel %vm4621_vm14, %v9608_v29, %v4749_v19  ;;  %v9578_v61 = vadd.f32 %v3848_v30, %v12281_v36  ;;  %v9610_v28 = vadd.f32 %v4074_v62, %v12285_v2  ;;  %v3850_v22 = vpop.f32.mrb[143].mxu1  ;;  %v4076_v55 = vpop.f32.mrb[111].mxu0 }
 0x812   :  { %v12377_v59 = vsel %vm4620_vm15, %v9577_v7, %v4748_v24  ;;  %v12379_v58 = vsel %vm4622_vm1, %v9609_v9, %v4750_v5  ;;  %v9579_v10 = vadd.f32 %v3850_v22, %v12289_v52  ;;  %v9611_v11 = vadd.f32 %v4076_v55, %v12293_v33  ;;  %v3854_v21 = vpop.f32.mrb[144].mxu1  ;;  %v4080_v1 = vpop.f32.mrb[112].mxu0 }
 0x813   :  { %vm4627_vm2 = vcmp.ge.f32.partialorder %v9578_v61, 0.0  ;;  %v4755_v44 = vmul.f32 0.01, %v9578_v61  ;;  %vm4629_vm3 = vcmp.ge.f32.partialorder %v9610_v28, 0.0  ;;  %v4757_v57 = vmul.f32 0.01, %v9610_v28 }
 0x814   :  { %vm4628_vm4 = vcmp.ge.f32.partialorder %v9579_v10, 0.0  ;;  %v4756_v14 = vmul.f32 0.01, %v9579_v10  ;;  %vm4630_vm5 = vcmp.ge.f32.partialorder %v9611_v11, 0.0  ;;  %v4758_v3 = vmul.f32 0.01, %v9611_v11 }
 0x815   :  { %v12383_v42 = vsel %vm4627_vm2, %v9578_v61, %v4755_v44  ;;  %v12385_v53 = vsel %vm4629_vm3, %v9610_v28, %v4757_v57  ;;  %v9580_v25 = vadd.f32 %v3854_v21, %v12281_v36  ;;  %v9612_v51 = vadd.f32 %v4080_v1, %v12285_v2  ;;  %v3856_v29 = vpop.f32.mrb[145].mxu1  ;;  %v4082_v41 = vpop.f32.mrb[113].mxu0 }
 0x816   :  { %v12389_v13 = vsel %vm4628_vm4, %v9579_v10, %v4756_v14  ;;  %v12391_v7 = vsel %vm4630_vm5, %v9611_v11, %v4758_v3  ;;  %v9581_v9 = vadd.f32 %v3856_v29, %v12289_v52  ;;  %v9613_v30 = vadd.f32 %v4082_v41, %v12293_v33  ;;  %v3858_v62 = vpop.f32.mrb[146].mxu1  ;;  %v4084_v48 = vpop.f32.mrb[114].mxu0 }
 0x817   :  { %vm4635_vm6 = vcmp.ge.f32.partialorder %v9580_v25, 0.0  ;;  %v4763_v19 = vmul.f32 0.01, %v9580_v25  ;;  %vm4637_vm7 = vcmp.ge.f32.partialorder %v9612_v51, 0.0  ;;  %v4765_v24 = vmul.f32 0.01, %v9612_v51 }
 0x818   :  { %vm4636_vm8 = vcmp.ge.f32.partialorder %v9581_v9, 0.0  ;;  %v4764_v5 = vmul.f32 0.01, %v9581_v9  ;;  %vm4638_vm10 = vcmp.ge.f32.partialorder %v9613_v30, 0.0  ;;  %v4766_v61 = vmul.f32 0.01, %v9613_v30 }
 0x819   :  { %v12395_v28 = vsel %vm4635_vm6, %v9580_v25, %v4763_v19  ;;  %v12397_v22 = vsel %vm4637_vm7, %v9612_v51, %v4765_v24  ;;  %v9582_v55 = vadd.f32 %v3858_v62, %v12281_v36  ;;  %v9614_v10 = vadd.f32 %v4084_v48, %v12285_v2  ;;  %v3860_v11 = vpop.f32.mrb[147].mxu1  ;;  %v4086_v21 = vpop.f32.mrb[115].mxu0 }
 0x81a   :  { %14010 = vst [vmem:[#allocation151_spill] sm:$0xff] %v12397_v22  ;;  %v12401_v1 = vsel %vm4636_vm8, %v9581_v9, %v4764_v5  ;;  %v12403_v44 = vsel %vm4638_vm10, %v9613_v30, %v4766_v61  ;;  %v9583_v57 = vadd.f32 %v3860_v11, %v12289_v52  ;;  %v9615_v14 = vadd.f32 %v4086_v21, %v12293_v33  ;;  %v3864_v3 = vpop.f32.mrb[148].mxu1  ;;  %v4090_v29 = vpop.f32.mrb[116].mxu0 }
 0x81b   :  { %vm4643_vm11 = vcmp.ge.f32.partialorder %v9582_v55, 0.0  ;;  %v4771_v25 = vmul.f32 0.01, %v9582_v55  ;;  %vm4645_vm0 = vcmp.ge.f32.partialorder %v9614_v10, 0.0  ;;  %v4773_v51 = vmul.f32 0.01, %v9614_v10 }
 0x81c   :  { %vm4644_vm12 = vcmp.ge.f32.partialorder %v9583_v57, 0.0  ;;  %v4772_v41 = vmul.f32 0.01, %v9583_v57  ;;  %vm4646_vm13 = vcmp.ge.f32.partialorder %v9615_v14, 0.0  ;;  %v4774_v62 = vmul.f32 0.01, %v9615_v14 }
 0x81d   :  { %v12407_v48 = vsel %vm4643_vm11, %v9582_v55, %v4771_v25  ;;  %v12409_v9 = vsel %vm4645_vm0, %v9614_v10, %v4773_v51  ;;  %v9584_v30 = vadd.f32 %v3864_v3, %v12281_v36  ;;  %v9616_v19 = vadd.f32 %v4090_v29, %v12285_v2  ;;  %v3866_v24 = vpop.f32.mrb[149].mxu1  ;;  %v4092_v5 = vpop.f32.mrb[117].mxu0 }
 0x81e   :  { %14011 = vst [vmem:[#allocation153_spill] sm:$0xff] %v12407_v48  ;;  %14012 = vst [vmem:[#allocation155_spill] sm:$0xff] %v12409_v9  ;;  %v12413_v61 = vsel %vm4644_vm12, %v9583_v57, %v4772_v41  ;;  %v12415_v11 = vsel %vm4646_vm13, %v9615_v14, %v4774_v62  ;;  %v9585_v21 = vadd.f32 %v3866_v24, %v12289_v52  ;;  %v3868_v27 = vpop.f32.mrb[150].mxu1  ;;  %v4094_v47 = vpop.f32.mrb[118].mxu0 }
 0x81f   :  { %v9617_v31 = vadd.f32 %v4092_v5, %v12293_v33  ;;  %vm4651_vm14 = vcmp.ge.f32.partialorder %v9584_v30, 0.0  ;;  %v4779_v55 = vmul.f32 0.01, %v9584_v30  ;;  %vm4653_vm15 = vcmp.ge.f32.partialorder %v9616_v19, 0.0  ;;  %v3870_v41 = vpop.f32.mrb[151].mxu1  ;;  %v4096_v62 = vpop.f32.mrb[119].mxu0 }
 0x820   :  { %v4781_v10 = vmul.f32 0.01, %v9616_v19  ;;  %vm4652_vm1 = vcmp.ge.f32.partialorder %v9585_v21, 0.0  ;;  %v4780_v3 = vmul.f32 0.01, %v9585_v21  ;;  %v9586_v14 = vadd.f32 %v3868_v27, %v12281_v36 }
 0x821   :  { %vm4654_vm2 = vcmp.ge.f32.partialorder %v9617_v31, 0.0  ;;  %v4782_v29 = vmul.f32 0.01, %v9617_v31  ;;  %v12419_v25 = vsel %vm4651_vm14, %v9584_v30, %v4779_v55  ;;  %v9618_v51 = vadd.f32 %v4094_v47, %v12285_v2 }
 0x822   :  { %14013 = vst [vmem:[#allocation152_spill] sm:$0xff] %v12419_v25  ;;  %v12421_v57 = vsel %vm4653_vm15, %v9616_v19, %v4781_v10  ;;  %v12425_v24 = vsel %vm4652_vm1, %v9585_v21, %v4780_v3  ;;  %v9587_v45 = vadd.f32 %v3870_v41, %v12289_v52  ;;  %v9619_v9 = vadd.f32 %v4096_v62, %v12293_v33  ;;  %v3874_v22 = vpop.f32.mrb[152].mxu1  ;;  %v4100_v48 = vpop.f32.mrb[120].mxu0 }
 0x823   :  { %14014 = vst [vmem:[#allocation154_spill] sm:$0xff] %v12421_v57  ;;  %14015 = vst [vmem:[#allocation157_spill] sm:$0xff] %v12425_v24  ;;  %v12427_v5 = vsel %vm4654_vm2, %v9617_v31, %v4782_v29  ;;  %vm4659_vm3 = vcmp.ge.f32.partialorder %v9586_v14, 0.0  ;;  %v4787_v30 = vmul.f32 0.01, %v9586_v14  ;;  %vm4661_vm4 = vcmp.ge.f32.partialorder %v9618_v51, 0.0 }
 0x824   :  { %14016 = vst [vmem:[#allocation159_spill] sm:$0xff] %v12427_v5  ;;  %v4789_v19 = vmul.f32 0.01, %v9618_v51  ;;  %vm4660_vm5 = vcmp.ge.f32.partialorder %v9587_v45, 0.0  ;;  %v4788_v27 = vmul.f32 0.01, %v9587_v45  ;;  %v9588_v31 = vadd.f32 %v3874_v22, %v12281_v36 }
 0x825   :  { %vm4662_vm6 = vcmp.ge.f32.partialorder %v9619_v9, 0.0  ;;  %v4790_v47 = vmul.f32 0.01, %v9619_v9  ;;  %v12431_v55 = vsel %vm4659_vm3, %v9586_v14, %v4787_v30  ;;  %v9620_v10 = vadd.f32 %v4100_v48, %v12285_v2  ;;  %v3876_v3 = vpop.f32.mrb[153].mxu1  ;;  %v4102_v29 = vpop.f32.mrb[121].mxu0 }
 0x826   :  { %14017 = vst [vmem:[#allocation156_spill] sm:$0xff] %v12431_v55  ;;  %v12433_v21 = vsel %vm4661_vm4, %v9618_v51, %v4789_v19  ;;  %v12437_v41 = vsel %vm4660_vm5, %v9587_v45, %v4788_v27  ;;  %v9589_v57 = vadd.f32 %v3876_v3, %v12289_v52  ;;  %v9621_v25 = vadd.f32 %v4102_v29, %v12293_v33  ;;  %v3878_v5 = vpop.f32.mrb[154].mxu1  ;;  %v4104_v24 = vpop.f32.mrb[122].mxu0 }
 0x827   :  { %14018 = vst [vmem:[#allocation158_spill] sm:$0xff] %v12433_v21  ;;  %14019 = vst [vmem:[#allocation161_spill] sm:$0xff] %v12437_v41  ;;  %v12439_v62 = vsel %vm4662_vm6, %v9619_v9, %v4790_v47  ;;  %vm4667_vm7 = vcmp.ge.f32.partialorder %v9588_v31, 0.0  ;;  %v4795_v14 = vmul.f32 0.01, %v9588_v31  ;;  %vm4669_vm8 = vcmp.ge.f32.partialorder %v9620_v10, 0.0 }
 0x828   :  { %14020 = vst [vmem:[#allocation163_spill] sm:$0xff] %v12439_v62  ;;  %v4797_v51 = vmul.f32 0.01, %v9620_v10  ;;  %vm4668_vm10 = vcmp.ge.f32.partialorder %v9589_v57, 0.0  ;;  %v4796_v22 = vmul.f32 0.01, %v9589_v57  ;;  %v9590_v9 = vadd.f32 %v3878_v5, %v12281_v36 }
 0x829   :  { %vm4670_vm11 = vcmp.ge.f32.partialorder %v9621_v25, 0.0  ;;  %v4798_v48 = vmul.f32 0.01, %v9621_v25  ;;  %v12443_v30 = vsel %vm4667_vm7, %v9588_v31, %v4795_v14  ;;  %v9622_v19 = vadd.f32 %v4104_v24, %v12285_v2  ;;  %v3880_v27 = vpop.f32.mrb[155].mxu1  ;;  %v4106_v47 = vpop.f32.mrb[123].mxu0 }
 0x82a   :  { %14021 = vst [vmem:[#allocation160_spill] sm:$0xff] %v12443_v30  ;;  %v12445_v45 = vsel %vm4669_vm8, %v9620_v10, %v4797_v51  ;;  %v12449_v3 = vsel %vm4668_vm10, %v9589_v57, %v4796_v22  ;;  %v9591_v21 = vadd.f32 %v3880_v27, %v12289_v52  ;;  %v9623_v55 = vadd.f32 %v4106_v47, %v12293_v33  ;;  %v3884_v62 = vpop.f32.mrb[156].mxu1  ;;  %v4110_v41 = vpop.f32.mrb[124].mxu0 }
 0x82b   :  { %14022 = vst [vmem:[#allocation162_spill] sm:$0xff] %v12445_v45  ;;  %14023 = vst [vmem:[#allocation165_spill] sm:$0xff] %v12449_v3  ;;  %v12451_v29 = vsel %vm4670_vm11, %v9621_v25, %v4798_v48  ;;  %vm4675_vm0 = vcmp.ge.f32.partialorder %v9590_v9, 0.0  ;;  %v4803_v31 = vmul.f32 0.01, %v9590_v9  ;;  %vm4677_vm12 = vcmp.ge.f32.partialorder %v9622_v19, 0.0 }
 0x82c   :  { %14024 = vst [vmem:[#allocation167_spill] sm:$0xff] %v12451_v29  ;;  %v4805_v10 = vmul.f32 0.01, %v9622_v19  ;;  %vm4676_vm13 = vcmp.ge.f32.partialorder %v9591_v21, 0.0  ;;  %v4804_v5 = vmul.f32 0.01, %v9591_v21  ;;  %v9592_v25 = vadd.f32 %v3884_v62, %v12281_v36 }
 0x82d   :  { %vm4678_vm14 = vcmp.ge.f32.partialorder %v9623_v55, 0.0  ;;  %v4806_v24 = vmul.f32 0.01, %v9623_v55  ;;  %v12455_v14 = vsel %vm4675_vm0, %v9590_v9, %v4803_v31  ;;  %v9624_v51 = vadd.f32 %v4110_v41, %v12285_v2  ;;  %v3886_v22 = vpop.f32.mrb[157].mxu1  ;;  %v4112_v48 = vpop.f32.mrb[125].mxu0 }
 0x82e   :  { %14025 = vst [vmem:[#allocation164_spill] sm:$0xff] %v12455_v14  ;;  %v12457_v57 = vsel %vm4677_vm12, %v9622_v19, %v4805_v10  ;;  %v12461_v27 = vsel %vm4676_vm13, %v9591_v21, %v4804_v5  ;;  %v9593_v45 = vadd.f32 %v3886_v22, %v12289_v52  ;;  %v9625_v30 = vadd.f32 %v4112_v48, %v12293_v33  ;;  %v3888_v29 = vpop.f32.mrb[158].mxu1  ;;  %v4114_v3 = vpop.f32.mrb[126].mxu0 }
 0x82f   :  { %14026 = vst [vmem:[#allocation166_spill] sm:$0xff] %v12457_v57  ;;  %v12463_v47 = vsel %vm4678_vm14, %v9623_v55, %v4806_v24  ;;  %vm4683_vm15 = vcmp.ge.f32.partialorder %v9592_v25, 0.0  ;;  %v4811_v9 = vmul.f32 0.01, %v9592_v25  ;;  %vm4685_vm1 = vcmp.ge.f32.partialorder %v9624_v51, 0.0  ;;  %v3890_v5 = vpop.f32.mrb[159].mxu1 }
 0x830   :  { %14027 = vst [vmem:[#allocation168_spill] sm:$0xff] %v12463_v47  ;;  %v4813_v19 = vmul.f32 0.01, %v9624_v51  ;;  %vm4684_vm2 = vcmp.ge.f32.partialorder %v9593_v45, 0.0  ;;  %v4812_v62 = vmul.f32 0.01, %v9593_v45  ;;  %v9594_v55 = vadd.f32 %v3888_v29, %v12281_v36 }
 0x831   :  { %vm4686_vm3 = vcmp.ge.f32.partialorder %v9625_v30, 0.0  ;;  %v4814_v41 = vmul.f32 0.01, %v9625_v30  ;;  %v12467_v31 = vsel %vm4683_vm15, %v9592_v25, %v4811_v9  ;;  %v9626_v10 = vadd.f32 %v4114_v3, %v12285_v2  ;;  %v4116_v24 = vpop.f32.mrb[127].mxu0  ;;  %v14036_v3 = vld [vmem:[#allocation58_spill] sm:$0xff] }
 0x832   :  { %14028 = vst [vmem:[#allocation169_spill] sm:$0xff] %v12467_v31  ;;  %v12469_v21 = vsel %vm4685_vm1, %v9624_v51, %v4813_v19  ;;  %v12473_v22 = vsel %vm4684_vm2, %v9593_v45, %v4812_v62  ;;  %v9595_v57 = vadd.f32 %v3890_v5, %v12289_v52  ;;  %v9627_v14 = vadd.f32 %v4116_v24, %v12293_v33 }
 0x833   :  { %14029 = vst [vmem:[#allocation170_spill] sm:$0xff] %v12469_v21  ;;  %14030 = vst [vmem:[#allocation171_spill] sm:$0xff] %v12473_v22  ;;  %v12475_v48 = vsel %vm4686_vm3, %v9625_v30, %v4814_v41  ;;  %vm4691_vm4 = vcmp.ge.f32.partialorder %v9594_v55, 0.0  ;;  %v4819_v47 = vmul.f32 0.01, %v9594_v55  ;;  %vm4693_vm5 = vcmp.ge.f32.partialorder %v9626_v10, 0.0 }
 0x834   :  { %14031 = vst [vmem:[#allocation172_spill] sm:$0xff] %v12475_v48  ;;  %v4821_v25 = vmul.f32 0.01, %v9626_v10  ;;  %vm4692_vm6 = vcmp.ge.f32.partialorder %v9595_v57, 0.0  ;;  %v4820_v51 = vmul.f32 0.01, %v9595_v57 }
 0x835   :  { %vm4694_vm7 = vcmp.ge.f32.partialorder %v9627_v14, 0.0  ;;  %v4822_v36 = vmul.f32 0.01, %v9627_v14  ;;  %v12479_v29 = vsel %vm4691_vm4, %v9594_v55, %v4819_v47  ;;  %v3645_v52 = vsub.s32 4, %v14036_v3 }
 0x836   :  { %14032 = vst [vmem:[#allocation173_spill] sm:$0xff] %v12479_v29  ;;  %v12481_v2 = vsel %vm4693_vm5, %v9626_v10, %v4821_v25  ;;  %v12483_v45 = vsel %vm4692_vm6, %v9595_v57, %v4820_v51  ;;  %v3653_v33 = vsub.s32 6, %v14036_v3  ;;  %v3649_v9 = vsub.s32 5, %v14036_v3 }
 0x837   :  { %14033 = vst [vmem:[#allocation174_spill] sm:$0xff] %v12481_v2  ;;  %14034 = vst [vmem:[#allocation175_spill] sm:$0xff] %v12483_v45  ;;  %v12485_v30 = vsel %vm4694_vm7, %v9627_v14, %v4822_v36  ;;  %v3657_v19 = vsub.s32 7, %v14036_v3  ;;  %v12492_v62 = vrot.slane %v12277_v8, %v3645_v52 }
 0x838   :  { %14035 = vst [vmem:[#allocation176_spill] sm:$0xff] %v12485_v30  ;;  %v12495_v47 = vrot.slane %v12277_v8, %v3653_v33  ;;  %v12498_v41 = vrot.slane %v12277_v8, %v3649_v9 }
 0x839   :  { %v12501_v14 = vrot.slane %v12277_v8, %v3657_v19 }
 0x872   :  { %v4266_v57 = vpop.f32.mrb[160].mxu1  ;;  %v4492_v55 = vpop.f32.mrb[128].mxu0 }
 0x873   :  { %v9628_v10 = vadd.f32 %v4266_v57, %v12492_v62  ;;  %v9660_v5 = vadd.f32 %v4492_v55, %v12495_v47  ;;  %v4268_v24 = vpop.f32.mrb[161].mxu1  ;;  %v4494_v25 = vpop.f32.mrb[129].mxu0 }
 0x874   :  { %v9629_v51 = vadd.f32 %v4268_v24, %v12498_v41  ;;  %v9661_v36 = vadd.f32 %v4494_v25, %v12501_v14  ;;  %v4270_v52 = vpop.f32.mrb[162].mxu1  ;;  %v4496_v33 = vpop.f32.mrb[130].mxu0 }
 0x875   :  { %vm4575_vm8 = vcmp.ge.f32.partialorder %v9628_v10, 0.0  ;;  %v4703_v9 = vmul.f32 0.01, %v9628_v10  ;;  %vm4577_vm10 = vcmp.ge.f32.partialorder %v9660_v5, 0.0  ;;  %v4705_v3 = vmul.f32 0.01, %v9660_v5 }
 0x876   :  { %vm4576_vm11 = vcmp.ge.f32.partialorder %v9629_v51, 0.0  ;;  %v4704_v8 = vmul.f32 0.01, %v9629_v51  ;;  %vm4578_vm0 = vcmp.ge.f32.partialorder %v9661_v36, 0.0  ;;  %v4706_v19 = vmul.f32 0.01, %v9661_v36 }
 0x877   :  { %v12507_v2 = vsel %vm4575_vm8, %v9628_v10, %v4703_v9  ;;  %v12509_v57 = vsel %vm4577_vm10, %v9660_v5, %v4705_v3  ;;  %v9630_v55 = vadd.f32 %v4270_v52, %v12492_v62  ;;  %v9662_v24 = vadd.f32 %v4496_v33, %v12495_v47  ;;  %v4272_v21 = vpop.f32.mrb[163].mxu1  ;;  %v4498_v25 = vpop.f32.mrb[131].mxu0 }
 0x878   :  { %14037 = vst [vmem:[#allocation177_spill] sm:$0xff] %v12507_v2  ;;  %14038 = vst [vmem:[#allocation178_spill] sm:$0xff] %v12509_v57  ;;  %v12513_v29 = vsel %vm4576_vm11, %v9629_v51, %v4704_v8  ;;  %v12515_v31 = vsel %vm4578_vm0, %v9661_v36, %v4706_v19  ;;  %v9631_v30 = vadd.f32 %v4272_v21, %v12498_v41 }
 0x879   :  { %14039 = vst [vmem:[#allocation179_spill] sm:$0xff] %v12513_v29  ;;  %14040 = vst [vmem:[#allocation180_spill] sm:$0xff] %v12515_v31  ;;  %v9663_v48 = vadd.f32 %v4498_v25, %v12501_v14  ;;  %vm4583_vm12 = vcmp.ge.f32.partialorder %v9630_v55, 0.0  ;;  %v4711_v45 = vmul.f32 0.01, %v9630_v55  ;;  %vm4585_vm13 = vcmp.ge.f32.partialorder %v9662_v24, 0.0 }
 0x87a   :  { %v4713_v10 = vmul.f32 0.01, %v9662_v24  ;;  %vm4584_vm14 = vcmp.ge.f32.partialorder %v9631_v30, 0.0  ;;  %v4712_v3 = vmul.f32 0.01, %v9631_v30  ;;  %v4276_v51 = vpop.f32.mrb[164].mxu1 }
 0x87b   :  { %vm4586_vm15 = vcmp.ge.f32.partialorder %v9663_v48, 0.0  ;;  %v4714_v5 = vmul.f32 0.01, %v9663_v48  ;;  %v12519_v52 = vsel %vm4583_vm12, %v9630_v55, %v4711_v45  ;;  %v4502_v9 = vpop.f32.mrb[132].mxu0  ;;  %v9632_v21 = vadd.f32 %v4276_v51, %v12492_v62  ;;  %v4278_v25 = vpop.f32.mrb[165].mxu1 }
 0x87c   :  { %14041 = vst [vmem:[#allocation181_spill] sm:$0xff] %v12519_v52  ;;  %v12521_v33 = vsel %vm4585_vm13, %v9662_v24, %v4713_v10  ;;  %v12523_v36 = vsel %vm4584_vm14, %v9631_v30, %v4712_v3  ;;  %v9664_v19 = vadd.f32 %v4502_v9, %v12495_v47  ;;  %v4504_v57 = vpop.f32.mrb[133].mxu0  ;;  %v9633_v2 = vadd.f32 %v4278_v25, %v12498_v41  ;;  %v4280_v45 = vpop.f32.mrb[166].mxu1 }
 0x87d   :  { %14042 = vst [vmem:[#allocation182_spill] sm:$0xff] %v12521_v33  ;;  %14043 = vst [vmem:[#allocation183_spill] sm:$0xff] %v12523_v36  ;;  %v12525_v8 = vsel %vm4586_vm15, %v9663_v48, %v4714_v5  ;;  %v9665_v31 = vadd.f32 %v4504_v57, %v12501_v14  ;;  %v4506_v55 = vpop.f32.mrb[134].mxu0  ;;  %vm4591_vm1 = vcmp.ge.f32.partialorder %v9632_v21, 0.0  ;;  %v4719_v24 = vmul.f32 0.01, %v9632_v21 }
 0x87e   :  { %14044 = vst [vmem:[#allocation184_spill] sm:$0xff] %v12525_v8  ;;  %vm4593_vm2 = vcmp.ge.f32.partialorder %v9664_v19, 0.0  ;;  %v4721_v10 = vmul.f32 0.01, %v9664_v19  ;;  %vm4592_vm3 = vcmp.ge.f32.partialorder %v9633_v2, 0.0  ;;  %v9634_v51 = vadd.f32 %v4280_v45, %v12492_v62  ;;  %v4282_v25 = vpop.f32.mrb[167].mxu1 }
 0x87f   :  { %v4720_v30 = vmul.f32 0.01, %v9633_v2  ;;  %vm4594_vm4 = vcmp.ge.f32.partialorder %v9665_v31, 0.0  ;;  %v4722_v48 = vmul.f32 0.01, %v9665_v31  ;;  %v12531_v3 = vsel %vm4591_vm1, %v9632_v21, %v4719_v24  ;;  %v4508_v57 = vpop.f32.mrb[135].mxu0 }
 0x880   :  { %14045 = vst [vmem:[#allocation185_spill] sm:$0xff] %v12531_v3  ;;  %v12533_v5 = vsel %vm4593_vm2, %v9664_v19, %v4721_v10  ;;  %v9666_v9 = vadd.f32 %v4506_v55, %v12495_v47  ;;  %v9635_v8 = vadd.f32 %v4282_v25, %v12498_v41  ;;  %v9667_v36 = vadd.f32 %v4508_v57, %v12501_v14 }
 0x881   :  { %14046 = vst [vmem:[#allocation186_spill] sm:$0xff] %v12533_v5  ;;  %v12537_v33 = vsel %vm4592_vm3, %v9633_v2, %v4720_v30  ;;  %v12539_v52 = vsel %vm4594_vm4, %v9665_v31, %v4722_v48  ;;  %vm4599_vm5 = vcmp.ge.f32.partialorder %v9634_v51, 0.0  ;;  %v4727_v29 = vmul.f32 0.01, %v9634_v51 }
 0x882   :  { %14047 = vst [vmem:[#allocation187_spill] sm:$0xff] %v12537_v33  ;;  %14048 = vst [vmem:[#allocation188_spill] sm:$0xff] %v12539_v52  ;;  %vm4601_vm6 = vcmp.ge.f32.partialorder %v9666_v9, 0.0  ;;  %v4729_v21 = vmul.f32 0.01, %v9666_v9  ;;  %vm4600_vm7 = vcmp.ge.f32.partialorder %v9635_v8, 0.0 }
 0x883   :  { %v4728_v19 = vmul.f32 0.01, %v9635_v8  ;;  %vm4602_vm8 = vcmp.ge.f32.partialorder %v9667_v36, 0.0  ;;  %v4730_v45 = vmul.f32 0.01, %v9667_v36  ;;  %v12543_v24 = vsel %vm4599_vm5, %v9634_v51, %v4727_v29  ;;  %v4286_v2 = vpop.f32.mrb[168].mxu1 }
 0x884   :  { %14049 = vst [vmem:[#allocation189_spill] sm:$0xff] %v12543_v24  ;;  %v12545_v55 = vsel %vm4601_vm6, %v9666_v9, %v4729_v21  ;;  %v4512_v10 = vpop.f32.mrb[136].mxu0  ;;  %v9636_v48 = vadd.f32 %v4286_v2, %v12492_v62  ;;  %v4288_v57 = vpop.f32.mrb[169].mxu1 }
 0x885   :  { %14050 = vst [vmem:[#allocation190_spill] sm:$0xff] %v12545_v55  ;;  %v12547_v31 = vsel %vm4600_vm7, %v9635_v8, %v4728_v19  ;;  %v12549_v30 = vsel %vm4602_vm8, %v9667_v36, %v4730_v45  ;;  %v9668_v25 = vadd.f32 %v4512_v10, %v12495_v47  ;;  %v4514_v5 = vpop.f32.mrb[137].mxu0  ;;  %v9637_v3 = vadd.f32 %v4288_v57, %v12498_v41  ;;  %v4290_v29 = vpop.f32.mrb[170].mxu1 }
 0x886   :  { %14051 = vst [vmem:[#allocation191_spill] sm:$0xff] %v12547_v31  ;;  %14052 = vst [vmem:[#allocation192_spill] sm:$0xff] %v12549_v30  ;;  %v9669_v52 = vadd.f32 %v4514_v5, %v12501_v14  ;;  %v4516_v51 = vpop.f32.mrb[138].mxu0  ;;  %vm4607_vm10 = vcmp.ge.f32.partialorder %v9636_v48, 0.0  ;;  %v4735_v9 = vmul.f32 0.01, %v9636_v48  ;;  %v9638_v2 = vadd.f32 %v4290_v29, %v12492_v62 }
 0x887   :  { %vm4609_vm11 = vcmp.ge.f32.partialorder %v9668_v25, 0.0  ;;  %v4737_v21 = vmul.f32 0.01, %v9668_v25  ;;  %vm4608_vm0 = vcmp.ge.f32.partialorder %v9637_v3, 0.0  ;;  %v4736_v8 = vmul.f32 0.01, %v9637_v3 }
 0x888   :  { %vm4610_vm12 = vcmp.ge.f32.partialorder %v9669_v52, 0.0  ;;  %v4738_v36 = vmul.f32 0.01, %v9669_v52  ;;  %v12555_v19 = vsel %vm4607_vm10, %v9636_v48, %v4735_v9  ;;  %v9670_v10 = vadd.f32 %v4516_v51, %v12495_v47  ;;  %v4292_v57 = vpop.f32.mrb[171].mxu1  ;;  %v4518_v5 = vpop.f32.mrb[139].mxu0 }
 0x889   :  { %14053 = vst [vmem:[#allocation193_spill] sm:$0xff] %v12555_v19  ;;  %v12557_v45 = vsel %vm4609_vm11, %v9668_v25, %v4737_v21  ;;  %v12561_v55 = vsel %vm4608_vm0, %v9637_v3, %v4736_v8  ;;  %v9639_v30 = vadd.f32 %v4292_v57, %v12498_v41  ;;  %v9671_v31 = vadd.f32 %v4518_v5, %v12501_v14 }
 0x88a   :  { %14054 = vst [vmem:[#allocation194_spill] sm:$0xff] %v12557_v45  ;;  %14055 = vst [vmem:[#allocation195_spill] sm:$0xff] %v12561_v55  ;;  %v12563_v24 = vsel %vm4610_vm12, %v9669_v52, %v4738_v36  ;;  %v4296_v33 = vpop.f32.mrb[172].mxu1  ;;  %v4522_v22 = vpop.f32.mrb[140].mxu0  ;;  %vm4615_vm13 = vcmp.ge.f32.partialorder %v9638_v2, 0.0  ;;  %vm4617_vm14 = vcmp.ge.f32.partialorder %v9670_v10, 0.0 }
 0x88b   :  { %14056 = vst [vmem:[#allocation196_spill] sm:$0xff] %v12563_v24  ;;  %v4743_v48 = vmul.f32 0.01, %v9638_v2  ;;  %v4745_v25 = vmul.f32 0.01, %v9670_v10  ;;  %vm4616_vm15 = vcmp.ge.f32.partialorder %v9639_v30, 0.0  ;;  %v9640_v52 = vadd.f32 %v4296_v33, %v12492_v62 }
 0x88c   :  { %v4744_v29 = vmul.f32 0.01, %v9639_v30  ;;  %vm4618_vm1 = vcmp.ge.f32.partialorder %v9671_v31, 0.0  ;;  %v4746_v51 = vmul.f32 0.01, %v9671_v31  ;;  %v9672_v21 = vadd.f32 %v4522_v22, %v12495_v47  ;;  %v4298_v8 = vpop.f32.mrb[173].mxu1 }
 0x88d   :  { %v12567_v9 = vsel %vm4615_vm13, %v9638_v2, %v4743_v48  ;;  %v12569_v3 = vsel %vm4617_vm14, %v9670_v10, %v4745_v25  ;;  %v4524_v36 = vpop.f32.mrb[141].mxu0  ;;  %v9641_v45 = vadd.f32 %v4298_v8, %v12498_v41  ;;  %v4300_v24 = vpop.f32.mrb[174].mxu1  ;;  %vm4623_vm2 = vcmp.ge.f32.partialorder %v9640_v52, 0.0 }
 0x88e   :  { %14057 = vst [vmem:[#allocation197_spill] sm:$0xff] %v12567_v9  ;;  %14058 = vst [vmem:[#allocation198_spill] sm:$0xff] %v12569_v3  ;;  %v12573_v57 = vsel %vm4616_vm15, %v9639_v30, %v4744_v29  ;;  %v12575_v5 = vsel %vm4618_vm1, %v9671_v31, %v4746_v51  ;;  %v9673_v19 = vadd.f32 %v4524_v36, %v12501_v14  ;;  %v4526_v55 = vpop.f32.mrb[142].mxu0  ;;  %v4751_v2 = vmul.f32 0.01, %v9640_v52  ;;  %v4302_v29 = vpop.f32.mrb[175].mxu1 }
 0x88f   :  { %14059 = vst [vmem:[#allocation199_spill] sm:$0xff] %v12573_v57  ;;  %14060 = vst [vmem:[#allocation200_spill] sm:$0xff] %v12575_v5  ;;  %vm4625_vm3 = vcmp.ge.f32.partialorder %v9672_v21, 0.0  ;;  %v4753_v10 = vmul.f32 0.01, %v9672_v21  ;;  %vm4624_vm4 = vcmp.ge.f32.partialorder %v9641_v45, 0.0  ;;  %v9642_v31 = vadd.f32 %v4300_v24, %v12492_v62 }
 0x890   :  { %v4752_v33 = vmul.f32 0.01, %v9641_v45  ;;  %vm4626_vm5 = vcmp.ge.f32.partialorder %v9673_v19, 0.0  ;;  %v4754_v22 = vmul.f32 0.01, %v9673_v19  ;;  %v12579_v48 = vsel %vm4623_vm2, %v9640_v52, %v4751_v2  ;;  %v4528_v51 = vpop.f32.mrb[143].mxu0 }
 0x891   :  { %14061 = vst [vmem:[#allocation201_spill] sm:$0xff] %v12579_v48  ;;  %v12581_v30 = vsel %vm4625_vm3, %v9672_v21, %v4753_v10  ;;  %v9674_v25 = vadd.f32 %v4526_v55, %v12495_v47  ;;  %v9643_v3 = vadd.f32 %v4302_v29, %v12498_v41  ;;  %v9675_v9 = vadd.f32 %v4528_v51, %v12501_v14 }
 0x892   :  { %14062 = vst [vmem:[#allocation202_spill] sm:$0xff] %v12581_v30  ;;  %v12585_v8 = vsel %vm4624_vm4, %v9641_v45, %v4752_v33  ;;  %v12587_v36 = vsel %vm4626_vm5, %v9673_v19, %v4754_v22  ;;  %v4306_v5 = vpop.f32.mrb[176].mxu1  ;;  %v4532_v57 = vpop.f32.mrb[144].mxu0  ;;  %vm4631_vm6 = vcmp.ge.f32.partialorder %v9642_v31, 0.0  ;;  %v4759_v52 = vmul.f32 0.01, %v9642_v31 }
 0x893   :  { %14063 = vst [vmem:[#allocation203_spill] sm:$0xff] %v12585_v8  ;;  %14064 = vst [vmem:[#allocation204_spill] sm:$0xff] %v12587_v36  ;;  %vm4633_vm7 = vcmp.ge.f32.partialorder %v9674_v25, 0.0  ;;  %v4761_v21 = vmul.f32 0.01, %v9674_v25  ;;  %vm4632_vm8 = vcmp.ge.f32.partialorder %v9643_v3, 0.0  ;;  %v9644_v19 = vadd.f32 %v4306_v5, %v12492_v62 }
 0x894   :  { %v4760_v24 = vmul.f32 0.01, %v9643_v3  ;;  %vm4634_vm10 = vcmp.ge.f32.partialorder %v9675_v9, 0.0  ;;  %v4762_v55 = vmul.f32 0.01, %v9675_v9  ;;  %v12591_v2 = vsel %vm4631_vm6, %v9642_v31, %v4759_v52  ;;  %v4308_v33 = vpop.f32.mrb[177].mxu1 }
 0x895   :  { %14065 = vst [vmem:[#allocation205_spill] sm:$0xff] %v12591_v2  ;;  %v12593_v45 = vsel %vm4633_vm7, %v9674_v25, %v4761_v21  ;;  %v9676_v10 = vadd.f32 %v4532_v57, %v12495_v47  ;;  %v4534_v22 = vpop.f32.mrb[145].mxu0  ;;  %v9645_v30 = vadd.f32 %v4308_v33, %v12498_v41  ;;  %v4310_v36 = vpop.f32.mrb[178].mxu1  ;;  %vm4639_vm11 = vcmp.ge.f32.partialorder %v9644_v19, 0.0 }
 0x896   :  { %14066 = vst [vmem:[#allocation206_spill] sm:$0xff] %v12593_v45  ;;  %v12597_v29 = vsel %vm4632_vm8, %v9643_v3, %v4760_v24  ;;  %v12599_v51 = vsel %vm4634_vm10, %v9675_v9, %v4762_v55  ;;  %v9677_v48 = vadd.f32 %v4534_v22, %v12501_v14  ;;  %v4536_v8 = vpop.f32.mrb[146].mxu0  ;;  %v4767_v31 = vmul.f32 0.01, %v9644_v19  ;;  %v4312_v24 = vpop.f32.mrb[179].mxu1 }
 0x897   :  { %14067 = vst [vmem:[#allocation207_spill] sm:$0xff] %v12597_v29  ;;  %14068 = vst [vmem:[#allocation208_spill] sm:$0xff] %v12599_v51  ;;  %vm4641_vm0 = vcmp.ge.f32.partialorder %v9676_v10, 0.0  ;;  %v4769_v25 = vmul.f32 0.01, %v9676_v10  ;;  %vm4640_vm12 = vcmp.ge.f32.partialorder %v9645_v30, 0.0  ;;  %v9646_v9 = vadd.f32 %v4310_v36, %v12492_v62 }
 0x898   :  { %v4768_v5 = vmul.f32 0.01, %v9645_v30  ;;  %vm4642_vm13 = vcmp.ge.f32.partialorder %v9677_v48, 0.0  ;;  %v4770_v57 = vmul.f32 0.01, %v9677_v48  ;;  %v12603_v52 = vsel %vm4639_vm11, %v9644_v19, %v4767_v31  ;;  %v4538_v55 = vpop.f32.mrb[147].mxu0 }
 0x899   :  { %14069 = vst [vmem:[#allocation209_spill] sm:$0xff] %v12603_v52  ;;  %v12605_v3 = vsel %vm4641_vm0, %v9676_v10, %v4769_v25  ;;  %v9678_v21 = vadd.f32 %v4536_v8, %v12495_v47  ;;  %v9647_v45 = vadd.f32 %v4312_v24, %v12498_v41  ;;  %v9679_v2 = vadd.f32 %v4538_v55, %v12501_v14 }
 0x89a   :  { %14070 = vst [vmem:[#allocation210_spill] sm:$0xff] %v12605_v3  ;;  %v12609_v33 = vsel %vm4640_vm12, %v9645_v30, %v4768_v5  ;;  %v12611_v22 = vsel %vm4642_vm13, %v9677_v48, %v4770_v57  ;;  %v4316_v51 = vpop.f32.mrb[180].mxu1  ;;  %v4542_v29 = vpop.f32.mrb[148].mxu0  ;;  %vm4647_vm14 = vcmp.ge.f32.partialorder %v9646_v9, 0.0  ;;  %v4775_v19 = vmul.f32 0.01, %v9646_v9 }
 0x89b   :  { %14071 = vst [vmem:[#allocation211_spill] sm:$0xff] %v12609_v33  ;;  %14072 = vst [vmem:[#allocation212_spill] sm:$0xff] %v12611_v22  ;;  %vm4649_vm15 = vcmp.ge.f32.partialorder %v9678_v21, 0.0  ;;  %v4777_v10 = vmul.f32 0.01, %v9678_v21  ;;  %vm4648_vm1 = vcmp.ge.f32.partialorder %v9647_v45, 0.0  ;;  %v9648_v48 = vadd.f32 %v4316_v51, %v12492_v62 }
 0x89c   :  { %v4776_v36 = vmul.f32 0.01, %v9647_v45  ;;  %vm4650_vm2 = vcmp.ge.f32.partialorder %v9679_v2, 0.0  ;;  %v4778_v8 = vmul.f32 0.01, %v9679_v2  ;;  %v12615_v31 = vsel %vm4647_vm14, %v9646_v9, %v4775_v19  ;;  %v4318_v5 = vpop.f32.mrb[181].mxu1 }
 0x89d   :  { %14073 = vst [vmem:[#allocation213_spill] sm:$0xff] %v12615_v31  ;;  %v12617_v30 = vsel %vm4649_vm15, %v9678_v21, %v4777_v10  ;;  %v9680_v25 = vadd.f32 %v4542_v29, %v12495_v47  ;;  %v4544_v57 = vpop.f32.mrb[149].mxu0  ;;  %v9649_v3 = vadd.f32 %v4318_v5, %v12498_v41  ;;  %v4320_v22 = vpop.f32.mrb[182].mxu1  ;;  %vm4655_vm3 = vcmp.ge.f32.partialorder %v9648_v48, 0.0 }
 0x89e   :  { %14074 = vst [vmem:[#allocation214_spill] sm:$0xff] %v12617_v30  ;;  %v12621_v24 = vsel %vm4648_vm1, %v9647_v45, %v4776_v36  ;;  %v12623_v55 = vsel %vm4650_vm2, %v9679_v2, %v4778_v8  ;;  %v9681_v52 = vadd.f32 %v4544_v57, %v12501_v14  ;;  %v4546_v33 = vpop.f32.mrb[150].mxu0  ;;  %v4783_v9 = vmul.f32 0.01, %v9648_v48  ;;  %v4322_v36 = vpop.f32.mrb[183].mxu1 }
 0x89f   :  { %14075 = vst [vmem:[#allocation215_spill] sm:$0xff] %v12621_v24  ;;  %14076 = vst [vmem:[#allocation216_spill] sm:$0xff] %v12623_v55  ;;  %vm4657_vm4 = vcmp.ge.f32.partialorder %v9680_v25, 0.0  ;;  %v4785_v21 = vmul.f32 0.01, %v9680_v25  ;;  %vm4656_vm5 = vcmp.ge.f32.partialorder %v9649_v3, 0.0  ;;  %v9650_v2 = vadd.f32 %v4320_v22, %v12492_v62 }
 0x8a0   :  { %v4784_v51 = vmul.f32 0.01, %v9649_v3  ;;  %vm4658_vm6 = vcmp.ge.f32.partialorder %v9681_v52, 0.0  ;;  %v4786_v29 = vmul.f32 0.01, %v9681_v52  ;;  %v12627_v19 = vsel %vm4655_vm3, %v9648_v48, %v4783_v9  ;;  %v4548_v8 = vpop.f32.mrb[151].mxu0 }
 0x8a1   :  { %14077 = vst [vmem:[#allocation217_spill] sm:$0xff] %v12627_v19  ;;  %v12629_v45 = vsel %vm4657_vm4, %v9680_v25, %v4785_v21  ;;  %v9682_v10 = vadd.f32 %v4546_v33, %v12495_v47  ;;  %v9651_v30 = vadd.f32 %v4322_v36, %v12498_v41  ;;  %v9683_v31 = vadd.f32 %v4548_v8, %v12501_v14 }
 0x8a2   :  { %14078 = vst [vmem:[#allocation218_spill] sm:$0xff] %v12629_v45  ;;  %v12633_v5 = vsel %vm4656_vm5, %v9649_v3, %v4784_v51  ;;  %v12635_v57 = vsel %vm4658_vm6, %v9681_v52, %v4786_v29  ;;  %v4326_v55 = vpop.f32.mrb[184].mxu1  ;;  %v4552_v24 = vpop.f32.mrb[152].mxu0  ;;  %vm4663_vm7 = vcmp.ge.f32.partialorder %v9650_v2, 0.0  ;;  %v4791_v48 = vmul.f32 0.01, %v9650_v2 }
 0x8a3   :  { %14079 = vst [vmem:[#allocation219_spill] sm:$0xff] %v12633_v5  ;;  %14080 = vst [vmem:[#allocation220_spill] sm:$0xff] %v12635_v57  ;;  %vm4665_vm8 = vcmp.ge.f32.partialorder %v9682_v10, 0.0  ;;  %v4793_v25 = vmul.f32 0.01, %v9682_v10  ;;  %vm4664_vm10 = vcmp.ge.f32.partialorder %v9651_v30, 0.0  ;;  %v9652_v52 = vadd.f32 %v4326_v55, %v12492_v62 }
 0x8a4   :  { %v4792_v22 = vmul.f32 0.01, %v9651_v30  ;;  %vm4666_vm11 = vcmp.ge.f32.partialorder %v9683_v31, 0.0  ;;  %v4794_v33 = vmul.f32 0.01, %v9683_v31  ;;  %v12639_v9 = vsel %vm4663_vm7, %v9650_v2, %v4791_v48  ;;  %v4328_v51 = vpop.f32.mrb[185].mxu1 }
 0x8a5   :  { %14081 = vst [vmem:[#allocation221_spill] sm:$0xff] %v12639_v9  ;;  %v12641_v3 = vsel %vm4665_vm8, %v9682_v10, %v4793_v25  ;;  %v9684_v21 = vadd.f32 %v4552_v24, %v12495_v47  ;;  %v4554_v29 = vpop.f32.mrb[153].mxu0  ;;  %v9653_v45 = vadd.f32 %v4328_v51, %v12498_v41  ;;  %v4330_v57 = vpop.f32.mrb[186].mxu1  ;;  %vm4671_vm0 = vcmp.ge.f32.partialorder %v9652_v52, 0.0 }
 0x8a6   :  { %14082 = vst [vmem:[#allocation222_spill] sm:$0xff] %v12641_v3  ;;  %v12645_v36 = vsel %vm4664_vm10, %v9651_v30, %v4792_v22  ;;  %v12647_v8 = vsel %vm4666_vm11, %v9683_v31, %v4794_v33  ;;  %v9685_v19 = vadd.f32 %v4554_v29, %v12501_v14  ;;  %v4556_v5 = vpop.f32.mrb[154].mxu0  ;;  %v4799_v2 = vmul.f32 0.01, %v9652_v52  ;;  %v4332_v22 = vpop.f32.mrb[187].mxu1 }
 0x8a7   :  { %14083 = vst [vmem:[#allocation223_spill] sm:$0xff] %v12645_v36  ;;  %14084 = vst [vmem:[#allocation224_spill] sm:$0xff] %v12647_v8  ;;  %vm4673_vm12 = vcmp.ge.f32.partialorder %v9684_v21, 0.0  ;;  %v4801_v10 = vmul.f32 0.01, %v9684_v21  ;;  %vm4672_vm13 = vcmp.ge.f32.partialorder %v9653_v45, 0.0  ;;  %v9654_v31 = vadd.f32 %v4330_v57, %v12492_v62 }
 0x8a8   :  { %v4800_v55 = vmul.f32 0.01, %v9653_v45  ;;  %vm4674_vm14 = vcmp.ge.f32.partialorder %v9685_v19, 0.0  ;;  %v4802_v24 = vmul.f32 0.01, %v9685_v19  ;;  %v12651_v48 = vsel %vm4671_vm0, %v9652_v52, %v4799_v2  ;;  %v4558_v33 = vpop.f32.mrb[155].mxu0 }
 0x8a9   :  { %14085 = vst [vmem:[#allocation225_spill] sm:$0xff] %v12651_v48  ;;  %v12653_v30 = vsel %vm4673_vm12, %v9684_v21, %v4801_v10  ;;  %v9686_v25 = vadd.f32 %v4556_v5, %v12495_v47  ;;  %v9655_v3 = vadd.f32 %v4332_v22, %v12498_v41  ;;  %v9687_v9 = vadd.f32 %v4558_v33, %v12501_v14 }
 0x8aa   :  { %14086 = vst [vmem:[#allocation226_spill] sm:$0xff] %v12653_v30  ;;  %v12657_v51 = vsel %vm4672_vm13, %v9653_v45, %v4800_v55  ;;  %v12659_v29 = vsel %vm4674_vm14, %v9685_v19, %v4802_v24  ;;  %v4336_v8 = vpop.f32.mrb[188].mxu1  ;;  %v4562_v36 = vpop.f32.mrb[156].mxu0  ;;  %vm4679_vm15 = vcmp.ge.f32.partialorder %v9654_v31, 0.0  ;;  %v4807_v52 = vmul.f32 0.01, %v9654_v31 }
 0x8ab   :  { %14087 = vst [vmem:[#allocation227_spill] sm:$0xff] %v12657_v51  ;;  %14088 = vst [vmem:[#allocation228_spill] sm:$0xff] %v12659_v29  ;;  %vm4681_vm1 = vcmp.ge.f32.partialorder %v9686_v25, 0.0  ;;  %v4809_v21 = vmul.f32 0.01, %v9686_v25  ;;  %vm4680_vm2 = vcmp.ge.f32.partialorder %v9655_v3, 0.0  ;;  %v9656_v19 = vadd.f32 %v4336_v8, %v12492_v62 }
 0x8ac   :  { %v4808_v57 = vmul.f32 0.01, %v9655_v3  ;;  %vm4682_vm3 = vcmp.ge.f32.partialorder %v9687_v9, 0.0  ;;  %v4810_v5 = vmul.f32 0.01, %v9687_v9  ;;  %v12663_v2 = vsel %vm4679_vm15, %v9654_v31, %v4807_v52  ;;  %v4338_v55 = vpop.f32.mrb[189].mxu1 }
 0x8ad   :  { %14089 = vst [vmem:[#allocation229_spill] sm:$0xff] %v12663_v2  ;;  %v12665_v45 = vsel %vm4681_vm1, %v9686_v25, %v4809_v21  ;;  %v9688_v10 = vadd.f32 %v4562_v36, %v12495_v47  ;;  %v4564_v24 = vpop.f32.mrb[157].mxu0  ;;  %v9657_v30 = vadd.f32 %v4338_v55, %v12498_v41  ;;  %v4340_v29 = vpop.f32.mrb[190].mxu1  ;;  %vm4687_vm4 = vcmp.ge.f32.partialorder %v9656_v19, 0.0 }
 0x8ae   :  { %14090 = vst [vmem:[#allocation230_spill] sm:$0xff] %v12665_v45  ;;  %v12669_v22 = vsel %vm4680_vm2, %v9655_v3, %v4808_v57  ;;  %v12671_v33 = vsel %vm4682_vm3, %v9687_v9, %v4810_v5  ;;  %v9689_v48 = vadd.f32 %v4564_v24, %v12501_v14  ;;  %v4566_v51 = vpop.f32.mrb[158].mxu0  ;;  %v4815_v31 = vmul.f32 0.01, %v9656_v19  ;;  %v4342_v57 = vpop.f32.mrb[191].mxu1 }
 0x8af   :  { %14091 = vst [vmem:[#allocation231_spill] sm:$0xff] %v12671_v33  ;;  %vm4689_vm5 = vcmp.ge.f32.partialorder %v9688_v10, 0.0  ;;  %v4817_v25 = vmul.f32 0.01, %v9688_v10  ;;  %vm4688_vm6 = vcmp.ge.f32.partialorder %v9657_v30, 0.0  ;;  %v9658_v9 = vadd.f32 %v4340_v29, %v12492_v62  ;;  %v4568_v5 = vpop.f32.mrb[159].mxu0 }
 0x8b0   :  { %v4816_v8 = vmul.f32 0.01, %v9657_v30  ;;  %vm4690_vm7 = vcmp.ge.f32.partialorder %v9689_v48, 0.0  ;;  %v4818_v36 = vmul.f32 0.01, %v9689_v48  ;;  %v12675_v52 = vsel %vm4687_vm4, %v9656_v19, %v4815_v31 }
 0x8b1   :  { %v12677_v3 = vsel %vm4689_vm5, %v9688_v10, %v4817_v25  ;;  %v9690_v21 = vadd.f32 %v4566_v51, %v12495_v47  ;;  %v9659_v45 = vadd.f32 %v4342_v57, %v12498_v41  ;;  %v9691_v2 = vadd.f32 %v4568_v5, %v12501_v14 }
 0x8b2   :  { %v12681_v55 = vsel %vm4688_vm6, %v9657_v30, %v4816_v8  ;;  %v12683_v24 = vsel %vm4690_vm7, %v9689_v48, %v4818_v36  ;;  %vm4695_vm8 = vcmp.ge.f32.partialorder %v9658_v9, 0.0  ;;  %v4823_v33 = vmul.f32 0.01, %v9658_v9 }
 0x8b3   :  { %vm4697_vm10 = vcmp.ge.f32.partialorder %v9690_v21, 0.0  ;;  %v4825_v19 = vmul.f32 0.01, %v9690_v21  ;;  %vm4696_vm11 = vcmp.ge.f32.partialorder %v9659_v45, 0.0  ;;  %v4824_v10 = vmul.f32 0.01, %v9659_v45 }
 0x8b4   :  { %vm4698_vm0 = vcmp.ge.f32.partialorder %v9691_v2, 0.0  ;;  %v4826_v62 = vmul.f32 0.01, %v9691_v2  ;;  %v12687_v29 = vsel %vm4695_vm8, %v9658_v9, %v4823_v33 }
 0x8b5   :  { %v12689_v47 = vsel %vm4697_vm10, %v9690_v21, %v4825_v19  ;;  %v12691_v30 = vsel %vm4696_vm11, %v9659_v45, %v4824_v10 }
 0x8b6   :  { %v12693_v48 = vsel %vm4698_vm0, %v9691_v2, %v4826_v62 }
 0x8b7   :  { %10752 = dma.done.wait [#allocation9 + $0x2], 8192 }
 0x8b8   :  { %10753 = vsyncadd [#allocation9 + $0x2], 4294959104  ;;  %v4960_v41 = vpack.c.bf16 %v12315_v37, %v12305_v17  ;;  %v4962_v14 = vpack.c.bf16 %v12317_v46, %v12307_v32  ;;  %v14092_v51 = vmov 0   ;;  %v5031_v33 = vld [vmem:[#allocation4 + $0x40] sm:$0xff]  ;;  %v5032_v25 = vld [vmem:[#allocation4 + $0x48] sm:$0xff] }
 0x8b9   :  { %10239 = vset.pattern.permute.xlu1 %v14092_v51  ;;  %10238 = vset.pattern.permute.xlu0 %v14092_v51  ;;  %v5047_v31 = vld [vmem:[#allocation4 + $0xc0] sm:$0xff]  ;;  %v5048_v8 = vld [vmem:[#allocation4 + $0xc8] sm:$0xff]  ;;  %v5033_v37 = vld [vmem:[#allocation4 + $0x50] sm:$0xff] }
 0x8ba   :  { %5120 = vmatprep.mubr.bf16.mxu1 %v4960_v41  ;;  %5217 = vmatprep.mubr.bf16.mxu0 %v4962_v14  ;;  %v5023_v45 = vld [vmem:[#allocation4] sm:$0xff]  ;;  %v5024_v17 = vld [vmem:[#allocation4 + $0x8] sm:$0xff]  ;;  %v5049_v46 = vld [vmem:[#allocation4 + $0xd0] sm:$0xff] }
 0x8bb   :  { %9204 = vmatprep.subr.bf16.mxu1 %v5031_v33  ;;  %9268 = vmatprep.subr.bf16.mxu0 %v5047_v31  ;;  %v5039_v2 = vld [vmem:[#allocation4 + $0x80] sm:$0xff]  ;;  %v5040_v32 = vld [vmem:[#allocation4 + $0x88] sm:$0xff]  ;;  %v5025_v36 = vld [vmem:[#allocation4 + $0x10] sm:$0xff] }
 0x8bc   :  { %9205 = vmatpush3.bf16.msra.mxu1 %v5023_v45  ;;  %9269 = vmatpush3.bf16.msra.mxu0 %v5039_v2  ;;  %v5041_v9 = vld [vmem:[#allocation4 + $0x90] sm:$0xff]  ;;  %v5034_v21 = vld [vmem:[#allocation4 + $0x58] sm:$0xff]  ;;  %v5035_v10 = vld [vmem:[#allocation4 + $0x60] sm:$0xff] }
 0x8bd   :  { %9206 = vmatprep.subr.bf16.mxu1 %v5032_v25  ;;  %9270 = vmatprep.subr.bf16.mxu0 %v5048_v8  ;;  %v5050_v57 = vld [vmem:[#allocation4 + $0xd8] sm:$0xff]  ;;  %v5051_v62 = vld [vmem:[#allocation4 + $0xe0] sm:$0xff]  ;;  %v5036_v33 = vld [vmem:[#allocation4 + $0x68] sm:$0xff] }
 0x8be   :  { %v5026_v5 = vld [vmem:[#allocation4 + $0x18] sm:$0xff]  ;;  %v5027_v41 = vld [vmem:[#allocation4 + $0x20] sm:$0xff]  ;;  %v5052_v31 = vld [vmem:[#allocation4 + $0xe8] sm:$0xff] }
 0x8bf   :  { %v5042_v19 = vld [vmem:[#allocation4 + $0x98] sm:$0xff]  ;;  %v5043_v14 = vld [vmem:[#allocation4 + $0xa0] sm:$0xff]  ;;  %v5028_v45 = vld [vmem:[#allocation4 + $0x28] sm:$0xff] }
 0x8c0   :  { %9207 = vmatpush3.bf16.msra.mxu1 %v5024_v17  ;;  %9271 = vmatpush3.bf16.msra.mxu0 %v5040_v32  ;;  %v5044_v2 = vld [vmem:[#allocation4 + $0xa8] sm:$0xff]  ;;  %v5037_v25 = vld [vmem:[#allocation4 + $0x70] sm:$0xff] }
 0x8c1   :  { %9208 = vmatprep.subr.bf16.mxu1 %v5033_v37  ;;  %9272 = vmatprep.subr.bf16.mxu0 %v5049_v46  ;;  %v5053_v8 = vld [vmem:[#allocation4 + $0xf0] sm:$0xff]  ;;  %v5038_v37 = vld [vmem:[#allocation4 + $0x78] sm:$0xff] }
 0x8c2   :  { %v5029_v17 = vld [vmem:[#allocation4 + $0x30] sm:$0xff]  ;;  %v5054_v46 = vld [vmem:[#allocation4 + $0xf8] sm:$0xff] }
 0x8c3   :  { %v5045_v32 = vld [vmem:[#allocation4 + $0xb0] sm:$0xff] }
 0x8c4   :  { %9209 = vmatpush3.bf16.msra.mxu1 %v5025_v36  ;;  %9273 = vmatpush3.bf16.msra.mxu0 %v5041_v9  ;;  %v5030_v36 = vld [vmem:[#allocation4 + $0x38] sm:$0xff] }
 0x8c5   :  { %9210 = vmatprep.subr.bf16.mxu1 %v5034_v21  ;;  %9274 = vmatprep.subr.bf16.mxu0 %v5050_v57  ;;  %v5046_v9 = vld [vmem:[#allocation4 + $0xb8] sm:$0xff]  ;;  %v5063_v21 = vld [vmem:[#allocation4 + $0x140] sm:$0xff] }
 0x8c6   :  { %v5079_v57 = vld [vmem:[#allocation4 + $0x1c0] sm:$0xff] }
 0x8c8   :  { %9211 = vmatpush3.bf16.msra.mxu1 %v5026_v5  ;;  %9275 = vmatpush3.bf16.msra.mxu0 %v5042_v19  ;;  %v4959_v5 = vpack.c.bf16 %v12311_v6, %v12299_v23  ;;  %v4961_v19 = vpack.c.bf16 %v12313_v63, %v12301_v56  ;;  %v5056_v23 = vld [vmem:[#allocation4 + $0x108] sm:$0xff]  ;;  %v5065_v6 = vld [vmem:[#allocation4 + $0x150] sm:$0xff] }
 0x8c9   :  { %9212 = vmatprep.subr.bf16.mxu1 %v5035_v10  ;;  %9276 = vmatprep.subr.bf16.mxu0 %v5051_v62  ;;  %v5055_v10 = vld [vmem:[#allocation4 + $0x100] sm:$0xff]  ;;  %v5072_v56 = vld [vmem:[#allocation4 + $0x188] sm:$0xff]  ;;  %v5081_v63 = vld [vmem:[#allocation4 + $0x1d0] sm:$0xff] }
 0x8ca   :  { %v5071_v62 = vld [vmem:[#allocation4 + $0x180] sm:$0xff] }
 0x8cc   :  { %9213 = vmatpush3.bf16.msra.mxu1 %v5027_v41  ;;  %9277 = vmatpush3.bf16.msra.mxu0 %v5043_v14  ;;  %v4968_v41 = vpack.c.bf16 %v12339_v50, %v12329_v40  ;;  %v4970_v14 = vpack.c.bf16 %v12341_v20, %v12331_v60  ;;  %v4967_v40 = vpack.c.bf16 %v12335_v15, %v12323_v16  ;;  %v5058_v16 = vld [vmem:[#allocation4 + $0x118] sm:$0xff] }
 0x8cd   :  { %9214 = vmatprep.subr.bf16.mxu1 %v5036_v33  ;;  %9278 = vmatprep.subr.bf16.mxu0 %v5052_v31  ;;  %v5064_v33 = vld [vmem:[#allocation4 + $0x148] sm:$0xff]  ;;  %v4969_v60 = vpack.c.bf16 %v12337_v4, %v12325_v18  ;;  %v4976_v50 = vpack.c.bf16 %v12365_v38, %v12353_v49  ;;  %v4978_v20 = vpack.c.bf16 %v12367_v26, %v12355_v54  ;;  %v5074_v18 = vld [vmem:[#allocation4 + $0x198] sm:$0xff]  ;;  %v5067_v49 = vld [vmem:[#allocation4 + $0x160] sm:$0xff] }
 0x8ce   :  { %v5080_v31 = vld [vmem:[#allocation4 + $0x1c8] sm:$0xff]  ;;  %v4975_v15 = vpack.c.bf16 %v12359_v12, %v12347_v43  ;;  %v4977_v4 = vpack.c.bf16 %v12361_v35, %v12349_v34  ;;  %v5083_v54 = vld [vmem:[#allocation4 + $0x1e0] sm:$0xff]  ;;  %v4984_v38 = vpack.c.bf16 %v12389_v13, %v12377_v59  ;;  %v4986_v26 = vpack.c.bf16 %v12391_v7, %v12379_v58  ;;  %v5069_v13 = vld [vmem:[#allocation4 + $0x170] sm:$0xff] }
 0x8cf   :  { %v5068_v43 = vld [vmem:[#allocation4 + $0x168] sm:$0xff]  ;;  %v4983_v59 = vpack.c.bf16 %v12383_v42, %v12371_v0  ;;  %v4985_v58 = vpack.c.bf16 %v12385_v53, %v12373_v39  ;;  %v5085_v7 = vld [vmem:[#allocation4 + $0x1f0] sm:$0xff]  ;;  %v5070_v0 = vld [vmem:[#allocation4 + $0x178] sm:$0xff] }
 0x8d0   :  { %9215 = vmatpush3.bf16.msra.mxu1 %v5028_v45  ;;  %9279 = vmatpush3.bf16.msra.mxu0 %v5044_v2  ;;  %v5057_v45 = vld [vmem:[#allocation4 + $0x110] sm:$0xff]  ;;  %v5084_v12 = vld [vmem:[#allocation4 + $0x1e8] sm:$0xff]  ;;  %v5086_v42 = vld [vmem:[#allocation4 + $0x1f8] sm:$0xff] }
 0x8d1   :  { %9216 = vmatprep.subr.bf16.mxu1 %v5037_v25  ;;  %9280 = vmatprep.subr.bf16.mxu0 %v5053_v8  ;;  %v5073_v2 = vld [vmem:[#allocation4 + $0x190] sm:$0xff]  ;;  %v5066_v25 = vld [vmem:[#allocation4 + $0x158] sm:$0xff]  ;;  %v5060_v34 = vld [vmem:[#allocation4 + $0x128] sm:$0xff] }
 0x8d2   :  { %v5082_v8 = vld [vmem:[#allocation4 + $0x1d8] sm:$0xff]  ;;  %v5076_v35 = vld [vmem:[#allocation4 + $0x1a8] sm:$0xff] }
 0x8d3   :  { %v5062_v39 = vld [vmem:[#allocation4 + $0x138] sm:$0xff] }
 0x8d4   :  { %9217 = vmatpush3.bf16.msra.mxu1 %v5029_v17  ;;  %9281 = vmatpush3.bf16.msra.mxu0 %v5045_v32  ;;  %v5059_v17 = vld [vmem:[#allocation4 + $0x120] sm:$0xff]  ;;  %v5078_v53 = vld [vmem:[#allocation4 + $0x1b8] sm:$0xff] }
 0x8d5   :  { %9218 = vmatprep.subr.bf16.mxu1 %v5038_v37  ;;  %9282 = vmatprep.subr.bf16.mxu0 %v5054_v46  ;;  %v5075_v32 = vld [vmem:[#allocation4 + $0x1a0] sm:$0xff]  ;;  %v4992_v37 = vpack.c.bf16 %v12413_v61, %v12401_v1  ;;  %v4994_v46 = vpack.c.bf16 %v12415_v11, %v12403_v44  ;;  %v14093_v1 = vld [vmem:[#allocation153_spill] sm:$0xff] }
 0x8d6   :  { %v4991_v44 = vpack.c.bf16 %v14093_v1, %v12395_v28  ;;  %v14094_v61 = vld [vmem:[#allocation151_spill] sm:$0xff]  ;;  %v14103_v28 = vld [vmem:[#allocation158_spill] sm:$0xff] }
 0x8d7   :  { %v14095_v11 = vld [vmem:[#allocation155_spill] sm:$0xff] }
 0x8d8   :  { %9219 = vmatpush3.bf16.msra.mxu1 %v5030_v36  ;;  %9283 = vmatpush3.bf16.msra.mxu0 %v5046_v9  ;;  %v5061_v36 = vld [vmem:[#allocation4 + $0x130] sm:$0xff] }
 0x8d9   :  { %9332 = vmatprep.subr.bf16.mxu1 %v5063_v21  ;;  %9396 = vmatprep.subr.bf16.mxu0 %v5079_v57  ;;  %v5077_v9 = vld [vmem:[#allocation4 + $0x1b0] sm:$0xff]  ;;  %v4993_v21 = vpack.c.bf16 %v14095_v11, %v14094_v61  ;;  %v14130_v61 = vld [vmem:[#allocation192_spill] sm:$0xff] }
 0x8da   :  { %v14096_v57 = vld [vmem:[#allocation157_spill] sm:$0xff] }
 0x8db   :  { %5121 = vmatmul.mubr.bf16.vlgmr.msra.gmra.mrb[192].mxu1 %v4959_v5  ;;  %5218 = vmatmul.mubr.bf16.vlgmr.msra.gmra.mrb[160].mxu0 %v4961_v19  ;;  %v14097_v5 = vld [vmem:[#allocation161_spill] sm:$0xff] }
 0x8dc   :  { %9333 = vmatpush3.bf16.msra.mxu1 %v5055_v10  ;;  %9397 = vmatpush3.bf16.msra.mxu0 %v5071_v62  ;;  %v5000_v19 = vpack.c.bf16 %v14097_v5, %v14096_v57  ;;  %v14098_v10 = vld [vmem:[#allocation159_spill] sm:$0xff]  ;;  %v14132_v57 = vld [vmem:[#allocation189_spill] sm:$0xff] }
 0x8dd   :  { %5128 = vmatprep.mubr.bf16.mxu1 %v4968_v41  ;;  %5225 = vmatprep.mubr.bf16.mxu0 %v4970_v14  ;;  %v14099_v62 = vld [vmem:[#allocation163_spill] sm:$0xff]  ;;  %v14100_v14 = vld [vmem:[#allocation152_spill] sm:$0xff] }
 0x8de   :  { %9334 = vmatprep.subr.bf16.mxu1 %v5064_v33  ;;  %9398 = vmatprep.subr.bf16.mxu0 %v5080_v31  ;;  %v5002_v41 = vpack.c.bf16 %v14099_v62, %v14098_v10  ;;  %v14101_v33 = vld [vmem:[#allocation156_spill] sm:$0xff]  ;;  %v14134_v10 = vld [vmem:[#allocation190_spill] sm:$0xff] }
 0x8df   :  { %v4999_v31 = vpack.c.bf16 %v14101_v33, %v14100_v14  ;;  %v14136_v14 = vld [vmem:[#allocation199_spill] sm:$0xff] }
 0x8e0   :  { %9335 = vmatpush3.bf16.msra.mxu1 %v5056_v23  ;;  %9399 = vmatpush3.bf16.msra.mxu0 %v5072_v56  ;;  %v14102_v23 = vld [vmem:[#allocation154_spill] sm:$0xff] }
 0x8e1   :  { %9336 = vmatprep.subr.bf16.mxu1 %v5065_v6  ;;  %9400 = vmatprep.subr.bf16.mxu0 %v5081_v63  ;;  %v5001_v56 = vpack.c.bf16 %v14103_v28, %v14102_v23  ;;  %v14104_v6 = vld [vmem:[#allocation165_spill] sm:$0xff]  ;;  %v14138_v23 = vld [vmem:[#allocation200_spill] sm:$0xff] }
 0x8e2   :  { %v5008_v63 = vpack.c.bf16 %v12461_v27, %v14104_v6  ;;  %v14115_v27 = vld [vmem:[#allocation169_spill] sm:$0xff] }
 0x8e3   :  { %5129 = vmatmul.mubr.bf16.gmra.mrb[196].mxu1 %v4967_v40  ;;  %5226 = vmatmul.mubr.bf16.gmra.mrb[164].mxu0 %v4969_v60  ;;  %v14105_v40 = vld [vmem:[#allocation167_spill] sm:$0xff]  ;;  %v14106_v60 = vld [vmem:[#allocation168_spill] sm:$0xff]  ;;  %v14140_v6 = vld [vmem:[#allocation197_spill] sm:$0xff] }
 0x8e4   :  { %5136 = vmatprep.mubr.bf16.mxu1 %v4976_v50  ;;  %5233 = vmatprep.mubr.bf16.mxu0 %v4978_v20  ;;  %v5010_v50 = vpack.c.bf16 %v14106_v60, %v14105_v40  ;;  %v14107_v20 = vld [vmem:[#allocation160_spill] sm:$0xff]  ;;  %v14141_v40 = vld [vmem:[#allocation194_spill] sm:$0xff] }
 0x8e5   :  { %9337 = vmatpush3.bf16.msra.mxu1 %v5057_v45  ;;  %9401 = vmatpush3.bf16.msra.mxu0 %v5073_v2  ;;  %v14108_v45 = vld [vmem:[#allocation164_spill] sm:$0xff]  ;;  %v14142_v60 = vld [vmem:[#allocation198_spill] sm:$0xff] }
 0x8e6   :  { %9338 = vmatprep.subr.bf16.mxu1 %v5066_v25  ;;  %9402 = vmatprep.subr.bf16.mxu0 %v5082_v8  ;;  %v5007_v2 = vpack.c.bf16 %v14108_v45, %v14107_v20  ;;  %v14109_v25 = vld [vmem:[#allocation162_spill] sm:$0xff]  ;;  %v14143_v20 = vld [vmem:[#allocation203_spill] sm:$0xff] }
 0x8e7   :  { %v14110_v8 = vld [vmem:[#allocation166_spill] sm:$0xff]  ;;  %v14144_v45 = vld [vmem:[#allocation207_spill] sm:$0xff] }
 0x8e9   :  { %9339 = vmatpush3.bf16.msra.mxu1 %v5058_v16  ;;  %9403 = vmatpush3.bf16.msra.mxu0 %v5074_v18  ;;  %v5009_v16 = vpack.c.bf16 %v14110_v8, %v14109_v25  ;;  %v14111_v18 = vld [vmem:[#allocation171_spill] sm:$0xff]  ;;  %v14145_v25 = vld [vmem:[#allocation204_spill] sm:$0xff] }
 0x8ea   :  { %9340 = vmatprep.subr.bf16.mxu1 %v5067_v49  ;;  %9404 = vmatprep.subr.bf16.mxu0 %v5083_v54  ;;  %v14113_v49 = vld [vmem:[#allocation172_spill] sm:$0xff] }
 0x8eb   :  { %5137 = vmatmul.mubr.bf16.gmra.mrb[200].mxu1 %v4975_v15  ;;  %5234 = vmatmul.mubr.bf16.gmra.mrb[168].mxu0 %v4977_v4  ;;  %v14112_v15 = vld [vmem:[#allocation175_spill] sm:$0xff]  ;;  %v14114_v54 = vld [vmem:[#allocation176_spill] sm:$0xff] }
 0x8ec   :  { %5144 = vmatprep.mubr.bf16.mxu1 %v4984_v38  ;;  %5241 = vmatprep.mubr.bf16.mxu0 %v4986_v26  ;;  %v5016_v4 = vpack.c.bf16 %v14112_v15, %v14111_v18  ;;  %v5018_v38 = vpack.c.bf16 %v14114_v54, %v14113_v49  ;;  %v14116_v26 = vld [vmem:[#allocation173_spill] sm:$0xff]  ;;  %v14146_v8 = vld [vmem:[#allocation208_spill] sm:$0xff]  ;;  %v14149_v49 = vld [vmem:[#allocation202_spill] sm:$0xff] }
 0x8ed   :  { %9341 = vmatpush3.bf16.msra.mxu1 %v5059_v17  ;;  %9405 = vmatpush3.bf16.msra.mxu0 %v5075_v32  ;;  %v5015_v17 = vpack.c.bf16 %v14116_v26, %v14115_v27  ;;  %v14117_v32 = vld [vmem:[#allocation170_spill] sm:$0xff]  ;;  %v14147_v18 = vld [vmem:[#allocation201_spill] sm:$0xff]  ;;  %v14151_v27 = vld [vmem:[#allocation211_spill] sm:$0xff] }
 0x8ee   :  { %9342 = vmatprep.subr.bf16.mxu1 %v5068_v43  ;;  %9406 = vmatprep.subr.bf16.mxu0 %v5084_v12  ;;  %v14118_v43 = vld [vmem:[#allocation174_spill] sm:$0xff]  ;;  %v14148_v15 = vld [vmem:[#allocation205_spill] sm:$0xff]  ;;  %v14152_v26 = vld [vmem:[#allocation215_spill] sm:$0xff] }
 0x8ef   :  { %v5017_v12 = vpack.c.bf16 %v14118_v43, %v14117_v32  ;;  %v14150_v54 = vld [vmem:[#allocation206_spill] sm:$0xff]  ;;  %v14153_v32 = vld [vmem:[#allocation212_spill] sm:$0xff] }
 0x8f0   :  { %v14154_v43 = vld [vmem:[#allocation216_spill] sm:$0xff] }
 0x8f1   :  { %9343 = vmatpush3.bf16.msra.mxu1 %v5060_v34  ;;  %9407 = vmatpush3.bf16.msra.mxu0 %v5076_v35  ;;  %v14119_v34 = vld [vmem:[#allocation179_spill] sm:$0xff] }
 0x8f2   :  { %9344 = vmatprep.subr.bf16.mxu1 %v5069_v13  ;;  %9408 = vmatprep.subr.bf16.mxu0 %v5085_v7  ;;  %v14120_v35 = vld [vmem:[#allocation183_spill] sm:$0xff]  ;;  %v14122_v13 = vld [vmem:[#allocation184_spill] sm:$0xff] }
 0x8f3   :  { %5145 = vmatmul.mubr.bf16.gmra.mrb[204].mxu1 %v4983_v59  ;;  %5242 = vmatmul.mubr.bf16.gmra.mrb[172].mxu0 %v4985_v58  ;;  %v4964_v59 = vpack.c.bf16 %v14120_v35, %v14119_v34  ;;  %v14121_v58 = vld [vmem:[#allocation180_spill] sm:$0xff]  ;;  %v14155_v34 = vld [vmem:[#allocation209_spill] sm:$0xff] }
 0x8f4   :  { %5152 = vmatprep.mubr.bf16.mxu1 %v4992_v37  ;;  %5249 = vmatprep.mubr.bf16.mxu0 %v4994_v46  ;;  %v4966_v7 = vpack.c.bf16 %v14122_v13, %v14121_v58  ;;  %v14123_v37 = vld [vmem:[#allocation177_spill] sm:$0xff]  ;;  %v14157_v58 = vld [vmem:[#allocation210_spill] sm:$0xff] }
 0x8f5   :  { %9345 = vmatpush3.bf16.msra.mxu1 %v5061_v36  ;;  %9409 = vmatpush3.bf16.msra.mxu0 %v5077_v9  ;;  %v14124_v46 = vld [vmem:[#allocation181_spill] sm:$0xff]  ;;  %v14125_v9 = vld [vmem:[#allocation178_spill] sm:$0xff] }
 0x8f6   :  { %9346 = vmatprep.subr.bf16.mxu1 %v5070_v0  ;;  %9410 = vmatprep.subr.bf16.mxu0 %v5086_v42  ;;  %v4963_v36 = vpack.c.bf16 %v14124_v46, %v14123_v37  ;;  %v14126_v0 = vld [vmem:[#allocation182_spill] sm:$0xff]  ;;  %v14156_v35 = vld [vmem:[#allocation213_spill] sm:$0xff]  ;;  %v14159_v37 = vld [vmem:[#allocation219_spill] sm:$0xff] }
 0x8f7   :  { %v4965_v42 = vpack.c.bf16 %v14126_v0, %v14125_v9  ;;  %v14158_v13 = vld [vmem:[#allocation214_spill] sm:$0xff]  ;;  %v14160_v46 = vld [vmem:[#allocation223_spill] sm:$0xff]  ;;  %v14161_v9 = vld [vmem:[#allocation220_spill] sm:$0xff] }
 0x8f8   :  { %v14162_v0 = vld [vmem:[#allocation224_spill] sm:$0xff] }
 0x8f9   :  { %9347 = vmatpush3.bf16.msra.mxu1 %v5062_v39  ;;  %9411 = vmatpush3.bf16.msra.mxu0 %v5078_v53  ;;  %v14127_v39 = vld [vmem:[#allocation187_spill] sm:$0xff] }
 0x8fa   :  { %v14128_v53 = vld [vmem:[#allocation191_spill] sm:$0xff] }
 0x8fb   :  { %5153 = vmatmul.mubr.bf16.gmra.mrb[208].mxu1 %v4991_v44  ;;  %5250 = vmatmul.mubr.bf16.gmra.mrb[176].mxu0 %v4993_v21  ;;  %v4972_v1 = vpack.c.bf16 %v14128_v53, %v14127_v39  ;;  %v14129_v44 = vld [vmem:[#allocation188_spill] sm:$0xff]  ;;  %v14131_v21 = vld [vmem:[#allocation185_spill] sm:$0xff] }
 0x8fc   :  { %5160 = vmatprep.mubr.bf16.mxu1 %v5000_v19  ;;  %5257 = vmatprep.mubr.bf16.mxu0 %v5002_v41  ;;  %v4974_v11 = vpack.c.bf16 %v14130_v61, %v14129_v44  ;;  %v4971_v5 = vpack.c.bf16 %v14132_v57, %v14131_v21  ;;  %v14133_v19 = vld [vmem:[#allocation186_spill] sm:$0xff]  ;;  %v14135_v41 = vld [vmem:[#allocation195_spill] sm:$0xff]  ;;  %v14163_v39 = vld [vmem:[#allocation217_spill] sm:$0xff] }
 0x8fd   :  { %v4973_v62 = vpack.c.bf16 %v14134_v10, %v14133_v19  ;;  %v4980_v33 = vpack.c.bf16 %v14136_v14, %v14135_v41  ;;  %v14164_v53 = vld [vmem:[#allocation221_spill] sm:$0xff]  ;;  %v14165_v44 = vld [vmem:[#allocation218_spill] sm:$0xff]  ;;  %v14167_v21 = vld [vmem:[#allocation227_spill] sm:$0xff] }
 0x8fe   :  { %v14166_v61 = vld [vmem:[#allocation222_spill] sm:$0xff]  ;;  %v5012_v57 = vpack.c.bf16 %v12669_v22, %v14167_v21  ;;  %v14169_v19 = vld [vmem:[#allocation231_spill] sm:$0xff]  ;;  %v14171_v41 = vld [vmem:[#allocation229_spill] sm:$0xff]  ;;  %v5019_v22 = vpack.c.bf16 %v12687_v29, %v12675_v52 }
 0x903   :  { %5161 = vmatmul.mubr.bf16.gmra.mrb[212].mxu1 %v4999_v31  ;;  %5258 = vmatmul.mubr.bf16.gmra.mrb[180].mxu0 %v5001_v56  ;;  %v14137_v31 = vld [vmem:[#allocation196_spill] sm:$0xff]  ;;  %v14139_v56 = vld [vmem:[#allocation193_spill] sm:$0xff] }
 0x904   :  { %5168 = vmatprep.mubr.bf16.mxu1 %v5008_v63  ;;  %5265 = vmatprep.mubr.bf16.mxu0 %v5010_v50  ;;  %v4982_v28 = vpack.c.bf16 %v14138_v23, %v14137_v31  ;;  %v4979_v63 = vpack.c.bf16 %v14140_v6, %v14139_v56  ;;  %v4981_v50 = vpack.c.bf16 %v14142_v60, %v14141_v40  ;;  %v14173_v31 = vld [vmem:[#allocation230_spill] sm:$0xff] }
 0x905   :  { %v5022_v56 = vpack.c.bf16 %v12693_v48, %v12683_v24  ;;  %v5021_v6 = vpack.c.bf16 %v12689_v47, %v12677_v3  ;;  %v12825_v60 = vld [vmem:[#allocation25 + $0x5] ss:$0 sm:$0xff] }
 0x90b   :  { %5169 = vmatmul.mubr.bf16.gmra.mrb[216].mxu1 %v5007_v2  ;;  %5266 = vmatmul.mubr.bf16.gmra.mrb[184].mxu0 %v5009_v16  ;;  %v4988_v2 = vpack.c.bf16 %v14144_v45, %v14143_v20  ;;  %v4990_v16 = vpack.c.bf16 %v14146_v8, %v14145_v25 }
 0x90c   :  { %5176 = vmatprep.mubr.bf16.mxu1 %v5016_v4  ;;  %5273 = vmatprep.mubr.bf16.mxu0 %v5018_v38  ;;  %v4987_v4 = vpack.c.bf16 %v14148_v15, %v14147_v18  ;;  %v4989_v38 = vpack.c.bf16 %v14150_v54, %v14149_v49 }
 0x913   :  { %5177 = vmatmul.mubr.bf16.gmra.mrb[220].mxu1 %v5015_v17  ;;  %5274 = vmatmul.mubr.bf16.gmra.mrb[188].mxu0 %v5017_v12  ;;  %v4996_v17 = vpack.c.bf16 %v14152_v26, %v14151_v27  ;;  %v4998_v12 = vpack.c.bf16 %v14154_v43, %v14153_v32 }
 0x914   :  { %5314 = vmatprep.mubr.bf16.mxu1 %v4964_v59  ;;  %5411 = vmatprep.mubr.bf16.mxu0 %v4966_v7  ;;  %v4995_v59 = vpack.c.bf16 %v14156_v35, %v14155_v34  ;;  %v4997_v7 = vpack.c.bf16 %v14158_v13, %v14157_v58 }
 0x91b   :  { %5315 = vmatmul.mubr.bf16.vlgmr.msra.gmra.mrb[224].mxu1 %v4963_v36  ;;  %5412 = vmatmul.mubr.bf16.vlgmr.msra.gmra.mrb[192].mxu0 %v4965_v42  ;;  %v5004_v36 = vpack.c.bf16 %v14160_v46, %v14159_v37  ;;  %v5006_v42 = vpack.c.bf16 %v14162_v0, %v14161_v9 }
 0x91c   :  { %5322 = vmatprep.mubr.bf16.mxu1 %v4972_v1  ;;  %5419 = vmatprep.mubr.bf16.mxu0 %v4974_v11  ;;  %v5003_v1 = vpack.c.bf16 %v14164_v53, %v14163_v39  ;;  %v5005_v11 = vpack.c.bf16 %v14166_v61, %v14165_v44 }
 0x923   :  { %5323 = vmatmul.mubr.bf16.gmra.mrb[228].mxu1 %v4971_v5  ;;  %5420 = vmatmul.mubr.bf16.gmra.mrb[196].mxu0 %v4973_v62  ;;  %v14168_v5 = vld [vmem:[#allocation228_spill] sm:$0xff]  ;;  %v14170_v62 = vld [vmem:[#allocation225_spill] sm:$0xff] }
 0x924   :  { %5330 = vmatprep.mubr.bf16.mxu1 %v4980_v33  ;;  %5427 = vmatprep.mubr.bf16.mxu0 %v4982_v28  ;;  %v5014_v10 = vpack.c.bf16 %v14169_v19, %v14168_v5  ;;  %v5011_v14 = vpack.c.bf16 %v14171_v41, %v14170_v62  ;;  %v14172_v33 = vld [vmem:[#allocation226_spill] sm:$0xff]  ;;  %v5020_v28 = vpack.c.bf16 %v12691_v30, %v12681_v55 }
 0x925   :  { %v5013_v23 = vpack.c.bf16 %v14173_v31, %v14172_v33 }
 0x92b   :  { %5331 = vmatmul.mubr.bf16.gmra.mrb[232].mxu1 %v4979_v63  ;;  %5428 = vmatmul.mubr.bf16.gmra.mrb[200].mxu0 %v4981_v50 }
 0x92c   :  { %5338 = vmatprep.mubr.bf16.mxu1 %v4988_v2  ;;  %5435 = vmatprep.mubr.bf16.mxu0 %v4990_v16 }
 0x933   :  { %5339 = vmatmul.mubr.bf16.gmra.mrb[236].mxu1 %v4987_v4  ;;  %5436 = vmatmul.mubr.bf16.gmra.mrb[204].mxu0 %v4989_v38 }
 0x934   :  { %5346 = vmatprep.mubr.bf16.mxu1 %v4996_v17  ;;  %5443 = vmatprep.mubr.bf16.mxu0 %v4998_v12 }
 0x93b   :  { %5347 = vmatmul.mubr.bf16.gmra.mrb[240].mxu1 %v4995_v59  ;;  %5444 = vmatmul.mubr.bf16.gmra.mrb[208].mxu0 %v4997_v7 }
 0x93c   :  { %5354 = vmatprep.mubr.bf16.mxu1 %v5004_v36  ;;  %5451 = vmatprep.mubr.bf16.mxu0 %v5006_v42 }
 0x943   :  { %5355 = vmatmul.mubr.bf16.gmra.mrb[244].mxu1 %v5003_v1  ;;  %5452 = vmatmul.mubr.bf16.gmra.mrb[212].mxu0 %v5005_v11 }
 0x944   :  { %5362 = vmatprep.mubr.bf16.mxu1 %v5012_v57  ;;  %5459 = vmatprep.mubr.bf16.mxu0 %v5014_v10 }
 0x94b   :  { %5363 = vmatmul.mubr.bf16.gmra.mrb[248].mxu1 %v5011_v14  ;;  %5460 = vmatmul.mubr.bf16.gmra.mrb[216].mxu0 %v5013_v23 }
 0x94c   :  { %5370 = vmatprep.mubr.bf16.mxu1 %v5020_v28  ;;  %5467 = vmatprep.mubr.bf16.mxu0 %v5022_v56 }
 0x953   :  { %5371 = vmatmul.mubr.bf16.gmra.mrb[252].mxu1 %v5019_v22  ;;  %5468 = vmatmul.mubr.bf16.gmra.mrb[220].mxu0 %v5021_v6 }
 0x9ae   :  { %v9220_v63 = vpop.f32.mrb[192].mxu1  ;;  %v9284_v40 = vpop.f32.mrb[160].mxu0 }
 0x9af   :  { %v9221_v55 = vpop.f32.mrb[193].mxu1  ;;  %v9285_v30 = vpop.f32.mrb[161].mxu0 }
 0x9b0   :  { %v9222_v50 = vadd.f32 %v9221_v55, %v9220_v63  ;;  %v9286_v24 = vadd.f32 %v9285_v30, %v9284_v40  ;;  %v9223_v48 = vpop.f32.mrb[194].mxu1  ;;  %v9287_v20 = vpop.f32.mrb[162].mxu0 }
 0x9b1   :  { %v9224_v45 = vpop.f32.mrb[195].mxu1  ;;  %v9288_v2 = vpop.f32.mrb[163].mxu0 }
 0x9b2   :  { %v5123_v25 = vadd.f32 %v9222_v50, %v12825_v60  ;;  %v9225_v52 = vadd.f32 %v9224_v45, %v9223_v48  ;;  %v9289_v29 = vadd.f32 %v9288_v2, %v9287_v20 }
 0x9b4   :  { %v12828_v8 = vadd.f32 %v9286_v24, %v5123_v25  ;;  %v5126_v3 = vadd.f32 %v9225_v52, %v12825_v60 }
 0x9b6   :  { %v12831_v47 = vadd.f32 %v9289_v29, %v5126_v3  ;;  %v9226_v16 = vpop.f32.mrb[196].mxu1  ;;  %v9290_v18 = vpop.f32.mrb[164].mxu0 }
 0x9b7   :  { %v9227_v15 = vpop.f32.mrb[197].mxu1  ;;  %v9291_v4 = vpop.f32.mrb[165].mxu0 }
 0x9b8   :  { %v9228_v49 = vadd.f32 %v9227_v15, %v9226_v16  ;;  %v9292_v54 = vadd.f32 %v9291_v4, %v9290_v18  ;;  %v9229_v38 = vpop.f32.mrb[198].mxu1  ;;  %v9293_v27 = vpop.f32.mrb[166].mxu0 }
 0x9b9   :  { %v9230_v26 = vpop.f32.mrb[199].mxu1  ;;  %v9294_v17 = vpop.f32.mrb[167].mxu0 }
 0x9ba   :  { %v5131_v32 = vadd.f32 %v9228_v49, %v12825_v60  ;;  %v9231_v43 = vadd.f32 %v9230_v26, %v9229_v38  ;;  %v9295_v12 = vadd.f32 %v9294_v17, %v9293_v27 }
 0x9bc   :  { %v12834_v34 = vadd.f32 %v9292_v54, %v5131_v32  ;;  %v5134_v35 = vadd.f32 %v9231_v43, %v12825_v60 }
 0x9be   :  { %v12837_v59 = vadd.f32 %v9295_v12, %v5134_v35  ;;  %v9232_v58 = vpop.f32.mrb[200].mxu1  ;;  %v9296_v13 = vpop.f32.mrb[168].mxu0 }
 0x9bf   :  { %v9233_v7 = vpop.f32.mrb[201].mxu1  ;;  %v9297_v37 = vpop.f32.mrb[169].mxu0 }
 0x9c0   :  { %v9234_v46 = vadd.f32 %v9233_v7, %v9232_v58  ;;  %v9298_v36 = vadd.f32 %v9297_v37, %v9296_v13  ;;  %v9235_v9 = vpop.f32.mrb[202].mxu1  ;;  %v9299_v0 = vpop.f32.mrb[170].mxu0 }
 0x9c1   :  { %v9236_v42 = vpop.f32.mrb[203].mxu1  ;;  %v9300_v39 = vpop.f32.mrb[171].mxu0 }
 0x9c2   :  { %v5139_v53 = vadd.f32 %v9234_v46, %v12825_v60  ;;  %v9237_v1 = vadd.f32 %v9236_v42, %v9235_v9  ;;  %v9301_v44 = vadd.f32 %v9300_v39, %v9299_v0 }
 0x9c4   :  { %v12840_v61 = vadd.f32 %v9298_v36, %v5139_v53  ;;  %v5142_v11 = vadd.f32 %v9237_v1, %v12825_v60 }
 0x9c6   :  { %v12843_v21 = vadd.f32 %v9301_v44, %v5142_v11  ;;  %v9238_v57 = vpop.f32.mrb[204].mxu1  ;;  %v9302_v5 = vpop.f32.mrb[172].mxu0 }
 0x9c7   :  { %v9239_v19 = vpop.f32.mrb[205].mxu1  ;;  %v9303_v10 = vpop.f32.mrb[173].mxu0 }
 0x9c8   :  { %v9240_v62 = vadd.f32 %v9239_v19, %v9238_v57  ;;  %v9304_v41 = vadd.f32 %v9303_v10, %v9302_v5  ;;  %v9241_v14 = vpop.f32.mrb[206].mxu1  ;;  %v9305_v33 = vpop.f32.mrb[174].mxu0 }
 0x9c9   :  { %v9242_v31 = vpop.f32.mrb[207].mxu1  ;;  %v9306_v23 = vpop.f32.mrb[175].mxu0 }
 0x9ca   :  { %v5147_v28 = vadd.f32 %v9240_v62, %v12825_v60  ;;  %v9243_v56 = vadd.f32 %v9242_v31, %v9241_v14  ;;  %v9307_v22 = vadd.f32 %v9306_v23, %v9305_v33 }
 0x9cc   :  { %v12846_v6 = vadd.f32 %v9304_v41, %v5147_v28  ;;  %v5150_v63 = vadd.f32 %v9243_v56, %v12825_v60 }
 0x9ce   :  { %v12849_v40 = vadd.f32 %v9307_v22, %v5150_v63  ;;  %v9244_v55 = vpop.f32.mrb[208].mxu1  ;;  %v9308_v30 = vpop.f32.mrb[176].mxu0 }
 0x9cf   :  { %v9245_v50 = vpop.f32.mrb[209].mxu1  ;;  %v9309_v24 = vpop.f32.mrb[177].mxu0 }
 0x9d0   :  { %v9246_v48 = vadd.f32 %v9245_v50, %v9244_v55  ;;  %v9310_v20 = vadd.f32 %v9309_v24, %v9308_v30  ;;  %v9247_v45 = vpop.f32.mrb[210].mxu1  ;;  %v9311_v2 = vpop.f32.mrb[178].mxu0 }
 0x9d1   :  { %v9248_v25 = vpop.f32.mrb[211].mxu1  ;;  %v9312_v52 = vpop.f32.mrb[179].mxu0 }
 0x9d2   :  { %v5155_v29 = vadd.f32 %v9246_v48, %v12825_v60  ;;  %v9249_v3 = vadd.f32 %v9248_v25, %v9247_v45  ;;  %v9313_v16 = vadd.f32 %v9312_v52, %v9311_v2 }
 0x9d4   :  { %v12852_v18 = vadd.f32 %v9310_v20, %v5155_v29  ;;  %v5158_v15 = vadd.f32 %v9249_v3, %v12825_v60 }
 0x9d6   :  { %v12855_v4 = vadd.f32 %v9313_v16, %v5158_v15  ;;  %v9250_v49 = vpop.f32.mrb[212].mxu1  ;;  %v9314_v54 = vpop.f32.mrb[180].mxu0 }
 0x9d7   :  { %v9251_v38 = vpop.f32.mrb[213].mxu1  ;;  %v9315_v27 = vpop.f32.mrb[181].mxu0 }
 0x9d8   :  { %v9252_v26 = vadd.f32 %v9251_v38, %v9250_v49  ;;  %v9316_v17 = vadd.f32 %v9315_v27, %v9314_v54  ;;  %v9253_v32 = vpop.f32.mrb[214].mxu1  ;;  %v9317_v43 = vpop.f32.mrb[182].mxu0 }
 0x9d9   :  { %v9254_v12 = vpop.f32.mrb[215].mxu1  ;;  %v9318_v35 = vpop.f32.mrb[183].mxu0 }
 0x9da   :  { %v5163_v58 = vadd.f32 %v9252_v26, %v12825_v60  ;;  %v9255_v13 = vadd.f32 %v9254_v12, %v9253_v32  ;;  %v9319_v7 = vadd.f32 %v9318_v35, %v9317_v43 }
 0x9dc   :  { %v12858_v37 = vadd.f32 %v9316_v17, %v5163_v58  ;;  %v5166_v46 = vadd.f32 %v9255_v13, %v12825_v60 }
 0x9de   :  { %v12861_v36 = vadd.f32 %v9319_v7, %v5166_v46  ;;  %v9256_v9 = vpop.f32.mrb[216].mxu1  ;;  %v9320_v0 = vpop.f32.mrb[184].mxu0 }
 0x9df   :  { %v9257_v42 = vpop.f32.mrb[217].mxu1  ;;  %v9321_v39 = vpop.f32.mrb[185].mxu0 }
 0x9e0   :  { %v9258_v53 = vadd.f32 %v9257_v42, %v9256_v9  ;;  %v9322_v1 = vadd.f32 %v9321_v39, %v9320_v0  ;;  %v9259_v44 = vpop.f32.mrb[218].mxu1  ;;  %v9323_v11 = vpop.f32.mrb[186].mxu0 }
 0x9e1   :  { %v9260_v57 = vpop.f32.mrb[219].mxu1  ;;  %v9324_v5 = vpop.f32.mrb[187].mxu0 }
 0x9e2   :  { %v5171_v19 = vadd.f32 %v9258_v53, %v12825_v60  ;;  %v9261_v10 = vadd.f32 %v9260_v57, %v9259_v44  ;;  %v9325_v62 = vadd.f32 %v9324_v5, %v9323_v11 }
 0x9e4   :  { %v12864_v41 = vadd.f32 %v9322_v1, %v5171_v19  ;;  %v5174_v14 = vadd.f32 %v9261_v10, %v12825_v60 }
 0x9e6   :  { %v12867_v33 = vadd.f32 %v9325_v62, %v5174_v14  ;;  %v9262_v31 = vpop.f32.mrb[220].mxu1  ;;  %v9326_v23 = vpop.f32.mrb[188].mxu0 }
 0x9e7   :  { %v9263_v28 = vpop.f32.mrb[221].mxu1  ;;  %v9327_v56 = vpop.f32.mrb[189].mxu0 }
 0x9e8   :  { %v9264_v22 = vadd.f32 %v9263_v28, %v9262_v31  ;;  %v9328_v63 = vadd.f32 %v9327_v56, %v9326_v23  ;;  %v9265_v55 = vpop.f32.mrb[222].mxu1  ;;  %v9329_v30 = vpop.f32.mrb[190].mxu0 }
 0x9e9   :  { %v9266_v50 = vpop.f32.mrb[223].mxu1  ;;  %v9330_v24 = vpop.f32.mrb[191].mxu0 }
 0x9ea   :  { %v5179_v48 = vadd.f32 %v9264_v22, %v12825_v60  ;;  %v9267_v20 = vadd.f32 %v9266_v50, %v9265_v55  ;;  %v9331_v45 = vadd.f32 %v9330_v24, %v9329_v30 }
 0x9ec   :  { %v12870_v2 = vadd.f32 %v9328_v63, %v5179_v48  ;;  %v5182_v25 = vadd.f32 %v9267_v20, %v12825_v60  ;;  %v12877_v60 = vld [vmem:[#allocation16] ss:$0 sm:$0xff] }
 0x9ee   :  { %v12873_v52 = vadd.f32 %v9331_v45, %v5182_v25  ;;  %v9348_v29 = vpop.f32.mrb[224].mxu1  ;;  %v9412_v3 = vpop.f32.mrb[192].mxu0 }
 0x9ef   :  { %v9349_v16 = vpop.f32.mrb[225].mxu1  ;;  %v9413_v15 = vpop.f32.mrb[193].mxu0 }
 0x9f0   :  { %v9350_v49 = vadd.f32 %v9349_v16, %v9348_v29  ;;  %v9414_v54 = vadd.f32 %v9413_v15, %v9412_v3  ;;  %v9351_v38 = vpop.f32.mrb[226].mxu1  ;;  %v9415_v27 = vpop.f32.mrb[194].mxu0 }
 0x9f1   :  { %v9352_v26 = vpop.f32.mrb[227].mxu1  ;;  %v9416_v17 = vpop.f32.mrb[195].mxu0 }
 0x9f2   :  { %v5317_v32 = vadd.f32 %v9350_v49, %v12828_v8  ;;  %v9353_v43 = vadd.f32 %v9352_v26, %v9351_v38  ;;  %v9417_v12 = vadd.f32 %v9416_v17, %v9415_v27 }
 0x9f4   :  { %v5414_v35 = vadd.f32 %v9414_v54, %v5317_v32  ;;  %v5320_v58 = vadd.f32 %v9353_v43, %v12831_v47 }
 0x9f6   :  { %v5417_v13 = vadd.f32 %v9417_v12, %v5320_v58  ;;  %v9354_v7 = vpop.f32.mrb[228].mxu1  ;;  %v9418_v46 = vpop.f32.mrb[196].mxu0  ;;  %vm5476_vm12 = vcmp.ge.f32.partialorder %v5414_v35, 0.0  ;;  %v5492_v9 = vmul.f32 0.01, %v5414_v35 }
 0x9f7   :  { %v9355_v0 = vpop.f32.mrb[229].mxu1  ;;  %v9419_v42 = vpop.f32.mrb[197].mxu0 }
 0x9f8   :  { %v5493_v39 = vmul.f32 0.01, %v5417_v13  ;;  %v9356_v53 = vadd.f32 %v9355_v0, %v9354_v7  ;;  %v9420_v1 = vadd.f32 %v9419_v42, %v9418_v46  ;;  %v9357_v44 = vpop.f32.mrb[230].mxu1  ;;  %v9421_v11 = vpop.f32.mrb[198].mxu0  ;;  %v12879_v8 = vsel %vm5476_vm12, %v5414_v35, %v5492_v9 }
 0x9f9   :  { %v9358_v57 = vpop.f32.mrb[231].mxu1  ;;  %v9422_v5 = vpop.f32.mrb[199].mxu0  ;;  %v5586_v47 = vmul.f32 %v12877_v60, %v12879_v8  ;;  %vm5477_vm13 = vcmp.ge.f32.partialorder %v5417_v13, 0.0 }
 0x9fa   :  { %v5325_v19 = vadd.f32 %v9356_v53, %v12834_v34  ;;  %v9359_v10 = vadd.f32 %v9358_v57, %v9357_v44  ;;  %v9423_v62 = vadd.f32 %v9422_v5, %v9421_v11  ;;  %v12884_v14 = vsel %vm5477_vm13, %v5417_v13, %v5493_v39 }
 0x9fb   :  { %5602 = vadd.xlane.f32.xlu0 %v5586_v47  ;;  %v5524_v31 = vadd.f32 %v12884_v14, %v12879_v8  ;;  %v5587_v56 = vmul.f32 %v12877_v60, %v12884_v14  ;;  %vm5651_vm13 = vcmask 7168  }
 0x9fc   :  { %v5422_v23 = vadd.f32 %v9420_v1, %v5325_v19  ;;  %v5328_v28 = vadd.f32 %v9359_v10, %v12837_v59 }
 0x9fe   :  { %v5425_v22 = vadd.f32 %v9423_v62, %v5328_v28  ;;  %v9360_v63 = vpop.f32.mrb[232].mxu1  ;;  %v9424_v55 = vpop.f32.mrb[200].mxu0  ;;  %vm5478_vm14 = vcmp.ge.f32.partialorder %v5422_v23, 0.0  ;;  %v5494_v30 = vmul.f32 0.01, %v5422_v23 }
 0x9ff   :  { %v9361_v34 = vpop.f32.mrb[233].mxu1  ;;  %v9425_v50 = vpop.f32.mrb[201].mxu0  ;;  %5604 = vadd.xlane.f32.xlu0 %v5587_v56 }
 0xa00   :  { %v5495_v24 = vmul.f32 0.01, %v5425_v22  ;;  %v9362_v48 = vadd.f32 %v9361_v34, %v9360_v63  ;;  %v9426_v20 = vadd.f32 %v9425_v50, %v9424_v55  ;;  %v9363_v45 = vpop.f32.mrb[234].mxu1  ;;  %v9427_v25 = vpop.f32.mrb[202].mxu0  ;;  %v5510_v29 = vsel %vm5478_vm14, %v5422_v23, %v5494_v30 }
 0xa01   :  { %v9364_v3 = vpop.f32.mrb[235].mxu1  ;;  %v9428_v16 = vpop.f32.mrb[203].mxu0  ;;  %v5588_v59 = vmul.f32 %v12877_v60, %v5510_v29  ;;  %v5525_v15 = vadd.f32 %v5524_v31, %v5510_v29  ;;  %v5553_v49 = vmax.f32 %v12879_v8, %v5510_v29  ;;  %vm5479_vm15 = vcmp.ge.f32.partialorder %v5425_v22, 0.0 }
 0xa02   :  { %v5333_v54 = vadd.f32 %v9362_v48, %v12840_v61  ;;  %v9365_v38 = vadd.f32 %v9364_v3, %v9363_v45  ;;  %v9429_v27 = vadd.f32 %v9428_v16, %v9427_v25  ;;  %v5511_v26 = vsel %vm5479_vm15, %v5425_v22, %v5495_v24 }
 0xa03   :  { %5606 = vadd.xlane.f32.xlu1 %v5588_v59  ;;  %v5526_v17 = vadd.f32 %v5525_v15, %v5511_v26  ;;  %v5554_v32 = vmax.f32 %v12884_v14, %v5511_v26  ;;  %v5589_v35 = vmul.f32 %v12877_v60, %v5511_v26 }
 0xa04   :  { %v5430_v43 = vadd.f32 %v9426_v20, %v5333_v54  ;;  %v5336_v12 = vadd.f32 %v9365_v38, %v12843_v21 }
 0xa06   :  { %v5496_v58 = vmul.f32 0.01, %v5430_v43  ;;  %v5433_v13 = vadd.f32 %v9429_v27, %v5336_v12  ;;  %v9366_v7 = vpop.f32.mrb[236].mxu1  ;;  %v9430_v46 = vpop.f32.mrb[204].mxu0  ;;  %vm5480_vm1 = vcmp.ge.f32.partialorder %v5430_v43, 0.0 }
 0xa07   :  { %v9367_v9 = vpop.f32.mrb[237].mxu1  ;;  %v9431_v0 = vpop.f32.mrb[205].mxu0  ;;  %5608 = vadd.xlane.f32.xlu1 %v5589_v35 }
 0xa08   :  { %v5497_v61 = vmul.f32 0.01, %v5433_v13  ;;  %v9368_v42 = vadd.f32 %v9367_v9, %v9366_v7  ;;  %v9432_v39 = vadd.f32 %v9431_v0, %v9430_v46  ;;  %v9369_v53 = vpop.f32.mrb[238].mxu1  ;;  %v9433_v1 = vpop.f32.mrb[206].mxu0  ;;  %v5512_v44 = vsel %vm5480_vm1, %v5430_v43, %v5496_v58 }
 0xa09   :  { %v9370_v11 = vpop.f32.mrb[239].mxu1  ;;  %v9434_v8 = vpop.f32.mrb[207].mxu0  ;;  %v5590_v21 = vmul.f32 %v12877_v60, %v5512_v44  ;;  %v5527_v57 = vadd.f32 %v5526_v17, %v5512_v44  ;;  %v5555_v5 = vmax.f32 %v5553_v49, %v5512_v44  ;;  %vm5481_vm2 = vcmp.ge.f32.partialorder %v5433_v13, 0.0 }
 0xa0a   :  { %v5341_v47 = vadd.f32 %v9368_v42, %v12846_v6  ;;  %v9371_v19 = vadd.f32 %v9370_v11, %v9369_v53  ;;  %v9435_v10 = vadd.f32 %v9434_v8, %v9433_v1  ;;  %v5513_v62 = vsel %vm5481_vm2, %v5433_v13, %v5497_v61 }
 0xa0b   :  { %5610 = vadd.xlane.f32.xlu0 %v5590_v21  ;;  %v5591_v14 = vmul.f32 %v12877_v60, %v5513_v62  ;;  %v5528_v31 = vadd.f32 %v5527_v57, %v5513_v62  ;;  %v5556_v23 = vmax.f32 %v5554_v32, %v5513_v62 }
 0xa0c   :  { %v5438_v28 = vadd.f32 %v9432_v39, %v5341_v47  ;;  %v5344_v56 = vadd.f32 %v9371_v19, %v12849_v40 }
 0xa0d   :  { %5612 = vadd.xlane.f32.xlu1 %v5591_v14 }
 0xa0e   :  { %v5498_v22 = vmul.f32 0.01, %v5438_v28  ;;  %v5441_v63 = vadd.f32 %v9435_v10, %v5344_v56  ;;  %v9372_v55 = vpop.f32.mrb[240].mxu1  ;;  %v9436_v30 = vpop.f32.mrb[208].mxu0  ;;  %vm5482_vm3 = vcmp.ge.f32.partialorder %v5438_v28, 0.0 }
 0xa0f   :  { %v9373_v34 = vpop.f32.mrb[241].mxu1  ;;  %v9437_v50 = vpop.f32.mrb[209].mxu0 }
 0xa10   :  { %v5499_v6 = vmul.f32 0.01, %v5441_v63  ;;  %v9374_v24 = vadd.f32 %v9373_v34, %v9372_v55  ;;  %v9438_v48 = vadd.f32 %v9437_v50, %v9436_v30  ;;  %v9375_v20 = vpop.f32.mrb[242].mxu1  ;;  %v9439_v45 = vpop.f32.mrb[210].mxu0  ;;  %v5514_v25 = vsel %vm5482_vm3, %v5438_v28, %v5498_v22 }
 0xa11   :  { %v9376_v29 = vpop.f32.mrb[243].mxu1  ;;  %v9440_v3 = vpop.f32.mrb[211].mxu0  ;;  %v5592_v16 = vmul.f32 %v12877_v60, %v5514_v25  ;;  %v5529_v59 = vadd.f32 %v5528_v31, %v5514_v25  ;;  %v5557_v40 = vmax.f32 %v5555_v5, %v5514_v25  ;;  %vm5483_vm4 = vcmp.ge.f32.partialorder %v5441_v63, 0.0 }
 0xa12   :  { %v5349_v15 = vadd.f32 %v9374_v24, %v12852_v18  ;;  %v9377_v49 = vadd.f32 %v9376_v29, %v9375_v20  ;;  %v9441_v54 = vadd.f32 %v9440_v3, %v9439_v45  ;;  %v5515_v38 = vsel %vm5483_vm4, %v5441_v63, %v5499_v6 }
 0xa13   :  { %5614 = vadd.xlane.f32.xlu0 %v5592_v16  ;;  %v5593_v27 = vmul.f32 %v12877_v60, %v5515_v38  ;;  %v5530_v26 = vadd.f32 %v5529_v59, %v5515_v38  ;;  %v5558_v17 = vmax.f32 %v5556_v23, %v5515_v38 }
 0xa14   :  { %v5446_v32 = vadd.f32 %v9438_v48, %v5349_v15  ;;  %v5352_v43 = vadd.f32 %v9377_v49, %v12855_v4 }
 0xa15   :  { %5616 = vadd.xlane.f32.xlu1 %v5593_v27  ;;  %v5531_v12 = vrot.slane %v5530_v26, 4  ;;  %v5559_v35 = vmax.f32 %v5557_v40, %v5558_v17 }
 0xa16   :  { %v5500_v58 = vmul.f32 0.01, %v5446_v32  ;;  %v5449_v13 = vadd.f32 %v9441_v54, %v5352_v43  ;;  %v9378_v7 = vpop.f32.mrb[244].mxu1  ;;  %v9442_v46 = vpop.f32.mrb[212].mxu0  ;;  %vm5484_vm5 = vcmp.ge.f32.partialorder %v5446_v32, 0.0 }
 0xa17   :  { %v5532_v18 = vadd.f32 %v5531_v12, %v5530_v26  ;;  %v5560_v9 = vrot.slane %v5559_v35, 4  ;;  %v9379_v0 = vpop.f32.mrb[245].mxu1  ;;  %v9443_v61 = vpop.f32.mrb[213].mxu0 }
 0xa18   :  { %v5501_v42 = vmul.f32 0.01, %v5449_v13  ;;  %v9380_v39 = vadd.f32 %v9379_v0, %v9378_v7  ;;  %v9444_v53 = vadd.f32 %v9443_v61, %v9442_v46  ;;  %v9381_v1 = vpop.f32.mrb[246].mxu1  ;;  %v9445_v44 = vpop.f32.mrb[214].mxu0  ;;  %v12905_v11 = vsel %vm5484_vm5, %v5446_v32, %v5500_v58 }
 0xa19   :  { %v5533_v4 = vrot.slane %v5532_v18, 2  ;;  %v5561_v8 = vmax.f32 %v5559_v35, %v5560_v9  ;;  %v9382_v21 = vpop.f32.mrb[247].mxu1  ;;  %v9446_v57 = vpop.f32.mrb[215].mxu0  ;;  %v5594_v5 = vmul.f32 %v12877_v60, %v12905_v11  ;;  %vm5485_vm6 = vcmp.ge.f32.partialorder %v5449_v13, 0.0 }
 0xa1a   :  { %v5357_v47 = vadd.f32 %v9380_v39, %v12858_v37  ;;  %v9383_v19 = vadd.f32 %v9382_v21, %v9381_v1  ;;  %v9447_v10 = vadd.f32 %v9446_v57, %v9445_v44  ;;  %v12910_v62 = vsel %vm5485_vm6, %v5449_v13, %v5501_v42 }
 0xa1b   :  { %v5534_v14 = vadd.f32 %v5533_v4, %v5532_v18  ;;  %v5562_v31 = vrot.slane %v5561_v8, 2  ;;  %5618 = vadd.xlane.f32.xlu0 %v5594_v5  ;;  %v5537_v23 = vadd.f32 %v12910_v62, %v12905_v11  ;;  %v5595_v28 = vmul.f32 %v12877_v60, %v12910_v62 }
 0xa1c   :  { %v5454_v56 = vadd.f32 %v9444_v53, %v5357_v47  ;;  %v5360_v22 = vadd.f32 %v9383_v19, %v12861_v36 }
 0xa1d   :  { %v5535_v63 = vrot.slane %v5534_v14, 1  ;;  %v5563_v55 = vmax.f32 %v5561_v8, %v5562_v31  ;;  %5620 = vadd.xlane.f32.xlu1 %v5595_v28 }
 0xa1e   :  { %v5502_v37 = vmul.f32 0.01, %v5454_v56  ;;  %v5457_v30 = vadd.f32 %v9447_v10, %v5360_v22  ;;  %v9384_v34 = vpop.f32.mrb[248].mxu1  ;;  %v9448_v50 = vpop.f32.mrb[216].mxu0  ;;  %vm5486_vm7 = vcmp.ge.f32.partialorder %v5454_v56, 0.0 }
 0xa1f   :  { %v5536_v6 = vadd.f32 %v5535_v63, %v5534_v14  ;;  %v5564_v24 = vrot.slane %v5563_v55, 1  ;;  %v9385_v48 = vpop.f32.mrb[249].mxu1  ;;  %v9449_v20 = vpop.f32.mrb[217].mxu0 }
 0xa20   :  { %v5503_v45 = vmul.f32 0.01, %v5457_v30  ;;  %v9386_v25 = vadd.f32 %v9385_v48, %v9384_v34  ;;  %v9450_v29 = vadd.f32 %v9449_v20, %v9448_v50  ;;  %v9387_v3 = vpop.f32.mrb[250].mxu1  ;;  %v9451_v16 = vpop.f32.mrb[218].mxu0  ;;  %v5518_v59 = vsel %vm5486_vm7, %v5454_v56, %v5502_v37 }
 0xa21   :  { %v12917_v40 = vmul.f32 0.015625, %v5536_v6  ;;  %v12919_v36 = vmax.f32 %v5563_v55, %v5564_v24  ;;  %v9388_v15 = vpop.f32.mrb[251].mxu1  ;;  %v9452_v49 = vpop.f32.mrb[219].mxu0  ;;  %v5538_v54 = vadd.f32 %v5537_v23, %v5518_v59  ;;  %v5566_v38 = vmax.f32 %v12905_v11, %v5518_v59 }
 0xa22   :  { %v5365_v27 = vadd.f32 %v9386_v25, %v12864_v41  ;;  %v9389_v26 = vadd.f32 %v9388_v15, %v9387_v3  ;;  %v9453_v17 = vadd.f32 %v9452_v49, %v9451_v16  ;;  %v5596_v32 = vmul.f32 %v12877_v60, %v5518_v59 }
 0xa23   :  { %vm5487_vm8 = vcmp.ge.f32.partialorder %v5457_v30, 0.0 }
 0xa24   :  { %v5462_v43 = vadd.f32 %v9450_v29, %v5365_v27  ;;  %v5368_v12 = vadd.f32 %v9389_v26, %v12867_v33  ;;  %5622 = vadd.xlane.f32.xlu0 %v5596_v32  ;;  %v5519_v35 = vsel %vm5487_vm8, %v5457_v30, %v5503_v45 }
 0xa25   :  { %v5539_v58 = vadd.f32 %v5538_v54, %v5519_v35  ;;  %v5567_v13 = vmax.f32 %v12910_v62, %v5519_v35  ;;  %v5597_v7 = vmul.f32 %v12877_v60, %v5519_v35 }
 0xa26   :  { %v5504_v46 = vmul.f32 0.01, %v5462_v43  ;;  %v5465_v18 = vadd.f32 %v9453_v17, %v5368_v12  ;;  %v9390_v9 = vpop.f32.mrb[252].mxu1  ;;  %v9454_v0 = vpop.f32.mrb[220].mxu0  ;;  %vm5488_vm10 = vcmp.ge.f32.partialorder %v5462_v43, 0.0 }
 0xa27   :  { %5624 = vadd.xlane.f32.xlu1 %v5597_v7  ;;  %v9391_v41 = vpop.f32.mrb[253].mxu1  ;;  %v9455_v61 = vpop.f32.mrb[221].mxu0 }
 0xa28   :  { %v5505_v42 = vmul.f32 0.01, %v5465_v18  ;;  %v9392_v39 = vadd.f32 %v9391_v41, %v9390_v9  ;;  %v9456_v53 = vadd.f32 %v9455_v61, %v9454_v0  ;;  %v9393_v1 = vpop.f32.mrb[254].mxu1  ;;  %v9457_v33 = vpop.f32.mrb[222].mxu0  ;;  %v5520_v44 = vsel %vm5488_vm10, %v5462_v43, %v5504_v46  ;;  %v12937_v43 = vld [vmem:[#allocation25 + $0x6] ss:$0 sm:$0xff] }
 0xa29   :  { %v9394_v11 = vpop.f32.mrb[255].mxu1  ;;  %v9458_v4 = vpop.f32.mrb[223].mxu0  ;;  %v5540_v8 = vadd.f32 %v5539_v58, %v5520_v44  ;;  %v5568_v21 = vmax.f32 %v5566_v38, %v5520_v44  ;;  %v5598_v57 = vmul.f32 %v12877_v60, %v5520_v44  ;;  %vm5489_vm11 = vcmp.ge.f32.partialorder %v5465_v18, 0.0 }
 0xa2a   :  { %v5373_v5 = vadd.f32 %v9392_v39, %v12870_v2  ;;  %v9395_v47 = vadd.f32 %v9394_v11, %v9393_v1  ;;  %v9459_v19 = vadd.f32 %v9458_v4, %v9457_v33  ;;  %v5521_v10 = vsel %vm5489_vm11, %v5465_v18, %v5505_v42 }
 0xa2b   :  { %5626 = vadd.xlane.f32.xlu0 %v5598_v57  ;;  %v5541_v62 = vadd.f32 %v5540_v8, %v5521_v10  ;;  %v5569_v14 = vmax.f32 %v5567_v13, %v5521_v10  ;;  %v5599_v31 = vmul.f32 %v12877_v60, %v5521_v10 }
 0xa2c   :  { %v5470_v23 = vadd.f32 %v9456_v53, %v5373_v5  ;;  %v5376_v28 = vadd.f32 %v9395_v47, %v12873_v52 }
 0xa2d   :  { %5628 = vadd.xlane.f32.xlu1 %v5599_v31 }
 0xa2e   :  { %v5506_v56 = vmul.f32 0.01, %v5470_v23  ;;  %v5473_v22 = vadd.f32 %v9459_v19, %v5376_v28  ;;  %vm5490_vm0 = vcmp.ge.f32.partialorder %v5470_v23, 0.0 }
 0xa30   :  { %v5507_v63 = vmul.f32 0.01, %v5473_v22  ;;  %v5522_v55 = vsel %vm5490_vm0, %v5470_v23, %v5506_v56  ;;  %vm5491_vm12 = vcmp.ge.f32.partialorder %v5473_v22, 0.0 }
 0xa31   :  { %v5542_v37 = vadd.f32 %v5541_v62, %v5522_v55  ;;  %v5570_v2 = vmax.f32 %v5568_v21, %v5522_v55  ;;  %v5600_v30 = vmul.f32 %v12877_v60, %v5522_v55 }
 0xa32   :  { %v5523_v34 = vsel %vm5491_vm12, %v5473_v22, %v5507_v63 }
 0xa33   :  { %5630 = vadd.xlane.f32.xlu0 %v5600_v30  ;;  %v5543_v50 = vadd.f32 %v5542_v37, %v5523_v34  ;;  %v5571_v6 = vmax.f32 %v5569_v14, %v5523_v34  ;;  %v5601_v24 = vmul.f32 %v12877_v60, %v5523_v34 }
 0xa35   :  { %v5544_v48 = vrot.slane %v5543_v50, 4  ;;  %v5572_v20 = vmax.f32 %v5570_v2, %v5571_v6  ;;  %5632 = vadd.xlane.f32.xlu1 %v5601_v24 }
 0xa37   :  { %v5545_v52 = vadd.f32 %v5544_v48, %v5543_v50  ;;  %v5573_v45 = vrot.slane %v5572_v20, 4 }
 0xa39   :  { %v5546_v25 = vrot.slane %v5545_v52, 2  ;;  %v5574_v29 = vmax.f32 %v5572_v20, %v5573_v45 }
 0xa3b   :  { %v5547_v3 = vadd.f32 %v5546_v25, %v5545_v52  ;;  %v5575_v16 = vrot.slane %v5574_v29, 2 }
 0xa3d   :  { %v5548_v59 = vrot.slane %v5547_v3, 1  ;;  %v5576_v15 = vmax.f32 %v5574_v29, %v5575_v16 }
 0xa3f   :  { %v5549_v49 = vadd.f32 %v5548_v59, %v5547_v3  ;;  %v5577_v54 = vrot.slane %v5576_v15, 1 }
 0xa41   :  { %v12933_v38 = vmul.f32 0.015625, %v5549_v49  ;;  %v12935_v27 = vmax.f32 %v5576_v15, %v5577_v54 }
 0xa88   :  { %v5603_v26 = vpop.xlane.xlu0 %5602 }
 0xa89   :  { %v5635_v7 = vadd.f32 %v12937_v43, %v5603_v26 }
 0xa8b   :  { %v5652_v61 = vsel %vm5651_vm13, %v5635_v7, -inf }
 0xa8c   :  { %v5605_v60 = vpop.xlane.xlu0 %5604 }
 0xa8d   :  { %v5636_v46 = vadd.f32 %v12937_v43, %v5605_v60 }
 0xa8f   :  { %v5653_v39 = vsel %vm5651_vm13, %v5636_v46, -inf }
 0xa90   :  { %v5607_v17 = vpop.xlane.xlu1 %5606 }
 0xa91   :  { %v5637_v58 = vadd.f32 %v12937_v43, %v5607_v17 }
 0xa93   :  { %v5654_v0 = vsel %vm5651_vm13, %v5637_v58, -inf }
 0xa94   :  { %v5609_v32 = vpop.xlane.xlu1 %5608  ;;  %v5655_v44 = vmax.f32 %v5652_v61, %v5654_v0 }
 0xa95   :  { %v5638_v13 = vadd.f32 %v12937_v43, %v5609_v32 }
 0xa97   :  { %v5656_v41 = vsel %vm5651_vm13, %v5638_v13, -inf }
 0xa98   :  { %v5611_v12 = vpop.xlane.xlu0 %5610  ;;  %v5657_v11 = vmax.f32 %v5653_v39, %v5656_v41 }
 0xa99   :  { %v5639_v18 = vadd.f32 %v12937_v43, %v5611_v12 }
 0xa9a   :  { %v5613_v35 = vpop.xlane.xlu1 %5612 }
 0xa9b   :  { %v5640_v9 = vadd.f32 %v12937_v43, %v5613_v35  ;;  %v5658_v53 = vsel %vm5651_vm13, %v5639_v18, -inf }
 0xa9c   :  { %v5659_v57 = vmax.f32 %v5655_v44, %v5658_v53 }
 0xa9d   :  { %v5660_v1 = vsel %vm5651_vm13, %v5640_v9, -inf }
 0xa9e   :  { %v5661_v5 = vmax.f32 %v5657_v11, %v5660_v1 }
 0xaa0   :  { %v5615_v42 = vpop.xlane.xlu0 %5614 }
 0xaa1   :  { %v5641_v33 = vadd.f32 %v12937_v43, %v5615_v42 }
 0xaa2   :  { %v5617_v4 = vpop.xlane.xlu1 %5616 }
 0xaa3   :  { %v5662_v8 = vsel %vm5651_vm13, %v5641_v33, -inf  ;;  %v5642_v21 = vadd.f32 %v12937_v43, %v5617_v4 }
 0xaa4   :  { %v5663_v19 = vmax.f32 %v5659_v57, %v5662_v8 }
 0xaa5   :  { %v5664_v47 = vsel %vm5651_vm13, %v5642_v21, -inf }
 0xaa6   :  { %v5665_v10 = vmax.f32 %v5661_v5, %v5664_v47 }
 0xaa8   :  { %v5666_v62 = vmax.f32 %v5663_v19, %v5665_v10  ;;  %v5619_v22 = vpop.xlane.xlu0 %5618 }
 0xaa9   :  { %v12956_v24 = vadd.f32 %v12937_v43, %v5619_v22 }
 0xaaa   :  { %v5667_v14 = vrot.slane %v5666_v62, 4  ;;  %v5621_v63 = vpop.xlane.xlu1 %5620 }
 0xaab   :  { %v12965_v59 = vadd.f32 %v12937_v43, %v5621_v63  ;;  %v5673_v17 = vsel %vm5651_vm13, %v12956_v24, -inf }
 0xaac   :  { %v5668_v31 = vmax.f32 %v5666_v62, %v5667_v14 }
 0xaae   :  { %v5669_v23 = vrot.slane %v5668_v31, 2 }
 0xab0   :  { %v5670_v28 = vmax.f32 %v5668_v31, %v5669_v23 }
 0xab1   :  { %v5623_v37 = vpop.xlane.xlu0 %5622 }
 0xab2   :  { %v5671_v56 = vrot.slane %v5670_v28, 1  ;;  %v12959_v48 = vadd.f32 %v12937_v43, %v5623_v37 }
 0xab4   :  { %v5672_v55 = vmax.f32 %v5670_v28, %v5671_v56  ;;  %v5625_v2 = vpop.xlane.xlu1 %5624  ;;  %v5675_v60 = vsel %vm5651_vm13, %v12959_v48, -inf }
 0xab5   :  { %v12962_v29 = vadd.f32 %v12937_v43, %v5625_v2  ;;  %v5676_v41 = vmax.f32 %v5673_v17, %v5675_v60 }
 0xab6   :  { %v5694_v30 = vsub.f32 %v5635_v7, %v5672_v55  ;;  %v5695_v34 = vsub.f32 %v5636_v46, %v5672_v55  ;;  %v5697_v50 = vsub.f32 %v5638_v13, %v5672_v55  ;;  %v5696_v6 = vsub.f32 %v5637_v58, %v5672_v55 }
 0xab7   :  { %v5698_v25 = vsub.f32 %v5639_v18, %v5672_v55  ;;  %v5699_v16 = vsub.f32 %v5640_v9, %v5672_v55  ;;  %v5700_v32 = vsub.f32 %v5641_v33, %v5672_v55  ;;  %v5677_v35 = vsel %vm5651_vm13, %v12962_v29, -inf }
 0xab8   :  { %v5627_v20 = vpop.xlane.xlu0 %5626  ;;  %v5710_v45 = vmul.f32 1.442695, %v5694_v30  ;;  %v5712_v3 = vmul.f32 1.442695, %v5695_v34  ;;  %v5714_v15 = vmul.f32 1.442695, %v5696_v6  ;;  %v5701_v58 = vsub.f32 %v5642_v21, %v5672_v55 }
 0xab9   :  { %v12968_v49 = vadd.f32 %v12937_v43, %v5627_v20  ;;  %v5716_v26 = vmul.f32 1.442695, %v5697_v50  ;;  %v5718_v12 = vmul.f32 1.442695, %v5698_v25  ;;  %v5720_v13 = vmul.f32 1.442695, %v5699_v16 }
 0xaba   :  { %v5629_v52 = vpop.xlane.xlu1 %5628  ;;  %10240 = vpow2.f32 %v5710_v45  ;;  %v5674_v7 = vsel %vm5651_vm13, %v12965_v59, -inf  ;;  %v5722_v39 = vmul.f32 1.442695, %v5700_v32  ;;  %v5724_v11 = vmul.f32 1.442695, %v5701_v58 }
 0xabb   :  { %v12971_v54 = vadd.f32 %v12937_v43, %v5629_v52  ;;  %10242 = vpow2.f32 %v5712_v3  ;;  %v5679_v18 = vsel %vm5651_vm13, %v12968_v49, -inf  ;;  %v5678_v61 = vmax.f32 %v5674_v7, %v5677_v35 }
 0xabc   :  { %10244 = vpow2.f32 %v5714_v15  ;;  %v5680_v33 = vmax.f32 %v5676_v41, %v5679_v18 }
 0xabd   :  { %v5681_v9 = vsel %vm5651_vm13, %v12971_v54, -inf  ;;  %10246 = vpow2.f32 %v5716_v26 }
 0xabe   :  { %10248 = vpow2.f32 %v5718_v12  ;;  %v5682_v44 = vmax.f32 %v5678_v61, %v5681_v9 }
 0xabf   :  { %10250 = vpow2.f32 %v5720_v13 }
 0xac0   :  { %v5631_v46 = vpop.xlane.xlu0 %5630  ;;  %10252 = vpow2.f32 %v5722_v39 }
 0xac1   :  { %v12986_v0 = vadd.f32 %v12937_v43, %v5631_v46  ;;  %10254 = vpow2.f32 %v5724_v11 }
 0xac2   :  { %v5633_v42 = vpop.xlane.xlu1 %5632 }
 0xac3   :  { %v5683_v53 = vsel %vm5651_vm13, %v12986_v0, -inf  ;;  %v12991_v1 = vadd.f32 %v12937_v43, %v5633_v42 }
 0xac4   :  { %v5684_v8 = vmax.f32 %v5680_v33, %v5683_v53  ;;  %v12995_v57 = vpop.eup %10240 }
 0xac5   :  { %v5685_v4 = vsel %vm5651_vm13, %v12991_v1, -inf  ;;  %v12997_v47 = vpop.eup %10242  ;;  %v5742_v43 = vsel %vm5651_vm13, %v12995_v57, 0.0 }
 0xac6   :  { %v5686_v21 = vmax.f32 %v5682_v44, %v5685_v4  ;;  %v13001_v19 = vpop.eup %10244  ;;  %v5743_v62 = vsel %vm5651_vm13, %v12997_v47, 0.0 }
 0xac7   :  { %v13005_v14 = vpop.eup %10246  ;;  %v5744_v31 = vadd.f32 %v5743_v62, %v5742_v43  ;;  %v5745_v28 = vsel %vm5651_vm13, %v13001_v19, 0.0 }
 0xac8   :  { %v5687_v5 = vmax.f32 %v5684_v8, %v5686_v21  ;;  %v13009_v56 = vpop.eup %10248  ;;  %v5747_v55 = vsel %vm5651_vm13, %v13005_v14, 0.0 }
 0xac9   :  { %v5746_v22 = vadd.f32 %v5745_v28, %v5744_v31  ;;  %v13013_v37 = vpop.eup %10250  ;;  %v5749_v34 = vsel %vm5651_vm13, %v13009_v56, 0.0 }
 0xaca   :  { %v5688_v10 = vrot.slane %v5687_v5, 4  ;;  %v13017_v50 = vpop.eup %10252  ;;  %v5751_v52 = vsel %vm5651_vm13, %v13013_v37, 0.0 }
 0xacb   :  { %v5748_v2 = vadd.f32 %v5747_v55, %v5746_v22  ;;  %v13021_v45 = vpop.eup %10254  ;;  %v5753_v16 = vsel %vm5651_vm13, %v13017_v50, 0.0 }
 0xacc   :  { %v5689_v23 = vmax.f32 %v5687_v5, %v5688_v10  ;;  %v5755_v26 = vsel %vm5651_vm13, %v13021_v45, 0.0 }
 0xacd   :  { %v5750_v6 = vadd.f32 %v5749_v34, %v5748_v2 }
 0xace   :  { %v5690_v63 = vrot.slane %v5689_v23, 2 }
 0xacf   :  { %v5752_v25 = vadd.f32 %v5751_v52, %v5750_v6 }
 0xad0   :  { %v5691_v30 = vmax.f32 %v5689_v23, %v5690_v63 }
 0xad1   :  { %v5754_v15 = vadd.f32 %v5753_v16, %v5752_v25 }
 0xad2   :  { %v5692_v20 = vrot.slane %v5691_v30, 1 }
 0xad3   :  { %v5756_v12 = vadd.f32 %v5755_v26, %v5754_v15 }
 0xad4   :  { %v5693_v3 = vmax.f32 %v5691_v30, %v5692_v20 }
 0xad5   :  { %v5757_v46 = vrot.slane %v5756_v12, 4 }
 0xad6   :  { %v5702_v17 = vsub.f32 %v12956_v24, %v5693_v3  ;;  %v5703_v60 = vsub.f32 %v12965_v59, %v5693_v3  ;;  %v5704_v32 = vsub.f32 %v12959_v48, %v5693_v3  ;;  %v5705_v35 = vsub.f32 %v12962_v29, %v5693_v3 }
 0xad7   :  { %v5706_v58 = vsub.f32 %v12968_v49, %v5693_v3  ;;  %v5707_v18 = vsub.f32 %v12971_v54, %v5693_v3  ;;  %v5708_v61 = vsub.f32 %v12986_v0, %v5693_v3  ;;  %v5758_v24 = vadd.f32 %v5757_v46, %v5756_v12 }
 0xad8   :  { %v5726_v13 = vmul.f32 1.442695, %v5702_v17  ;;  %v5728_v7 = vmul.f32 1.442695, %v5703_v60  ;;  %v5730_v9 = vmul.f32 1.442695, %v5704_v32  ;;  %v5709_v48 = vsub.f32 %v12991_v1, %v5693_v3 }
 0xad9   :  { %v5732_v41 = vmul.f32 1.442695, %v5705_v35  ;;  %v5734_v59 = vmul.f32 1.442695, %v5706_v58  ;;  %v5759_v42 = vrot.slane %v5758_v24, 2 }
 0xada   :  { %10256 = vpow2.f32 %v5726_v13  ;;  %v5736_v29 = vmul.f32 1.442695, %v5707_v18  ;;  %v5738_v39 = vmul.f32 1.442695, %v5708_v61  ;;  %v5740_v53 = vmul.f32 1.442695, %v5709_v48 }
 0xadb   :  { %10258 = vpow2.f32 %v5728_v7  ;;  %v5760_v49 = vadd.f32 %v5759_v42, %v5758_v24 }
 0xadc   :  { %10260 = vpow2.f32 %v5730_v9 }
 0xadd   :  { %10262 = vpow2.f32 %v5732_v41  ;;  %v5761_v33 = vrot.slane %v5760_v49, 1 }
 0xade   :  { %10264 = vpow2.f32 %v5734_v59 }
 0xadf   :  { %10266 = vpow2.f32 %v5736_v29  ;;  %v5762_v54 = vadd.f32 %v5761_v33, %v5760_v49  ;;  %v14174_v29 = vld [vmem:[#allocation67_spill] sm:$0xff]  ;;  %v14176_v33 = vld [vmem:[#allocation68_spill] sm:$0xff] }
 0xae0   :  { %10268 = vpow2.f32 %v5738_v39  ;;  %v14175_v39 = vld [vmem:[#allocation69_spill] sm:$0xff] }
 0xae1   :  { %10270 = vpow2.f32 %v5740_v53 }
 0xae2   :  { %10272 = vrcp.f32 %v5762_v54 }
 0xae4   :  { %v10257_v44 = vpop.eup %10256 }
 0xae5   :  { %v10259_v0 = vpop.eup %10258  ;;  %v5763_v11 = vsel %vm5651_vm13, %v10257_v44, 0.0 }
 0xae6   :  { %v5764_v1 = vsel %vm5651_vm13, %v10259_v0, 0.0  ;;  %v10261_v4 = vpop.eup %10260 }
 0xae7   :  { %v5765_v8 = vadd.f32 %v5764_v1, %v5763_v11  ;;  %v10263_v21 = vpop.eup %10262  ;;  %v5766_v5 = vsel %vm5651_vm13, %v10261_v4, 0.0  ;;  %v14178_v1 = vld [vmem:[#allocation63_spill] sm:$0xff] }
 0xae8   :  { %v10265_v43 = vpop.eup %10264  ;;  %v5768_v62 = vsel %vm5651_vm13, %v10263_v21, 0.0 }
 0xae9   :  { %v5767_v10 = vadd.f32 %v5766_v5, %v5765_v8  ;;  %v10267_v31 = vpop.eup %10266  ;;  %v5770_v28 = vsel %vm5651_vm13, %v10265_v43, 0.0  ;;  %v14181_v5 = vld [vmem:[#allocation66_spill] sm:$0xff] }
 0xaea   :  { %v10269_v22 = vpop.eup %10268  ;;  %v5772_v2 = vsel %vm5651_vm13, %v10267_v31, 0.0 }
 0xaeb   :  { %v5769_v23 = vadd.f32 %v5768_v62, %v5767_v10  ;;  %v10271_v55 = vpop.eup %10270  ;;  %v5774_v52 = vsel %vm5651_vm13, %v10269_v22, 0.0  ;;  %v14182_v10 = vld [vmem:[#allocation71_spill] sm:$0xff] }
 0xaec   :  { %v10273_v30 = vpop.eup %10272  ;;  %v5776_v3 = vsel %vm5651_vm13, %v10271_v55, 0.0 }
 0xaed   :  { %v5771_v63 = vadd.f32 %v5770_v28, %v5769_v23  ;;  %v5787_v6 = vmul.f32 %v10273_v30, %v12997_v47  ;;  %v5786_v20 = vmul.f32 %v10273_v30, %v12995_v57  ;;  %v5788_v15 = vmul.f32 %v10273_v30, %v13001_v19  ;;  %v14184_v28 = vld [vmem:[#allocation72_spill] sm:$0xff] }
 0xaee   :  { %v5789_v60 = vmul.f32 %v10273_v30, %v13005_v14  ;;  %v5790_v57 = vmul.f32 %v10273_v30, %v13009_v56  ;;  %v5791_v58 = vmul.f32 %v10273_v30, %v13013_v37  ;;  %v5792_v37 = vmul.f32 %v10273_v30, %v13017_v50  ;;  %v14179_v50 = vld [vmem:[#allocation65_spill] sm:$0xff] }
 0xaef   :  { %v5773_v34 = vadd.f32 %v5772_v2, %v5771_v63  ;;  %5809 = vperm.xlu1 %10239, %v5787_v6   ;;  %5804 = vperm.xlu0 %10238, %v5786_v20   ;;  %v5793_v61 = vmul.f32 %v10273_v30, %v13021_v45  ;;  %v14185_v63 = vld [vmem:[#allocation74_spill] sm:$0xff]  ;;  %v14186_v20 = vld [vmem:[#allocation75_spill] sm:$0xff] }
 0xaf1   :  { %v5775_v25 = vadd.f32 %v5774_v52, %v5773_v34 }
 0xaf3   :  { %v5777_v16 = vadd.f32 %v5776_v3, %v5775_v25  ;;  %5814 = vperm.xlu1 %10239, %v5788_v15   ;;  %v14187_v25 = vld [vmem:[#allocation77_spill] sm:$0xff] }
 0xaf5   :  { %v5778_v26 = vrot.slane %v5777_v16, 4 }
 0xaf7   :  { %v5779_v17 = vadd.f32 %v5778_v26, %v5777_v16  ;;  %5819 = vperm.xlu1 %10239, %v5789_v60   ;;  %v14188_v16 = vld [vmem:[#allocation76_spill] sm:$0xff]  ;;  %v14189_v26 = vld [vmem:[#allocation78_spill] sm:$0xff] }
 0xaf9   :  { %v5780_v32 = vrot.slane %v5779_v17, 2 }
 0xafb   :  { %v5781_v47 = vadd.f32 %v5780_v32, %v5779_v17  ;;  %5824 = vperm.xlu1 %10239, %v5790_v57  }
 0xafd   :  { %v5782_v12 = vrot.slane %v5781_v47, 1 }
 0xaff   :  { %v5783_v35 = vadd.f32 %v5782_v12, %v5781_v47  ;;  %5829 = vperm.xlu1 %10239, %v5791_v58  }
 0xb01   :  { %10274 = vrcp.f32 %v5783_v35  ;;  %v14190_v35 = vld [vmem:[#allocation79_spill] sm:$0xff] }
 0xb0b   :  { %v10275_v13 = vpop.eup %10274 }
 0xb0c   :  { %v5798_v7 = vmul.f32 %v10275_v13, %v10265_v43  ;;  %v5794_v19 = vmul.f32 %v10275_v13, %v10257_v44  ;;  %v5799_v46 = vmul.f32 %v10275_v13, %v10267_v31  ;;  %v5795_v18 = vmul.f32 %v10275_v13, %v10259_v0  ;;  %v14177_v44 = vld [vmem:[#allocation70_spill] sm:$0xff]  ;;  %v14183_v31 = vld [vmem:[#allocation73_spill] sm:$0xff] }
 0xb0d   :  { %v5800_v14 = vmul.f32 %v10275_v13, %v10269_v22  ;;  %v5796_v9 = vmul.f32 %v10275_v13, %v10261_v4  ;;  %v5801_v56 = vmul.f32 %v10275_v13, %v10271_v55  ;;  %v5797_v41 = vmul.f32 %v10275_v13, %v10263_v21  ;;  %v14180_v21 = vld [vmem:[#allocation64_spill] sm:$0xff]  ;;  %v14191_v13 = vld [vmem:[#allocation81_spill] sm:$0xff] }
 0xb0e   :  { %5864 = vperm.xlu0 %10238, %v5798_v7   ;;  %5844 = vperm.xlu1 %10239, %v5794_v19   ;;  %v14192_v19 = vld [vmem:[#allocation80_spill] sm:$0xff] }
 0xb12   :  { %5869 = vperm.xlu0 %10238, %v5799_v46   ;;  %5849 = vperm.xlu1 %10239, %v5795_v18   ;;  %v14193_v18 = vld [vmem:[#allocation82_spill] sm:$0xff] }
 0xb16   :  { %5874 = vperm.xlu0 %10238, %v5800_v14   ;;  %5854 = vperm.xlu1 %10239, %v5796_v9  }
 0xb1a   :  { %5879 = vperm.xlu0 %10238, %v5801_v56   ;;  %5859 = vperm.xlu1 %10239, %v5797_v41  }
 0xb1e   :  { %5834 = vperm.xlu1 %10239, %v5792_v37  }
 0xb22   :  { %5839 = vperm.xlu1 %10239, %v5793_v61  }
 0xb6e   :  { %v5810_v24 = vpop.permute.xlu1 %5809  ;;  %v5805_v42 = vpop.permute.xlu0 %5804 }
 0xb6f   :  { %v5886_v49 = vmul.f32 %v5810_v24, %v14174_v29  ;;  %v5887_v53 = vmul.f32 %v5810_v24, %v14175_v39  ;;  %v5888_v54 = vmul.f32 %v5810_v24, %v14176_v33  ;;  %v5889_v0 = vmul.f32 %v5810_v24, %v14177_v44 }
 0xb70   :  { %v5882_v4 = vmul.f32 %v5805_v42, %v14178_v1  ;;  %v5883_v8 = vmul.f32 %v5805_v42, %v14179_v50  ;;  %v5884_v45 = vmul.f32 %v5805_v42, %v14180_v21  ;;  %v5885_v43 = vmul.f32 %v5805_v42, %v14181_v5  ;;  %v14195_v42 = vld [vmem:[#allocation85_spill] sm:$0xff]  ;;  %v14198_v5 = vld [vmem:[#allocation99_spill] sm:$0xff] }
 0xb72   :  { %v5815_v59 = vpop.permute.xlu1 %5814  ;;  %v5946_v2 = vadd.f32 %v5886_v49, %v5882_v4  ;;  %v5959_v30 = vadd.f32 %v5887_v53, %v5883_v8  ;;  %v5972_v34 = vadd.f32 %v5888_v54, %v5884_v45  ;;  %v5985_v6 = vadd.f32 %v5889_v0, %v5885_v43  ;;  %v14196_v49 = vld [vmem:[#allocation84_spill] sm:$0xff]  ;;  %v14197_v53 = vld [vmem:[#allocation86_spill] sm:$0xff] }
 0xb73   :  { %v5890_v62 = vmul.f32 %v5815_v59, %v14182_v10  ;;  %v5891_v23 = vmul.f32 %v5815_v59, %v14183_v31  ;;  %v5892_v22 = vmul.f32 %v5815_v59, %v14184_v28  ;;  %v5893_v55 = vmul.f32 %v5815_v59, %v14185_v63  ;;  %v14194_v59 = vld [vmem:[#allocation83_spill] sm:$0xff]  ;;  %v14199_v10 = vld [vmem:[#allocation101_spill] sm:$0xff]  ;;  %v14200_v31 = vld [vmem:[#allocation100_spill] sm:$0xff] }
 0xb74   :  { %v14201_v28 = vld [vmem:[#allocation102_spill] sm:$0xff]  ;;  %v14202_v63 = vld [vmem:[#allocation95_spill] sm:$0xff] }
 0xb75   :  { %v5947_v32 = vadd.f32 %v5946_v2, %v5890_v62  ;;  %v5960_v47 = vadd.f32 %v5959_v30, %v5891_v23  ;;  %v5973_v57 = vadd.f32 %v5972_v34, %v5892_v22  ;;  %v5986_v12 = vadd.f32 %v5985_v6, %v5893_v55  ;;  %v14203_v2 = vld [vmem:[#allocation97_spill] sm:$0xff]  ;;  %v14204_v34 = vld [vmem:[#allocation96_spill] sm:$0xff] }
 0xb76   :  { %v5820_v48 = vpop.permute.xlu1 %5819 }
 0xb77   :  { %v5894_v52 = vmul.f32 %v5820_v48, %v14186_v20  ;;  %v5895_v3 = vmul.f32 %v5820_v48, %v14187_v25  ;;  %v5896_v15 = vmul.f32 %v5820_v48, %v14188_v16  ;;  %v5897_v17 = vmul.f32 %v5820_v48, %v14189_v26  ;;  %v14205_v20 = vld [vmem:[#allocation98_spill] sm:$0xff]  ;;  %v14206_v25 = vld [vmem:[#allocation111_spill] sm:$0xff]  ;;  %v14207_v16 = vld [vmem:[#allocation113_spill] sm:$0xff] }
 0xb78   :  { %v14208_v26 = vld [vmem:[#allocation112_spill] sm:$0xff] }
 0xb79   :  { %v5948_v9 = vadd.f32 %v5947_v32, %v5894_v52  ;;  %v5961_v56 = vadd.f32 %v5960_v47, %v5895_v3  ;;  %v5974_v41 = vadd.f32 %v5973_v57, %v5896_v15  ;;  %v5987_v37 = vadd.f32 %v5986_v12, %v5897_v17  ;;  %v14210_v12 = vld [vmem:[#allocation103_spill] sm:$0xff] }
 0xb7a   :  { %v5825_v11 = vpop.permute.xlu1 %5824 }
 0xb7b   :  { %v5898_v58 = vmul.f32 %v5825_v11, %v14190_v35  ;;  %v5899_v7 = vmul.f32 %v5825_v11, %v14191_v13  ;;  %v5900_v46 = vmul.f32 %v5825_v11, %v14192_v19  ;;  %v5901_v14 = vmul.f32 %v5825_v11, %v14193_v18 }
 0xb7d   :  { %v5949_v54 = vadd.f32 %v5948_v9, %v5898_v58  ;;  %v5962_v44 = vadd.f32 %v5961_v56, %v5899_v7  ;;  %v5975_v0 = vadd.f32 %v5974_v41, %v5900_v46  ;;  %v5988_v1 = vadd.f32 %v5987_v37, %v5901_v14  ;;  %v14211_v58 = vld [vmem:[#allocation105_spill] sm:$0xff]  ;;  %v14212_v7 = vld [vmem:[#allocation104_spill] sm:$0xff]  ;;  %v14213_v46 = vld [vmem:[#allocation106_spill] sm:$0xff] }
 0xb7e   :  { %v5830_v60 = vpop.permute.xlu1 %5829  ;;  %v14214_v37 = vld [vmem:[#allocation115_spill] sm:$0xff] }
 0xb7f   :  { %v5902_v48 = vmul.f32 %v5830_v60, %v14194_v59  ;;  %v5903_v29 = vmul.f32 %v5830_v60, %v14195_v42  ;;  %v5904_v39 = vmul.f32 %v5830_v60, %v14196_v49  ;;  %v5905_v33 = vmul.f32 %v5830_v60, %v14197_v53  ;;  %v14209_v60 = vld [vmem:[#allocation114_spill] sm:$0xff]  ;;  %v14215_v59 = vld [vmem:[#allocation117_spill] sm:$0xff]  ;;  %v14216_v42 = vld [vmem:[#allocation116_spill] sm:$0xff] }
 0xb81   :  { %v13075_v50 = vadd.f32 %v5949_v54, %v5902_v48  ;;  %v13077_v8 = vadd.f32 %v5962_v44, %v5903_v29  ;;  %v13079_v21 = vadd.f32 %v5975_v0, %v5904_v39  ;;  %v13081_v45 = vadd.f32 %v5988_v1, %v5905_v33  ;;  %v14217_v29 = vld [vmem:[#allocation118_spill] sm:$0xff]  ;;  %v14218_v0 = vld [vmem:[#allocation107_spill] sm:$0xff] }
 0xb8d   :  { %v5845_v61 = vpop.permute.xlu1 %5844  ;;  %v5865_v24 = vpop.permute.xlu0 %5864 }
 0xb8e   :  { %v5914_v55 = vmul.f32 %v5845_v61, %v14202_v63  ;;  %v5915_v30 = vmul.f32 %v5845_v61, %v14203_v2  ;;  %v5916_v6 = vmul.f32 %v5845_v61, %v14204_v34  ;;  %v5917_v52 = vmul.f32 %v5845_v61, %v14205_v20  ;;  %v14223_v63 = vld [vmem:[#allocation121_spill] sm:$0xff]  ;;  %v14224_v2 = vld [vmem:[#allocation120_spill] sm:$0xff] }
 0xb8f   :  { %v5930_v3 = vmul.f32 %v5865_v24, %v14206_v25  ;;  %v5931_v15 = vmul.f32 %v5865_v24, %v14207_v16  ;;  %v5932_v17 = vmul.f32 %v5865_v24, %v14208_v26  ;;  %v5933_v32 = vmul.f32 %v5865_v24, %v14209_v60  ;;  %v14226_v16 = vld [vmem:[#allocation123_spill] sm:$0xff]  ;;  %v14227_v60 = vld [vmem:[#allocation125_spill] sm:$0xff] }
 0xb91   :  { %v5850_v4 = vpop.permute.xlu1 %5849  ;;  %v5870_v11 = vpop.permute.xlu0 %5869 }
 0xb92   :  { %v5918_v43 = vmul.f32 %v5850_v4, %v14198_v5  ;;  %v5919_v62 = vmul.f32 %v5850_v4, %v14199_v10  ;;  %v5920_v23 = vmul.f32 %v5850_v4, %v14200_v31  ;;  %v5921_v22 = vmul.f32 %v5850_v4, %v14201_v28  ;;  %v14219_v4 = vld [vmem:[#allocation109_spill] sm:$0xff]  ;;  %v14222_v28 = vld [vmem:[#allocation119_spill] sm:$0xff] }
 0xb93   :  { %v5934_v61 = vmul.f32 %v5870_v11, %v14214_v37  ;;  %v5935_v48 = vmul.f32 %v5870_v11, %v14215_v59  ;;  %v5936_v24 = vmul.f32 %v5870_v11, %v14216_v42  ;;  %v5937_v49 = vmul.f32 %v5870_v11, %v14217_v29  ;;  %v14232_v37 = vld [vmem:[#allocation88_spill] sm:$0xff]  ;;  %v14233_v42 = vld [vmem:[#allocation90_spill] sm:$0xff] }
 0xb94   :  { %v5998_v14 = vadd.f32 %v5918_v43, %v5914_v55  ;;  %v6011_v9 = vadd.f32 %v5919_v62, %v5915_v30  ;;  %v6024_v56 = vadd.f32 %v5920_v23, %v5916_v6  ;;  %v6037_v41 = vadd.f32 %v5921_v22, %v5917_v52  ;;  %v14220_v43 = vld [vmem:[#allocation108_spill] sm:$0xff]  ;;  %v14221_v62 = vld [vmem:[#allocation110_spill] sm:$0xff] }
 0xb95   :  { %v5855_v47 = vpop.permute.xlu1 %5854  ;;  %v5875_v57 = vpop.permute.xlu0 %5874  ;;  %v14225_v30 = vld [vmem:[#allocation122_spill] sm:$0xff] }
 0xb96   :  { %v5922_v35 = vmul.f32 %v5855_v47, %v14210_v12  ;;  %v5923_v13 = vmul.f32 %v5855_v47, %v14211_v58  ;;  %v5924_v19 = vmul.f32 %v5855_v47, %v14212_v7  ;;  %v5925_v18 = vmul.f32 %v5855_v47, %v14213_v46  ;;  %v14228_v12 = vld [vmem:[#allocation124_spill] sm:$0xff]  ;;  %v14229_v58 = vld [vmem:[#allocation126_spill] sm:$0xff] }
 0xb97   :  { %v5938_v22 = vmul.f32 %v5875_v57, %v14222_v28  ;;  %v5939_v55 = vmul.f32 %v5875_v57, %v14223_v63  ;;  %v5940_v11 = vmul.f32 %v5875_v57, %v14224_v2  ;;  %v5941_v34 = vmul.f32 %v5875_v57, %v14225_v30  ;;  %v14231_v57 = vld [vmem:[#allocation89_spill] sm:$0xff] }
 0xb98   :  { %v5999_v39 = vadd.f32 %v5998_v14, %v5922_v35  ;;  %v6012_v53 = vadd.f32 %v6011_v9, %v5923_v13  ;;  %v6025_v33 = vadd.f32 %v6024_v56, %v5924_v19  ;;  %v6038_v54 = vadd.f32 %v6037_v41, %v5925_v18  ;;  %v14230_v9 = vld [vmem:[#allocation87_spill] sm:$0xff] }
 0xb99   :  { %v5860_v44 = vpop.permute.xlu1 %5859  ;;  %v5880_v23 = vpop.permute.xlu0 %5879 }
 0xb9a   :  { %v5926_v1 = vmul.f32 %v5860_v44, %v14218_v0  ;;  %v5927_v5 = vmul.f32 %v5860_v44, %v14219_v4  ;;  %v5928_v10 = vmul.f32 %v5860_v44, %v14220_v43  ;;  %v5929_v31 = vmul.f32 %v5860_v44, %v14221_v62  ;;  %v14234_v43 = vld [vmem:[#allocation91_spill] sm:$0xff]  ;;  %v14235_v62 = vld [vmem:[#allocation93_spill] sm:$0xff] }
 0xb9b   :  { %v5942_v26 = vmul.f32 %v5880_v23, %v14226_v16  ;;  %v5943_v47 = vmul.f32 %v5880_v23, %v14227_v60  ;;  %v5944_v35 = vmul.f32 %v5880_v23, %v14228_v12  ;;  %v5945_v13 = vmul.f32 %v5880_v23, %v14229_v58 }
 0xb9c   :  { %v6000_v6 = vadd.f32 %v5999_v39, %v5926_v1  ;;  %v6013_v20 = vadd.f32 %v6012_v53, %v5927_v5  ;;  %v6026_v52 = vadd.f32 %v6025_v33, %v5928_v10  ;;  %v6039_v25 = vadd.f32 %v6038_v54, %v5929_v31 }
 0xb9d   :  { %v5835_v7 = vpop.permute.xlu1 %5834 }
 0xb9e   :  { %v6001_v19 = vadd.f32 %v6000_v6, %v5930_v3  ;;  %v6014_v46 = vadd.f32 %v6013_v20, %v5931_v15  ;;  %v6027_v18 = vadd.f32 %v6026_v52, %v5932_v17  ;;  %v6040_v14 = vadd.f32 %v6039_v25, %v5933_v32 }
 0xb9f   :  { %v5906_v56 = vmul.f32 %v5835_v7, %v14230_v9  ;;  %v5907_v41 = vmul.f32 %v5835_v7, %v14231_v57  ;;  %v5908_v59 = vmul.f32 %v5835_v7, %v14232_v37  ;;  %v5909_v29 = vmul.f32 %v5835_v7, %v14233_v42 }
 0xba0   :  { %v6002_v39 = vadd.f32 %v6001_v19, %v5934_v61  ;;  %v6015_v53 = vadd.f32 %v6014_v46, %v5935_v48  ;;  %v6028_v33 = vadd.f32 %v6027_v18, %v5936_v24  ;;  %v6041_v54 = vadd.f32 %v6040_v14, %v5937_v49  ;;  %v14236_v48 = vld [vmem:[#allocation92_spill] sm:$0xff]  ;;  %v14237_v49 = vld [vmem:[#allocation94_spill] sm:$0xff] }
 0xba1   :  { %v5840_v44 = vpop.permute.xlu1 %5839  ;;  %v5951_v0 = vadd.f32 %v13075_v50, %v5906_v56  ;;  %v5964_v3 = vadd.f32 %v13077_v8, %v5907_v41  ;;  %v5977_v15 = vadd.f32 %v13079_v21, %v5908_v59  ;;  %v5990_v17 = vadd.f32 %v13081_v45, %v5909_v29 }
 0xba2   :  { %v6003_v32 = vadd.f32 %v6002_v39, %v5938_v22  ;;  %v6016_v1 = vadd.f32 %v6015_v53, %v5939_v55  ;;  %v6029_v4 = vadd.f32 %v6028_v33, %v5940_v11  ;;  %v6042_v5 = vadd.f32 %v6041_v54, %v5941_v34 }
 0xba3   :  { %v5910_v10 = vmul.f32 %v5840_v44, %v14234_v43  ;;  %v5911_v61 = vmul.f32 %v5840_v44, %v14235_v62  ;;  %v5912_v24 = vmul.f32 %v5840_v44, %v14236_v48  ;;  %v5913_v31 = vmul.f32 %v5840_v44, %v14237_v49 }
 0xba4   :  { %v6004_v23 = vadd.f32 %v6003_v32, %v5942_v26  ;;  %v6017_v50 = vadd.f32 %v6016_v1, %v5943_v47  ;;  %v6030_v28 = vadd.f32 %v6029_v4, %v5944_v35  ;;  %v6043_v8 = vadd.f32 %v6042_v5, %v5945_v13 }
 0xba5   :  { %v5952_v63 = vadd.f32 %v5951_v0, %v5910_v10  ;;  %v5965_v21 = vadd.f32 %v5964_v3, %v5911_v61  ;;  %v5978_v2 = vadd.f32 %v5977_v15, %v5912_v24  ;;  %v5991_v45 = vadd.f32 %v5990_v17, %v5913_v31 }
 0xba6   :  { %v6005_v22 = vrot.slane %v6004_v23, 4  ;;  %v6018_v55 = vrot.slane %v6017_v50, 4  ;;  %v6031_v11 = vrot.slane %v6030_v28, 4  ;;  %v6044_v30 = vrot.slane %v6043_v8, 4 }
 0xba7   :  { %v5953_v34 = vrot.slane %v5952_v63, 4  ;;  %v5966_v6 = vrot.slane %v5965_v21, 4  ;;  %v5979_v20 = vrot.slane %v5978_v2, 4  ;;  %v5992_v52 = vrot.slane %v5991_v45, 4 }
 0xba8   :  { %v6006_v25 = vadd.f32 %v6005_v22, %v6004_v23  ;;  %v6019_v16 = vadd.f32 %v6018_v55, %v6017_v50  ;;  %v6032_v60 = vadd.f32 %v6031_v11, %v6030_v28  ;;  %v6045_v12 = vadd.f32 %v6044_v30, %v6043_v8 }
 0xba9   :  { %v5954_v26 = vadd.f32 %v5953_v34, %v5952_v63  ;;  %v5967_v47 = vadd.f32 %v5966_v6, %v5965_v21  ;;  %v5980_v35 = vadd.f32 %v5979_v20, %v5978_v2  ;;  %v5993_v58 = vadd.f32 %v5992_v52, %v5991_v45 }
 0xbaa   :  { %v6007_v13 = vrot.slane %v6006_v25, 2  ;;  %v6020_v7 = vrot.slane %v6019_v16, 2  ;;  %v6033_v19 = vrot.slane %v6032_v60, 2  ;;  %v6046_v46 = vrot.slane %v6045_v12, 2 }
 0xbab   :  { %v5955_v18 = vrot.slane %v5954_v26, 2  ;;  %v5968_v14 = vrot.slane %v5967_v47, 2  ;;  %v5981_v9 = vrot.slane %v5980_v35, 2  ;;  %v5994_v56 = vrot.slane %v5993_v58, 2 }
 0xbac   :  { %v6008_v57 = vadd.f32 %v6007_v13, %v6006_v25  ;;  %v6021_v41 = vadd.f32 %v6020_v7, %v6019_v16  ;;  %v6034_v37 = vadd.f32 %v6033_v19, %v6032_v60  ;;  %v6047_v59 = vadd.f32 %v6046_v46, %v6045_v12 }
 0xbad   :  { %v5956_v42 = vadd.f32 %v5955_v18, %v5954_v26  ;;  %v5969_v29 = vadd.f32 %v5968_v14, %v5967_v47  ;;  %v5982_v39 = vadd.f32 %v5981_v9, %v5980_v35  ;;  %v5995_v53 = vadd.f32 %v5994_v56, %v5993_v58 }
 0xbae   :  { %v6009_v33 = vrot.slane %v6008_v57, 1  ;;  %v6022_v54 = vrot.slane %v6021_v41, 1  ;;  %v6035_v44 = vrot.slane %v6034_v37, 1  ;;  %v6048_v0 = vrot.slane %v6047_v59, 1 }
 0xbaf   :  { %v5957_v3 = vrot.slane %v5956_v42, 1  ;;  %v5970_v15 = vrot.slane %v5969_v29, 1  ;;  %v5983_v17 = vrot.slane %v5982_v39, 1  ;;  %v5996_v32 = vrot.slane %v5995_v53, 1 }
 0xbb0   :  { %v13127_v1 = vadd.f32 %v6009_v33, %v6008_v57  ;;  %v13129_v4 = vadd.f32 %v6022_v54, %v6021_v41  ;;  %v13131_v5 = vadd.f32 %v6035_v44, %v6034_v37  ;;  %v13133_v43 = vadd.f32 %v6048_v0, %v6047_v59 }
 0xbb1   :  { %v13135_v10 = vadd.f32 %v5957_v3, %v5956_v42  ;;  %v13137_v62 = vadd.f32 %v5970_v15, %v5969_v29  ;;  %v13139_v61 = vadd.f32 %v5983_v17, %v5982_v39  ;;  %v13141_v48 = vadd.f32 %v5996_v32, %v5995_v53 }
 0xbb2   :  { %14238 = vst [vmem:[#allocation153_spill] sm:$0xff] %v13127_v1 }
 0xbb3   :  { %14239 = vst [vmem:[#allocation151_spill] sm:$0xff] %v13135_v10 }
 0xbb4   :  { %10754 = dma.done.wait [#allocation9 + $0x3], 12288 }
 0xbb5   :  { %10755 = vsyncadd [#allocation9 + $0x3], 4294955008  ;;  %v14240_v24 = vld [vmem:[#allocation129_spill] sm:$0xff]  ;;  %v14241_v49 = vld [vmem:[#allocation132_spill] sm:$0xff] }
 0xbb6   :  { %v6055_v31 = vpack.c.bf16 %v14241_v49, %v14240_v24  ;;  %v6067_v23 = vld [vmem:[#allocation5 + $0x8] sm:$0xff]  ;;  %v6069_v50 = vld [vmem:[#allocation5 + $0x18] sm:$0xff]  ;;  %v6066_v28 = vld [vmem:[#allocation5] sm:$0xff] }
 0xbb7   :  { %6185 = vmatprep.subr.bf16.mxu1 %v6067_v23  ;;  %6331 = vmatprep.subr.bf16.mxu0 %v6069_v50  ;;  %v6068_v8 = vld [vmem:[#allocation5 + $0x10] sm:$0xff]  ;;  %v6071_v63 = vld [vmem:[#allocation5 + $0x28] sm:$0xff]  ;;  %v6073_v21 = vld [vmem:[#allocation5 + $0x38] sm:$0xff] }
 0xbb8   :  { %6217 = vmatprep.mubr.bf16.mxu1 %v6055_v31  ;;  %6363 = vmatprep.mubr.bf16.mxu0 %v6055_v31  ;;  %v6070_v2 = vld [vmem:[#allocation5 + $0x20] sm:$0xff]  ;;  %v6072_v45 = vld [vmem:[#allocation5 + $0x30] sm:$0xff]  ;;  %v6075_v22 = vld [vmem:[#allocation5 + $0x48] sm:$0xff] }
 0xbb9   :  { %6186 = vmatpush1.bf16.msra.mxu1 %v6066_v28  ;;  %6332 = vmatpush1.bf16.msra.mxu0 %v6068_v8  ;;  %v6077_v55 = vld [vmem:[#allocation5 + $0x58] sm:$0xff]  ;;  %v6074_v11 = vld [vmem:[#allocation5 + $0x40] sm:$0xff]  ;;  %v6076_v30 = vld [vmem:[#allocation5 + $0x50] sm:$0xff] }
 0xbba   :  { %6187 = vmatprep.subr.bf16.mxu1 %v6071_v63  ;;  %6333 = vmatprep.subr.bf16.mxu0 %v6073_v21  ;;  %v6079_v34 = vld [vmem:[#allocation5 + $0x68] sm:$0xff]  ;;  %v6081_v6 = vld [vmem:[#allocation5 + $0x78] sm:$0xff]  ;;  %v6078_v20 = vld [vmem:[#allocation5 + $0x60] sm:$0xff] }
 0xbbb   :  { %v6080_v52 = vld [vmem:[#allocation5 + $0x70] sm:$0xff]  ;;  %v6083_v25 = vld [vmem:[#allocation5 + $0x88] sm:$0xff]  ;;  %v6085_v16 = vld [vmem:[#allocation5 + $0x98] sm:$0xff] }
 0xbbc   :  { %v6082_v60 = vld [vmem:[#allocation5 + $0x80] sm:$0xff]  ;;  %v6084_v12 = vld [vmem:[#allocation5 + $0x90] sm:$0xff]  ;;  %v6087_v26 = vld [vmem:[#allocation5 + $0xa8] sm:$0xff] }
 0xbbd   :  { %6188 = vmatpush1.bf16.msra.mxu1 %v6070_v2  ;;  %6334 = vmatpush1.bf16.msra.mxu0 %v6072_v45  ;;  %v6089_v47 = vld [vmem:[#allocation5 + $0xb8] sm:$0xff]  ;;  %v6086_v35 = vld [vmem:[#allocation5 + $0xa0] sm:$0xff]  ;;  %v6088_v58 = vld [vmem:[#allocation5 + $0xb0] sm:$0xff] }
 0xbbe   :  { %6189 = vmatprep.subr.bf16.mxu1 %v6075_v22  ;;  %6335 = vmatprep.subr.bf16.mxu0 %v6077_v55  ;;  %v6091_v13 = vld [vmem:[#allocation5 + $0xc8] sm:$0xff]  ;;  %v6093_v7 = vld [vmem:[#allocation5 + $0xd8] sm:$0xff]  ;;  %v6090_v19 = vld [vmem:[#allocation5 + $0xc0] sm:$0xff] }
 0xbbf   :  { %v6092_v46 = vld [vmem:[#allocation5 + $0xd0] sm:$0xff]  ;;  %v6095_v18 = vld [vmem:[#allocation5 + $0xe8] sm:$0xff]  ;;  %v6097_v14 = vld [vmem:[#allocation5 + $0xf8] sm:$0xff] }
 0xbc0   :  { %v6094_v9 = vld [vmem:[#allocation5 + $0xe0] sm:$0xff]  ;;  %v6096_v56 = vld [vmem:[#allocation5 + $0xf0] sm:$0xff]  ;;  %v6099_v57 = vld [vmem:[#allocation5 + $0x108] sm:$0xff] }
 0xbc1   :  { %6190 = vmatpush1.bf16.msra.mxu1 %v6074_v11  ;;  %6336 = vmatpush1.bf16.msra.mxu0 %v6076_v30  ;;  %v6101_v41 = vld [vmem:[#allocation5 + $0x118] sm:$0xff]  ;;  %v6098_v37 = vld [vmem:[#allocation5 + $0x100] sm:$0xff]  ;;  %v6100_v59 = vld [vmem:[#allocation5 + $0x110] sm:$0xff] }
 0xbc2   :  { %6191 = vmatprep.subr.bf16.mxu1 %v6079_v34  ;;  %6337 = vmatprep.subr.bf16.mxu0 %v6081_v6  ;;  %v6103_v42 = vld [vmem:[#allocation5 + $0x128] sm:$0xff]  ;;  %v6105_v29 = vld [vmem:[#allocation5 + $0x138] sm:$0xff]  ;;  %v6102_v39 = vld [vmem:[#allocation5 + $0x120] sm:$0xff] }
 0xbc3   :  { %v6104_v53 = vld [vmem:[#allocation5 + $0x130] sm:$0xff]  ;;  %v6107_v33 = vld [vmem:[#allocation5 + $0x148] sm:$0xff]  ;;  %v6109_v54 = vld [vmem:[#allocation5 + $0x158] sm:$0xff] }
 0xbc4   :  { %v6106_v44 = vld [vmem:[#allocation5 + $0x140] sm:$0xff]  ;;  %v6108_v0 = vld [vmem:[#allocation5 + $0x150] sm:$0xff]  ;;  %v6111_v3 = vld [vmem:[#allocation5 + $0x168] sm:$0xff] }
 0xbc5   :  { %6192 = vmatpush1.bf16.msra.mxu1 %v6078_v20  ;;  %6338 = vmatpush1.bf16.msra.mxu0 %v6080_v52  ;;  %v6113_v15 = vld [vmem:[#allocation5 + $0x178] sm:$0xff]  ;;  %v6110_v17 = vld [vmem:[#allocation5 + $0x160] sm:$0xff]  ;;  %v6112_v32 = vld [vmem:[#allocation5 + $0x170] sm:$0xff] }
 0xbc6   :  { %6193 = vmatprep.subr.bf16.mxu1 %v6083_v25  ;;  %6339 = vmatprep.subr.bf16.mxu0 %v6085_v16  ;;  %v6115_v24 = vld [vmem:[#allocation5 + $0x188] sm:$0xff]  ;;  %v6117_v49 = vld [vmem:[#allocation5 + $0x198] sm:$0xff]  ;;  %v6114_v31 = vld [vmem:[#allocation5 + $0x180] sm:$0xff] }
 0xbc7   :  { %v6116_v23 = vld [vmem:[#allocation5 + $0x190] sm:$0xff]  ;;  %v6119_v50 = vld [vmem:[#allocation5 + $0x1a8] sm:$0xff]  ;;  %v6121_v28 = vld [vmem:[#allocation5 + $0x1b8] sm:$0xff] }
 0xbc8   :  { %v6118_v8 = vld [vmem:[#allocation5 + $0x1a0] sm:$0xff]  ;;  %v6120_v63 = vld [vmem:[#allocation5 + $0x1b0] sm:$0xff]  ;;  %v6123_v21 = vld [vmem:[#allocation5 + $0x1c8] sm:$0xff] }
 0xbc9   :  { %6194 = vmatpush1.bf16.msra.mxu1 %v6082_v60  ;;  %6340 = vmatpush1.bf16.msra.mxu0 %v6084_v12  ;;  %v6125_v2 = vld [vmem:[#allocation5 + $0x1d8] sm:$0xff]  ;;  %v6122_v45 = vld [vmem:[#allocation5 + $0x1c0] sm:$0xff]  ;;  %v6124_v22 = vld [vmem:[#allocation5 + $0x1d0] sm:$0xff] }
 0xbca   :  { %6195 = vmatprep.subr.bf16.mxu1 %v6087_v26  ;;  %6341 = vmatprep.subr.bf16.mxu0 %v6089_v47  ;;  %v6127_v55 = vld [vmem:[#allocation5 + $0x1e8] sm:$0xff]  ;;  %v6129_v11 = vld [vmem:[#allocation5 + $0x1f8] sm:$0xff]  ;;  %v6126_v30 = vld [vmem:[#allocation5 + $0x1e0] sm:$0xff] }
 0xbcb   :  { %v6128_v34 = vld [vmem:[#allocation5 + $0x1f0] sm:$0xff]  ;;  %v6131_v6 = vld [vmem:[#allocation5 + $0x208] sm:$0xff]  ;;  %v6133_v20 = vld [vmem:[#allocation5 + $0x218] sm:$0xff] }
 0xbcc   :  { %v14242_v52 = vld [vmem:[#allocation127_spill] sm:$0xff]  ;;  %v14243_v25 = vld [vmem:[#allocation130_spill] sm:$0xff]  ;;  %v6135_v26 = vld [vmem:[#allocation5 + $0x228] sm:$0xff] }
 0xbcd   :  { %6196 = vmatpush1.bf16.msra.mxu1 %v6086_v35  ;;  %6342 = vmatpush1.bf16.msra.mxu0 %v6088_v58  ;;  %v6054_v16 = vpack.c.bf16 %v14243_v25, %v14242_v52  ;;  %v6130_v60 = vld [vmem:[#allocation5 + $0x200] sm:$0xff]  ;;  %v6132_v12 = vld [vmem:[#allocation5 + $0x210] sm:$0xff]  ;;  %v6137_v47 = vld [vmem:[#allocation5 + $0x238] sm:$0xff] }
 0xbce   :  { %6197 = vmatprep.subr.bf16.mxu1 %v6091_v13  ;;  %6343 = vmatprep.subr.bf16.mxu0 %v6093_v7  ;;  %v14244_v35 = vld [vmem:[#allocation135_spill] sm:$0xff]  ;;  %v14245_v58 = vld [vmem:[#allocation138_spill] sm:$0xff]  ;;  %v14256_v52 = vld [vmem:[#allocation128_spill] sm:$0xff] }
 0xbcf   :  { %v6058_v13 = vpack.c.bf16 %v14245_v58, %v14244_v35  ;;  %v6134_v7 = vld [vmem:[#allocation5 + $0x220] sm:$0xff] }
 0xbd0   :  { %v14257_v25 = vld [vmem:[#allocation131_spill] sm:$0xff] }
 0xbd1   :  { %6198 = vmatpush1.bf16.msra.mxu1 %v6090_v19  ;;  %6344 = vmatpush1.bf16.msra.mxu0 %v6092_v46  ;;  %v6136_v19 = vld [vmem:[#allocation5 + $0x230] sm:$0xff]  ;;  %v6139_v46 = vld [vmem:[#allocation5 + $0x248] sm:$0xff]  ;;  %v14261_v35 = vld [vmem:[#allocation143_spill] sm:$0xff] }
 0xbd2   :  { %6199 = vmatprep.subr.bf16.mxu1 %v6095_v18  ;;  %6345 = vmatprep.subr.bf16.mxu0 %v6097_v14  ;;  %v6141_v18 = vld [vmem:[#allocation5 + $0x258] sm:$0xff]  ;;  %v14246_v14 = vld [vmem:[#allocation133_spill] sm:$0xff] }
 0xbd5   :  { %6200 = vmatpush1.bf16.msra.mxu1 %v6094_v9  ;;  %6346 = vmatpush1.bf16.msra.mxu0 %v6096_v56  ;;  %v14247_v9 = vld [vmem:[#allocation136_spill] sm:$0xff] }
 0xbd6   :  { %6201 = vmatprep.subr.bf16.mxu1 %v6099_v57  ;;  %6347 = vmatprep.subr.bf16.mxu0 %v6101_v41  ;;  %v6057_v56 = vpack.c.bf16 %v14247_v9, %v14246_v14  ;;  %v6138_v57 = vld [vmem:[#allocation5 + $0x240] sm:$0xff]  ;;  %v6140_v41 = vld [vmem:[#allocation5 + $0x250] sm:$0xff] }
 0xbd7   :  { %v14265_v9 = vld [vmem:[#allocation61_spill] sm:$0xff] }
 0xbd9   :  { %6202 = vmatpush1.bf16.msra.mxu1 %v6098_v37  ;;  %6348 = vmatpush1.bf16.msra.mxu0 %v6100_v59  ;;  %v6143_v37 = vld [vmem:[#allocation5 + $0x268] sm:$0xff]  ;;  %v6145_v59 = vld [vmem:[#allocation5 + $0x278] sm:$0xff] }
 0xbda   :  { %6203 = vmatprep.subr.bf16.mxu1 %v6103_v42  ;;  %6349 = vmatprep.subr.bf16.mxu0 %v6105_v29  ;;  %v14248_v42 = vld [vmem:[#allocation141_spill] sm:$0xff]  ;;  %v14249_v29 = vld [vmem:[#allocation144_spill] sm:$0xff] }
 0xbdd   :  { %6204 = vmatpush1.bf16.msra.mxu1 %v6102_v39  ;;  %6350 = vmatpush1.bf16.msra.mxu0 %v6104_v53  ;;  %v6061_v39 = vpack.c.bf16 %v14249_v29, %v14248_v42  ;;  %v6142_v53 = vld [vmem:[#allocation5 + $0x260] sm:$0xff] }
 0xbde   :  { %6205 = vmatprep.subr.bf16.mxu1 %v6107_v33  ;;  %6351 = vmatprep.subr.bf16.mxu0 %v6109_v54  ;;  %v6144_v33 = vld [vmem:[#allocation5 + $0x270] sm:$0xff]  ;;  %v6147_v54 = vld [vmem:[#allocation5 + $0x288] sm:$0xff] }
 0xbe1   :  { %6206 = vmatpush1.bf16.msra.mxu1 %v6106_v44  ;;  %6352 = vmatpush1.bf16.msra.mxu0 %v6108_v0  ;;  %v6149_v44 = vld [vmem:[#allocation5 + $0x298] sm:$0xff] }
 0xbe2   :  { %6207 = vmatprep.subr.bf16.mxu1 %v6111_v3  ;;  %6353 = vmatprep.subr.bf16.mxu0 %v6113_v15  ;;  %v14250_v0 = vld [vmem:[#allocation139_spill] sm:$0xff]  ;;  %v14251_v3 = vld [vmem:[#allocation142_spill] sm:$0xff] }
 0xbe3   :  { %v6060_v15 = vpack.c.bf16 %v14251_v3, %v14250_v0 }
 0xbe5   :  { %6208 = vmatpush1.bf16.msra.mxu1 %v6110_v17  ;;  %6354 = vmatpush1.bf16.msra.mxu0 %v6112_v32  ;;  %v6146_v17 = vld [vmem:[#allocation5 + $0x280] sm:$0xff]  ;;  %v6148_v32 = vld [vmem:[#allocation5 + $0x290] sm:$0xff] }
 0xbe6   :  { %6209 = vmatprep.subr.bf16.mxu1 %v6115_v24  ;;  %6355 = vmatprep.subr.bf16.mxu0 %v6117_v49  ;;  %v6151_v24 = vld [vmem:[#allocation5 + $0x2a8] sm:$0xff]  ;;  %v6153_v49 = vld [vmem:[#allocation5 + $0x2b8] sm:$0xff] }
 0xbe9   :  { %6210 = vmatpush1.bf16.msra.mxu1 %v6114_v31  ;;  %6356 = vmatpush1.bf16.msra.mxu0 %v6116_v23  ;;  %v14252_v31 = vld [vmem:[#allocation147_spill] sm:$0xff]  ;;  %v14253_v23 = vld [vmem:[#allocation150_spill] sm:$0xff] }
 0xbea   :  { %6211 = vmatprep.subr.bf16.mxu1 %v6119_v50  ;;  %6357 = vmatprep.subr.bf16.mxu0 %v6121_v28  ;;  %v6064_v50 = vpack.c.bf16 %v14253_v23, %v14252_v31  ;;  %v6150_v28 = vld [vmem:[#allocation5 + $0x2a0] sm:$0xff] }
 0xbed   :  { %6212 = vmatpush1.bf16.msra.mxu1 %v6118_v8  ;;  %6358 = vmatpush1.bf16.msra.mxu0 %v6120_v63  ;;  %v6152_v8 = vld [vmem:[#allocation5 + $0x2b0] sm:$0xff]  ;;  %v6155_v63 = vld [vmem:[#allocation5 + $0x2c8] sm:$0xff] }
 0xbee   :  { %6213 = vmatprep.subr.bf16.mxu1 %v6123_v21  ;;  %6359 = vmatprep.subr.bf16.mxu0 %v6125_v2  ;;  %v6157_v21 = vld [vmem:[#allocation5 + $0x2d8] sm:$0xff]  ;;  %v14254_v2 = vld [vmem:[#allocation145_spill] sm:$0xff] }
 0xbf1   :  { %6214 = vmatpush1.bf16.msra.mxu1 %v6122_v45  ;;  %6360 = vmatpush1.bf16.msra.mxu0 %v6124_v22  ;;  %v14255_v45 = vld [vmem:[#allocation148_spill] sm:$0xff] }
 0xbf2   :  { %6215 = vmatprep.subr.bf16.mxu1 %v6127_v55  ;;  %6361 = vmatprep.subr.bf16.mxu0 %v6129_v11  ;;  %v6063_v22 = vpack.c.bf16 %v14255_v45, %v14254_v2  ;;  %v6154_v55 = vld [vmem:[#allocation5 + $0x2c0] sm:$0xff]  ;;  %v6156_v11 = vld [vmem:[#allocation5 + $0x2d0] sm:$0xff] }
 0xbf5   :  { %6216 = vmatpush1.bf16.msra.mxu1 %v6126_v30  ;;  %6362 = vmatpush1.bf16.msra.mxu0 %v6128_v34  ;;  %v6159_v30 = vld [vmem:[#allocation5 + $0x2e8] sm:$0xff]  ;;  %v6161_v34 = vld [vmem:[#allocation5 + $0x2f8] sm:$0xff] }
 0xbf6   :  { %6258 = vmatprep.subr.bf16.mxu1 %v6131_v6  ;;  %6404 = vmatprep.subr.bf16.mxu0 %v6133_v20  ;;  %v6158_v6 = vld [vmem:[#allocation5 + $0x2e0] sm:$0xff]  ;;  %v6160_v20 = vld [vmem:[#allocation5 + $0x2f0] sm:$0xff] }
 0xbf8   :  { %6218 = vmatmul.mubr.bf16.vlgmr.msra.gmra.mrb[0].mxu1 %v6054_v16  ;;  %6364 = vmatmul.mubr.bf16.vlgmr.msra.gmra.mrb[224].mxu0 %v6054_v16  ;;  %v6056_v16 = vpack.c.bf16 %v14257_v25, %v14256_v52 }
 0xbf9   :  { %6259 = vmatpush1.bf16.msra.mxu1 %v6130_v60  ;;  %6405 = vmatpush1.bf16.msra.mxu0 %v6132_v12  ;;  %v14258_v60 = vld [vmem:[#allocation134_spill] sm:$0xff]  ;;  %v14259_v12 = vld [vmem:[#allocation137_spill] sm:$0xff] }
 0xbfa   :  { %6260 = vmatprep.subr.bf16.mxu1 %v6135_v26  ;;  %6406 = vmatprep.subr.bf16.mxu0 %v6137_v47  ;;  %v6059_v26 = vpack.c.bf16 %v14259_v12, %v14258_v60  ;;  %v14260_v47 = vld [vmem:[#allocation140_spill] sm:$0xff] }
 0xbfb   :  { %6227 = vmatprep.mubr.bf16.mxu1 %v6058_v13  ;;  %6373 = vmatprep.mubr.bf16.mxu0 %v6058_v13  ;;  %v6062_v58 = vpack.c.bf16 %v14261_v35, %v14260_v47  ;;  %v14262_v13 = vld [vmem:[#allocation146_spill] sm:$0xff] }
 0xbfd   :  { %6261 = vmatpush1.bf16.msra.mxu1 %v6134_v7  ;;  %6407 = vmatpush1.bf16.msra.mxu0 %v6136_v19  ;;  %v14263_v7 = vld [vmem:[#allocation149_spill] sm:$0xff] }
 0xbfe   :  { %6262 = vmatprep.subr.bf16.mxu1 %v6139_v46  ;;  %6408 = vmatprep.subr.bf16.mxu0 %v6141_v18  ;;  %v6065_v19 = vpack.c.bf16 %v14263_v7, %v14262_v13  ;;  %v6163_v46 = vld [vmem:[#allocation25 + $0x41] ss:$8 sm:$0xf] }
 0xbff   :  { %v14264_v18 = vld [vmem:[#allocation59_spill] sm:$0xff] }
 0xc00   :  { %6228 = vmatmul.mubr.bf16.gmra.mrb[4].mxu1 %v6057_v56  ;;  %6374 = vmatmul.mubr.bf16.gmra.mrb[228].mxu0 %v6057_v56  ;;  %v13176_v14 = vrot.slane %v6163_v46, %v14264_v18  ;;  %v13179_v56 = vrot.slane %v6163_v46, %v14265_v9 }
 0xc01   :  { %6263 = vmatpush1.bf16.msra.mxu1 %v6138_v57  ;;  %6409 = vmatpush1.bf16.msra.mxu0 %v6140_v41  ;;  %v14266_v57 = vld [vmem:[#allocation60_spill] sm:$0xff] }
 0xc02   :  { %6264 = vmatprep.subr.bf16.mxu1 %v6143_v37  ;;  %6410 = vmatprep.subr.bf16.mxu0 %v6145_v59  ;;  %v13182_v41 = vrot.slane %v6163_v46, %v14266_v57  ;;  %v14267_v37 = vld [vmem:[#allocation62_spill] sm:$0xff] }
 0xc03   :  { %6237 = vmatprep.mubr.bf16.mxu1 %v6061_v39  ;;  %6383 = vmatprep.mubr.bf16.mxu0 %v6061_v39  ;;  %v13185_v59 = vrot.slane %v6163_v46, %v14267_v37 }
 0xc05   :  { %6265 = vmatpush1.bf16.msra.mxu1 %v6142_v53  ;;  %6411 = vmatpush1.bf16.msra.mxu0 %v6144_v33 }
 0xc06   :  { %6266 = vmatprep.subr.bf16.mxu1 %v6147_v54  ;;  %6412 = vmatprep.subr.bf16.mxu0 %v6149_v44 }
 0xc08   :  { %6238 = vmatmul.mubr.bf16.gmra.mrb[8].mxu1 %v6060_v15  ;;  %6384 = vmatmul.mubr.bf16.gmra.mrb[232].mxu0 %v6060_v15 }
 0xc09   :  { %6267 = vmatpush1.bf16.msra.mxu1 %v6146_v17  ;;  %6413 = vmatpush1.bf16.msra.mxu0 %v6148_v32 }
 0xc0a   :  { %6268 = vmatprep.subr.bf16.mxu1 %v6151_v24  ;;  %6414 = vmatprep.subr.bf16.mxu0 %v6153_v49 }
 0xc0b   :  { %6247 = vmatprep.mubr.bf16.mxu1 %v6064_v50  ;;  %6393 = vmatprep.mubr.bf16.mxu0 %v6064_v50 }
 0xc0d   :  { %6269 = vmatpush1.bf16.msra.mxu1 %v6150_v28  ;;  %6415 = vmatpush1.bf16.msra.mxu0 %v6152_v8 }
 0xc0e   :  { %6270 = vmatprep.subr.bf16.mxu1 %v6155_v63  ;;  %6416 = vmatprep.subr.bf16.mxu0 %v6157_v21 }
 0xc10   :  { %6248 = vmatmul.mubr.bf16.gmra.mrb[12].mxu1 %v6063_v22  ;;  %6394 = vmatmul.mubr.bf16.gmra.mrb[236].mxu0 %v6063_v22 }
 0xc11   :  { %6271 = vmatpush1.bf16.msra.mxu1 %v6154_v55  ;;  %6417 = vmatpush1.bf16.msra.mxu0 %v6156_v11 }
 0xc12   :  { %6272 = vmatprep.subr.bf16.mxu1 %v6159_v30  ;;  %6418 = vmatprep.subr.bf16.mxu0 %v6161_v34 }
 0xc13   :  { %6290 = vmatprep.mubr.bf16.mxu1 %v14092_v51  ;;  %6436 = vmatprep.mubr.bf16.mxu0 %v14092_v51 }
 0xc15   :  { %6273 = vmatpush1.bf16.msra.mxu1 %v6158_v6  ;;  %6419 = vmatpush1.bf16.msra.mxu0 %v6160_v20 }
 0xc18   :  { %6291 = vmatmul.mubr.bf16.vlgmr.msra.gmra.mrb[0].mxu1 %v6056_v16  ;;  %6437 = vmatmul.mubr.bf16.vlgmr.msra.gmra.mrb[224].mxu0 %v6056_v16 }
 0xc19   :  { %6300 = vmatprep.mubr.bf16.mxu1 %v14092_v51  ;;  %6446 = vmatprep.mubr.bf16.mxu0 %v14092_v51 }
 0xc20   :  { %6301 = vmatmul.mubr.bf16.gmra.mrb[4].mxu1 %v6059_v26  ;;  %6447 = vmatmul.mubr.bf16.gmra.mrb[228].mxu0 %v6059_v26 }
 0xc21   :  { %6310 = vmatprep.mubr.bf16.mxu1 %v14092_v51  ;;  %6456 = vmatprep.mubr.bf16.mxu0 %v14092_v51 }
 0xc28   :  { %6311 = vmatmul.mubr.bf16.gmra.mrb[8].mxu1 %v6062_v58  ;;  %6457 = vmatmul.mubr.bf16.gmra.mrb[232].mxu0 %v6062_v58 }
 0xc29   :  { %6320 = vmatprep.mubr.bf16.mxu1 %v14092_v51  ;;  %6466 = vmatprep.mubr.bf16.mxu0 %v14092_v51 }
 0xc30   :  { %6321 = vmatmul.mubr.bf16.gmra.mrb[12].mxu1 %v6065_v19  ;;  %6467 = vmatmul.mubr.bf16.gmra.mrb[236].mxu0 %v6065_v19 }
 0xceb   :  { %v6292_v42 = vpop.f32.mrb[0].mxu1  ;;  %v6438_v29 = vpop.f32.mrb[224].mxu0 }
 0xcec   :  { %v9692_v39 = vadd.f32 %v6292_v42, %v13176_v14  ;;  %v9708_v53 = vadd.f32 %v6438_v29, %v13179_v56  ;;  %v6294_v33 = vpop.f32.mrb[1].mxu1  ;;  %v6440_v54 = vpop.f32.mrb[225].mxu0 }
 0xced   :  { %v9693_v44 = vadd.f32 %v6294_v33, %v13182_v41  ;;  %v9709_v0 = vadd.f32 %v6440_v54, %v13185_v59  ;;  %v6296_v3 = vpop.f32.mrb[2].mxu1  ;;  %v6442_v15 = vpop.f32.mrb[226].mxu0 }
 0xcee   :  { %vm6477_vm14 = vcmp.ge.f32.partialorder %v9692_v39, 0.0  ;;  %v6509_v17 = vmul.f32 0.01, %v9692_v39  ;;  %vm6479_vm15 = vcmp.ge.f32.partialorder %v9708_v53, 0.0  ;;  %v6511_v32 = vmul.f32 0.01, %v9708_v53 }
 0xcef   :  { %vm6478_vm1 = vcmp.ge.f32.partialorder %v9693_v44, 0.0  ;;  %v6510_v24 = vmul.f32 0.01, %v9693_v44  ;;  %vm6480_vm2 = vcmp.ge.f32.partialorder %v9709_v0, 0.0  ;;  %v6512_v49 = vmul.f32 0.01, %v9709_v0 }
 0xcf0   :  { %v13191_v31 = vsel %vm6477_vm14, %v9692_v39, %v6509_v17  ;;  %v13193_v23 = vsel %vm6479_vm15, %v9708_v53, %v6511_v32  ;;  %v9694_v50 = vadd.f32 %v6296_v3, %v13176_v14  ;;  %v9710_v28 = vadd.f32 %v6442_v15, %v13179_v56  ;;  %v6298_v8 = vpop.f32.mrb[3].mxu1  ;;  %v6444_v63 = vpop.f32.mrb[227].mxu0 }
 0xcf1   :  { %v13197_v21 = vsel %vm6478_vm1, %v9693_v44, %v6510_v24  ;;  %v13199_v2 = vsel %vm6480_vm2, %v9709_v0, %v6512_v49  ;;  %v9695_v45 = vadd.f32 %v6298_v8, %v13182_v41  ;;  %v9711_v22 = vadd.f32 %v6444_v63, %v13185_v59 }
 0xcf2   :  { %vm6481_vm3 = vcmp.ge.f32.partialorder %v9694_v50, 0.0  ;;  %v6513_v55 = vmul.f32 0.01, %v9694_v50  ;;  %vm6483_vm4 = vcmp.ge.f32.partialorder %v9710_v28, 0.0  ;;  %v6515_v11 = vmul.f32 0.01, %v9710_v28 }
 0xcf3   :  { %vm6482_vm5 = vcmp.ge.f32.partialorder %v9695_v45, 0.0  ;;  %v6514_v30 = vmul.f32 0.01, %v9695_v45  ;;  %vm6484_vm6 = vcmp.ge.f32.partialorder %v9711_v22, 0.0  ;;  %v6516_v34 = vmul.f32 0.01, %v9711_v22 }
 0xcf4   :  { %v13203_v6 = vsel %vm6481_vm3, %v9694_v50, %v6513_v55  ;;  %v13205_v20 = vsel %vm6483_vm4, %v9710_v28, %v6515_v11  ;;  %v6302_v52 = vpop.f32.mrb[4].mxu1  ;;  %v6448_v25 = vpop.f32.mrb[228].mxu0 }
 0xcf5   :  { %v13207_v16 = vsel %vm6482_vm5, %v9695_v45, %v6514_v30  ;;  %v13209_v60 = vsel %vm6484_vm6, %v9711_v22, %v6516_v34  ;;  %v9696_v12 = vadd.f32 %v6302_v52, %v13176_v14  ;;  %v9712_v26 = vadd.f32 %v6448_v25, %v13179_v56  ;;  %v6304_v47 = vpop.f32.mrb[5].mxu1  ;;  %v6450_v35 = vpop.f32.mrb[229].mxu0 }
 0xcf6   :  { %v9697_v58 = vadd.f32 %v6304_v47, %v13182_v41  ;;  %v9713_v13 = vadd.f32 %v6450_v35, %v13185_v59  ;;  %v6306_v7 = vpop.f32.mrb[6].mxu1  ;;  %v6452_v19 = vpop.f32.mrb[230].mxu0 }
 0xcf7   :  { %vm6485_vm7 = vcmp.ge.f32.partialorder %v9696_v12, 0.0  ;;  %v6517_v46 = vmul.f32 0.01, %v9696_v12  ;;  %vm6487_vm8 = vcmp.ge.f32.partialorder %v9712_v26, 0.0  ;;  %v6519_v42 = vmul.f32 0.01, %v9712_v26 }
 0xcf8   :  { %vm6486_vm10 = vcmp.ge.f32.partialorder %v9697_v58, 0.0  ;;  %v6518_v29 = vmul.f32 0.01, %v9697_v58  ;;  %vm6488_vm11 = vcmp.ge.f32.partialorder %v9713_v13, 0.0  ;;  %v6520_v39 = vmul.f32 0.01, %v9713_v13 }
 0xcf9   :  { %v13215_v53 = vsel %vm6485_vm7, %v9696_v12, %v6517_v46  ;;  %v13217_v33 = vsel %vm6487_vm8, %v9712_v26, %v6519_v42  ;;  %v9698_v54 = vadd.f32 %v6306_v7, %v13176_v14  ;;  %v9714_v44 = vadd.f32 %v6452_v19, %v13179_v56  ;;  %v6308_v0 = vpop.f32.mrb[7].mxu1  ;;  %v6454_v3 = vpop.f32.mrb[231].mxu0 }
 0xcfa   :  { %v13221_v15 = vsel %vm6486_vm10, %v9697_v58, %v6518_v29  ;;  %v13223_v17 = vsel %vm6488_vm11, %v9713_v13, %v6520_v39  ;;  %v9699_v32 = vadd.f32 %v6308_v0, %v13182_v41  ;;  %v9715_v24 = vadd.f32 %v6454_v3, %v13185_v59 }
 0xcfb   :  { %vm6489_vm0 = vcmp.ge.f32.partialorder %v9698_v54, 0.0  ;;  %v6521_v49 = vmul.f32 0.01, %v9698_v54  ;;  %vm6491_vm12 = vcmp.ge.f32.partialorder %v9714_v44, 0.0  ;;  %v6523_v50 = vmul.f32 0.01, %v9714_v44 }
 0xcfc   :  { %vm6490_vm13 = vcmp.ge.f32.partialorder %v9699_v32, 0.0  ;;  %v6522_v28 = vmul.f32 0.01, %v9699_v32  ;;  %vm6492_vm14 = vcmp.ge.f32.partialorder %v9715_v24, 0.0  ;;  %v6524_v8 = vmul.f32 0.01, %v9715_v24 }
 0xcfd   :  { %v13227_v63 = vsel %vm6489_vm0, %v9698_v54, %v6521_v49  ;;  %v13229_v45 = vsel %vm6491_vm12, %v9714_v44, %v6523_v50  ;;  %v6312_v22 = vpop.f32.mrb[8].mxu1  ;;  %v6458_v55 = vpop.f32.mrb[232].mxu0 }
 0xcfe   :  { %v13231_v11 = vsel %vm6490_vm13, %v9699_v32, %v6522_v28  ;;  %v13233_v30 = vsel %vm6492_vm14, %v9715_v24, %v6524_v8  ;;  %v9700_v34 = vadd.f32 %v6312_v22, %v13176_v14  ;;  %v9716_v52 = vadd.f32 %v6458_v55, %v13179_v56  ;;  %v6314_v25 = vpop.f32.mrb[9].mxu1  ;;  %v6460_v12 = vpop.f32.mrb[233].mxu0 }
 0xcff   :  { %v9701_v26 = vadd.f32 %v6314_v25, %v13182_v41  ;;  %v9717_v47 = vadd.f32 %v6460_v12, %v13185_v59  ;;  %v6316_v35 = vpop.f32.mrb[10].mxu1  ;;  %v6462_v58 = vpop.f32.mrb[234].mxu0 }
 0xd00   :  { %vm6493_vm15 = vcmp.ge.f32.partialorder %v9700_v34, 0.0  ;;  %v6525_v13 = vmul.f32 0.01, %v9700_v34  ;;  %vm6495_vm1 = vcmp.ge.f32.partialorder %v9716_v52, 0.0  ;;  %v6527_v7 = vmul.f32 0.01, %v9716_v52 }
 0xd01   :  { %vm6494_vm2 = vcmp.ge.f32.partialorder %v9701_v26, 0.0  ;;  %v6526_v19 = vmul.f32 0.01, %v9701_v26  ;;  %vm6496_vm3 = vcmp.ge.f32.partialorder %v9717_v47, 0.0  ;;  %v6528_v46 = vmul.f32 0.01, %v9717_v47 }
 0xd02   :  { %v13239_v42 = vsel %vm6493_vm15, %v9700_v34, %v6525_v13  ;;  %v13241_v29 = vsel %vm6495_vm1, %v9716_v52, %v6527_v7  ;;  %v9702_v39 = vadd.f32 %v6316_v35, %v13176_v14  ;;  %v9718_v54 = vadd.f32 %v6462_v58, %v13179_v56  ;;  %v6318_v44 = vpop.f32.mrb[11].mxu1  ;;  %v6464_v0 = vpop.f32.mrb[235].mxu0 }
 0xd03   :  { %v13245_v3 = vsel %vm6494_vm2, %v9701_v26, %v6526_v19  ;;  %v13247_v32 = vsel %vm6496_vm3, %v9717_v47, %v6528_v46  ;;  %v9703_v24 = vadd.f32 %v6318_v44, %v13182_v41  ;;  %v9719_v49 = vadd.f32 %v6464_v0, %v13185_v59  ;;  %v6322_v50 = vpop.f32.mrb[12].mxu1  ;;  %v6468_v28 = vpop.f32.mrb[236].mxu0 }
 0xd04   :  { %vm6497_vm4 = vcmp.ge.f32.partialorder %v9702_v39, 0.0  ;;  %v6529_v8 = vmul.f32 0.01, %v9702_v39  ;;  %vm6499_vm5 = vcmp.ge.f32.partialorder %v9718_v54, 0.0  ;;  %v6531_v22 = vmul.f32 0.01, %v9718_v54 }
 0xd05   :  { %vm6498_vm6 = vcmp.ge.f32.partialorder %v9703_v24, 0.0  ;;  %v6530_v55 = vmul.f32 0.01, %v9703_v24  ;;  %vm6500_vm7 = vcmp.ge.f32.partialorder %v9719_v49, 0.0  ;;  %v6532_v34 = vmul.f32 0.01, %v9719_v49 }
 0xd06   :  { %v13251_v52 = vsel %vm6497_vm4, %v9702_v39, %v6529_v8  ;;  %v13253_v25 = vsel %vm6499_vm5, %v9718_v54, %v6531_v22  ;;  %v9704_v12 = vadd.f32 %v6322_v50, %v13176_v14  ;;  %v9720_v26 = vadd.f32 %v6468_v28, %v13179_v56  ;;  %v6324_v47 = vpop.f32.mrb[13].mxu1  ;;  %v6470_v35 = vpop.f32.mrb[237].mxu0 }
 0xd07   :  { %v13257_v58 = vsel %vm6498_vm6, %v9703_v24, %v6530_v55  ;;  %v13259_v13 = vsel %vm6500_vm7, %v9719_v49, %v6532_v34  ;;  %v9705_v7 = vadd.f32 %v6324_v47, %v13182_v41  ;;  %v9721_v19 = vadd.f32 %v6470_v35, %v13185_v59  ;;  %v6326_v46 = vpop.f32.mrb[14].mxu1  ;;  %v6472_v44 = vpop.f32.mrb[238].mxu0 }
 0xd08   :  { %vm6501_vm8 = vcmp.ge.f32.partialorder %v9704_v12, 0.0  ;;  %v6533_v39 = vmul.f32 0.01, %v9704_v12  ;;  %vm6503_vm10 = vcmp.ge.f32.partialorder %v9720_v26, 0.0  ;;  %v6535_v54 = vmul.f32 0.01, %v9720_v26 }
 0xd09   :  { %vm6502_vm11 = vcmp.ge.f32.partialorder %v9705_v7, 0.0  ;;  %v6534_v0 = vmul.f32 0.01, %v9705_v7  ;;  %vm6504_vm0 = vcmp.ge.f32.partialorder %v9721_v19, 0.0  ;;  %v6536_v50 = vmul.f32 0.01, %v9721_v19 }
 0xd0a   :  { %v13263_v28 = vsel %vm6501_vm8, %v9704_v12, %v6533_v39  ;;  %v13265_v24 = vsel %vm6503_vm10, %v9720_v26, %v6535_v54  ;;  %v9706_v49 = vadd.f32 %v6326_v46, %v13176_v14  ;;  %v9722_v8 = vadd.f32 %v6472_v44, %v13179_v56  ;;  %v6328_v22 = vpop.f32.mrb[15].mxu1  ;;  %v6474_v55 = vpop.f32.mrb[239].mxu0 }
 0xd0b   :  { %v13269_v34 = vsel %vm6502_vm11, %v9705_v7, %v6534_v0  ;;  %v13271_v47 = vsel %vm6504_vm0, %v9721_v19, %v6536_v50  ;;  %v9707_v35 = vadd.f32 %v6328_v22, %v13182_v41  ;;  %v9723_v1 = vadd.f32 %v6474_v55, %v13185_v59 }
 0xd0c   :  { %vm6505_vm12 = vcmp.ge.f32.partialorder %v9706_v49, 0.0  ;;  %v6537_v10 = vmul.f32 0.01, %v9706_v49  ;;  %vm6507_vm13 = vcmp.ge.f32.partialorder %v9722_v8, 0.0  ;;  %v6539_v12 = vmul.f32 0.01, %v9722_v8 }
 0xd0d   :  { %vm6506_vm14 = vcmp.ge.f32.partialorder %v9707_v35, 0.0  ;;  %v6538_v26 = vmul.f32 0.01, %v9707_v35  ;;  %vm6508_vm15 = vcmp.ge.f32.partialorder %v9723_v1, 0.0  ;;  %v6540_v14 = vmul.f32 0.01, %v9723_v1 }
 0xd0e   :  { %v13275_v46 = vsel %vm6505_vm12, %v9706_v49, %v6537_v10  ;;  %v13277_v56 = vsel %vm6507_vm13, %v9722_v8, %v6539_v12 }
 0xd0f   :  { %v13279_v7 = vsel %vm6506_vm14, %v9707_v35, %v6538_v26  ;;  %v13281_v19 = vsel %vm6508_vm15, %v9723_v1, %v6540_v14 }
 0xd10   :  { %10756 = dma.done.wait [#allocation9 + $0x4], 8192 }
 0xd11   :  { %10757 = vsyncadd [#allocation9 + $0x4], 4294959104  ;;  %v6577_v41 = vpack.c.bf16 %v13207_v16, %v13197_v21  ;;  %v6593_v59 = vld [vmem:[#allocation6 + $0x8] sm:$0xff]  ;;  %v6592_v44 = vld [vmem:[#allocation6] sm:$0xff] }
 0xd12   :  { %v6595_v39 = vld [vmem:[#allocation6 + $0x18] sm:$0xff]  ;;  %6669 = vmatprep.subr.bf16.mxu1 %v6593_v59  ;;  %v6594_v10 = vld [vmem:[#allocation6 + $0x10] sm:$0xff]  ;;  %v6597_v54 = vld [vmem:[#allocation6 + $0x28] sm:$0xff] }
 0xd13   :  { %6701 = vmatprep.mubr.bf16.mxu1 %v6577_v41  ;;  %6670 = vmatpush1.bf16.msra.mxu1 %v6592_v44  ;;  %v6596_v0 = vld [vmem:[#allocation6 + $0x20] sm:$0xff]  ;;  %v6599_v50 = vld [vmem:[#allocation6 + $0x38] sm:$0xff]  ;;  %v6598_v1 = vld [vmem:[#allocation6 + $0x30] sm:$0xff] }
 0xd14   :  { %6671 = vmatprep.subr.bf16.mxu1 %v6595_v39  ;;  %v6601_v49 = vld [vmem:[#allocation6 + $0x48] sm:$0xff]  ;;  %v6600_v21 = vld [vmem:[#allocation6 + $0x40] sm:$0xff]  ;;  %v6603_v16 = vld [vmem:[#allocation6 + $0x58] sm:$0xff] }
 0xd15   :  { %v6602_v8 = vld [vmem:[#allocation6 + $0x50] sm:$0xff]  ;;  %v6605_v22 = vld [vmem:[#allocation6 + $0x68] sm:$0xff]  ;;  %v6604_v55 = vld [vmem:[#allocation6 + $0x60] sm:$0xff] }
 0xd16   :  { %v6607_v35 = vld [vmem:[#allocation6 + $0x78] sm:$0xff]  ;;  %v6606_v12 = vld [vmem:[#allocation6 + $0x70] sm:$0xff]  ;;  %v6609_v26 = vld [vmem:[#allocation6 + $0x88] sm:$0xff] }
 0xd17   :  { %6672 = vmatpush1.bf16.msra.mxu1 %v6594_v10  ;;  %v6608_v14 = vld [vmem:[#allocation6 + $0x80] sm:$0xff]  ;;  %v6611_v41 = vld [vmem:[#allocation6 + $0x98] sm:$0xff]  ;;  %v6610_v59 = vld [vmem:[#allocation6 + $0x90] sm:$0xff] }
 0xd18   :  { %6673 = vmatprep.subr.bf16.mxu1 %v6597_v54  ;;  %v6613_v44 = vld [vmem:[#allocation6 + $0xa8] sm:$0xff]  ;;  %v6612_v39 = vld [vmem:[#allocation6 + $0xa0] sm:$0xff]  ;;  %v6615_v10 = vld [vmem:[#allocation6 + $0xb8] sm:$0xff] }
 0xd19   :  { %v6614_v54 = vld [vmem:[#allocation6 + $0xb0] sm:$0xff] }
 0xd1b   :  { %6674 = vmatpush1.bf16.msra.mxu1 %v6596_v0  ;;  %v6617_v0 = vld [vmem:[#allocation6 + $0xc8] sm:$0xff] }
 0xd1c   :  { %6675 = vmatprep.subr.bf16.mxu1 %v6599_v50  ;;  %v6616_v50 = vld [vmem:[#allocation6 + $0xc0] sm:$0xff] }
 0xd1f   :  { %6676 = vmatpush1.bf16.msra.mxu1 %v6598_v1  ;;  %v6619_v1 = vld [vmem:[#allocation6 + $0xd8] sm:$0xff] }
 0xd20   :  { %6677 = vmatprep.subr.bf16.mxu1 %v6601_v49  ;;  %v6618_v49 = vld [vmem:[#allocation6 + $0xd0] sm:$0xff] }
 0xd23   :  { %6678 = vmatpush1.bf16.msra.mxu1 %v6600_v21  ;;  %v6621_v21 = vld [vmem:[#allocation6 + $0xe8] sm:$0xff] }
 0xd24   :  { %6679 = vmatprep.subr.bf16.mxu1 %v6603_v16  ;;  %v6620_v16 = vld [vmem:[#allocation6 + $0xe0] sm:$0xff] }
 0xd27   :  { %6680 = vmatpush1.bf16.msra.mxu1 %v6602_v8  ;;  %v6623_v8 = vld [vmem:[#allocation6 + $0xf8] sm:$0xff] }
 0xd28   :  { %6681 = vmatprep.subr.bf16.mxu1 %v6605_v22  ;;  %v6622_v22 = vld [vmem:[#allocation6 + $0xf0] sm:$0xff] }
 0xd2b   :  { %6682 = vmatpush1.bf16.msra.mxu1 %v6604_v55  ;;  %v6625_v55 = vld [vmem:[#allocation6 + $0x108] sm:$0xff] }
 0xd2c   :  { %6683 = vmatprep.subr.bf16.mxu1 %v6607_v35  ;;  %v6576_v35 = vpack.c.bf16 %v13203_v6, %v13191_v31  ;;  %v6585_v31 = vpack.c.bf16 %v13257_v58, %v13245_v3  ;;  %v6628_v6 = vld [vmem:[#allocation6 + $0x120] sm:$0xff]  ;;  %v6634_v3 = vld [vmem:[#allocation6 + $0x150] sm:$0xff]  ;;  %v6637_v58 = vld [vmem:[#allocation6 + $0x168] sm:$0xff] }
 0xd2f   :  { %6684 = vmatpush1.bf16.msra.mxu1 %v6606_v12  ;;  %v6581_v12 = vpack.c.bf16 %v13231_v11, %v13221_v15  ;;  %v6630_v15 = vld [vmem:[#allocation6 + $0x130] sm:$0xff]  ;;  %v6633_v11 = vld [vmem:[#allocation6 + $0x148] sm:$0xff] }
 0xd30   :  { %6685 = vmatprep.subr.bf16.mxu1 %v6609_v26  ;;  %v6624_v26 = vld [vmem:[#allocation6 + $0x100] sm:$0xff] }
 0xd33   :  { %6686 = vmatpush1.bf16.msra.mxu1 %v6608_v14  ;;  %v6627_v14 = vld [vmem:[#allocation6 + $0x118] sm:$0xff] }
 0xd34   :  { %6687 = vmatprep.subr.bf16.mxu1 %v6611_v41  ;;  %v6626_v41 = vld [vmem:[#allocation6 + $0x110] sm:$0xff] }
 0xd37   :  { %6688 = vmatpush1.bf16.msra.mxu1 %v6610_v59  ;;  %v6629_v59 = vld [vmem:[#allocation6 + $0x128] sm:$0xff] }
 0xd38   :  { %6689 = vmatprep.subr.bf16.mxu1 %v6613_v44  ;;  %v6580_v44 = vpack.c.bf16 %v13227_v63, %v13215_v53  ;;  %v6589_v53 = vpack.c.bf16 %v13279_v7, %v13269_v34  ;;  %v6632_v63 = vld [vmem:[#allocation6 + $0x140] sm:$0xff]  ;;  %v6638_v34 = vld [vmem:[#allocation6 + $0x170] sm:$0xff]  ;;  %v6641_v7 = vld [vmem:[#allocation6 + $0x188] sm:$0xff] }
 0xd3b   :  { %6690 = vmatpush1.bf16.msra.mxu1 %v6612_v39  ;;  %v6631_v39 = vld [vmem:[#allocation6 + $0x138] sm:$0xff] }
 0xd3c   :  { %6691 = vmatprep.subr.bf16.mxu1 %v6615_v10  ;;  %v6584_v10 = vpack.c.bf16 %v13251_v52, %v13239_v42  ;;  %v6579_v42 = vpack.c.bf16 %v13209_v60, %v13199_v2  ;;  %v6636_v52 = vld [vmem:[#allocation6 + $0x160] sm:$0xff]  ;;  %v6647_v60 = vld [vmem:[#allocation6 + $0x1b8] sm:$0xff] }
 0xd3d   :  { %v6644_v2 = vld [vmem:[#allocation6 + $0x1a0] sm:$0xff] }
 0xd3f   :  { %6692 = vmatpush1.bf16.msra.mxu1 %v6614_v54  ;;  %v6635_v54 = vld [vmem:[#allocation6 + $0x158] sm:$0xff] }
 0xd40   :  { %6693 = vmatprep.subr.bf16.mxu1 %v6617_v0  ;;  %v6588_v0 = vpack.c.bf16 %v13275_v46, %v13263_v28  ;;  %v6642_v28 = vld [vmem:[#allocation6 + $0x190] sm:$0xff]  ;;  %v6645_v46 = vld [vmem:[#allocation6 + $0x1a8] sm:$0xff] }
 0xd43   :  { %6694 = vmatpush1.bf16.msra.mxu1 %v6616_v50  ;;  %v6639_v50 = vld [vmem:[#allocation6 + $0x178] sm:$0xff] }
 0xd44   :  { %6695 = vmatprep.subr.bf16.mxu1 %v6619_v1  ;;  %v6640_v1 = vld [vmem:[#allocation6 + $0x180] sm:$0xff] }
 0xd47   :  { %6696 = vmatpush1.bf16.msra.mxu1 %v6618_v49  ;;  %v6643_v49 = vld [vmem:[#allocation6 + $0x198] sm:$0xff] }
 0xd48   :  { %6697 = vmatprep.subr.bf16.mxu1 %v6621_v21  ;;  %v6646_v21 = vld [vmem:[#allocation6 + $0x1b0] sm:$0xff] }
 0xd4b   :  { %6698 = vmatpush1.bf16.msra.mxu1 %v6620_v16  ;;  %v6649_v16 = vld [vmem:[#allocation6 + $0x1c8] sm:$0xff] }
 0xd4c   :  { %6699 = vmatprep.subr.bf16.mxu1 %v6623_v8  ;;  %v6648_v8 = vld [vmem:[#allocation6 + $0x1c0] sm:$0xff] }
 0xd4f   :  { %6700 = vmatpush1.bf16.msra.mxu1 %v6622_v22  ;;  %v6651_v22 = vld [vmem:[#allocation6 + $0x1d8] sm:$0xff] }
 0xd50   :  { %6742 = vmatprep.subr.bf16.mxu1 %v6625_v55  ;;  %v6650_v55 = vld [vmem:[#allocation6 + $0x1d0] sm:$0xff] }
 0xd52   :  { %6702 = vmatmul.mubr.bf16.vlgmr.msra.gmra.mrb[16].mxu1 %v6576_v35  ;;  %v6653_v35 = vld [vmem:[#allocation6 + $0x1e8] sm:$0xff] }
 0xd53   :  { %6743 = vmatpush1.bf16.msra.mxu1 %v6624_v26  ;;  %6711 = vmatprep.mubr.bf16.mxu1 %v6581_v12  ;;  %v6652_v12 = vld [vmem:[#allocation6 + $0x1e0] sm:$0xff]  ;;  %v6655_v26 = vld [vmem:[#allocation6 + $0x1f8] sm:$0xff] }
 0xd54   :  { %6744 = vmatprep.subr.bf16.mxu1 %v6627_v14  ;;  %v6654_v14 = vld [vmem:[#allocation6 + $0x1f0] sm:$0xff] }
 0xd57   :  { %6745 = vmatpush1.bf16.msra.mxu1 %v6626_v41  ;;  %v6578_v41 = vpack.c.bf16 %v13205_v20, %v13193_v23  ;;  %v6591_v23 = vpack.c.bf16 %v13281_v19, %v13271_v47  ;;  %v6590_v20 = vpack.c.bf16 %v13277_v56, %v13265_v24 }
 0xd58   :  { %6746 = vmatprep.subr.bf16.mxu1 %v6629_v59  ;;  %v6583_v59 = vpack.c.bf16 %v13233_v30, %v13223_v17  ;;  %v6657_v17 = vld [vmem:[#allocation25 + $0x42] ss:$8 sm:$0x3] }
 0xd5a   :  { %6712 = vmatmul.mubr.bf16.gmra.mrb[20].mxu1 %v6580_v44  ;;  %v6582_v44 = vpack.c.bf16 %v13229_v45, %v13217_v33  ;;  %v13316_v33 = vrot.slane %v6657_v17, %v14264_v18  ;;  %v13319_v45 = vrot.slane %v6657_v17, %v14266_v57 }
 0xd5b   :  { %6747 = vmatpush1.bf16.msra.mxu1 %v6628_v6  ;;  %6721 = vmatprep.mubr.bf16.mxu1 %v6585_v31  ;;  %v6587_v31 = vpack.c.bf16 %v13259_v13, %v13247_v32  ;;  %v6586_v6 = vpack.c.bf16 %v13253_v25, %v13241_v29 }
 0xd5c   :  { %6748 = vmatprep.subr.bf16.mxu1 %v6631_v39 }
 0xd5f   :  { %6749 = vmatpush1.bf16.msra.mxu1 %v6630_v15 }
 0xd60   :  { %6750 = vmatprep.subr.bf16.mxu1 %v6633_v11 }
 0xd62   :  { %6722 = vmatmul.mubr.bf16.gmra.mrb[24].mxu1 %v6584_v10 }
 0xd63   :  { %6751 = vmatpush1.bf16.msra.mxu1 %v6632_v63  ;;  %6731 = vmatprep.mubr.bf16.mxu1 %v6589_v53 }
 0xd64   :  { %6752 = vmatprep.subr.bf16.mxu1 %v6635_v54 }
 0xd67   :  { %6753 = vmatpush1.bf16.msra.mxu1 %v6634_v3 }
 0xd68   :  { %6754 = vmatprep.subr.bf16.mxu1 %v6637_v58 }
 0xd6a   :  { %6732 = vmatmul.mubr.bf16.gmra.mrb[28].mxu1 %v6588_v0 }
 0xd6b   :  { %6755 = vmatpush1.bf16.msra.mxu1 %v6636_v52  ;;  %6774 = vmatprep.mubr.bf16.mxu1 %v6579_v42 }
 0xd6c   :  { %6756 = vmatprep.subr.bf16.mxu1 %v6639_v50 }
 0xd6f   :  { %6757 = vmatpush1.bf16.msra.mxu1 %v6638_v34 }
 0xd70   :  { %6758 = vmatprep.subr.bf16.mxu1 %v6641_v7 }
 0xd73   :  { %6759 = vmatpush1.bf16.msra.mxu1 %v6640_v1 }
 0xd74   :  { %6760 = vmatprep.subr.bf16.mxu1 %v6643_v49 }
 0xd77   :  { %6761 = vmatpush1.bf16.msra.mxu1 %v6642_v28 }
 0xd78   :  { %6762 = vmatprep.subr.bf16.mxu1 %v6645_v46 }
 0xd7b   :  { %6763 = vmatpush1.bf16.msra.mxu1 %v6644_v2 }
 0xd7c   :  { %6764 = vmatprep.subr.bf16.mxu1 %v6647_v60 }
 0xd7f   :  { %6765 = vmatpush1.bf16.msra.mxu1 %v6646_v21 }
 0xd80   :  { %6766 = vmatprep.subr.bf16.mxu1 %v6649_v16 }
 0xd83   :  { %6767 = vmatpush1.bf16.msra.mxu1 %v6648_v8 }
 0xd84   :  { %6768 = vmatprep.subr.bf16.mxu1 %v6651_v22 }
 0xd87   :  { %6769 = vmatpush1.bf16.msra.mxu1 %v6650_v55 }
 0xd88   :  { %6770 = vmatprep.subr.bf16.mxu1 %v6653_v35 }
 0xd8b   :  { %6771 = vmatpush1.bf16.msra.mxu1 %v6652_v12 }
 0xd8c   :  { %6772 = vmatprep.subr.bf16.mxu1 %v6655_v26 }
 0xd8f   :  { %6773 = vmatpush1.bf16.msra.mxu1 %v6654_v14 }
 0xd92   :  { %6775 = vmatmul.mubr.bf16.vlgmr.msra.gmra.mrb[16].mxu1 %v6578_v41 }
 0xd93   :  { %6784 = vmatprep.mubr.bf16.mxu1 %v6583_v59 }
 0xd9a   :  { %6785 = vmatmul.mubr.bf16.gmra.mrb[20].mxu1 %v6582_v44 }
 0xd9b   :  { %6794 = vmatprep.mubr.bf16.mxu1 %v6587_v31 }
 0xda2   :  { %6795 = vmatmul.mubr.bf16.gmra.mrb[24].mxu1 %v6586_v6 }
 0xda3   :  { %6804 = vmatprep.mubr.bf16.mxu1 %v6591_v23 }
 0xdaa   :  { %6805 = vmatmul.mubr.bf16.gmra.mrb[28].mxu1 %v6590_v20 }
 0xe65   :  { %v6776_v30 = vpop.f32.mrb[16].mxu1 }
 0xe66   :  { %v9724_v32 = vadd.f32 %v6776_v30, %v13316_v33  ;;  %v6778_v29 = vpop.f32.mrb[17].mxu1 }
 0xe67   :  { %v9725_v25 = vadd.f32 %v6778_v29, %v13319_v45  ;;  %v6780_v13 = vpop.f32.mrb[18].mxu1 }
 0xe68   :  { %vm6815_vm1 = vcmp.ge.f32.partialorder %v9724_v32, 0.0  ;;  %v6831_v47 = vmul.f32 0.01, %v9724_v32  ;;  %v9726_v19 = vadd.f32 %v6780_v13, %v13316_v33  ;;  %v6782_v24 = vpop.f32.mrb[19].mxu1 }
 0xe69   :  { %vm6816_vm2 = vcmp.ge.f32.partialorder %v9725_v25, 0.0  ;;  %v6832_v56 = vmul.f32 0.01, %v9725_v25  ;;  %v9727_v39 = vadd.f32 %v6782_v24, %v13319_v45 }
 0xe6a   :  { %v13325_v15 = vsel %vm6815_vm1, %v9724_v32, %v6831_v47  ;;  %vm6817_vm3 = vcmp.ge.f32.partialorder %v9726_v19, 0.0  ;;  %v6833_v11 = vmul.f32 0.01, %v9726_v19 }
 0xe6b   :  { %v13327_v10 = vsel %vm6816_vm2, %v9725_v25, %v6832_v56  ;;  %vm6818_vm4 = vcmp.ge.f32.partialorder %v9727_v39, 0.0  ;;  %v6834_v53 = vmul.f32 0.01, %v9727_v39 }
 0xe6c   :  { %v13329_v63 = vsel %vm6817_vm3, %v9726_v19, %v6833_v11 }
 0xe6d   :  { %v13331_v54 = vsel %vm6818_vm4, %v9727_v39, %v6834_v53  ;;  %v6786_v3 = vpop.f32.mrb[20].mxu1 }
 0xe6e   :  { %v9728_v58 = vadd.f32 %v6786_v3, %v13316_v33  ;;  %v6788_v0 = vpop.f32.mrb[21].mxu1 }
 0xe6f   :  { %v9729_v42 = vadd.f32 %v6788_v0, %v13319_v45  ;;  %v6790_v52 = vpop.f32.mrb[22].mxu1 }
 0xe70   :  { %vm6819_vm5 = vcmp.ge.f32.partialorder %v9728_v58, 0.0  ;;  %v6835_v50 = vmul.f32 0.01, %v9728_v58  ;;  %v9730_v34 = vadd.f32 %v6790_v52, %v13316_v33  ;;  %v6792_v7 = vpop.f32.mrb[23].mxu1 }
 0xe71   :  { %vm6820_vm6 = vcmp.ge.f32.partialorder %v9729_v42, 0.0  ;;  %v6836_v1 = vmul.f32 0.01, %v9729_v42  ;;  %v9731_v49 = vadd.f32 %v6792_v7, %v13319_v45 }
 0xe72   :  { %v13337_v28 = vsel %vm6819_vm5, %v9728_v58, %v6835_v50  ;;  %vm6821_vm7 = vcmp.ge.f32.partialorder %v9730_v34, 0.0  ;;  %v6837_v46 = vmul.f32 0.01, %v9730_v34 }
 0xe73   :  { %v13339_v2 = vsel %vm6820_vm6, %v9729_v42, %v6836_v1  ;;  %vm6822_vm8 = vcmp.ge.f32.partialorder %v9731_v49, 0.0  ;;  %v6838_v60 = vmul.f32 0.01, %v9731_v49 }
 0xe74   :  { %v13341_v21 = vsel %vm6821_vm7, %v9730_v34, %v6837_v46 }
 0xe75   :  { %v13343_v16 = vsel %vm6822_vm8, %v9731_v49, %v6838_v60  ;;  %v6796_v8 = vpop.f32.mrb[24].mxu1 }
 0xe76   :  { %v9732_v22 = vadd.f32 %v6796_v8, %v13316_v33  ;;  %v6798_v55 = vpop.f32.mrb[25].mxu1 }
 0xe77   :  { %v9733_v35 = vadd.f32 %v6798_v55, %v13319_v45  ;;  %v6800_v12 = vpop.f32.mrb[26].mxu1 }
 0xe78   :  { %vm6823_vm10 = vcmp.ge.f32.partialorder %v9732_v22, 0.0  ;;  %v6839_v26 = vmul.f32 0.01, %v9732_v22  ;;  %v9734_v14 = vadd.f32 %v6800_v12, %v13316_v33  ;;  %v6802_v41 = vpop.f32.mrb[27].mxu1 }
 0xe79   :  { %vm6824_vm11 = vcmp.ge.f32.partialorder %v9733_v35, 0.0  ;;  %v6840_v59 = vmul.f32 0.01, %v9733_v35  ;;  %v9735_v44 = vadd.f32 %v6802_v41, %v13319_v45 }
 0xe7a   :  { %v13349_v31 = vsel %vm6823_vm10, %v9732_v22, %v6839_v26  ;;  %vm6825_vm0 = vcmp.ge.f32.partialorder %v9734_v14, 0.0  ;;  %v6841_v6 = vmul.f32 0.01, %v9734_v14 }
 0xe7b   :  { %v13351_v23 = vsel %vm6824_vm11, %v9733_v35, %v6840_v59  ;;  %vm6826_vm12 = vcmp.ge.f32.partialorder %v9735_v44, 0.0  ;;  %v6842_v20 = vmul.f32 0.01, %v9735_v44 }
 0xe7c   :  { %v13353_v17 = vsel %vm6825_vm0, %v9734_v14, %v6841_v6 }
 0xe7d   :  { %v13355_v30 = vsel %vm6826_vm12, %v9735_v44, %v6842_v20  ;;  %v6806_v32 = vpop.f32.mrb[28].mxu1 }
 0xe7e   :  { %v9736_v29 = vadd.f32 %v6806_v32, %v13316_v33  ;;  %v6808_v25 = vpop.f32.mrb[29].mxu1 }
 0xe7f   :  { %v9737_v13 = vadd.f32 %v6808_v25, %v13319_v45  ;;  %v6810_v47 = vpop.f32.mrb[30].mxu1 }
 0xe80   :  { %vm6827_vm13 = vcmp.ge.f32.partialorder %v9736_v29, 0.0  ;;  %v6843_v19 = vmul.f32 0.01, %v9736_v29  ;;  %v9738_v24 = vadd.f32 %v6810_v47, %v13316_v33  ;;  %v6812_v56 = vpop.f32.mrb[31].mxu1 }
 0xe81   :  { %vm6828_vm14 = vcmp.ge.f32.partialorder %v9737_v13, 0.0  ;;  %v6844_v39 = vmul.f32 0.01, %v9737_v13  ;;  %v9739_v11 = vadd.f32 %v6812_v56, %v13319_v45 }
 0xe82   :  { %v13361_v53 = vsel %vm6827_vm13, %v9736_v29, %v6843_v19  ;;  %vm6829_vm15 = vcmp.ge.f32.partialorder %v9738_v24, 0.0  ;;  %v6845_v3 = vmul.f32 0.01, %v9738_v24 }
 0xe83   :  { %v13363_v58 = vsel %vm6828_vm14, %v9737_v13, %v6844_v39  ;;  %vm6830_vm1 = vcmp.ge.f32.partialorder %v9739_v11, 0.0  ;;  %v6846_v0 = vmul.f32 0.01, %v9739_v11 }
 0xe84   :  { %v13365_v42 = vsel %vm6829_vm15, %v9738_v24, %v6845_v3 }
 0xe85   :  { %v13367_v52 = vsel %vm6830_vm1, %v9739_v11, %v6846_v0 }
 0xe86   :  { %10758 = dma.done.wait [#allocation9 + $0x5], 8192 }
 0xe87   :  { %10759 = vsyncadd [#allocation9 + $0x5], 4294959104  ;;  %v13371_v33 = vpack.c.bf16 %v13331_v54, %v13327_v10  ;;  %v6876_v45 = vld [vmem:[#allocation7 + $0x8] sm:$0xff]  ;;  %v6875_v50 = vld [vmem:[#allocation7] sm:$0xff]  ;;  %v13376_v0 = vpack.c.bf16 %v13329_v63, %v13325_v15  ;;  %v13386_v15 = vpack.c.bf16 %v13341_v21, %v13337_v28  ;;  %v13390_v63 = vpack.c.bf16 %v13355_v30, %v13351_v23 }
 0xe88   :  { %v6880_v34 = vld [vmem:[#allocation7 + $0x28] sm:$0xff]  ;;  %6962 = vmatprep.subr.bf16.mxu0 %v6876_v45  ;;  %v6879_v7 = vld [vmem:[#allocation7 + $0x20] sm:$0xff]  ;;  %v6878_v3 = vld [vmem:[#allocation7 + $0x18] sm:$0xff]  ;;  %v13380_v45 = vpack.c.bf16 %v13343_v16, %v13339_v2  ;;  %v6871_v28 = vpack.c.bf16 %v13353_v17, %v13349_v31  ;;  %v6874_v21 = vpack.c.bf16 %v13367_v52, %v13363_v58 }
 0xe89   :  { %6994 = vmatprep.mubr.bf16.mxu0 %v13371_v33  ;;  %6963 = vmatpush1.bf16.msra.mxu0 %v6875_v50  ;;  %v6884_v1 = vld [vmem:[#allocation7 + $0x48] sm:$0xff]  ;;  %v6883_v49 = vld [vmem:[#allocation7 + $0x40] sm:$0xff]  ;;  %v6877_v50 = vld [vmem:[#allocation7 + $0x10] sm:$0xff] }
 0xe8a   :  { %6964 = vmatprep.subr.bf16.mxu0 %v6880_v34  ;;  %v6888_v46 = vld [vmem:[#allocation7 + $0x68] sm:$0xff]  ;;  %v6887_v60 = vld [vmem:[#allocation7 + $0x60] sm:$0xff]  ;;  %v6882_v34 = vld [vmem:[#allocation7 + $0x38] sm:$0xff] }
 0xe8b   :  { %v6892_v8 = vld [vmem:[#allocation7 + $0x88] sm:$0xff]  ;;  %v6891_v10 = vld [vmem:[#allocation7 + $0x80] sm:$0xff]  ;;  %v6885_v2 = vld [vmem:[#allocation7 + $0x50] sm:$0xff] }
 0xe8c   :  { %v6896_v54 = vld [vmem:[#allocation7 + $0xa8] sm:$0xff]  ;;  %v6895_v22 = vld [vmem:[#allocation7 + $0xa0] sm:$0xff]  ;;  %v6890_v16 = vld [vmem:[#allocation7 + $0x78] sm:$0xff] }
 0xe8d   :  { %6965 = vmatpush1.bf16.msra.mxu0 %v6879_v7  ;;  %v6900_v55 = vld [vmem:[#allocation7 + $0xc8] sm:$0xff]  ;;  %v6899_v35 = vld [vmem:[#allocation7 + $0xc0] sm:$0xff]  ;;  %v6881_v7 = vld [vmem:[#allocation7 + $0x30] sm:$0xff] }
 0xe8e   :  { %6966 = vmatprep.subr.bf16.mxu0 %v6884_v1  ;;  %v6904_v12 = vld [vmem:[#allocation7 + $0xe8] sm:$0xff]  ;;  %v6903_v26 = vld [vmem:[#allocation7 + $0xe0] sm:$0xff]  ;;  %v6886_v1 = vld [vmem:[#allocation7 + $0x58] sm:$0xff] }
 0xe8f   :  { %v6908_v14 = vld [vmem:[#allocation7 + $0x108] sm:$0xff]  ;;  %v6907_v41 = vld [vmem:[#allocation7 + $0x100] sm:$0xff]  ;;  %v6893_v23 = vld [vmem:[#allocation7 + $0x90] sm:$0xff] }
 0xe90   :  { %v6912_v59 = vld [vmem:[#allocation7 + $0x128] sm:$0xff]  ;;  %v6911_v44 = vld [vmem:[#allocation7 + $0x120] sm:$0xff]  ;;  %v6898_v30 = vld [vmem:[#allocation7 + $0xb8] sm:$0xff] }
 0xe91   :  { %6967 = vmatpush1.bf16.msra.mxu0 %v6883_v49  ;;  %v6916_v6 = vld [vmem:[#allocation7 + $0x148] sm:$0xff]  ;;  %v6915_v20 = vld [vmem:[#allocation7 + $0x140] sm:$0xff]  ;;  %v6889_v49 = vld [vmem:[#allocation7 + $0x70] sm:$0xff] }
 0xe92   :  { %6968 = vmatprep.subr.bf16.mxu0 %v6888_v46  ;;  %v6920_v32 = vld [vmem:[#allocation7 + $0x168] sm:$0xff]  ;;  %v6919_v29 = vld [vmem:[#allocation7 + $0x160] sm:$0xff]  ;;  %v6894_v46 = vld [vmem:[#allocation7 + $0x98] sm:$0xff] }
 0xe93   :  { %v6924_v25 = vld [vmem:[#allocation7 + $0x188] sm:$0xff]  ;;  %v6923_v13 = vld [vmem:[#allocation7 + $0x180] sm:$0xff]  ;;  %v6906_v31 = vld [vmem:[#allocation7 + $0xf8] sm:$0xff] }
 0xe94   :  { %v6928_v47 = vld [vmem:[#allocation7 + $0x1a8] sm:$0xff]  ;;  %v6927_v19 = vld [vmem:[#allocation7 + $0x1a0] sm:$0xff]  ;;  %v6905_v17 = vld [vmem:[#allocation7 + $0xf0] sm:$0xff] }
 0xe95   :  { %6969 = vmatpush1.bf16.msra.mxu0 %v6887_v60  ;;  %v6932_v24 = vld [vmem:[#allocation7 + $0x1c8] sm:$0xff]  ;;  %v6931_v56 = vld [vmem:[#allocation7 + $0x1c0] sm:$0xff]  ;;  %v6897_v60 = vld [vmem:[#allocation7 + $0xb0] sm:$0xff] }
 0xe96   :  { %6970 = vmatprep.subr.bf16.mxu0 %v6892_v8  ;;  %v6936_v39 = vld [vmem:[#allocation7 + $0x1e8] sm:$0xff]  ;;  %v6935_v11 = vld [vmem:[#allocation7 + $0x1e0] sm:$0xff]  ;;  %v6902_v8 = vld [vmem:[#allocation7 + $0xd8] sm:$0xff] }
 0xe97   :  { %v6910_v58 = vld [vmem:[#allocation7 + $0x118] sm:$0xff]  ;;  %v6909_v52 = vld [vmem:[#allocation7 + $0x110] sm:$0xff] }
 0xe99   :  { %6971 = vmatpush1.bf16.msra.mxu0 %v6891_v10  ;;  %v6873_v10 = vpack.c.bf16 %v13365_v42, %v13361_v53  ;;  %v6917_v53 = vld [vmem:[#allocation7 + $0x150] sm:$0xff]  ;;  %v6922_v42 = vld [vmem:[#allocation7 + $0x178] sm:$0xff] }
 0xe9a   :  { %6972 = vmatprep.subr.bf16.mxu0 %v6896_v54  ;;  %v6901_v54 = vld [vmem:[#allocation7 + $0xd0] sm:$0xff] }
 0xe9d   :  { %6973 = vmatpush1.bf16.msra.mxu0 %v6895_v22  ;;  %v6914_v22 = vld [vmem:[#allocation7 + $0x138] sm:$0xff] }
 0xe9e   :  { %6974 = vmatprep.subr.bf16.mxu0 %v6900_v55  ;;  %v6913_v55 = vld [vmem:[#allocation7 + $0x130] sm:$0xff] }
 0xea1   :  { %6975 = vmatpush1.bf16.msra.mxu0 %v6899_v35  ;;  %v6918_v35 = vld [vmem:[#allocation7 + $0x158] sm:$0xff] }
 0xea2   :  { %6976 = vmatprep.subr.bf16.mxu0 %v6904_v12  ;;  %v6921_v12 = vld [vmem:[#allocation7 + $0x170] sm:$0xff] }
 0xea5   :  { %6977 = vmatpush1.bf16.msra.mxu0 %v6903_v26  ;;  %v6926_v26 = vld [vmem:[#allocation7 + $0x198] sm:$0xff] }
 0xea6   :  { %6978 = vmatprep.subr.bf16.mxu0 %v6908_v14  ;;  %v6930_v14 = vld [vmem:[#allocation7 + $0x1b8] sm:$0xff] }
 0xea9   :  { %6979 = vmatpush1.bf16.msra.mxu0 %v6907_v41  ;;  %v6929_v41 = vld [vmem:[#allocation7 + $0x1b0] sm:$0xff] }
 0xeaa   :  { %6980 = vmatprep.subr.bf16.mxu0 %v6912_v59  ;;  %v6934_v59 = vld [vmem:[#allocation7 + $0x1d8] sm:$0xff] }
 0xead   :  { %6981 = vmatpush1.bf16.msra.mxu0 %v6911_v44  ;;  %v6933_v44 = vld [vmem:[#allocation7 + $0x1d0] sm:$0xff] }
 0xeae   :  { %6982 = vmatprep.subr.bf16.mxu0 %v6916_v6  ;;  %v6938_v6 = vld [vmem:[#allocation7 + $0x1f8] sm:$0xff] }
 0xeb1   :  { %6983 = vmatpush1.bf16.msra.mxu0 %v6915_v20  ;;  %v6937_v20 = vld [vmem:[#allocation7 + $0x1f0] sm:$0xff] }
 0xeb2   :  { %6984 = vmatprep.subr.bf16.mxu0 %v6920_v32  ;;  %v13405_v32 = vld [vmem:[#allocation25 + $0x43] ss:$8 sm:$0xf] }
 0xeb5   :  { %6985 = vmatpush1.bf16.msra.mxu0 %v6919_v29  ;;  %v13409_v29 = vrot.slane %v13405_v32, %v14264_v18 }
 0xeb6   :  { %6986 = vmatprep.subr.bf16.mxu0 %v6924_v25  ;;  %v13413_v25 = vrot.slane %v13405_v32, %v14266_v57 }
 0xeb9   :  { %6987 = vmatpush1.bf16.msra.mxu0 %v6923_v13 }
 0xeba   :  { %6988 = vmatprep.subr.bf16.mxu0 %v6928_v47 }
 0xebd   :  { %6989 = vmatpush1.bf16.msra.mxu0 %v6927_v19 }
 0xebe   :  { %6990 = vmatprep.subr.bf16.mxu0 %v6932_v24 }
 0xec1   :  { %6991 = vmatpush1.bf16.msra.mxu0 %v6931_v56 }
 0xec2   :  { %6992 = vmatprep.subr.bf16.mxu0 %v6936_v39 }
 0xec5   :  { %6993 = vmatpush1.bf16.msra.mxu0 %v6935_v11 }
 0xec6   :  { %7035 = vmatprep.subr.bf16.mxu0 %v6878_v3 }
 0xec8   :  { %6995 = vmatmul.mubr.bf16.vlgmr.msra.gmra.mrb[240].mxu0 %v13376_v0 }
 0xec9   :  { %7036 = vmatpush1.bf16.msra.mxu0 %v6877_v50  ;;  %7004 = vmatprep.mubr.bf16.mxu0 %v13380_v45 }
 0xeca   :  { %7037 = vmatprep.subr.bf16.mxu0 %v6882_v34 }
 0xecd   :  { %7038 = vmatpush1.bf16.msra.mxu0 %v6881_v7 }
 0xece   :  { %7039 = vmatprep.subr.bf16.mxu0 %v6886_v1 }
 0xed0   :  { %7005 = vmatmul.mubr.bf16.gmra.mrb[244].mxu0 %v13386_v15 }
 0xed1   :  { %7040 = vmatpush1.bf16.msra.mxu0 %v6885_v2  ;;  %7014 = vmatprep.mubr.bf16.mxu0 %v13390_v63 }
 0xed2   :  { %7041 = vmatprep.subr.bf16.mxu0 %v6890_v16 }
 0xed5   :  { %7042 = vmatpush1.bf16.msra.mxu0 %v6889_v49 }
 0xed6   :  { %7043 = vmatprep.subr.bf16.mxu0 %v6894_v46 }
 0xed8   :  { %7015 = vmatmul.mubr.bf16.gmra.mrb[248].mxu0 %v6871_v28 }
 0xed9   :  { %7044 = vmatpush1.bf16.msra.mxu0 %v6893_v23  ;;  %7024 = vmatprep.mubr.bf16.mxu0 %v6874_v21 }
 0xeda   :  { %7045 = vmatprep.subr.bf16.mxu0 %v6898_v30 }
 0xedd   :  { %7046 = vmatpush1.bf16.msra.mxu0 %v6897_v60 }
 0xede   :  { %7047 = vmatprep.subr.bf16.mxu0 %v6902_v8 }
 0xee0   :  { %7025 = vmatmul.mubr.bf16.gmra.mrb[252].mxu0 %v6873_v10 }
 0xee1   :  { %7048 = vmatpush1.bf16.msra.mxu0 %v6901_v54  ;;  %7067 = vmatprep.mubr.bf16.mxu0 %v13371_v33  ;;  %v6925_v33 = vld [vmem:[#allocation7 + $0x190] sm:$0xff] }
 0xee2   :  { %7049 = vmatprep.subr.bf16.mxu0 %v6906_v31 }
 0xee5   :  { %7050 = vmatpush1.bf16.msra.mxu0 %v6905_v17 }
 0xee6   :  { %7051 = vmatprep.subr.bf16.mxu0 %v6910_v58 }
 0xee9   :  { %7052 = vmatpush1.bf16.msra.mxu0 %v6909_v52 }
 0xeea   :  { %7053 = vmatprep.subr.bf16.mxu0 %v6914_v22 }
 0xeed   :  { %7054 = vmatpush1.bf16.msra.mxu0 %v6913_v55 }
 0xeee   :  { %7055 = vmatprep.subr.bf16.mxu0 %v6918_v35 }
 0xef1   :  { %7056 = vmatpush1.bf16.msra.mxu0 %v6917_v53 }
 0xef2   :  { %7057 = vmatprep.subr.bf16.mxu0 %v6922_v42 }
 0xef5   :  { %7058 = vmatpush1.bf16.msra.mxu0 %v6921_v12 }
 0xef6   :  { %7059 = vmatprep.subr.bf16.mxu0 %v6926_v26 }
 0xef9   :  { %7060 = vmatpush1.bf16.msra.mxu0 %v6925_v33 }
 0xefa   :  { %7061 = vmatprep.subr.bf16.mxu0 %v6930_v14 }
 0xefd   :  { %7062 = vmatpush1.bf16.msra.mxu0 %v6929_v41 }
 0xefe   :  { %7063 = vmatprep.subr.bf16.mxu0 %v6934_v59 }
 0xf01   :  { %7064 = vmatpush1.bf16.msra.mxu0 %v6933_v44 }
 0xf02   :  { %7065 = vmatprep.subr.bf16.mxu0 %v6938_v6 }
 0xf05   :  { %7066 = vmatpush1.bf16.msra.mxu0 %v6937_v20 }
 0xf08   :  { %7068 = vmatmul.mubr.bf16.vlgmr.msra.gmra.mrb[0].mxu0 %v13376_v0 }
 0xf09   :  { %7077 = vmatprep.mubr.bf16.mxu0 %v13380_v45 }
 0xf10   :  { %7078 = vmatmul.mubr.bf16.gmra.mrb[4].mxu0 %v13386_v15 }
 0xf11   :  { %7087 = vmatprep.mubr.bf16.mxu0 %v13390_v63 }
 0xf18   :  { %7088 = vmatmul.mubr.bf16.gmra.mrb[8].mxu0 %v6871_v28 }
 0xf19   :  { %7097 = vmatprep.mubr.bf16.mxu0 %v6874_v21 }
 0xf20   :  { %7098 = vmatmul.mubr.bf16.gmra.mrb[12].mxu0 %v6873_v10 }
 0xf9b   :  { %v6996_v13 = vpop.f32.mrb[240].mxu0 }
 0xf9c   :  { %v6997_v47 = vadd.f32 %v6996_v13, %v13409_v29  ;;  %v6998_v19 = vpop.f32.mrb[241].mxu0 }
 0xf9d   :  { %v6999_v24 = vadd.f32 %v6998_v19, %v13413_v25  ;;  %v7000_v56 = vpop.f32.mrb[242].mxu0 }
 0xf9e   :  { %vm7108_vm2 = vcmp.ge.f32.partialorder %v6997_v47, 0.0  ;;  %v7140_v39 = vmul.f32 0.01, %v6997_v47  ;;  %v7001_v11 = vadd.f32 %v7000_v56, %v13409_v29  ;;  %v7002_v3 = vpop.f32.mrb[243].mxu0 }
 0xf9f   :  { %vm7109_vm3 = vcmp.ge.f32.partialorder %v6999_v24, 0.0  ;;  %v7141_v0 = vmul.f32 0.01, %v6999_v24  ;;  %v7003_v45 = vadd.f32 %v7002_v3, %v13413_v25 }
 0xfa0   :  { %v13419_v50 = vsel %vm7108_vm2, %v6997_v47, %v7140_v39  ;;  %vm7112_vm4 = vcmp.ge.f32.partialorder %v7001_v11, 0.0  ;;  %v7144_v34 = vmul.f32 0.01, %v7001_v11 }
 0xfa1   :  { %v13421_v7 = vsel %vm7109_vm3, %v6999_v24, %v7141_v0  ;;  %vm7113_vm5 = vcmp.ge.f32.partialorder %v7003_v45, 0.0  ;;  %v7145_v1 = vmul.f32 0.01, %v7003_v45 }
 0xfa2   :  { %v13423_v15 = vsel %vm7112_vm4, %v7001_v11, %v7144_v34 }
 0xfa3   :  { %v13425_v63 = vsel %vm7113_vm5, %v7003_v45, %v7145_v1  ;;  %v7006_v2 = vpop.f32.mrb[244].mxu0 }
 0xfa4   :  { %v7007_v16 = vadd.f32 %v7006_v2, %v13409_v29  ;;  %v7008_v49 = vpop.f32.mrb[245].mxu0 }
 0xfa5   :  { %v7009_v46 = vadd.f32 %v7008_v49, %v13413_v25  ;;  %v7010_v28 = vpop.f32.mrb[246].mxu0 }
 0xfa6   :  { %vm7116_vm6 = vcmp.ge.f32.partialorder %v7007_v16, 0.0  ;;  %v7148_v21 = vmul.f32 0.01, %v7007_v16  ;;  %v7011_v23 = vadd.f32 %v7010_v28, %v13409_v29  ;;  %v7012_v30 = vpop.f32.mrb[247].mxu0 }
 0xfa7   :  { %vm7117_vm7 = vcmp.ge.f32.partialorder %v7009_v46, 0.0  ;;  %v7149_v60 = vmul.f32 0.01, %v7009_v46  ;;  %v7013_v8 = vadd.f32 %v7012_v30, %v13413_v25 }
 0xfa8   :  { %v13431_v10 = vsel %vm7116_vm6, %v7007_v16, %v7148_v21  ;;  %vm7120_vm8 = vcmp.ge.f32.partialorder %v7011_v23, 0.0  ;;  %v7152_v54 = vmul.f32 0.01, %v7011_v23 }
 0xfa9   :  { %v13433_v31 = vsel %vm7117_vm7, %v7009_v46, %v7149_v60  ;;  %vm7121_vm10 = vcmp.ge.f32.partialorder %v7013_v8, 0.0  ;;  %v7153_v17 = vmul.f32 0.01, %v7013_v8 }
 0xfaa   :  { %v13435_v58 = vsel %vm7120_vm8, %v7011_v23, %v7152_v54  ;;  %v13469_v23 = vrot.slane %v13405_v32, %v14267_v37 }
 0xfab   :  { %v13437_v52 = vsel %vm7121_vm10, %v7013_v8, %v7153_v17  ;;  %v7016_v22 = vpop.f32.mrb[248].mxu0 }
 0xfac   :  { %v7017_v55 = vadd.f32 %v7016_v22, %v13409_v29  ;;  %v7018_v35 = vpop.f32.mrb[249].mxu0 }
 0xfad   :  { %v7019_v53 = vadd.f32 %v7018_v35, %v13413_v25  ;;  %v7020_v42 = vpop.f32.mrb[250].mxu0 }
 0xfae   :  { %vm7124_vm11 = vcmp.ge.f32.partialorder %v7017_v55, 0.0  ;;  %v7156_v12 = vmul.f32 0.01, %v7017_v55  ;;  %v7021_v26 = vadd.f32 %v7020_v42, %v13409_v29  ;;  %v7022_v33 = vpop.f32.mrb[251].mxu0 }
 0xfaf   :  { %vm7125_vm0 = vcmp.ge.f32.partialorder %v7019_v53, 0.0  ;;  %v7157_v14 = vmul.f32 0.01, %v7019_v53  ;;  %v7023_v41 = vadd.f32 %v7022_v33, %v13413_v25 }
 0xfb0   :  { %v13443_v59 = vsel %vm7124_vm11, %v7017_v55, %v7156_v12  ;;  %vm7128_vm12 = vcmp.ge.f32.partialorder %v7021_v26, 0.0  ;;  %v7160_v44 = vmul.f32 0.01, %v7021_v26 }
 0xfb1   :  { %v13445_v6 = vsel %vm7125_vm0, %v7019_v53, %v7157_v14  ;;  %vm7129_vm13 = vcmp.ge.f32.partialorder %v7023_v41, 0.0  ;;  %v7161_v20 = vmul.f32 0.01, %v7023_v41 }
 0xfb2   :  { %v13447_v13 = vsel %vm7128_vm12, %v7021_v26, %v7160_v44 }
 0xfb3   :  { %v13449_v47 = vsel %vm7129_vm13, %v7023_v41, %v7161_v20  ;;  %v7026_v19 = vpop.f32.mrb[252].mxu0 }
 0xfb4   :  { %v7027_v24 = vadd.f32 %v7026_v19, %v13409_v29  ;;  %v7028_v56 = vpop.f32.mrb[253].mxu0 }
 0xfb5   :  { %v7029_v39 = vadd.f32 %v7028_v56, %v13413_v25  ;;  %v7030_v11 = vpop.f32.mrb[254].mxu0 }
 0xfb6   :  { %vm7132_vm14 = vcmp.ge.f32.partialorder %v7027_v24, 0.0  ;;  %v7164_v3 = vmul.f32 0.01, %v7027_v24  ;;  %v7031_v0 = vadd.f32 %v7030_v11, %v13409_v29  ;;  %v7032_v45 = vpop.f32.mrb[255].mxu0  ;;  %v13465_v29 = vrot.slane %v13405_v32, %v14265_v9 }
 0xfb7   :  { %vm7133_vm15 = vcmp.ge.f32.partialorder %v7029_v39, 0.0  ;;  %v7165_v34 = vmul.f32 0.01, %v7029_v39  ;;  %v7033_v1 = vadd.f32 %v7032_v45, %v13413_v25 }
 0xfb8   :  { %v13455_v2 = vsel %vm7132_vm14, %v7027_v24, %v7164_v3  ;;  %vm7136_vm1 = vcmp.ge.f32.partialorder %v7031_v0, 0.0  ;;  %v7168_v16 = vmul.f32 0.01, %v7031_v0 }
 0xfb9   :  { %v13457_v49 = vsel %vm7133_vm15, %v7029_v39, %v7165_v34  ;;  %vm7137_vm2 = vcmp.ge.f32.partialorder %v7033_v1, 0.0  ;;  %v7169_v46 = vmul.f32 0.01, %v7033_v1 }
 0xfba   :  { %v13459_v28 = vsel %vm7136_vm1, %v7031_v0, %v7168_v16 }
 0xfbb   :  { %v13461_v21 = vsel %vm7137_vm2, %v7033_v1, %v7169_v46 }
 0xfdb   :  { %v7069_v25 = vpop.f32.mrb[0].mxu0 }
 0xfdc   :  { %v7070_v30 = vadd.f32 %v7069_v25, %v13465_v29  ;;  %v7071_v60 = vpop.f32.mrb[1].mxu0 }
 0xfdd   :  { %v7072_v8 = vadd.f32 %v7071_v60, %v13469_v23  ;;  %v7073_v54 = vpop.f32.mrb[2].mxu0 }
 0xfde   :  { %vm7110_vm3 = vcmp.ge.f32.partialorder %v7070_v30, 0.0  ;;  %v7142_v17 = vmul.f32 0.01, %v7070_v30  ;;  %v7074_v22 = vadd.f32 %v7073_v54, %v13465_v29  ;;  %v7075_v55 = vpop.f32.mrb[3].mxu0 }
 0xfdf   :  { %vm7111_vm4 = vcmp.ge.f32.partialorder %v7072_v8, 0.0  ;;  %v7143_v35 = vmul.f32 0.01, %v7072_v8  ;;  %v7076_v9 = vadd.f32 %v7075_v55, %v13469_v23 }
 0xfe0   :  { %v13475_v53 = vsel %vm7110_vm3, %v7070_v30, %v7142_v17  ;;  %vm7114_vm5 = vcmp.ge.f32.partialorder %v7074_v22, 0.0  ;;  %v7146_v37 = vmul.f32 0.01, %v7074_v22 }
 0xfe1   :  { %v13477_v32 = vsel %vm7111_vm4, %v7072_v8, %v7143_v35  ;;  %vm7115_vm6 = vcmp.ge.f32.partialorder %v7076_v9, 0.0  ;;  %v7147_v42 = vmul.f32 0.01, %v7076_v9 }
 0xfe2   :  { %v13479_v12 = vsel %vm7114_vm5, %v7074_v22, %v7146_v37 }
 0xfe3   :  { %v13481_v26 = vsel %vm7115_vm6, %v7076_v9, %v7147_v42  ;;  %v7079_v33 = vpop.f32.mrb[4].mxu0 }
 0xfe4   :  { %v7080_v14 = vadd.f32 %v7079_v33, %v13465_v29  ;;  %v7081_v41 = vpop.f32.mrb[5].mxu0 }
 0xfe5   :  { %v7082_v44 = vadd.f32 %v7081_v41, %v13469_v23  ;;  %v7083_v20 = vpop.f32.mrb[6].mxu0 }
 0xfe6   :  { %vm7118_vm7 = vcmp.ge.f32.partialorder %v7080_v14, 0.0  ;;  %v7150_v19 = vmul.f32 0.01, %v7080_v14  ;;  %v7084_v24 = vadd.f32 %v7083_v20, %v13465_v29  ;;  %v7085_v56 = vpop.f32.mrb[7].mxu0 }
 0xfe7   :  { %vm7119_vm8 = vcmp.ge.f32.partialorder %v7082_v44, 0.0  ;;  %v7151_v39 = vmul.f32 0.01, %v7082_v44  ;;  %v7086_v11 = vadd.f32 %v7085_v56, %v13469_v23 }
 0xfe8   :  { %v13487_v3 = vsel %vm7118_vm7, %v7080_v14, %v7150_v19  ;;  %vm7122_vm10 = vcmp.ge.f32.partialorder %v7084_v24, 0.0  ;;  %v7154_v0 = vmul.f32 0.01, %v7084_v24 }
 0xfe9   :  { %v13489_v45 = vsel %vm7119_vm8, %v7082_v44, %v7151_v39  ;;  %vm7123_vm11 = vcmp.ge.f32.partialorder %v7086_v11, 0.0  ;;  %v7155_v34 = vmul.f32 0.01, %v7086_v11 }
 0xfea   :  { %v13491_v1 = vsel %vm7122_vm10, %v7084_v24, %v7154_v0 }
 0xfeb   :  { %v13493_v16 = vsel %vm7123_vm11, %v7086_v11, %v7155_v34  ;;  %v7089_v46 = vpop.f32.mrb[8].mxu0 }
 0xfec   :  { %v7090_v25 = vadd.f32 %v7089_v46, %v13465_v29  ;;  %v7091_v30 = vpop.f32.mrb[9].mxu0 }
 0xfed   :  { %v7092_v60 = vadd.f32 %v7091_v30, %v13469_v23  ;;  %v7093_v8 = vpop.f32.mrb[10].mxu0 }
 0xfee   :  { %vm7126_vm0 = vcmp.ge.f32.partialorder %v7090_v25, 0.0  ;;  %v7158_v54 = vmul.f32 0.01, %v7090_v25  ;;  %v7094_v17 = vadd.f32 %v7093_v8, %v13465_v29  ;;  %v7095_v22 = vpop.f32.mrb[11].mxu0 }
 0xfef   :  { %vm7127_vm12 = vcmp.ge.f32.partialorder %v7092_v60, 0.0  ;;  %v7159_v55 = vmul.f32 0.01, %v7092_v60  ;;  %v7096_v35 = vadd.f32 %v7095_v22, %v13469_v23 }
 0xff0   :  { %v13499_v9 = vsel %vm7126_vm0, %v7090_v25, %v7158_v54  ;;  %vm7130_vm13 = vcmp.ge.f32.partialorder %v7094_v17, 0.0  ;;  %v7162_v37 = vmul.f32 0.01, %v7094_v17 }
 0xff1   :  { %v13501_v42 = vsel %vm7127_vm12, %v7092_v60, %v7159_v55  ;;  %vm7131_vm14 = vcmp.ge.f32.partialorder %v7096_v35, 0.0  ;;  %v7163_v33 = vmul.f32 0.01, %v7096_v35 }
 0xff2   :  { %v13503_v14 = vsel %vm7130_vm13, %v7094_v17, %v7162_v37 }
 0xff3   :  { %v13505_v41 = vsel %vm7131_vm14, %v7096_v35, %v7163_v33  ;;  %v7099_v44 = vpop.f32.mrb[12].mxu0 }
 0xff4   :  { %v7100_v20 = vadd.f32 %v7099_v44, %v13465_v29  ;;  %v7101_v19 = vpop.f32.mrb[13].mxu0 }
 0xff5   :  { %v7102_v24 = vadd.f32 %v7101_v19, %v13469_v23  ;;  %v7103_v56 = vpop.f32.mrb[14].mxu0 }
 0xff6   :  { %vm7134_vm15 = vcmp.ge.f32.partialorder %v7100_v20, 0.0  ;;  %v7166_v39 = vmul.f32 0.01, %v7100_v20  ;;  %v7104_v11 = vadd.f32 %v7103_v56, %v13465_v29  ;;  %v7105_v0 = vpop.f32.mrb[15].mxu0 }
 0xff7   :  { %vm7135_vm1 = vcmp.ge.f32.partialorder %v7102_v24, 0.0  ;;  %v7167_v34 = vmul.f32 0.01, %v7102_v24  ;;  %v7106_v46 = vadd.f32 %v7105_v0, %v13469_v23 }
 0xff8   :  { %v13511_v25 = vsel %vm7134_vm15, %v7100_v20, %v7166_v39  ;;  %vm7138_vm2 = vcmp.ge.f32.partialorder %v7104_v11, 0.0  ;;  %v7170_v30 = vmul.f32 0.01, %v7104_v11 }
 0xff9   :  { %v13513_v60 = vsel %vm7135_vm1, %v7102_v24, %v7167_v34  ;;  %vm7139_vm3 = vcmp.ge.f32.partialorder %v7106_v46, 0.0  ;;  %v7171_v8 = vmul.f32 0.01, %v7106_v46 }
 0xffa   :  { %v13515_v54 = vsel %vm7138_vm2, %v7104_v11, %v7170_v30 }
 0xffb   :  { %v13517_v17 = vsel %vm7139_vm3, %v7106_v46, %v7171_v8 }
 0xffc   :  { %10760 = dma.done.wait [#allocation9 + $0x6], 8192 }
 0xffd   :  { %10761 = vsyncadd [#allocation9 + $0x6], 4294959104  ;;  %v7541_v29 = vpack.c.bf16 %v12919_v36, %v12919_v36  ;;  %v7542_v23 = vpack.c.bf16 %v12935_v27, %v12935_v27  ;;  %v7207_v22 = vpack.c.bf16 %v13425_v63, %v13421_v7  ;;  %7635 = vmatprep.mubr.bf16.mxu0 %v14092_v51  ;;  %vm7555_vm4 = vcmask 1041409   ;;  %v7223_v44 = vld [vmem:[#allocation8 + $0x8] sm:$0xff]  ;;  %v7222_v20 = vld [vmem:[#allocation8] sm:$0xff]  ;;  %s14270_s24 = sld [smem:[#allocation240_spill]] }
 0xffe   :  { %v7225_v19 = vld [vmem:[#allocation8 + $0x18] sm:$0xff]  ;;  %7299 = vmatprep.subr.bf16.mxu1 %v7223_v44  ;;  %v7224_v36 = vld [vmem:[#allocation8 + $0x10] sm:$0xff]  ;;  %v7227_v27 = vld [vmem:[#allocation8 + $0x28] sm:$0xff]  ;;  %s14271_s13 = sld [smem:[#allocation234_spill]]  ;;  %s14272_s1 = sld [smem:[#allocation241_spill]] }
 0xfff   :  { %v7553_v55 = vunpack.c.l.b16 %v7541_v29  ;;  %v7554_v35 = vunpack.c.l.b16 %v7542_v23  ;;  %7331 = vmatprep.mubr.bf16.mxu1 %v7207_v22  ;;  %7300 = vmatpush1.bf16.msra.mxu1 %v7222_v20  ;;  %v7226_v7 = vld [vmem:[#allocation8 + $0x20] sm:$0xff]  ;;  %v7229_v63 = vld [vmem:[#allocation8 + $0x38] sm:$0xff]  ;;  %v7228_v24 = vld [vmem:[#allocation8 + $0x30] sm:$0xff] }
0x1000   :  { %7301 = vmatprep.subr.bf16.mxu1 %v7225_v19  ;;  %v7231_v56 = vld [vmem:[#allocation8 + $0x48] sm:$0xff]  ;;  %v7230_v39 = vld [vmem:[#allocation8 + $0x40] sm:$0xff]  ;;  %v7233_v11 = vld [vmem:[#allocation8 + $0x58] sm:$0xff] }
0x1001   :  { %v7556_v37 = vsel %vm7555_vm4, %v7554_v35, %v7553_v55  ;;  %v7232_v0 = vld [vmem:[#allocation8 + $0x50] sm:$0xff]  ;;  %v7235_v34 = vld [vmem:[#allocation8 + $0x68] sm:$0xff]  ;;  %v7234_v46 = vld [vmem:[#allocation8 + $0x60] sm:$0xff] }
0x1002   :  { %v7557_v33 = vpack.c.b16 %v7556_v37, %v7556_v37  ;;  %v7237_v30 = vld [vmem:[#allocation8 + $0x78] sm:$0xff]  ;;  %v10279_v23 = vld [vmem:[#allocation21 + $0x14] ss:$8 sps:$4 sm:$0xff]   ;;  %v10281_v35 = vld [vmem:[#allocation21 + $0x10] ss:$8 sps:$4 sm:$0xff]  }
0x1003   :  { %7302 = vmatpush1.bf16.msra.mxu1 %v7224_v36  ;;  %v10276_v8 = vld [vmem:[#allocation21 + $0x4] ss:$8 sps:$4 sm:$0xff]   ;;  %v10278_v29 = vld [vmem:[#allocation21] ss:$8 sps:$4 sm:$0xff]   ;;  %v7239_v55 = vld [vmem:[#allocation8 + $0x88] sm:$0xff] }
0x1004   :  { %7558 = vrot.lane.b32.xlu0 %v7557_v33, %s13846_s4  ;;  %7303 = vmatprep.subr.bf16.mxu1 %v7227_v27  ;;  %v7236_v22 = vld [vmem:[#allocation8 + $0x70] sm:$0xff]  ;;  %v7238_v33 = vld [vmem:[#allocation8 + $0x80] sm:$0xff]  ;;  %v7241_v44 = vld [vmem:[#allocation8 + $0x98] sm:$0xff] }
0x1005   :  { %7603 = vmatprep.subr.bf16.mxu0 %v10276_v8  ;;  %v10282_v37 = vld [vmem:[#allocation21 + $0x24] ss:$8 sps:$4 sm:$0xff]   ;;  %v10284_v20 = vld [vmem:[#allocation21 + $0x20] ss:$8 sps:$4 sm:$0xff]   ;;  %v10285_v19 = vld [vmem:[#allocation21 + $0x34] ss:$8 sps:$4 sm:$0xff]  }
0x1006   :  { %7604 = vmatpush1.bf16.msra.mxu0 %v10278_v29  ;;  %v7240_v36 = vld [vmem:[#allocation8 + $0x90] sm:$0xff]  ;;  %v7243_v27 = vld [vmem:[#allocation8 + $0xa8] sm:$0xff]  ;;  %v7250_v8 = vld [vmem:[#allocation8 + $0xe0] sm:$0xff] }
0x1007   :  { %7304 = vmatpush1.bf16.msra.mxu1 %v7226_v7  ;;  %7605 = vmatprep.subr.bf16.mxu0 %v10279_v23  ;;  %v10287_v7 = vld [vmem:[#allocation21 + $0x30] ss:$8 sps:$4 sm:$0xff]   ;;  %v7253_v29 = vld [vmem:[#allocation8 + $0xf8] sm:$0xff]  ;;  %v7252_v23 = vld [vmem:[#allocation8 + $0xf0] sm:$0xff] }
0x1008   :  { %7305 = vmatprep.subr.bf16.mxu1 %v7229_v63  ;;  %v10290_v63 = vld [vmem:[#allocation19 + $0x4] ss:$8 sps:$4 sm:$0xff]  }
0x100a   :  { %7606 = vmatpush1.bf16.msra.mxu0 %v10281_v35  ;;  %v7211_v35 = vpack.c.bf16 %v13437_v52, %v13433_v31  ;;  %v7260_v31 = vld [vmem:[#allocation8 + $0x130] sm:$0xff]  ;;  %v7263_v52 = vld [vmem:[#allocation8 + $0x148] sm:$0xff] }
0x100b   :  { %7306 = vmatpush1.bf16.msra.mxu1 %v7228_v24  ;;  %7607 = vmatprep.subr.bf16.mxu0 %v10282_v37  ;;  %v7242_v24 = vld [vmem:[#allocation8 + $0xa0] sm:$0xff] }
0x100c   :  { %7307 = vmatprep.subr.bf16.mxu1 %v7231_v56  ;;  %v7245_v56 = vld [vmem:[#allocation8 + $0xb8] sm:$0xff]  ;;  %v7254_v37 = vld [vmem:[#allocation8 + $0x100] sm:$0xff] }
0x100e   :  { %7608 = vmatpush1.bf16.msra.mxu0 %v10284_v20  ;;  %v7259_v20 = vld [vmem:[#allocation8 + $0x128] sm:$0xff] }
0x100f   :  { %7308 = vmatpush1.bf16.msra.mxu1 %v7230_v39  ;;  %7609 = vmatprep.subr.bf16.mxu0 %v10285_v19  ;;  %v7244_v39 = vld [vmem:[#allocation8 + $0xb0] sm:$0xff]  ;;  %v7210_v19 = vpack.c.bf16 %v13435_v58, %v13431_v10  ;;  %v7219_v10 = vpack.c.bf16 %v13461_v21, %v13457_v49  ;;  %v7265_v58 = vld [vmem:[#allocation8 + $0x158] sm:$0xff]  ;;  %v7271_v49 = vld [vmem:[#allocation8 + $0x188] sm:$0xff] }
0x1010   :  { %7309 = vmatprep.subr.bf16.mxu1 %v7233_v11  ;;  %v7247_v11 = vld [vmem:[#allocation8 + $0xc8] sm:$0xff]  ;;  %v7270_v21 = vld [vmem:[#allocation8 + $0x180] sm:$0xff] }
0x1012   :  { %7610 = vmatpush1.bf16.msra.mxu0 %v10287_v7  ;;  %v7262_v7 = vld [vmem:[#allocation8 + $0x140] sm:$0xff] }
0x1013   :  { %7310 = vmatpush1.bf16.msra.mxu1 %v7232_v0  ;;  %7693 = vmatprep.subr.bf16.mxu0 %v10290_v63  ;;  %v7246_v0 = vld [vmem:[#allocation8 + $0xc0] sm:$0xff] }
0x1014   :  { %7311 = vmatprep.subr.bf16.mxu1 %v7235_v34  ;;  %v7249_v34 = vld [vmem:[#allocation8 + $0xd8] sm:$0xff]  ;;  %v7266_v63 = vld [vmem:[#allocation8 + $0x160] sm:$0xff] }
0x1017   :  { %7312 = vmatpush1.bf16.msra.mxu1 %v7234_v46  ;;  %v7248_v46 = vld [vmem:[#allocation8 + $0xd0] sm:$0xff] }
0x1018   :  { %7313 = vmatprep.subr.bf16.mxu1 %v7237_v30  ;;  %v7251_v30 = vld [vmem:[#allocation8 + $0xe8] sm:$0xff] }
0x101b   :  { %7314 = vmatpush1.bf16.msra.mxu1 %v7236_v22  ;;  %v7255_v22 = vld [vmem:[#allocation8 + $0x108] sm:$0xff] }
0x101c   :  { %7315 = vmatprep.subr.bf16.mxu1 %v7239_v55  ;;  %v7206_v55 = vpack.c.bf16 %v13423_v15, %v13419_v50  ;;  %v7215_v50 = vpack.c.bf16 %v13449_v47, %v13445_v6  ;;  %v7258_v15 = vld [vmem:[#allocation8 + $0x120] sm:$0xff]  ;;  %v7264_v6 = vld [vmem:[#allocation8 + $0x150] sm:$0xff]  ;;  %v7267_v47 = vld [vmem:[#allocation8 + $0x168] sm:$0xff] }
0x101f   :  { %7316 = vmatpush1.bf16.msra.mxu1 %v7238_v33  ;;  %v7257_v33 = vld [vmem:[#allocation8 + $0x118] sm:$0xff] }
0x1020   :  { %7317 = vmatprep.subr.bf16.mxu1 %v7241_v44  ;;  %v7256_v44 = vld [vmem:[#allocation8 + $0x110] sm:$0xff] }
0x1023   :  { %7318 = vmatpush1.bf16.msra.mxu1 %v7240_v36  ;;  %v7261_v36 = vld [vmem:[#allocation8 + $0x138] sm:$0xff] }
0x1024   :  { %7319 = vmatprep.subr.bf16.mxu1 %v7243_v27  ;;  %v7214_v27 = vpack.c.bf16 %v13447_v13, %v13443_v59  ;;  %v7209_v59 = vpack.c.bf16 %v13481_v26, %v13477_v32  ;;  %v7268_v13 = vld [vmem:[#allocation8 + $0x170] sm:$0xff]  ;;  %v7279_v26 = vld [vmem:[#allocation8 + $0x1c8] sm:$0xff] }
0x1025   :  { %v7276_v32 = vld [vmem:[#allocation8 + $0x1b0] sm:$0xff] }
0x1027   :  { %7320 = vmatpush1.bf16.msra.mxu1 %v7242_v24  ;;  %v7218_v24 = vpack.c.bf16 %v13459_v28, %v13455_v2  ;;  %v7274_v2 = vld [vmem:[#allocation8 + $0x1a0] sm:$0xff]  ;;  %v7277_v28 = vld [vmem:[#allocation8 + $0x1b8] sm:$0xff] }
0x1028   :  { %7321 = vmatprep.subr.bf16.mxu1 %v7245_v56  ;;  %v7269_v56 = vld [vmem:[#allocation8 + $0x178] sm:$0xff] }
0x102b   :  { %7322 = vmatpush1.bf16.msra.mxu1 %v7244_v39  ;;  %v7273_v39 = vld [vmem:[#allocation8 + $0x198] sm:$0xff] }
0x102c   :  { %7323 = vmatprep.subr.bf16.mxu1 %v7247_v11  ;;  %v7272_v11 = vld [vmem:[#allocation8 + $0x190] sm:$0xff] }
0x102f   :  { %7324 = vmatpush1.bf16.msra.mxu1 %v7246_v0  ;;  %v7275_v0 = vld [vmem:[#allocation8 + $0x1a8] sm:$0xff] }
0x1030   :  { %7325 = vmatprep.subr.bf16.mxu1 %v7249_v34  ;;  %v7278_v34 = vld [vmem:[#allocation8 + $0x1c0] sm:$0xff] }
0x1033   :  { %7326 = vmatpush1.bf16.msra.mxu1 %v7248_v46  ;;  %v7281_v46 = vld [vmem:[#allocation8 + $0x1d8] sm:$0xff] }
0x1034   :  { %7327 = vmatprep.subr.bf16.mxu1 %v7251_v30  ;;  %v10288_v30 = vld [vmem:[#allocation19] ss:$8 sps:$4 sm:$0xff]  }
0x1037   :  { %7328 = vmatpush1.bf16.msra.mxu1 %v7250_v8  ;;  %v10293_v8 = vld [vmem:[#allocation19 + $0x14] ss:$8 sps:$4 sm:$0xff]  }
0x1038   :  { %7329 = vmatprep.subr.bf16.mxu1 %v7253_v29 }
0x103b   :  { %7330 = vmatpush1.bf16.msra.mxu1 %v7252_v23  ;;  %v7280_v23 = vld [vmem:[#allocation8 + $0x1d0] sm:$0xff] }
0x103c   :  { %7372 = vmatprep.subr.bf16.mxu1 %v7255_v22  ;;  %v7283_v22 = vld [vmem:[#allocation8 + $0x1e8] sm:$0xff] }
0x103e   :  { %7332 = vmatmul.mubr.bf16.vlgmr.msra.gmra.mrb[32].mxu1 %v7206_v55  ;;  %v10291_v55 = vld [vmem:[#allocation19 + $0x10] ss:$8 sps:$4 sm:$0xff]  }
0x103f   :  { %7373 = vmatpush1.bf16.msra.mxu1 %v7254_v37  ;;  %7341 = vmatprep.mubr.bf16.mxu1 %v7211_v35  ;;  %v7531_v35 = vpack.c.bf16 %v12917_v40, %v12917_v40  ;;  %v7532_v37 = vpack.c.bf16 %v12933_v38, %v12933_v38  ;;  %v10299_v40 = vld [vmem:[#allocation19 + $0x34] ss:$8 sps:$4 sm:$0xff]  }
0x1040   :  { %7374 = vmatprep.subr.bf16.mxu1 %v7257_v33  ;;  %v10296_v33 = vld [vmem:[#allocation19 + $0x24] ss:$8 sps:$4 sm:$0xff]  }
0x1043   :  { %7375 = vmatpush1.bf16.msra.mxu1 %v7256_v44  ;;  %v7735_v44 = vpack.c.bf16 %v13137_v62, %v13137_v62  ;;  %v10297_v62 = vld [vmem:[#allocation19 + $0x30] ss:$8 sps:$4 sm:$0xff]  }
0x1044   :  { %7376 = vmatprep.subr.bf16.mxu1 %v7259_v20  ;;  %v7739_v20 = vpack.c.bf16 %v13129_v4, %v13129_v4 }
0x1046   :  { %7342 = vmatmul.mubr.bf16.gmra.mrb[36].mxu1 %v7210_v19  ;;  %v7282_v19 = vld [vmem:[#allocation8 + $0x1e0] sm:$0xff]  ;;  %v7819_v38 = vunpack.c.l.b16 %v7739_v20 }
0x1047   :  { %7377 = vmatpush1.bf16.msra.mxu1 %v7258_v15  ;;  %7351 = vmatprep.mubr.bf16.mxu1 %v7215_v50  ;;  %v7285_v50 = vld [vmem:[#allocation8 + $0x1f8] sm:$0xff]  ;;  %v10344_v20 = vld [vmem:[#allocation22 + $0x74] ss:$8 sps:$4 sm:$0xff]  }
0x1048   :  { %7378 = vmatprep.subr.bf16.mxu1 %v7261_v36  ;;  %v10294_v15 = vld [vmem:[#allocation19 + $0x20] ss:$8 sps:$4 sm:$0xff]   ;;  %v7646_v36 = vunpack.c.l.b16 %v7531_v35 }
0x1049   :  { %v10339_v35 = vld [vmem:[#allocation22 + $0x160] ss:$8 sps:$4 sm:$0xff]  }
0x104b   :  { %7379 = vmatpush1.bf16.msra.mxu1 %v7260_v31  ;;  %v7647_v31 = vunpack.c.l.b16 %v7532_v37 }
0x104c   :  { %7380 = vmatprep.subr.bf16.mxu1 %v7263_v52  ;;  %v7815_v52 = vunpack.c.l.b16 %v7735_v44  ;;  %v10336_v44 = vld [vmem:[#allocation22 + $0x60] ss:$8 sps:$4 sm:$0xff]  }
0x104d   :  { %v7648_v4 = vsel %vm7555_vm4, %v7647_v31, %v7646_v36  ;;  %v10359_v36 = vld [vmem:[#allocation22 + $0x194] ss:$8 sps:$4 sm:$0xff]   ;;  %v10348_v31 = vld [vmem:[#allocation22 + $0x80] ss:$8 sps:$4 sm:$0xff]  }
0x104e   :  { %7352 = vmatmul.mubr.bf16.gmra.mrb[40].mxu1 %v7214_v27  ;;  %v7284_v27 = vld [vmem:[#allocation8 + $0x1f0] sm:$0xff] }
0x104f   :  { %7381 = vmatpush1.bf16.msra.mxu1 %v7262_v7  ;;  %7361 = vmatprep.mubr.bf16.mxu1 %v7219_v10  ;;  %v10305_v7 = vld [vmem:[#allocation22 + $0x104] ss:$8 sps:$4 sm:$0xff]   ;;  %v7208_v10 = vpack.c.bf16 %v13479_v12, %v13475_v53  ;;  %v10309_v53 = vld [vmem:[#allocation22 + $0x110] ss:$8 sps:$4 sm:$0xff]  }
0x1050   :  { %7382 = vmatprep.subr.bf16.mxu1 %v7265_v58  ;;  %v10302_v58 = vld [vmem:[#allocation22 + $0x4] ss:$8 sps:$4 sm:$0xff]  }
0x1051   :  { %v10317_v12 = vld [vmem:[#allocation22 + $0x124] ss:$8 sps:$4 sm:$0xff]  }
0x1053   :  { %7383 = vmatpush1.bf16.msra.mxu1 %v7264_v6  ;;  %v7823_v6 = vsel %vm7555_vm4, %v7819_v38, %v7815_v52  ;;  %v10357_v52 = vld [vmem:[#allocation22 + $0x190] ss:$8 sps:$4 sm:$0xff]   ;;  %v10365_v38 = vld [vmem:[#allocation22 + $0x1a4] ss:$8 sps:$4 sm:$0xff]  }
0x1054   :  { %7384 = vmatprep.subr.bf16.mxu1 %v7267_v47  ;;  %v7213_v47 = vpack.c.bf16 %v13493_v16, %v13489_v45  ;;  %v7212_v45 = vpack.c.bf16 %v13491_v1, %v13487_v3  ;;  %v10314_v16 = vld [vmem:[#allocation22 + $0x24] ss:$8 sps:$4 sm:$0xff]   ;;  %v7737_v3 = vpack.c.bf16 %v13141_v48, %v13141_v48  ;;  %v7741_v1 = vpack.c.bf16 %v13133_v43, %v13133_v43  ;;  %v10324_v48 = vld [vmem:[#allocation22 + $0x40] ss:$8 sps:$4 sm:$0xff]   ;;  %v10332_v43 = vld [vmem:[#allocation22 + $0x54] ss:$8 sps:$4 sm:$0xff]  }
0x1056   :  { %7362 = vmatmul.mubr.bf16.gmra.mrb[44].mxu1 %v7218_v24  ;;  %v7649_v24 = vpack.c.b16 %v7648_v4, %v7648_v4  ;;  %v10371_v4 = vld [vmem:[#allocation22 + $0x1b4] ss:$8 sps:$4 sm:$0xff]  }
0x1057   :  { %7385 = vmatpush1.bf16.msra.mxu1 %v7266_v63  ;;  %7404 = vmatprep.mubr.bf16.mxu1 %v7209_v59  ;;  %v10303_v63 = vld [vmem:[#allocation22 + $0x100] ss:$8 sps:$4 sm:$0xff]  }
0x1058   :  { %7386 = vmatprep.subr.bf16.mxu1 %v7269_v56  ;;  %v10311_v56 = vld [vmem:[#allocation22 + $0x114] ss:$8 sps:$4 sm:$0xff]   ;;  %v10300_v59 = vld [vmem:[#allocation22] ss:$8 sps:$4 sm:$0xff]  }
0x105b   :  { %7387 = vmatpush1.bf16.msra.mxu1 %v7268_v13  ;;  %v7827_v13 = vpack.c.b16 %v7823_v6, %v7823_v6  ;;  %v10369_v6 = vld [vmem:[#allocation22 + $0x1b0] ss:$8 sps:$4 sm:$0xff]  }
0x105c   :  { %7388 = vmatprep.subr.bf16.mxu1 %v7271_v49  ;;  %v10308_v49 = vld [vmem:[#allocation22 + $0x14] ss:$8 sps:$4 sm:$0xff]  }
0x105f   :  { %7389 = vmatpush1.bf16.msra.mxu1 %v7270_v21  ;;  %v10306_v21 = vld [vmem:[#allocation22 + $0x10] ss:$8 sps:$4 sm:$0xff]  }
0x1060   :  { %7390 = vmatprep.subr.bf16.mxu1 %v7273_v39  ;;  %v7217_v39 = vpack.c.bf16 %v13505_v41, %v13501_v42  ;;  %v10318_v42 = vld [vmem:[#allocation22 + $0x30] ss:$8 sps:$4 sm:$0xff]   ;;  %v7216_v41 = vpack.c.bf16 %v13503_v14, %v13499_v9  ;;  %v10341_v9 = vld [vmem:[#allocation22 + $0x164] ss:$8 sps:$4 sm:$0xff]  }
0x1063   :  { %7391 = vmatpush1.bf16.msra.mxu1 %v7272_v11  ;;  %v10315_v11 = vld [vmem:[#allocation22 + $0x120] ss:$8 sps:$4 sm:$0xff]  }
0x1064   :  { %7392 = vmatprep.subr.bf16.mxu1 %v7275_v0  ;;  %v10323_v0 = vld [vmem:[#allocation22 + $0x134] ss:$8 sps:$4 sm:$0xff]  }
0x1067   :  { %7393 = vmatpush1.bf16.msra.mxu1 %v7274_v2  ;;  %v10312_v2 = vld [vmem:[#allocation22 + $0x20] ss:$8 sps:$4 sm:$0xff]  }
0x1068   :  { %7394 = vmatprep.subr.bf16.mxu1 %v7277_v28  ;;  %v10320_v28 = vld [vmem:[#allocation22 + $0x34] ss:$8 sps:$4 sm:$0xff]  }
0x106b   :  { %7395 = vmatpush1.bf16.msra.mxu1 %v7276_v32  ;;  %v10321_v32 = vld [vmem:[#allocation22 + $0x130] ss:$8 sps:$4 sm:$0xff]  }
0x106c   :  { %7396 = vmatprep.subr.bf16.mxu1 %v7279_v26  ;;  %v10329_v26 = vld [vmem:[#allocation22 + $0x144] ss:$8 sps:$4 sm:$0xff]  }
0x106f   :  { %7397 = vmatpush1.bf16.msra.mxu1 %v7278_v34  ;;  %v10326_v34 = vld [vmem:[#allocation22 + $0x44] ss:$8 sps:$4 sm:$0xff]  }
0x1070   :  { %7398 = vmatprep.subr.bf16.mxu1 %v7281_v46  ;;  %v7221_v46 = vpack.c.bf16 %v13517_v17, %v13513_v60  ;;  %v10330_v60 = vld [vmem:[#allocation22 + $0x50] ss:$8 sps:$4 sm:$0xff]   ;;  %v7220_v17 = vpack.c.bf16 %v13515_v54, %v13511_v25  ;;  %v10350_v25 = vld [vmem:[#allocation22 + $0x84] ss:$8 sps:$4 sm:$0xff]   ;;  %v10351_v54 = vld [vmem:[#allocation22 + $0x180] ss:$8 sps:$4 sm:$0xff]  }
0x1073   :  { %7399 = vmatpush1.bf16.msra.mxu1 %v7280_v23  ;;  %v7821_v23 = vunpack.c.l.b16 %v7741_v1 }
0x1074   :  { %7400 = vmatprep.subr.bf16.mxu1 %v7283_v22  ;;  %v10333_v22 = vld [vmem:[#allocation22 + $0x150] ss:$8 sps:$4 sm:$0xff]  }
0x1076   :  { %v7559_v29 = vpop.permute.xlu0 %7558 }
0x1077   :  { %9057 = vmatmul.mubr.msk.bf16.vlgmr.msra.gmra.mrb[16].mxu0 %vm2277_vm9, %v7559_v29  ;;  %7401 = vmatpush1.bf16.msra.mxu1 %v7282_v19  ;;  %v7817_v29 = vunpack.c.l.b16 %v7737_v3  ;;  %v10345_v19 = vld [vmem:[#allocation22 + $0x170] ss:$8 sps:$4 sm:$0xff]  }
0x1078   :  { %7694 = vmatpush1.bf16.msra.mxu0 %v10288_v30  ;;  %7725 = vmatprep.mubr.bf16.mxu0 %v14092_v51  ;;  %v10327_v30 = vld [vmem:[#allocation22 + $0x140] ss:$8 sps:$4 sm:$0xff]  }
0x1079   :  { %7695 = vmatprep.subr.bf16.mxu0 %v10293_v8  ;;  %7402 = vmatprep.subr.bf16.mxu1 %v7285_v50  ;;  %v10335_v8 = vld [vmem:[#allocation22 + $0x154] ss:$8 sps:$4 sm:$0xff]   ;;  %v7825_v14 = vsel %vm7555_vm4, %v7821_v23, %v7817_v29  ;;  %v10353_v50 = vld [vmem:[#allocation22 + $0x184] ss:$8 sps:$4 sm:$0xff]  }
0x107a   :  { %v7829_v37 = vpack.c.b16 %v7825_v14, %v7825_v14  ;;  %v10398_v23 = vld [vmem:[#allocation24 + $0x4] ss:$8 sps:$4 sm:$0xff]  }
0x107b   :  { %7403 = vmatpush1.bf16.msra.mxu1 %v7284_v27  ;;  %v10354_v27 = vld [vmem:[#allocation22 + $0x90] ss:$8 sps:$4 sm:$0xff]   ;;  %v10404_v14 = vld [vmem:[#allocation24 + $0x24] ss:$8 sps:$4 sm:$0xff]  }
0x107c   :  { %7696 = vmatpush1.bf16.msra.mxu0 %v10291_v55  ;;  %8195 = vmatprep.subr.bf16.mxu1 %v10305_v7  ;;  %v10338_v55 = vld [vmem:[#allocation22 + $0x64] ss:$8 sps:$4 sm:$0xff]  }
0x107d   :  { %7697 = vmatprep.subr.bf16.mxu0 %v10296_v33  ;;  %v10347_v33 = vld [vmem:[#allocation22 + $0x174] ss:$8 sps:$4 sm:$0xff]   ;;  %v10362_v7 = vld [vmem:[#allocation22 + $0xa4] ss:$8 sps:$4 sm:$0xff]  }
0x107e   :  { %7405 = vmatmul.mubr.bf16.vlgmr.msra.gmra.mrb[32].mxu1 %v7208_v10  ;;  %v10360_v10 = vld [vmem:[#allocation22 + $0xa0] ss:$8 sps:$4 sm:$0xff]  }
0x107f   :  { %7414 = vmatprep.mubr.bf16.mxu1 %v7213_v47  ;;  %8196 = vmatpush1.bf16.msra.mxu1 %v10303_v63  ;;  %v10377_v47 = vld [vmem:[#allocation22 + $0x1c4] ss:$8 sps:$4 sm:$0xff]   ;;  %v10366_v63 = vld [vmem:[#allocation22 + $0xb0] ss:$8 sps:$4 sm:$0xff]  }
0x1080   :  { %7698 = vmatpush1.bf16.msra.mxu0 %v10294_v15  ;;  %8197 = vmatprep.subr.bf16.mxu1 %v10311_v56  ;;  %v10342_v15 = vld [vmem:[#allocation22 + $0x70] ss:$8 sps:$4 sm:$0xff]   ;;  %v10375_v56 = vld [vmem:[#allocation22 + $0x1c0] ss:$8 sps:$4 sm:$0xff]  }
0x1081   :  { %7699 = vmatprep.subr.bf16.mxu0 %v10299_v40  ;;  %v10356_v40 = vld [vmem:[#allocation22 + $0x94] ss:$8 sps:$4 sm:$0xff]  }
0x1083   :  { %8198 = vmatpush1.bf16.msra.mxu1 %v10309_v53  ;;  %v10381_v53 = vld [vmem:[#allocation22 + $0x1d0] ss:$8 sps:$4 sm:$0xff]  }
0x1084   :  { %7700 = vmatpush1.bf16.msra.mxu0 %v10297_v62  ;;  %8199 = vmatprep.subr.bf16.mxu1 %v10317_v12  ;;  %v10363_v62 = vld [vmem:[#allocation22 + $0x1a0] ss:$8 sps:$4 sm:$0xff]   ;;  %v7736_v12 = vpack.c.bf16 %v13139_v61, %v13139_v61  ;;  %v10395_v61 = vld [vmem:[#allocation22 + $0x1f4] ss:$8 sps:$4 sm:$0xff]  }
0x1085   :  { %8154 = vmatprep.subr.bf16.mxu0 %v10302_v58  ;;  %v10368_v58 = vld [vmem:[#allocation22 + $0xb4] ss:$8 sps:$4 sm:$0xff]  }
0x1086   :  { %7415 = vmatmul.mubr.bf16.gmra.mrb[36].mxu1 %v7212_v45  ;;  %v10389_v45 = vld [vmem:[#allocation22 + $0x1e4] ss:$8 sps:$4 sm:$0xff]  }
0x1087   :  { %9066 = vmatmul.mubr.msk.bf16.vlgmr.msra.gmra.mrb[20].mxu0 %vm2277_vm9, %v7649_v24  ;;  %7424 = vmatprep.mubr.bf16.mxu1 %v7217_v39  ;;  %v10374_v24 = vld [vmem:[#allocation22 + $0xc4] ss:$8 sps:$4 sm:$0xff]  }
0x1088   :  { %8155 = vmatpush1.bf16.msra.mxu0 %v10300_v59  ;;  %8186 = vmatprep.mubr.bf16.mxu0 %v7827_v13  ;;  %v10383_v59 = vld [vmem:[#allocation22 + $0x1d4] ss:$8 sps:$4 sm:$0xff]   ;;  %v10372_v13 = vld [vmem:[#allocation22 + $0xc0] ss:$8 sps:$4 sm:$0xff]  }
0x1089   :  { %8156 = vmatprep.subr.bf16.mxu0 %v10308_v49  ;;  %8200 = vmatpush1.bf16.msra.mxu1 %v10315_v11  ;;  %v10380_v49 = vld [vmem:[#allocation22 + $0xd4] ss:$8 sps:$4 sm:$0xff]   ;;  %v14268_v39 = vld [vmem:[#allocation151_spill] sm:$0xff] }
0x108a   :  { %8201 = vmatprep.subr.bf16.mxu1 %v10323_v0  ;;  %v7734_v11 = vpack.c.bf16 %v14268_v39, %v14268_v39  ;;  %v14269_v0 = vld [vmem:[#allocation153_spill] sm:$0xff] }
0x108b   :  { %v10453_v39 = vld [vmem:[#allocation24 + $0xf0] ss:$8 sps:$4 sm:$0xff]  }
0x108c   :  { %8157 = vmatpush1.bf16.msra.mxu0 %v10306_v21  ;;  %v7740_v21 = vpack.c.bf16 %v13131_v5, %v13131_v5  ;;  %v10384_v5 = vld [vmem:[#allocation22 + $0xe0] ss:$8 sps:$4 sm:$0xff]   ;;  %v7814_v1 = vunpack.c.l.b16 %v7734_v11 }
0x108d   :  { %8158 = vmatprep.subr.bf16.mxu0 %v10314_v16  ;;  %8202 = vmatpush1.bf16.msra.mxu1 %v10321_v32  ;;  %v10378_v16 = vld [vmem:[#allocation22 + $0xd0] ss:$8 sps:$4 sm:$0xff]   ;;  %v10387_v32 = vld [vmem:[#allocation22 + $0x1e0] ss:$8 sps:$4 sm:$0xff]  }
0x108e   :  { %8203 = vmatprep.subr.bf16.mxu1 %v10329_v26  ;;  %7425 = vmatmul.mubr.bf16.gmra.mrb[40].mxu1 %v7216_v41  ;;  %v7816_v26 = vunpack.c.l.b16 %v7736_v12  ;;  %v7820_v3 = vunpack.c.l.b16 %v7740_v21  ;;  %v10392_v41 = vld [vmem:[#allocation22 + $0xf4] ss:$8 sps:$4 sm:$0xff]  }
0x108f   :  { %7434 = vmatprep.mubr.bf16.mxu1 %v7221_v46  ;;  %v10450_v12 = vld [vmem:[%s14270_s24 + $0x30] ss:$8 sps:$4 sm:$0xff]  }
0x1090   :  { %8159 = vmatpush1.bf16.msra.mxu0 %v10312_v2  ;;  %v7738_v2 = vpack.c.bf16 %v14269_v0, %v14269_v0  ;;  %v7824_v46 = vsel %vm7555_vm4, %v7820_v3, %v7816_v26  ;;  %v10455_v21 = vld [vmem:[#allocation24 + $0xf4] ss:$8 sps:$4 sm:$0xff]  }
0x1091   :  { %8160 = vmatprep.subr.bf16.mxu0 %v10320_v28  ;;  %8204 = vmatpush1.bf16.msra.mxu1 %v10327_v30  ;;  %v10386_v28 = vld [vmem:[#allocation22 + $0xe4] ss:$8 sps:$4 sm:$0xff]   ;;  %v10390_v30 = vld [vmem:[#allocation22 + $0xf0] ss:$8 sps:$4 sm:$0xff]   ;;  %v7828_v29 = vpack.c.b16 %v7824_v46, %v7824_v46 }
0x1092   :  { %8205 = vmatprep.subr.bf16.mxu1 %v10335_v8  ;;  %v10456_v26 = vld [vmem:[%s14272_s1 + $0x40] sm:$0xff]  }
0x1094   :  { %8161 = vmatpush1.bf16.msra.mxu0 %v10318_v42  ;;  %v7818_v42 = vunpack.c.l.b16 %v7738_v2 }
0x1095   :  { %8162 = vmatprep.subr.bf16.mxu0 %v10326_v34  ;;  %8206 = vmatpush1.bf16.msra.mxu1 %v10333_v22  ;;  %v10393_v34 = vld [vmem:[#allocation22 + $0x1f0] ss:$8 sps:$4 sm:$0xff]   ;;  %v10401_v22 = vld [vmem:[#allocation24 + $0x14] ss:$8 sps:$4 sm:$0xff]  }
0x1096   :  { %8207 = vmatprep.subr.bf16.mxu1 %v10341_v9  ;;  %7435 = vmatmul.mubr.bf16.gmra.mrb[44].mxu1 %v7220_v17  ;;  %v7822_v8 = vsel %vm7555_vm4, %v7818_v42, %v7814_v1  ;;  %v10399_v9 = vld [vmem:[#allocation24 + $0x10] ss:$8 sps:$4 sm:$0xff]   ;;  %v10407_v17 = vld [vmem:[#allocation24 + $0x34] ss:$8 sps:$4 sm:$0xff]  }
0x1097   :  { %8227 = vmatprep.mubr.bf16.mxu1 %v7829_v37  ;;  %v10408_v37 = vld [vmem:[#allocation24 + $0x40] ss:$8 sps:$4 sm:$0xff]   ;;  %v7287_v42 = vld [vmem:[#allocation25 + $0x44] ss:$8 sm:$0x3] }
0x1098   :  { %8163 = vmatpush1.bf16.msra.mxu0 %v10324_v48  ;;  %v7826_v48 = vpack.c.b16 %v7822_v8, %v7822_v8 }
0x1099   :  { %8164 = vmatprep.subr.bf16.mxu0 %v10332_v43  ;;  %8208 = vmatpush1.bf16.msra.mxu1 %v10339_v35  ;;  %v10396_v43 = vld [vmem:[#allocation24] ss:$8 sps:$4 sm:$0xff]   ;;  %v10410_v35 = vld [vmem:[#allocation24 + $0x44] ss:$8 sps:$4 sm:$0xff]  }
0x109a   :  { %8209 = vmatprep.subr.bf16.mxu1 %v10347_v33  ;;  %v10413_v33 = vld [vmem:[#allocation24 + $0x54] ss:$8 sps:$4 sm:$0xff]  }
0x109c   :  { %8165 = vmatpush1.bf16.msra.mxu0 %v10330_v60  ;;  %v10402_v60 = vld [vmem:[#allocation24 + $0x20] ss:$8 sps:$4 sm:$0xff]  }
0x109d   :  { %8166 = vmatprep.subr.bf16.mxu0 %v10338_v55  ;;  %8210 = vmatpush1.bf16.msra.mxu1 %v10345_v19  ;;  %v10405_v55 = vld [vmem:[#allocation24 + $0x30] ss:$8 sps:$4 sm:$0xff]   ;;  %v10419_v19 = vld [vmem:[#allocation24 + $0x74] ss:$8 sps:$4 sm:$0xff]  }
0x109e   :  { %8211 = vmatprep.subr.bf16.mxu1 %v10353_v50  ;;  %v10417_v50 = vld [vmem:[#allocation24 + $0x70] ss:$8 sps:$4 sm:$0xff]  }
0x10a0   :  { %8167 = vmatpush1.bf16.msra.mxu0 %v10336_v44  ;;  %v10411_v44 = vld [vmem:[#allocation24 + $0x50] ss:$8 sps:$4 sm:$0xff]  }
0x10a1   :  { %8168 = vmatprep.subr.bf16.mxu0 %v10344_v20  ;;  %8212 = vmatpush1.bf16.msra.mxu1 %v10351_v54  ;;  %v10414_v20 = vld [vmem:[#allocation24 + $0x60] ss:$8 sps:$4 sm:$0xff]   ;;  %v10425_v54 = vld [vmem:[#allocation24 + $0x94] ss:$8 sps:$4 sm:$0xff]  }
0x10a2   :  { %8213 = vmatprep.subr.bf16.mxu1 %v10359_v36  ;;  %v10423_v36 = vld [vmem:[#allocation24 + $0x90] ss:$8 sps:$4 sm:$0xff]  }
0x10a4   :  { %8169 = vmatpush1.bf16.msra.mxu0 %v10342_v15  ;;  %v10422_v15 = vld [vmem:[#allocation24 + $0x84] ss:$8 sps:$4 sm:$0xff]  }
0x10a5   :  { %8170 = vmatprep.subr.bf16.mxu0 %v10350_v25  ;;  %8214 = vmatpush1.bf16.msra.mxu1 %v10357_v52  ;;  %v10420_v25 = vld [vmem:[#allocation24 + $0x80] ss:$8 sps:$4 sm:$0xff]   ;;  %v10431_v52 = vld [vmem:[#allocation24 + $0xb4] ss:$8 sps:$4 sm:$0xff]  }
0x10a6   :  { %8215 = vmatprep.subr.bf16.mxu1 %v10365_v38  ;;  %v10429_v38 = vld [vmem:[#allocation24 + $0xb0] ss:$8 sps:$4 sm:$0xff]  }
0x10a8   :  { %8171 = vmatpush1.bf16.msra.mxu0 %v10348_v31  ;;  %v10428_v31 = vld [vmem:[#allocation24 + $0xa4] ss:$8 sps:$4 sm:$0xff]  }
0x10a9   :  { %8172 = vmatprep.subr.bf16.mxu0 %v10356_v40  ;;  %8216 = vmatpush1.bf16.msra.mxu1 %v10363_v62  ;;  %v10426_v40 = vld [vmem:[#allocation24 + $0xa0] ss:$8 sps:$4 sm:$0xff]   ;;  %v10437_v62 = vld [vmem:[#allocation24 + $0xc4] ss:$8 sps:$4 sm:$0xff]  }
0x10aa   :  { %8217 = vmatprep.subr.bf16.mxu1 %v10371_v4  ;;  %v10435_v4 = vld [vmem:[#allocation24 + $0xc0] ss:$8 sps:$4 sm:$0xff]  }
0x10ac   :  { %8173 = vmatpush1.bf16.msra.mxu0 %v10354_v27  ;;  %v10434_v27 = vld [vmem:[%s14270_s24 + $0x4] ss:$8 sps:$4 sm:$0xff]  }
0x10ad   :  { %8174 = vmatprep.subr.bf16.mxu0 %v10362_v7  ;;  %8218 = vmatpush1.bf16.msra.mxu1 %v10369_v6  ;;  %v10432_v7 = vld [vmem:[%s14270_s24] ss:$8 sps:$4 sm:$0xff]  }
0x10ae   :  { %8219 = vmatprep.subr.bf16.mxu1 %v10377_v47  ;;  %v10443_v6 = vld [vmem:[#allocation24 + $0xd4] ss:$8 sps:$4 sm:$0xff]   ;;  %v10441_v47 = vld [vmem:[#allocation24 + $0xd0] ss:$8 sps:$4 sm:$0xff]  }
0x10b0   :  { %8175 = vmatpush1.bf16.msra.mxu0 %v10360_v10  ;;  %v10440_v10 = vld [vmem:[%s14270_s24 + $0x14] ss:$8 sps:$4 sm:$0xff]  }
0x10b1   :  { %8176 = vmatprep.subr.bf16.mxu0 %v10368_v58  ;;  %8220 = vmatpush1.bf16.msra.mxu1 %v10375_v56  ;;  %v10438_v58 = vld [vmem:[%s14270_s24 + $0x10] ss:$8 sps:$4 sm:$0xff]   ;;  %v10444_v56 = vld [vmem:[%s14270_s24 + $0x20] ss:$8 sps:$4 sm:$0xff]  }
0x10b2   :  { %8221 = vmatprep.subr.bf16.mxu1 %v10383_v59  ;;  %v10447_v59 = vld [vmem:[#allocation24 + $0xe0] ss:$8 sps:$4 sm:$0xff]  }
0x10b4   :  { %8177 = vmatpush1.bf16.msra.mxu0 %v10366_v63  ;;  %v10446_v63 = vld [vmem:[%s14270_s24 + $0x24] ss:$8 sps:$4 sm:$0xff]  }
0x10b5   :  { %8178 = vmatprep.subr.bf16.mxu0 %v10374_v24  ;;  %8222 = vmatpush1.bf16.msra.mxu1 %v10381_v53  ;;  %v7530_v24 = vld [vmem:[%s14271_s13 + $0x1] sm:$0x1]  ;;  %v10452_v53 = vld [vmem:[%s14270_s24 + $0x34] ss:$8 sps:$4 sm:$0xff]  }
0x10b6   :  { %8223 = vmatprep.subr.bf16.mxu1 %v10389_v45  ;;  %v7529_v45 = vld [vmem:[%s14271_s13] sm:$0x1] }
0x10b7   :  { %v8491_v11 = vpack.c.bf16 %v7529_v45, %v7529_v45 }
0x10b8   :  { %8179 = vmatpush1.bf16.msra.mxu0 %v10372_v13  ;;  %v10449_v13 = vld [vmem:[#allocation24 + $0xe4] ss:$8 sps:$4 sm:$0xff]  }
0x10b9   :  { %8180 = vmatprep.subr.bf16.mxu0 %v10380_v49  ;;  %8224 = vmatpush1.bf16.msra.mxu1 %v10387_v32  ;;  %v8492_v49 = vpack.c.bf16 %v7530_v24, %v7530_v24  ;;  %v8503_v2 = vunpack.c.l.b16 %v8491_v11 }
0x10ba   :  { %8225 = vmatprep.subr.bf16.mxu1 %v10395_v61 }
0x10bc   :  { %8181 = vmatpush1.bf16.msra.mxu0 %v10378_v16  ;;  %v8504_v16 = vunpack.c.l.b16 %v8492_v49 }
0x10bd   :  { %8182 = vmatprep.subr.bf16.mxu0 %v10386_v28  ;;  %8226 = vmatpush1.bf16.msra.mxu1 %v10393_v34  ;;  %v13626_v34 = vrot.slane %v7287_v42, %v14266_v57 }
0x10be   :  { %8551 = vmatprep.subr.bf16.mxu1 %v10434_v27  ;;  %v8505_v0 = vrot.slane %v8504_v16, 7 }
0x10c0   :  { %8183 = vmatpush1.bf16.msra.mxu0 %v10384_v5  ;;  %8228 = vmatmul.mubr.bf16.vlgmr.msra.gmra.mrb[48].mxu1 %v7828_v29  ;;  %v8506_v28 = vsel %vm7555_vm4, %v8505_v0, %v8503_v2 }
0x10c1   :  { %8184 = vmatprep.subr.bf16.mxu0 %v10392_v41  ;;  %8583 = vmatprep.mubr.bf16.mxu1 %v14092_v51  ;;  %v10416_v51 = vld [vmem:[#allocation24 + $0x64] ss:$8 sps:$4 sm:$0xff]   ;;  %v8507_v32 = vpack.c.b16 %v8506_v28, %v8506_v28  ;;  %v13623_v41 = vrot.slane %v7287_v42, %v14264_v18 }
0x10c2   :  { %8552 = vmatpush1.bf16.msra.mxu1 %v10432_v7 }
0x10c3   :  { %8553 = vmatprep.subr.bf16.mxu1 %v10440_v10 }
0x10c4   :  { %8185 = vmatpush1.bf16.msra.mxu0 %v10390_v30 }
0x10c5   :  { %8448 = vmatprep.subr.bf16.mxu0 %v10398_v23 }
0x10c6   :  { %8554 = vmatpush1.bf16.msra.mxu1 %v10438_v58 }
0x10c7   :  { %8187 = vmatmul.mubr.bf16.vlgmr.msra.gmra.mrb[24].mxu0 %v7826_v48  ;;  %8555 = vmatprep.subr.bf16.mxu1 %v10446_v63 }
0x10c8   :  { %8449 = vmatpush1.bf16.msra.mxu0 %v10396_v43 }
0x10c9   :  { %8450 = vmatprep.subr.bf16.mxu0 %v10401_v22 }
0x10ca   :  { %8556 = vmatpush1.bf16.msra.mxu1 %v10444_v56 }
0x10cb   :  { %8557 = vmatprep.subr.bf16.mxu1 %v10452_v53 }
0x10cc   :  { %8451 = vmatpush1.bf16.msra.mxu0 %v10399_v9 }
0x10cd   :  { %8452 = vmatprep.subr.bf16.mxu0 %v10404_v14 }
0x10ce   :  { %8558 = vmatpush1.bf16.msra.mxu1 %v10450_v12 }
0x10d0   :  { %8453 = vmatpush1.bf16.msra.mxu0 %v10402_v60 }
0x10d1   :  { %8454 = vmatprep.subr.bf16.mxu0 %v10407_v17  ;;  %9171 = vmatmul.mubr.msk.bf16.vlgmr.msra.gmra.mrb[52].mxu1 %vm2277_vm9, %v8507_v32 }
0x10d4   :  { %8455 = vmatpush1.bf16.msra.mxu0 %v10405_v55 }
0x10d5   :  { %8456 = vmatprep.subr.bf16.mxu0 %v10410_v35 }
0x10d8   :  { %8457 = vmatpush1.bf16.msra.mxu0 %v10408_v37 }
0x10d9   :  { %8458 = vmatprep.subr.bf16.mxu0 %v10413_v33 }
0x10dc   :  { %8459 = vmatpush1.bf16.msra.mxu0 %v10411_v44 }
0x10dd   :  { %8460 = vmatprep.subr.bf16.mxu0 %v10416_v51 }
0x10e0   :  { %8461 = vmatpush1.bf16.msra.mxu0 %v10414_v20 }
0x10e1   :  { %8462 = vmatprep.subr.bf16.mxu0 %v10419_v19 }
0x10e4   :  { %8463 = vmatpush1.bf16.msra.mxu0 %v10417_v50 }
0x10e5   :  { %8464 = vmatprep.subr.bf16.mxu0 %v10422_v15 }
0x10e8   :  { %8465 = vmatpush1.bf16.msra.mxu0 %v10420_v25 }
0x10e9   :  { %8466 = vmatprep.subr.bf16.mxu0 %v10425_v54 }
0x10ec   :  { %8467 = vmatpush1.bf16.msra.mxu0 %v10423_v36 }
0x10ed   :  { %8468 = vmatprep.subr.bf16.mxu0 %v10428_v31 }
0x10f0   :  { %8469 = vmatpush1.bf16.msra.mxu0 %v10426_v40 }
0x10f1   :  { %8470 = vmatprep.subr.bf16.mxu0 %v10431_v52 }
0x10f4   :  { %8471 = vmatpush1.bf16.msra.mxu0 %v10429_v38 }
0x10f5   :  { %8472 = vmatprep.subr.bf16.mxu0 %v10437_v62 }
0x10f8   :  { %8473 = vmatpush1.bf16.msra.mxu0 %v10435_v4 }
0x10f9   :  { %8474 = vmatprep.subr.bf16.mxu0 %v10443_v6 }
0x10fc   :  { %8475 = vmatpush1.bf16.msra.mxu0 %v10441_v47 }
0x10fd   :  { %8476 = vmatprep.subr.bf16.mxu0 %v10449_v13 }
0x1100   :  { %8477 = vmatpush1.bf16.msra.mxu0 %v10447_v59 }
0x1101   :  { %8478 = vmatprep.subr.bf16.mxu0 %v10455_v21 }
0x1104   :  { %8479 = vmatpush1.bf16.msra.mxu0 %v10453_v39 }
0x1105   :  { %9460 = vmatprep.subr.bf16.mxu0 %v10456_v26 }
0x114a   :  { %v7637_v3 = vpop.f32.mrb[16].mxu0 }
0x114b   :  { %v7639_v61 = vpop.f32.mrb[17].mxu0 }
0x114c   :  { %v7641_v5 = vpop.f32.mrb[18].mxu0 }
0x114d   :  { %v7642_v1 = vpop.f32.mrb[19].mxu0 }
0x1151   :  { %v7406_v46 = vpop.f32.mrb[32].mxu1 }
0x1152   :  { %v9740_v30 = vadd.f32 %v7406_v46, %v13623_v41  ;;  %v7408_v8 = vpop.f32.mrb[33].mxu1 }
0x1153   :  { %v9741_v29 = vadd.f32 %v7408_v8, %v13626_v34  ;;  %v7410_v23 = vpop.f32.mrb[34].mxu1 }
0x1154   :  { %v7461_v43 = vmul.f32 0.01, %v9740_v30  ;;  %v9742_v22 = vadd.f32 %v7410_v23, %v13623_v41  ;;  %v7412_v9 = vpop.f32.mrb[35].mxu1  ;;  %vm7445_vm9 = vcmp.ge.f32.partialorder %v9740_v30, 0.0 }
0x1155   :  { %v7462_v17 = vmul.f32 0.01, %v9741_v29  ;;  %v9743_v55 = vadd.f32 %v7412_v9, %v13626_v34  ;;  %vm7446_vm5 = vcmp.ge.f32.partialorder %v9741_v29, 0.0 }
0x1156   :  { %vm7447_vm6 = vcmp.ge.f32.partialorder %v9742_v22, 0.0  ;;  %v7463_v33 = vmul.f32 0.01, %v9742_v22  ;;  %v7477_v20 = vsel %vm7445_vm9, %v9740_v30, %v7461_v43 }
0x1157   :  { %vm7448_vm7 = vcmp.ge.f32.partialorder %v9743_v55, 0.0  ;;  %v7464_v51 = vmul.f32 0.01, %v9743_v55  ;;  %v7478_v50 = vsel %vm7446_vm5, %v9741_v29, %v7462_v17 }
0x1158   :  { %v7479_v19 = vsel %vm7447_vm6, %v9742_v22, %v7463_v33  ;;  %vm8811_vm6 = vcmask 516096  }
0x1159   :  { %v7493_v15 = vmax.f32 %v7477_v20, %v7479_v19  ;;  %v7480_v25 = vsel %vm7448_vm7, %v9743_v55, %v7464_v51  ;;  %v7416_v54 = vpop.f32.mrb[36].mxu1 }
0x115a   :  { %v7727_v48 = vpop.f32.mrb[20].mxu0  ;;  %v7502_v36 = vmax.f32 %v7478_v50, %v7480_v25  ;;  %v9744_v31 = vadd.f32 %v7416_v54, %v13623_v41  ;;  %v7418_v40 = vpop.f32.mrb[37].mxu1 }
0x115b   :  { %v13631_v14 = vadd.f32 %v7727_v48, %v7637_v3  ;;  %v7729_v60 = vpop.f32.mrb[21].mxu0  ;;  %v9745_v52 = vadd.f32 %v7418_v40, %v13626_v34  ;;  %v7420_v38 = vpop.f32.mrb[38].mxu1 }
0x115c   :  { %v13634_v35 = vadd.f32 %v7729_v60, %v7639_v61  ;;  %v7731_v37 = vpop.f32.mrb[22].mxu0  ;;  %vm7449_vm8 = vcmp.ge.f32.partialorder %v9744_v31, 0.0  ;;  %v7465_v27 = vmul.f32 0.01, %v9744_v31  ;;  %v9746_v7 = vadd.f32 %v7420_v38, %v13623_v41  ;;  %v7422_v62 = vpop.f32.mrb[39].mxu1 }
0x115d   :  { %v7732_v44 = vpop.f32.mrb[23].mxu0  ;;  %vm7450_vm10 = vcmp.ge.f32.partialorder %v9745_v52, 0.0  ;;  %v7466_v4 = vmul.f32 0.01, %v9745_v52  ;;  %v9747_v10 = vadd.f32 %v7422_v62, %v13626_v34 }
0x115e   :  { %v7481_v58 = vsel %vm7449_vm8, %v9744_v31, %v7465_v27  ;;  %vm7451_vm11 = vcmp.ge.f32.partialorder %v9746_v7, 0.0  ;;  %v7467_v6 = vmul.f32 0.01, %v9746_v7 }
0x115f   :  { %v7494_v47 = vmax.f32 %v7493_v15, %v7481_v58  ;;  %v7482_v63 = vsel %vm7450_vm10, %v9745_v52, %v7466_v4  ;;  %vm7452_vm0 = vcmp.ge.f32.partialorder %v9747_v10, 0.0  ;;  %v7468_v24 = vmul.f32 0.01, %v9747_v10 }
0x1160   :  { %v7503_v56 = vmax.f32 %v7502_v36, %v7482_v63  ;;  %v7483_v59 = vsel %vm7451_vm11, %v9746_v7, %v7467_v6 }
0x1161   :  { %v7495_v13 = vmax.f32 %v7494_v47, %v7483_v59  ;;  %v7484_v49 = vsel %vm7452_vm0, %v9747_v10, %v7468_v24  ;;  %v7426_v53 = vpop.f32.mrb[40].mxu1 }
0x1162   :  { %v7504_v12 = vmax.f32 %v7503_v56, %v7484_v49  ;;  %v9748_v21 = vadd.f32 %v7426_v53, %v13623_v41  ;;  %v7428_v45 = vpop.f32.mrb[41].mxu1 }
0x1163   :  { %v9749_v16 = vadd.f32 %v7428_v45, %v13626_v34  ;;  %v7430_v39 = vpop.f32.mrb[42].mxu1  ;;  %v7496_v28 = vrot.slane %v7495_v13, 4 }
0x1164   :  { %v7469_v11 = vmul.f32 0.01, %v9748_v21  ;;  %v9750_v0 = vadd.f32 %v7430_v39, %v13623_v41  ;;  %v7432_v2 = vpop.f32.mrb[43].mxu1  ;;  %vm7453_vm12 = vcmp.ge.f32.partialorder %v9748_v21, 0.0  ;;  %v7505_v61 = vrot.slane %v7504_v12, 4 }
0x1165   :  { %v7470_v32 = vmul.f32 0.01, %v9749_v16  ;;  %v9751_v26 = vadd.f32 %v7432_v2, %v13626_v34  ;;  %vm7454_vm13 = vcmp.ge.f32.partialorder %v9749_v16, 0.0  ;;  %v7497_v46 = vmax.f32 %v7495_v13, %v7496_v28 }
0x1166   :  { %vm7455_vm14 = vcmp.ge.f32.partialorder %v9750_v0, 0.0  ;;  %v7471_v3 = vmul.f32 0.01, %v9750_v0  ;;  %v7485_v1 = vsel %vm7453_vm12, %v9748_v21, %v7469_v11  ;;  %v7506_v9 = vmax.f32 %v7504_v12, %v7505_v61 }
0x1167   :  { %vm7456_vm15 = vcmp.ge.f32.partialorder %v9751_v26, 0.0  ;;  %v7472_v5 = vmul.f32 0.01, %v9751_v26  ;;  %v7486_v30 = vsel %vm7454_vm13, %v9749_v16, %v7470_v32  ;;  %v7498_v44 = vrot.slane %v7497_v46, 2 }
0x1168   :  { %v7487_v42 = vsel %vm7455_vm14, %v9750_v0, %v7471_v3  ;;  %v7507_v15 = vrot.slane %v7506_v9, 2 }
0x1169   :  { %v7511_v8 = vmax.f32 %v7485_v1, %v7487_v42  ;;  %v7488_v29 = vsel %vm7456_vm15, %v9751_v26, %v7472_v5  ;;  %v7436_v23 = vpop.f32.mrb[44].mxu1  ;;  %v7499_v52 = vmax.f32 %v7497_v46, %v7498_v44  ;;  %v10457_v5 = vld [vmem:[%s14272_s1] sm:$0xff]   ;;  %v10458_v42 = vld [vmem:[%s14272_s1 + $0x48] sm:$0xff]  }
0x116a   :  { %v7520_v48 = vmax.f32 %v7486_v30, %v7488_v29  ;;  %v9752_v43 = vadd.f32 %v7436_v23, %v13623_v41  ;;  %v7438_v22 = vpop.f32.mrb[45].mxu1  ;;  %v10459_v46 = vld [vmem:[%s14272_s1 + $0x8] sm:$0xff]   ;;  %v10460_v30 = vld [vmem:[%s14272_s1 + $0x50] sm:$0xff]   ;;  %v10462_v29 = vld [vmem:[%s14272_s1 + $0x58] sm:$0xff]  }
0x116b   :  { %v9753_v60 = vadd.f32 %v7438_v22, %v13626_v34  ;;  %v7440_v17 = vpop.f32.mrb[46].mxu1  ;;  %v7500_v4 = vrot.slane %v7499_v52, 1 }
0x116c   :  { %vm7457_vm1 = vcmp.ge.f32.partialorder %v9752_v43, 0.0  ;;  %v7473_v55 = vmul.f32 0.01, %v9752_v43  ;;  %v9754_v37 = vadd.f32 %v7440_v17, %v13623_v41  ;;  %v7442_v33 = vpop.f32.mrb[47].mxu1  ;;  %v7508_v41 = vmax.f32 %v7506_v9, %v7507_v15 }
0x116d   :  { %vm7458_vm2 = vcmp.ge.f32.partialorder %v9753_v60, 0.0  ;;  %v7474_v51 = vmul.f32 0.01, %v9753_v60  ;;  %v9755_v20 = vadd.f32 %v7442_v33, %v13626_v34  ;;  %v7501_v63 = vmax.f32 %v7499_v52, %v7500_v4  ;;  %v10470_v52 = vld [vmem:[%s14272_s1 + $0x78] sm:$0xff]  }
0x116e   :  { %v7489_v19 = vsel %vm7457_vm1, %v9752_v43, %v7473_v55  ;;  %vm7459_vm3 = vcmp.ge.f32.partialorder %v9754_v37, 0.0  ;;  %v7475_v50 = vmul.f32 0.01, %v9754_v37  ;;  %v7509_v47 = vrot.slane %v7508_v41, 1  ;;  %v10463_v43 = vld [vmem:[%s14272_s1 + $0x18] sm:$0xff]  }
0x116f   :  { %v7512_v25 = vmax.f32 %v7511_v8, %v7489_v19  ;;  %v7490_v54 = vsel %vm7458_vm2, %v9753_v60, %v7474_v51  ;;  %vm7460_vm9 = vcmp.ge.f32.partialorder %v9755_v20, 0.0  ;;  %v7476_v40 = vmul.f32 0.01, %v9755_v20  ;;  %v10461_v8 = vld [vmem:[%s14272_s1 + $0x10] sm:$0xff]   ;;  %v10464_v60 = vld [vmem:[%s14272_s1 + $0x60] sm:$0xff]  }
0x1170   :  { %v7521_v36 = vmax.f32 %v7520_v48, %v7490_v54  ;;  %v7491_v31 = vsel %vm7459_vm3, %v9754_v37, %v7475_v50  ;;  %v7510_v49 = vmax.f32 %v7508_v41, %v7509_v47  ;;  %v8238_v53 = vpack.c.bf16 %v7501_v63, %v7501_v63 }
0x1171   :  { %v7513_v38 = vmax.f32 %v7512_v25, %v7491_v31  ;;  %v7492_v27 = vsel %vm7460_vm9, %v9755_v20, %v7476_v40  ;;  %v10465_v20 = vld [vmem:[%s14272_s1 + $0x20] sm:$0xff]   ;;  %v10466_v25 = vld [vmem:[%s14272_s1 + $0x68] sm:$0xff]  }
0x1172   :  { %v7522_v62 = vmax.f32 %v7521_v36, %v7492_v27  ;;  %v8239_v39 = vpack.c.bf16 %v7510_v49, %v7510_v49  ;;  %v8278_v0 = vunpack.c.l.b16 %v8238_v53  ;;  %v10467_v36 = vld [vmem:[%s14272_s1 + $0x28] sm:$0xff]   ;;  %v8595_v27 = vld [vmem:[#allocation25 + $0x45] ss:$8 sm:$0x3] }
0x1173   :  { %v7514_v7 = vrot.slane %v7513_v38, 4 }
0x1174   :  { %v7523_v58 = vrot.slane %v7522_v62, 4  ;;  %v8279_v28 = vunpack.c.l.b16 %v8239_v39  ;;  %v8649_v39 = vld [vmem:[#allocation25 + $0x46] ss:$0 sm:$0xff] }
0x1175   :  { %v7515_v10 = vmax.f32 %v7513_v38, %v7514_v7  ;;  %v10471_v38 = vld [vmem:[%s14272_s1 + $0x38] sm:$0xff]  }
0x1176   :  { %v7524_v6 = vmax.f32 %v7522_v62, %v7523_v58  ;;  %v8600_v62 = vrot.slane %v8595_v27, %v14264_v18  ;;  %v8604_v58 = vrot.slane %v8595_v27, %v14266_v57  ;;  %v10804_v18 = vmov 1966171168  }
0x1177   :  { %v7516_v34 = vrot.slane %v7515_v10, 2 }
0x1178   :  { %v7525_v56 = vrot.slane %v7524_v6, 2 }
0x1179   :  { %v7517_v24 = vmax.f32 %v7515_v10, %v7516_v34 }
0x117a   :  { %v7526_v13 = vmax.f32 %v7524_v6, %v7525_v56 }
0x117b   :  { %v7518_v59 = vrot.slane %v7517_v24, 1 }
0x117c   :  { %v7527_v21 = vrot.slane %v7526_v13, 1 }
0x117d   :  { %v7519_v12 = vmax.f32 %v7517_v24, %v7518_v59 }
0x117e   :  { %v7528_v16 = vmax.f32 %v7526_v13, %v7527_v21 }
0x117f   :  { %v8240_v45 = vpack.c.bf16 %v7519_v12, %v7519_v12 }
0x1180   :  { %v8241_v11 = vpack.c.bf16 %v7528_v16, %v7528_v16 }
0x1181   :  { %v8280_v2 = vunpack.c.l.b16 %v8240_v45  ;;  %v8788_v45 = vunpack.c.l.s4 %v10804_v18 }
0x1182   :  { %v8281_v32 = vunpack.c.l.b16 %v8241_v11 }
0x1183   :  { %v8282_v26 = vsel %vm7555_vm4, %v8280_v2, %v8278_v0  ;;  %v8789_v16 = vunpack.c.0.s8 %v8788_v45  ;;  %v14273_v2 = vld [vmem:[#allocation58_spill] sm:$0xff] }
0x1184   :  { %v8283_v3 = vsel %vm7555_vm4, %v8281_v32, %v8279_v28  ;;  %v8284_v1 = vpack.c.b16 %v8282_v26, %v8282_v26 }
0x1185   :  { %v8285_v61 = vpack.c.b16 %v8283_v3, %v8283_v3  ;;  %v8792_v28 = vsub.s32 %v8789_v16, %v14273_v2 }
0x1187   :  { %8480 = vmatprep.mubr.bf16.mxu0 %v8285_v61 }
0x1188   :  { %8481 = vmatmul.mubr.bf16.vlgmr.msra.gmra.mrb[28].mxu0 %v8284_v1 }
0x1189   :  { %9461 = vmatpush3.bf16.msra.mxu0 %v10457_v5 }
0x118a   :  { %9462 = vmatprep.subr.bf16.mxu0 %v10458_v42 }
0x118d   :  { %9463 = vmatpush3.bf16.msra.mxu0 %v10459_v46 }
0x118e   :  { %9464 = vmatprep.subr.bf16.mxu0 %v10460_v30 }
0x1191   :  { %9465 = vmatpush3.bf16.msra.mxu0 %v10461_v8 }
0x1192   :  { %9466 = vmatprep.subr.bf16.mxu0 %v10462_v29 }
0x1193   :  { %v8229_v23 = vpop.f32.mrb[48].mxu1 }
0x1194   :  { %v8231_v48 = vpop.f32.mrb[49].mxu1 }
0x1195   :  { %v8233_v9 = vpop.f32.mrb[50].mxu1  ;;  %9467 = vmatpush3.bf16.msra.mxu0 %v10463_v43 }
0x1196   :  { %v8234_v37 = vpop.f32.mrb[51].mxu1  ;;  %9468 = vmatprep.subr.bf16.mxu0 %v10464_v60 }
0x1199   :  { %9469 = vmatpush3.bf16.msra.mxu0 %v10465_v20 }
0x119a   :  { %v8188_v22 = vpop.f32.mrb[24].mxu0  ;;  %9470 = vmatprep.subr.bf16.mxu0 %v10466_v25 }
0x119b   :  { %v8230_v17 = vadd.f32 %v8229_v23, %v8188_v22  ;;  %v8190_v55 = vpop.f32.mrb[25].mxu0 }
0x119c   :  { %v8232_v33 = vadd.f32 %v8231_v48, %v8190_v55  ;;  %v8192_v44 = vpop.f32.mrb[26].mxu0 }
0x119d   :  { %v8193_v51 = vpop.f32.mrb[27].mxu0  ;;  %v8236_v19 = vadd.f32 %v8230_v17, %v13631_v14  ;;  %9471 = vmatpush3.bf16.msra.mxu0 %v10467_v36  ;;  %v10468_v14 = vld [vmem:[%s14272_s1 + $0x70] sm:$0xff]  }
0x119e   :  { %v8237_v50 = vadd.f32 %v8232_v33, %v13634_v35  ;;  %v10469_v35 = vld [vmem:[%s14272_s1 + $0x30] sm:$0xff]   ;;  %9472 = vmatprep.subr.bf16.mxu0 %v10468_v14  ;;  %s10805_s1 = smov [#allocation27]  }
0x119f   :  { %s8819_s11 = sshll.u32 %s10805_s1, 4  ;;  %s8820_s11 = int_to_ptr.vmem [resolvable:$true] %s8819_s11 }
0x11a0   :  { %s10714_s17 = scalar_lea.vmem %s8820_s11, 32  ;;  %p10719_p5 = scmp.lt.s32.totalorder %s8820_s11, %s8820_s11 }
0x11a1   :  { %9473 = vmatpush3.bf16.msra.mxu0 %v10469_v35  ;;  %p10715_p4 = scmp.ne.s32.totalorder %s8820_s11, %s10714_s17  ;;  %p10720_p6 = scmp.lt.s32.totalorder %s10714_s17, %s10714_s17 }
0x11a2   :  { %9474 = vmatprep.subr.bf16.mxu0 %v10470_v52 }
0x11a3   :  { %p10721_p7 = por %p10720_p6, %p10719_p5 }
0x11a4   :  { %v8585_v15 = vpop.f32.mrb[52].mxu1 }
0x11a5   :  { %v8587_v54 = vpop.f32.mrb[53].mxu1  ;;  %9475 = vmatpush3.bf16.msra.mxu0 %v10471_v38  ;;  %p10722_p8 = pnand %p10721_p7, %p10715_p4 }
0x11a6   :  { %v8589_v31 = vpop.f32.mrb[54].mxu1 }
0x11a7   :  { %v8590_v40 = vpop.f32.mrb[55].mxu1 }
0x125b   :  { %v8482_v41 = vpop.f32.mrb[28].mxu0 }
0x125c   :  { %v8489_v7 = vadd.f32 %v8482_v41, %v8236_v19  ;;  %v8484_v4 = vpop.f32.mrb[29].mxu0 }
0x125d   :  { %v8490_v10 = vadd.f32 %v8484_v4, %v8237_v50  ;;  %v8486_v34 = vpop.f32.mrb[30].mxu0 }
0x125e   :  { %v8592_v6 = vadd.f32 %v8585_v15, %v8489_v7  ;;  %v8487_v47 = vpop.f32.mrb[31].mxu0 }
0x125f   :  { %v8593_v63 = vadd.f32 %v8587_v54, %v8490_v10 }
0x1260   :  { %v8607_v24 = vadd.f32 %v8600_v62, %v8592_v6 }
0x1261   :  { %v8608_v56 = vadd.f32 %v8604_v58, %v8593_v63 }
0x1262   :  { %vm8609_vm4 = vcmp.ge.f32.partialorder %v8607_v24, 0.0  ;;  %v8611_v59 = vmul.f32 0.01, %v8607_v24 }
0x1263   :  { %vm8610_vm5 = vcmp.ge.f32.partialorder %v8608_v56, 0.0  ;;  %v8612_v13 = vmul.f32 0.01, %v8608_v56 }
0x1264   :  { %v8613_v49 = vsel %vm8609_vm4, %v8607_v24, %v8611_v59 }
0x1265   :  { %v8614_v53 = vsel %vm8610_vm5, %v8608_v56, %v8612_v13  ;;  %v8615_v21 = vpack.c.bf16 %v8613_v49, %v8613_v49 }
0x1266   :  { %v8616_v12 = vpack.c.bf16 %v8614_v53, %v8614_v53 }
0x1268   :  { %8778 = vmatprep.mubr.bf16.mxu0 %v8616_v12 }
0x1269   :  { %8779 = vmatmul.mubr.bf16.vlgmr.msra.gmra.mrb[32].mxu0 %v8615_v21 }
0x133c   :  { %v9476_v57 = vpop.f32.mrb[32].mxu0 }
0x133d   :  { %v9477_v11 = vpop.f32.mrb[33].mxu0 }
0x133e   :  { %v9478_v0 = vadd.f32 %v9477_v11, %v9476_v57  ;;  %v9479_v32 = vpop.f32.mrb[34].mxu0 }
0x133f   :  { %v9480_v26 = vpop.f32.mrb[35].mxu0 }
0x1340   :  { %v8781_v3 = vadd.f32 %v9478_v0, %v8649_v39 }
0x1342   :  { %v8793_v61 = vrot.slane %v8781_v3, %v8792_v28 }
0x1344   :  { %v8794_v5 = vcombine.high %v8793_v61, %v8793_v61  ;;  %v8801_v1 = vrot.slane %v8793_v61, %v8792_v28 }
0x1346   :  { %v8808_v42 = vrot.slane %v8794_v5, %v8792_v28  ;;  %8812 = vst.msk [vmem:[#allocation27] sm:$0x1] %vm8811_vm6, %v8801_v1 }
0x1348   :  { %8813 = vst.msk [vmem:[#allocation27 + $0x1] sm:$0x1] %vm8811_vm6, %v8808_v42 }
0x1349   :  { %10725 = shalt.err (!%p10722_p8)
}
0x134a   :  { %s14274_s8 = sld [smem:[#allocation242_spill]] }
0x1350   :  { %s10726_s4 = scalar_lea.hbm %s14274_s8, 32 }
0x1351   :  { %p10727_p9 = scmp.ne.s32.totalorder %s14274_s8, %s10726_s4  ;;  %p10730_p10 = scmp.lt.u32.totalorder %s10726_s4, %s14274_s8 }
0x1353   :  { %p10732_p11 = pnand %p10730_p10, %p10727_p9 }
0x1355   :  { %10735 = shalt.err (!%p10732_p11)
}
0x1356   :  { %s10806_s20 = smov 1  }
0x1357   :  { %8825 = dma.vmem_to_hbm [thread:$0]  %s8820_s11, 32, %s14274_s8, [#allocation12], %s10775_s6, %s10775_s6, %s10806_s20  }
0x1358   :  { %10762 = dma.done.wait [#allocation12], 32  }
0x1359   :  { %10763 = vsyncadd [#allocation12], 4294967264 }
0x135a   :  { %8829 = vsyncpa [#allocation11], 1 }
0x135b   :  { %8830 = vsyncpa [#allocation14], 1 }
0x135c   :  { %8831 = vsyncpa [#allocation17], 1 }
0x135d   :  { %8832 = vsyncpa [#allocation20], 1 }
0x135e   :  { %8833 = vsyncpa [#allocation23], 1 }
0x135f   :  { %8834 = vsyncpa [#allocation26], 1 }
0x1360   :  { %8835 = vsyncpa [#allocation12], 1 }
0x1361   :  { %8836 = vsyncmov [#allocation9] }
0x1364   :  { %s8837_s5 = vpop.sfrf %8836 }
0x1365   :  { %p9188_p12 = scmp.ne.s32.totalorder %s8837_s5, 0 }
0x1367   :  { %8841 = shalt.err (%p9188_p12)  }
0x1368   :  { %8843 = vsyncmov [#allocation9 + $0x1] }
0x136b   :  { %s8844_s23 = vpop.sfrf %8843 }
0x136c   :  { %p9189_p13 = scmp.ne.s32.totalorder %s8844_s23, 0 }
0x136e   :  { %8848 = shalt.err (%p9189_p13)  }
0x136f   :  { %8850 = vsyncmov [#allocation9 + $0x2] }
0x1372   :  { %s8851_s9 = vpop.sfrf %8850 }
0x1373   :  { %p9190_p0 = scmp.ne.s32.totalorder %s8851_s9, 0 }
0x1375   :  { %8855 = shalt.err (%p9190_p0)  }
0x1376   :  { %8857 = vsyncmov [#allocation9 + $0x3] }
0x1379   :  { %s8858_s6 = vpop.sfrf %8857 }
0x137a   :  { %p9191_p1 = scmp.ne.s32.totalorder %s8858_s6, 0 }
0x137c   :  { %8862 = shalt.err (%p9191_p1)  }
0x137d   :  { %8864 = vsyncmov [#allocation9 + $0x4] }
0x1380   :  { %s8865_s21 = vpop.sfrf %8864 }
0x1381   :  { %p9192_p2 = scmp.ne.s32.totalorder %s8865_s21, 0 }
0x1383   :  { %8869 = shalt.err (%p9192_p2)  }
0x1384   :  { %8871 = vsyncmov [#allocation9 + $0x5] }
0x1387   :  { %s8872_s13 = vpop.sfrf %8871 }
0x1388   :  { %p9193_p3 = scmp.ne.s32.totalorder %s8872_s13, 0 }
0x138a   :  { %8876 = shalt.err (%p9193_p3)  }
0x138b   :  { %8878 = vsyncmov [#allocation9 + $0x6] }
0x138e   :  { %s8879_s3 = vpop.sfrf %8878 }
0x138f   :  { %p9194_p4 = scmp.ne.s32.totalorder %s8879_s3, 0 }
0x1391   :  { %8883 = shalt.err (%p9194_p4)  }

</bundles_post_ra>
